<compile_context>
chip_gen: v5e
topology: v5e:2x2
jax: 0.10.0
libtpu: 0.0.40
codegen_flags: <defaults>
</compile_context>

<pallas_src>
import functools

import jax
import jax.numpy as jnp
from jax import lax
from jax.experimental import pallas as pl
from jax.experimental.pallas import tpu as pltpu

# ---- hyperparameters from train.py ----
VOCAB_SIZE = 65                  # len(sorted(set(text))) for the Shakespeare charset
VOCAB_PAD  = 128                 # lane-dense padded lm_head output width
N_EMBED    = 384
N_HEAD     = 6
N_LAYER    = 6
BLOCK_SIZE = 256
HEAD_SIZE  = N_EMBED // N_HEAD   # 64
LN_EPS     = 1e-5


def _layernorm(x, g, b):
    mu = jnp.mean(x, axis=-1, keepdims=True)
    var = jnp.mean((x - mu) ** 2, axis=-1, keepdims=True)
    return (x - mu) * lax.rsqrt(var + LN_EPS) * g + b


# ---------------------------------------------------------------------------
# Fused kernel: all transformer blocks + final LN + lm_head.
# grid = (batch_blocks, n_layer); layer axis innermost ("arbitrary").
# x lives in a VMEM scratch across the layer axis.
# ---------------------------------------------------------------------------
def _fused_model_kernel(T, Bb,
                        x_ref, ln1g_ref, ln1b_ref, wqkv_ref, projw_ref, projb_ref,
                        ln2g_ref, ln2b_ref, w1_ref, b1_ref, w2_ref, b2_ref,
                        lnfg_ref, lnfb_ref, lmw_ref, lmb_ref,
                        logits_ref, x_acc):
    l = pl.program_id(1)
    n_layers = pl.num_programs(1)
    C = N_EMBED
    hs = HEAD_SIZE
    bf16 = jnp.bfloat16

    @pl.when(l == 0)
    def _():
        x_acc[...] = x_ref[...]

    # causal mask, hoisted out of the batch loop (JAX does not CSE broadcasts)
    rows = lax.broadcasted_iota(jnp.int32, (T, T), 0)
    cols = lax.broadcasted_iota(jnp.int32, (T, T), 1)
    causal = cols <= rows

    # per-layer weights, read once per layer and reused across the batch loop
    ln1g = ln1g_ref[0]
    ln1b = ln1b_ref[0]
    wqkv = wqkv_ref[0]            # (C, 3C) bf16, Q columns pre-scaled by C**-0.5
    pw = projw_ref[0]             # (C, C)  bf16
    pb = projb_ref[0]             # (1, C)  f32

    # ---------------- multi-head causal self-attention on LN1(x) ----------------
    def attn_body(b, carry):
        r0 = pl.multiple_of(b * T, T)
        x_b = x_acc[pl.ds(r0, T), :]                             # (T, C) f32
        xn = _layernorm(x_b, ln1g, ln1b).astype(bf16)
        # one fused QKV matmul per sequence; cast to bf16 once
        qkv = jnp.dot(xn, wqkv,
                      preferred_element_type=jnp.float32).astype(bf16)   # (T, 3C)

        heads = []
        for h in range(N_HEAD):                                  # static unroll over heads
            c0 = h * hs
            q = qkv[:, c0:c0 + hs]                               # (T, hs) bf16 (pre-scaled)
            k = qkv[:, C + c0:C + c0 + hs]
            v = qkv[:, 2 * C + c0:2 * C + c0 + hs]
            # q @ k^T without materializing a transpose (scale already folded into q)
            wei = lax.dot_general(q, k, (((1,), (1,)), ((), ())),
                                  preferred_element_type=jnp.float32)    # (T, T) f32
            wei = jnp.where(causal, wei, -jnp.inf)
            wei = wei - jnp.max(wei, axis=-1, keepdims=True)
            p = jnp.exp(wei)
            p = p * pl.reciprocal(jnp.sum(p, axis=-1, keepdims=True), approx=True)
            # Dropout(0.2) on attention weights: identity in eval-mode forward
            heads.append(jnp.dot(p.astype(bf16), v,
                                 preferred_element_type=jnp.float32))    # (T, hs)
        # cheap head concat (vst's), then ONE full-depth (K=C) projection matmul
        sa = jnp.concatenate(heads, axis=-1).astype(bf16)        # (T, C) bf16
        out = jnp.dot(sa, pw, preferred_element_type=jnp.float32) + pb
        x_acc[pl.ds(r0, T), :] = x_b + out                       # residual 1
        return carry

    lax.fori_loop(0, Bb, attn_body, 0, unroll=(Bb <= 2))

    # ---------------- feed-forward on LN2(x1), full (MB, C) block ----------------
    x1 = x_acc[...]
    yn = _layernorm(x1, ln2g_ref[0], ln2b_ref[0]).astype(bf16)
    h1 = jnp.dot(yn, w1_ref[0], preferred_element_type=jnp.float32) + b1_ref[0]
    h1 = jnp.maximum(h1, 0.0).astype(bf16)                       # ReLU
    ff = jnp.dot(h1, w2_ref[0], preferred_element_type=jnp.float32) + b2_ref[0]
    x_acc[...] = x1 + ff                                         # residual 2

    # ---------------- final LayerNorm + lm_head (last layer only) ----------------
    @pl.when(l == n_layers - 1)
    def _():
        xf = _layernorm(x_acc[...], lnfg_ref[...], lnfb_ref[...])
        logits_ref[...] = jnp.dot(xf.astype(bf16), lmw_ref[...],
                                  preferred_element_type=jnp.float32) + lmb_ref[...]


# ---------------------------------------------------------------------------
# Wrapper
# ---------------------------------------------------------------------------
def _layer_spec(arr):
    zeros = (0,) * (arr.ndim - 1)
    return pl.BlockSpec((1,) + arr.shape[1:], lambda bb, l, z=zeros: (l,) + z)


def _const_spec(arr):
    zeros = (0,) * arr.ndim
    return pl.BlockSpec(arr.shape, lambda bb, l, z=zeros: z)


def _tpu_budget():
    """(vmem_limit_bytes, target rows per batch block) per TPU generation."""
    try:
        cap = int(pltpu.get_tpu_info().vmem_capacity_bytes)
    except Exception:
        cap = 64 << 20
    if cap >= (100 << 20):        # v5e / v6e: 128 MiB physical VMEM
        return 100 << 20, 2048
    return 48 << 20, 1024         # v7x: 64 MiB physical VMEM per TC


def _pick_batch_block(B, T, target_rows):
    """Largest divisor of B with Bb*T <= target_rows, keeping >=2 grid blocks if possible."""
    divs = [d for d in range(1, B + 1) if B % d == 0]
    pref = [d for d in divs if B // d >= 2] or divs     # >=2 parallel blocks for megacore
    fit = [d for d in pref if d * T <= target_rows]
    return max(fit) if fit else min(pref)


def bigram_lm_forward(params, idx, targets=None, batch_block=None):
    B, T = idx.shape
    C = N_EMBED
    assert T % 8 == 0 and T <= BLOCK_SIZE

    # glue: embedding gathers in plain JAX (table lookup), like nn.Embedding
    tok = jnp.take(params["tok_emb"], idx, axis=0)       # (B, T, C)
    pos = params["pos_emb"][:T]                          # (T, C)
    x = (tok + pos).reshape(B * T, C)                    # flatten batch into matmul M dim

    vmem_limit, target_rows = _tpu_budget()
    Bb = _pick_batch_block(B, T, target_rows) if batch_block is None else batch_block
    assert B % Bb == 0
    MB = Bb * T

    bf16 = jnp.bfloat16

    # fold the C**-0.5 attention scale into the Q columns of wqkv (free at runtime)
    wqkv = params["wqkv"].at[:, :, :C].multiply(C ** (-0.5)).astype(bf16)

    # pad lm_head to a lane-dense 128-wide output
    lm_w = jnp.pad(params["lm_w"], ((0, 0), (0, VOCAB_PAD - VOCAB_SIZE)))
    lm_b = jnp.pad(params["lm_b"], ((0, 0), (0, VOCAB_PAD - VOCAB_SIZE)))

    args = (
        x,
        params["ln1_g"], params["ln1_b"],
        wqkv,
        params["proj_w"].astype(bf16), params["proj_b"],
        params["ln2_g"], params["ln2_b"],
        params["ff_w1"].astype(bf16), params["ff_b1"],
        params["ff_w2"].astype(bf16), params["ff_b2"],
        params["lnf_g"], params["lnf_b"],
        lm_w.astype(bf16), lm_b,
    )

    in_specs = [pl.BlockSpec((MB, C), lambda bb, l: (bb, 0))]
    in_specs += [_layer_spec(a) for a in args[1:12]]     # per-layer stacked params
    in_specs += [_const_spec(a) for a in args[12:]]      # grid-invariant final head

    grid_spec = pltpu.PrefetchScalarGridSpec(
        num_scalar_prefetch=0,
        grid=(B // Bb, N_LAYER),
        in_specs=in_specs,
        out_specs=pl.BlockSpec((MB, VOCAB_PAD), lambda bb, l: (bb, 0)),
        scratch_shapes=[pltpu.VMEM((MB, C), jnp.float32)],
    )

    logits_flat = pl.pallas_call(
        functools.partial(_fused_model_kernel, T, Bb),
        out_shape=jax.ShapeDtypeStruct((B * T, VOCAB_PAD), jnp.float32),
        grid_spec=grid_spec,
        compiler_params=pltpu.CompilerParams(
            dimension_semantics=("parallel", "arbitrary"),
            vmem_limit_bytes=vmem_limit,
        ),
    )(*args)

    logits = logits_flat.reshape(B, T, VOCAB_PAD)[:, :, :VOCAB_SIZE]

    if targets is None:
        loss = None
    else:
        # plain-JAX cross entropy (glue), matching F.cross_entropy on (B*T, V)
        lv = logits.reshape(B * T, VOCAB_SIZE)
        tv = targets.reshape(B * T)
        picked = jnp.take_along_axis(lv, tv[:, None], axis=-1)[:, 0]
        loss = jnp.mean(jax.nn.logsumexp(lv, axis=-1) - picked)
    return logits, loss


# ---------------------------------------------------------------------------
# Deterministic parameter initialization (normal std=0.02 weights, zero bias,
# LayerNorm gamma=1 / beta=0).  Per-layer weights are stacked with a leading
# layer axis; Q/K/V weights are fused as (L, C, 3C) with column layout
# [ q_head0..q_head5 | k_head0..k_head5 | v_head0..v_head5 ].
# ---------------------------------------------------------------------------
def init_params(rng):
    def nrm(key, shape):
        return 0.02 * jax.random.normal(key, shape, jnp.float32)

    ks = jax.random.split(rng, 8)
    L, C = N_LAYER, N_EMBED
    return {
        "tok_emb": nrm(ks[0], (VOCAB_SIZE, C)),
        "pos_emb": nrm(ks[1], (BLOCK_SIZE, C)),
        "ln1_g": jnp.ones((L, 1, C), jnp.float32),
        "ln1_b": jnp.zeros((L, 1, C), jnp.float32),
        "wqkv": nrm(ks[2], (L, C, 3 * C)),
        "proj_w": nrm(ks[3], (L, C, C)),
        "proj_b": jnp.zeros((L, 1, C), jnp.float32),
        "ln2_g": jnp.ones((L, 1, C), jnp.float32),
        "ln2_b": jnp.zeros((L, 1, C), jnp.float32),
        "ff_w1": nrm(ks[4], (L, C, 4 * C)),
        "ff_b1": jnp.zeros((L, 1, 4 * C), jnp.float32),
        "ff_w2": nrm(ks[5], (L, 4 * C, C)),
        "ff_b2": jnp.zeros((L, 1, C), jnp.float32),
        "lnf_g": jnp.ones((1, C), jnp.float32),
        "lnf_b": jnp.zeros((1, C), jnp.float32),
        "lm_w": nrm(ks[6], (C, VOCAB_SIZE)),
        "lm_b": jnp.zeros((1, VOCAB_SIZE), jnp.float32),
    }


# ---------------------------------------------------------------------------
# Pure-JAX f32 reference (module semantics: per-head linears, concat, proj)
# ---------------------------------------------------------------------------
def _ref_forward(params, idx):
    B, T = idx.shape
    C = N_EMBED
    x = params["tok_emb"][idx] + params["pos_emb"][:T]

    def ln(x, g, b):
        mu = x.mean(-1, keepdims=True)
        var = ((x - mu) ** 2).mean(-1, keepdims=True)
        return (x - mu) / jnp.sqrt(var + LN_EPS) * g + b

    mask = jnp.tril(jnp.ones((T, T), bool))
    for l in range(N_LAYER):
        xn = ln(x, params["ln1_g"][l, 0], params["ln1_b"][l, 0])
        heads = []
        for h in range(N_HEAD):
            c0 = h * HEAD_SIZE
            wq = params["wqkv"][l, :, c0:c0 + HEAD_SIZE]
            wk = params["wqkv"][l, :, C + c0:C + c0 + HEAD_SIZE]
            wv = params["wqkv"][l, :, 2 * C + c0:2 * C + c0 + HEAD_SIZE]
            q = xn @ wq; k = xn @ wk; v = xn @ wv
            wei = jnp.einsum("btd,bsd->bts", q, k) * (C ** -0.5)
            wei = jnp.where(mask, wei, -jnp.inf)
            wei = jax.nn.softmax(wei, axis=-1)
            heads.append(jnp.einsum("bts,bsd->btd", wei, v))
        sa = jnp.concatenate(heads, -1) @ params["proj_w"][l] + params["proj_b"][l, 0]
        x = x + sa
        yn = ln(x, params["ln2_g"][l, 0], params["ln2_b"][l, 0])
        x = x + (jax.nn.relu(yn @ params["ff_w1"][l] + params["ff_b1"][l, 0])
                 @ params["ff_w2"][l] + params["ff_b2"][l, 0])
    xn = ln(x, params["lnf_g"][0], params["lnf_b"][0])
    return xn @ params["lm_w"] + params["lm_b"][0]


if __name__ == "__main__":
    B, T = 2, 32                       # small demo shapes; T <= block_size (256)
    rng = jax.random.PRNGKey(0)
    pkey, ikey = jax.random.split(rng)
    params = init_params(pkey)
    idx = jax.random.randint(ikey, (B, T), 0, VOCAB_SIZE, dtype=jnp.int32)

    logits, loss = jax.jit(bigram_lm_forward)(params, idx)
    logits = jax.block_until_ready(logits)

    assert logits.shape == (B, T, VOCAB_SIZE) and logits.dtype == jnp.float32
    assert loss is None

    ref = _ref_forward(params, idx)
    # bf16 MXU matmuls + approx reciprocal vs f32 reference -> loosened tolerance
    err = float(jnp.max(jnp.abs(logits - ref)))
    assert err < 5e-2, f"mismatch vs f32 JAX reference: max abs err = {err}"

    print("KERNEL_OK")
</pallas_src>

<mosaic_0001>
module attributes {stable_mosaic.version = 11 : i64} {
  func.func @_fused_model_kernel(%arg0: i32, %arg1: i32, %arg2: memref<32x384xf32, #tpu.memory_space<vmem>>, %arg3: memref<1x1x384xf32, #tpu.memory_space<vmem>>, %arg4: memref<1x1x384xf32, #tpu.memory_space<vmem>>, %arg5: memref<1x384x1152xbf16, #tpu.memory_space<vmem>>, %arg6: memref<1x384x384xbf16, #tpu.memory_space<vmem>>, %arg7: memref<1x1x384xf32, #tpu.memory_space<vmem>>, %arg8: memref<1x1x384xf32, #tpu.memory_space<vmem>>, %arg9: memref<1x1x384xf32, #tpu.memory_space<vmem>>, %arg10: memref<1x384x1536xbf16, #tpu.memory_space<vmem>>, %arg11: memref<1x1x1536xf32, #tpu.memory_space<vmem>>, %arg12: memref<1x1536x384xbf16, #tpu.memory_space<vmem>>, %arg13: memref<1x1x384xf32, #tpu.memory_space<vmem>>, %arg14: memref<1x384xf32, #tpu.memory_space<vmem>>, %arg15: memref<1x384xf32, #tpu.memory_space<vmem>>, %arg16: memref<384x128xbf16, #tpu.memory_space<vmem>>, %arg17: memref<1x128xf32, #tpu.memory_space<vmem>>, %arg18: memref<32x128xf32, #tpu.memory_space<vmem>>, %arg19: memref<32x384xf32, #tpu.memory_space<vmem>>) attributes {dimension_semantics = [#tpu.dimension_semantics<parallel>, #tpu.dimension_semantics<arbitrary>], iteration_bounds = array<i64: 2, 6>, scalar_prefetch = 0 : i64, scratch_operands = 1 : i64, tpu.core_type = #tpu.core_type<tc>, window_params = [{transform_indices = @transform_0, window_bounds = array<i64: 32, 384>}, {transform_indices = @transform_1, window_bounds = array<i64: 1, 1, 384>}, {transform_indices = @transform_2, window_bounds = array<i64: 1, 1, 384>}, {transform_indices = @transform_3, window_bounds = array<i64: 1, 384, 1152>}, {transform_indices = @transform_4, window_bounds = array<i64: 1, 384, 384>}, {transform_indices = @transform_5, window_bounds = array<i64: 1, 1, 384>}, {transform_indices = @transform_6, window_bounds = array<i64: 1, 1, 384>}, {transform_indices = @transform_7, window_bounds = array<i64: 1, 1, 384>}, {transform_indices = @transform_8, window_bounds = array<i64: 1, 384, 1536>}, {transform_indices = @transform_9, window_bounds = array<i64: 1, 1, 1536>}, {transform_indices = @transform_10, window_bounds = array<i64: 1, 1536, 384>}, {transform_indices = @transform_11, window_bounds = array<i64: 1, 1, 384>}, {pipeline_mode = #tpu.pipeline_mode<synchronous>, transform_indices = @transform_12, window_bounds = array<i64: 1, 384>}, {pipeline_mode = #tpu.pipeline_mode<synchronous>, transform_indices = @transform_13, window_bounds = array<i64: 1, 384>}, {pipeline_mode = #tpu.pipeline_mode<synchronous>, transform_indices = @transform_14, window_bounds = array<i64: 384, 128>}, {pipeline_mode = #tpu.pipeline_mode<synchronous>, transform_indices = @transform_15, window_bounds = array<i64: 1, 128>}, {transform_indices = @transform_16, window_bounds = array<i64: 32, 128>}]} {
    %c0_i32 = arith.constant 0 : i32
    %0 = arith.cmpi eq, %arg1, %c0_i32 : i32
    %1 = arith.extui %0 : i1 to i32
    %c0_i32_0 = arith.constant 0 : i32
    %2 = arith.cmpi ne, %1, %c0_i32_0 : i32
    scf.if %2 {
      %c0_85 = arith.constant 0 : index
      %c0_86 = arith.constant 0 : index
      %211 = vector.load %arg2[%c0_85, %c0_86] : memref<32x384xf32, #tpu.memory_space<vmem>>, vector<32x384xf32>
      %c0_87 = arith.constant 0 : index
      %c0_88 = arith.constant 0 : index
      %212 = vector.load %arg19[%c0_87, %c0_88] : memref<32x384xf32, #tpu.memory_space<vmem>>, vector<32x384xf32>
      tpu.vector_store %arg19[%c0_87, %c0_88], %211 {strides = array<i32>} : memref<32x384xf32, #tpu.memory_space<vmem>>, vector<32x384xf32>,
    } else {
    }
    %3 = tpu.iota {dimensions = array<i32: 0>} : vector<32x32xi32>
    %4 = tpu.iota {dimensions = array<i32: 1>} : vector<32x32xi32>
    %5 = arith.cmpi sle, %4, %3 : vector<32x32xi32>
    %c0 = arith.constant 0 : index
    %c0_1 = arith.constant 0 : index
    %c0_2 = arith.constant 0 : index
    %6 = vector.load %arg3[%c0, %c0_1, %c0_2] : memref<1x1x384xf32, #tpu.memory_space<vmem>>, vector<1x1x384xf32>
    %7 = vector.shape_cast %6 : vector<1x1x384xf32> to vector<1x384xf32>
    %c0_3 = arith.constant 0 : index
    %c0_4 = arith.constant 0 : index
    %c0_5 = arith.constant 0 : index
    %8 = vector.load %arg4[%c0_3, %c0_4, %c0_5] : memref<1x1x384xf32, #tpu.memory_space<vmem>>, vector<1x1x384xf32>
    %9 = vector.shape_cast %8 : vector<1x1x384xf32> to vector<1x384xf32>
    %c0_6 = arith.constant 0 : index
    %c0_7 = arith.constant 0 : index
    %c0_8 = arith.constant 0 : index
    %10 = vector.load %arg5[%c0_6, %c0_7, %c0_8] : memref<1x384x1152xbf16, #tpu.memory_space<vmem>>, vector<1x384x1152xbf16>
    %11 = vector.shape_cast %10 : vector<1x384x1152xbf16> to vector<384x1152xbf16>
    %c0_9 = arith.constant 0 : index
    %c0_10 = arith.constant 0 : index
    %c0_11 = arith.constant 0 : index
    %12 = vector.load %arg6[%c0_9, %c0_10, %c0_11] : memref<1x384x384xbf16, #tpu.memory_space<vmem>>, vector<1x384x384xbf16>
    %13 = vector.shape_cast %12 : vector<1x384x384xbf16> to vector<384x384xbf16>
    %c0_12 = arith.constant 0 : index
    %c0_13 = arith.constant 0 : index
    %c0_14 = arith.constant 0 : index
    %14 = vector.load %arg7[%c0_12, %c0_13, %c0_14] : memref<1x1x384xf32, #tpu.memory_space<vmem>>, vector<1x1x384xf32>
    %15 = vector.shape_cast %14 : vector<1x1x384xf32> to vector<1x384xf32>
    %c0_i32_15 = arith.constant 0 : i32
    %c32_i32 = arith.constant 32 : i32
    %16 = arith.muli %c0_i32_15, %c32_i32 : i32
    %17 = tpu.assume_multiple %16, 32 : i32
    %18 = arith.index_cast %17 : i32 to index
    %c0_16 = arith.constant 0 : index
    %19 = vector.load %arg19[%18, %c0_16] : memref<32x384xf32, #tpu.memory_space<vmem>>, vector<32x384xf32>
    %cst = arith.constant dense<0.000000e+00> : vector<32xf32>
    %20 = vector.multi_reduction <add>, %19, %cst [1] : vector<32x384xf32> to vector<32xf32>
    %21 = vector.shape_cast %20 : vector<32xf32> to vector<32x1xf32>
    %cst_17 = arith.constant 3.840000e+02 : f32
    %22 = vector.broadcast %cst_17 : f32 to vector<32x1xf32>
    %23 = arith.divf %21, %22 : vector<32x1xf32>
    %24 = vector.broadcast %23 : vector<32x1xf32> to vector<32x384xf32>
    %25 = arith.subf %19, %24 : vector<32x384xf32>
    %26 = arith.mulf %25, %25 : vector<32x384xf32>
    %cst_18 = arith.constant dense<0.000000e+00> : vector<32xf32>
    %27 = vector.multi_reduction <add>, %26, %cst_18 [1] : vector<32x384xf32> to vector<32xf32>
    %28 = vector.shape_cast %27 : vector<32xf32> to vector<32x1xf32>
    %cst_19 = arith.constant 3.840000e+02 : f32
    %29 = vector.broadcast %cst_19 : f32 to vector<32x1xf32>
    %30 = arith.divf %28, %29 : vector<32x1xf32>
    %31 = vector.broadcast %23 : vector<32x1xf32> to vector<32x384xf32>
    %32 = arith.subf %19, %31 : vector<32x384xf32>
    %cst_20 = arith.constant 9.99999974E-6 : f32
    %33 = vector.broadcast %cst_20 : f32 to vector<32x1xf32>
    %34 = arith.addf %30, %33 : vector<32x1xf32>
    %35 = math.rsqrt %34 : vector<32x1xf32>
    %36 = vector.broadcast %35 : vector<32x1xf32> to vector<32x384xf32>
    %37 = arith.mulf %32, %36 : vector<32x384xf32>
    %38 = vector.broadcast %7 : vector<1x384xf32> to vector<32x384xf32>
    %39 = arith.mulf %37, %38 : vector<32x384xf32>
    %40 = vector.broadcast %9 : vector<1x384xf32> to vector<32x384xf32>
    %41 = arith.addf %39, %40 : vector<32x384xf32>
    %42 = arith.truncf %41 : vector<32x384xf32> to vector<32x384xbf16>
    %cst_21 = arith.constant dense<0.000000e+00> : vector<32x1152xf32>
    %43 = tpu.matmul %42, %11, %cst_21 {dimension_numbers = #tpu.dot_dimension_numbers<[1], [0], [0], [1], [0, 0, 1, 1], [], []>} : vector<32x384xbf16>, vector<384x1152xbf16>, vector<32x1152xf32> -> vector<32x1152xf32>
    %44 = arith.truncf %43 : vector<32x1152xf32> to vector<32x1152xbf16>
    %45 = vector.extract_strided_slice %44 {offsets = [0, 0], sizes = [32, 64], strides = [1, 1]} : vector<32x1152xbf16> to vector<32x64xbf16>
    %46 = vector.extract_strided_slice %44 {offsets = [0, 384], sizes = [32, 64], strides = [1, 1]} : vector<32x1152xbf16> to vector<32x64xbf16>
    %47 = vector.extract_strided_slice %44 {offsets = [0, 768], sizes = [32, 64], strides = [1, 1]} : vector<32x1152xbf16> to vector<32x64xbf16>
    %cst_22 = arith.constant dense<0.000000e+00> : vector<32x32xf32>
    %48 = tpu.matmul %45, %46, %cst_22 {dimension_numbers = #tpu.dot_dimension_numbers<[1], [1], [0], [0], [0, 0, 1, 0], [], []>} : vector<32x64xbf16>, vector<32x64xbf16>, vector<32x32xf32> -> vector<32x32xf32>
    %cst_23 = arith.constant 0xFF800000 : f32
    %49 = vector.broadcast %cst_23 : f32 to vector<32x32xf32>
    %50 = arith.select %5, %48, %49 : vector<32x32xi1>, vector<32x32xf32>
    %cst_24 = arith.constant dense<0xFF800000> : vector<32xf32>
    %51 = vector.multi_reduction <maximumf>, %50, %cst_24 [1] : vector<32x32xf32> to vector<32xf32>
    %52 = vector.shape_cast %51 : vector<32xf32> to vector<32x1xf32>
    %53 = vector.broadcast %52 : vector<32x1xf32> to vector<32x32xf32>
    %54 = arith.subf %50, %53 : vector<32x32xf32>
    %55 = math.exp %54 : vector<32x32xf32>
    %cst_25 = arith.constant dense<0.000000e+00> : vector<32xf32>
    %56 = vector.multi_reduction <add>, %55, %cst_25 [1] : vector<32x32xf32> to vector<32xf32>
    %57 = vector.shape_cast %56 : vector<32xf32> to vector<32x1xf32>
    %58 = tpu.reciprocal %57 {approx = true} : vector<32x1xf32> -> vector<32x1xf32>
    %59 = vector.broadcast %58 : vector<32x1xf32> to vector<32x32xf32>
    %60 = arith.mulf %55, %59 : vector<32x32xf32>
    %61 = arith.truncf %60 : vector<32x32xf32> to vector<32x32xbf16>
    %cst_26 = arith.constant dense<0.000000e+00> : vector<32x64xf32>
    %62 = tpu.matmul %61, %47, %cst_26 {dimension_numbers = #tpu.dot_dimension_numbers<[1], [0], [0], [1], [0, 0, 1, 1], [], []>} : vector<32x32xbf16>, vector<32x64xbf16>, vector<32x64xf32> -> vector<32x64xf32>
    %63 = vector.extract_strided_slice %44 {offsets = [0, 64], sizes = [32, 64], strides = [1, 1]} : vector<32x1152xbf16> to vector<32x64xbf16>
    %64 = vector.extract_strided_slice %44 {offsets = [0, 448], sizes = [32, 64], strides = [1, 1]} : vector<32x1152xbf16> to vector<32x64xbf16>
    %65 = vector.extract_strided_slice %44 {offsets = [0, 832], sizes = [32, 64], strides = [1, 1]} : vector<32x1152xbf16> to vector<32x64xbf16>
    %cst_27 = arith.constant dense<0.000000e+00> : vector<32x32xf32>
    %66 = tpu.matmul %63, %64, %cst_27 {dimension_numbers = #tpu.dot_dimension_numbers<[1], [1], [0], [0], [0, 0, 1, 0], [], []>} : vector<32x64xbf16>, vector<32x64xbf16>, vector<32x32xf32> -> vector<32x32xf32>
    %cst_28 = arith.constant 0xFF800000 : f32
    %67 = vector.broadcast %cst_28 : f32 to vector<32x32xf32>
    %68 = arith.select %5, %66, %67 : vector<32x32xi1>, vector<32x32xf32>
    %cst_29 = arith.constant dense<0xFF800000> : vector<32xf32>
    %69 = vector.multi_reduction <maximumf>, %68, %cst_29 [1] : vector<32x32xf32> to vector<32xf32>
    %70 = vector.shape_cast %69 : vector<32xf32> to vector<32x1xf32>
    %71 = vector.broadcast %70 : vector<32x1xf32> to vector<32x32xf32>
    %72 = arith.subf %68, %71 : vector<32x32xf32>
    %73 = math.exp %72 : vector<32x32xf32>
    %cst_30 = arith.constant dense<0.000000e+00> : vector<32xf32>
    %74 = vector.multi_reduction <add>, %73, %cst_30 [1] : vector<32x32xf32> to vector<32xf32>
    %75 = vector.shape_cast %74 : vector<32xf32> to vector<32x1xf32>
    %76 = tpu.reciprocal %75 {approx = true} : vector<32x1xf32> -> vector<32x1xf32>
    %77 = vector.broadcast %76 : vector<32x1xf32> to vector<32x32xf32>
    %78 = arith.mulf %73, %77 : vector<32x32xf32>
    %79 = arith.truncf %78 : vector<32x32xf32> to vector<32x32xbf16>
    %cst_31 = arith.constant dense<0.000000e+00> : vector<32x64xf32>
    %80 = tpu.matmul %79, %65, %cst_31 {dimension_numbers = #tpu.dot_dimension_numbers<[1], [0], [0], [1], [0, 0, 1, 1], [], []>} : vector<32x32xbf16>, vector<32x64xbf16>, vector<32x64xf32> -> vector<32x64xf32>
    %81 = vector.extract_strided_slice %44 {offsets = [0, 128], sizes = [32, 64], strides = [1, 1]} : vector<32x1152xbf16> to vector<32x64xbf16>
    %82 = vector.extract_strided_slice %44 {offsets = [0, 512], sizes = [32, 64], strides = [1, 1]} : vector<32x1152xbf16> to vector<32x64xbf16>
    %83 = vector.extract_strided_slice %44 {offsets = [0, 896], sizes = [32, 64], strides = [1, 1]} : vector<32x1152xbf16> to vector<32x64xbf16>
    %cst_32 = arith.constant dense<0.000000e+00> : vector<32x32xf32>
    %84 = tpu.matmul %81, %82, %cst_32 {dimension_numbers = #tpu.dot_dimension_numbers<[1], [1], [0], [0], [0, 0, 1, 0], [], []>} : vector<32x64xbf16>, vector<32x64xbf16>, vector<32x32xf32> -> vector<32x32xf32>
    %cst_33 = arith.constant 0xFF800000 : f32
    %85 = vector.broadcast %cst_33 : f32 to vector<32x32xf32>
    %86 = arith.select %5, %84, %85 : vector<32x32xi1>, vector<32x32xf32>
    %cst_34 = arith.constant dense<0xFF800000> : vector<32xf32>
    %87 = vector.multi_reduction <maximumf>, %86, %cst_34 [1] : vector<32x32xf32> to vector<32xf32>
    %88 = vector.shape_cast %87 : vector<32xf32> to vector<32x1xf32>
    %89 = vector.broadcast %88 : vector<32x1xf32> to vector<32x32xf32>
    %90 = arith.subf %86, %89 : vector<32x32xf32>
    %91 = math.exp %90 : vector<32x32xf32>
    %cst_35 = arith.constant dense<0.000000e+00> : vector<32xf32>
    %92 = vector.multi_reduction <add>, %91, %cst_35 [1] : vector<32x32xf32> to vector<32xf32>
    %93 = vector.shape_cast %92 : vector<32xf32> to vector<32x1xf32>
    %94 = tpu.reciprocal %93 {approx = true} : vector<32x1xf32> -> vector<32x1xf32>
    %95 = vector.broadcast %94 : vector<32x1xf32> to vector<32x32xf32>
    %96 = arith.mulf %91, %95 : vector<32x32xf32>
    %97 = arith.truncf %96 : vector<32x32xf32> to vector<32x32xbf16>
    %cst_36 = arith.constant dense<0.000000e+00> : vector<32x64xf32>
    %98 = tpu.matmul %97, %83, %cst_36 {dimension_numbers = #tpu.dot_dimension_numbers<[1], [0], [0], [1], [0, 0, 1, 1], [], []>} : vector<32x32xbf16>, vector<32x64xbf16>, vector<32x64xf32> -> vector<32x64xf32>
    %99 = vector.extract_strided_slice %44 {offsets = [0, 192], sizes = [32, 64], strides = [1, 1]} : vector<32x1152xbf16> to vector<32x64xbf16>
    %100 = vector.extract_strided_slice %44 {offsets = [0, 576], sizes = [32, 64], strides = [1, 1]} : vector<32x1152xbf16> to vector<32x64xbf16>
    %101 = vector.extract_strided_slice %44 {offsets = [0, 960], sizes = [32, 64], strides = [1, 1]} : vector<32x1152xbf16> to vector<32x64xbf16>
    %cst_37 = arith.constant dense<0.000000e+00> : vector<32x32xf32>
    %102 = tpu.matmul %99, %100, %cst_37 {dimension_numbers = #tpu.dot_dimension_numbers<[1], [1], [0], [0], [0, 0, 1, 0], [], []>} : vector<32x64xbf16>, vector<32x64xbf16>, vector<32x32xf32> -> vector<32x32xf32>
    %cst_38 = arith.constant 0xFF800000 : f32
    %103 = vector.broadcast %cst_38 : f32 to vector<32x32xf32>
    %104 = arith.select %5, %102, %103 : vector<32x32xi1>, vector<32x32xf32>
    %cst_39 = arith.constant dense<0xFF800000> : vector<32xf32>
    %105 = vector.multi_reduction <maximumf>, %104, %cst_39 [1] : vector<32x32xf32> to vector<32xf32>
    %106 = vector.shape_cast %105 : vector<32xf32> to vector<32x1xf32>
    %107 = vector.broadcast %106 : vector<32x1xf32> to vector<32x32xf32>
    %108 = arith.subf %104, %107 : vector<32x32xf32>
    %109 = math.exp %108 : vector<32x32xf32>
    %cst_40 = arith.constant dense<0.000000e+00> : vector<32xf32>
    %110 = vector.multi_reduction <add>, %109, %cst_40 [1] : vector<32x32xf32> to vector<32xf32>
    %111 = vector.shape_cast %110 : vector<32xf32> to vector<32x1xf32>
    %112 = tpu.reciprocal %111 {approx = true} : vector<32x1xf32> -> vector<32x1xf32>
    %113 = vector.broadcast %112 : vector<32x1xf32> to vector<32x32xf32>
    %114 = arith.mulf %109, %113 : vector<32x32xf32>
    %115 = arith.truncf %114 : vector<32x32xf32> to vector<32x32xbf16>
    %cst_41 = arith.constant dense<0.000000e+00> : vector<32x64xf32>
    %116 = tpu.matmul %115, %101, %cst_41 {dimension_numbers = #tpu.dot_dimension_numbers<[1], [0], [0], [1], [0, 0, 1, 1], [], []>} : vector<32x32xbf16>, vector<32x64xbf16>, vector<32x64xf32> -> vector<32x64xf32>
    %117 = vector.extract_strided_slice %44 {offsets = [0, 256], sizes = [32, 64], strides = [1, 1]} : vector<32x1152xbf16> to vector<32x64xbf16>
    %118 = vector.extract_strided_slice %44 {offsets = [0, 640], sizes = [32, 64], strides = [1, 1]} : vector<32x1152xbf16> to vector<32x64xbf16>
    %119 = vector.extract_strided_slice %44 {offsets = [0, 1024], sizes = [32, 64], strides = [1, 1]} : vector<32x1152xbf16> to vector<32x64xbf16>
    %cst_42 = arith.constant dense<0.000000e+00> : vector<32x32xf32>
    %120 = tpu.matmul %117, %118, %cst_42 {dimension_numbers = #tpu.dot_dimension_numbers<[1], [1], [0], [0], [0, 0, 1, 0], [], []>} : vector<32x64xbf16>, vector<32x64xbf16>, vector<32x32xf32> -> vector<32x32xf32>
    %cst_43 = arith.constant 0xFF800000 : f32
    %121 = vector.broadcast %cst_43 : f32 to vector<32x32xf32>
    %122 = arith.select %5, %120, %121 : vector<32x32xi1>, vector<32x32xf32>
    %cst_44 = arith.constant dense<0xFF800000> : vector<32xf32>
    %123 = vector.multi_reduction <maximumf>, %122, %cst_44 [1] : vector<32x32xf32> to vector<32xf32>
    %124 = vector.shape_cast %123 : vector<32xf32> to vector<32x1xf32>
    %125 = vector.broadcast %124 : vector<32x1xf32> to vector<32x32xf32>
    %126 = arith.subf %122, %125 : vector<32x32xf32>
    %127 = math.exp %126 : vector<32x32xf32>
    %cst_45 = arith.constant dense<0.000000e+00> : vector<32xf32>
    %128 = vector.multi_reduction <add>, %127, %cst_45 [1] : vector<32x32xf32> to vector<32xf32>
    %129 = vector.shape_cast %128 : vector<32xf32> to vector<32x1xf32>
    %130 = tpu.reciprocal %129 {approx = true} : vector<32x1xf32> -> vector<32x1xf32>
    %131 = vector.broadcast %130 : vector<32x1xf32> to vector<32x32xf32>
    %132 = arith.mulf %127, %131 : vector<32x32xf32>
    %133 = arith.truncf %132 : vector<32x32xf32> to vector<32x32xbf16>
    %cst_46 = arith.constant dense<0.000000e+00> : vector<32x64xf32>
    %134 = tpu.matmul %133, %119, %cst_46 {dimension_numbers = #tpu.dot_dimension_numbers<[1], [0], [0], [1], [0, 0, 1, 1], [], []>} : vector<32x32xbf16>, vector<32x64xbf16>, vector<32x64xf32> -> vector<32x64xf32>
    %135 = vector.extract_strided_slice %44 {offsets = [0, 320], sizes = [32, 64], strides = [1, 1]} : vector<32x1152xbf16> to vector<32x64xbf16>
    %136 = vector.extract_strided_slice %44 {offsets = [0, 704], sizes = [32, 64], strides = [1, 1]} : vector<32x1152xbf16> to vector<32x64xbf16>
    %137 = vector.extract_strided_slice %44 {offsets = [0, 1088], sizes = [32, 64], strides = [1, 1]} : vector<32x1152xbf16> to vector<32x64xbf16>
    %cst_47 = arith.constant dense<0.000000e+00> : vector<32x32xf32>
    %138 = tpu.matmul %135, %136, %cst_47 {dimension_numbers = #tpu.dot_dimension_numbers<[1], [1], [0], [0], [0, 0, 1, 0], [], []>} : vector<32x64xbf16>, vector<32x64xbf16>, vector<32x32xf32> -> vector<32x32xf32>
    %cst_48 = arith.constant 0xFF800000 : f32
    %139 = vector.broadcast %cst_48 : f32 to vector<32x32xf32>
    %140 = arith.select %5, %138, %139 : vector<32x32xi1>, vector<32x32xf32>
    %cst_49 = arith.constant dense<0xFF800000> : vector<32xf32>
    %141 = vector.multi_reduction <maximumf>, %140, %cst_49 [1] : vector<32x32xf32> to vector<32xf32>
    %142 = vector.shape_cast %141 : vector<32xf32> to vector<32x1xf32>
    %143 = vector.broadcast %142 : vector<32x1xf32> to vector<32x32xf32>
    %144 = arith.subf %140, %143 : vector<32x32xf32>
    %145 = math.exp %144 : vector<32x32xf32>
    %cst_50 = arith.constant dense<0.000000e+00> : vector<32xf32>
    %146 = vector.multi_reduction <add>, %145, %cst_50 [1] : vector<32x32xf32> to vector<32xf32>
    %147 = vector.shape_cast %146 : vector<32xf32> to vector<32x1xf32>
    %148 = tpu.reciprocal %147 {approx = true} : vector<32x1xf32> -> vector<32x1xf32>
    %149 = vector.broadcast %148 : vector<32x1xf32> to vector<32x32xf32>
    %150 = arith.mulf %145, %149 : vector<32x32xf32>
    %151 = arith.truncf %150 : vector<32x32xf32> to vector<32x32xbf16>
    %cst_51 = arith.constant dense<0.000000e+00> : vector<32x64xf32>
    %152 = tpu.matmul %151, %137, %cst_51 {dimension_numbers = #tpu.dot_dimension_numbers<[1], [0], [0], [1], [0, 0, 1, 1], [], []>} : vector<32x32xbf16>, vector<32x64xbf16>, vector<32x64xf32> -> vector<32x64xf32>
    %153 = tpu.concatenate %62, %80, %98, %116, %134, %152 in 1 : vector<32x64xf32>, vector<32x64xf32>, vector<32x64xf32>, vector<32x64xf32>, vector<32x64xf32>, vector<32x64xf32> -> vector<32x384xf32>
    %154 = arith.truncf %153 : vector<32x384xf32> to vector<32x384xbf16>
    %cst_52 = arith.constant dense<0.000000e+00> : vector<32x384xf32>
    %155 = tpu.matmul %154, %13, %cst_52 {dimension_numbers = #tpu.dot_dimension_numbers<[1], [0], [0], [1], [0, 0, 1, 1], [], []>} : vector<32x384xbf16>, vector<384x384xbf16>, vector<32x384xf32> -> vector<32x384xf32>
    %156 = vector.broadcast %15 : vector<1x384xf32> to vector<32x384xf32>
    %157 = arith.addf %155, %156 : vector<32x384xf32>
    %158 = arith.addf %19, %157 : vector<32x384xf32>
    %159 = arith.index_cast %17 : i32 to index
    %c0_53 = arith.constant 0 : index
    %160 = vector.load %arg19[%159, %c0_53] : memref<32x384xf32, #tpu.memory_space<vmem>>, vector<32x384xf32>
    tpu.vector_store %arg19[%159, %c0_53], %158 {strides = array<i32>} : memref<32x384xf32, #tpu.memory_space<vmem>>, vector<32x384xf32>,
    %c1_i32 = arith.constant 1 : i32
    %c0_54 = arith.constant 0 : index
    %c0_55 = arith.constant 0 : index
    %161 = vector.load %arg19[%c0_54, %c0_55] : memref<32x384xf32, #tpu.memory_space<vmem>>, vector<32x384xf32>
    %c0_56 = arith.constant 0 : index
    %c0_57 = arith.constant 0 : index
    %c0_58 = arith.constant 0 : index
    %162 = vector.load %arg8[%c0_56, %c0_57, %c0_58] : memref<1x1x384xf32, #tpu.memory_space<vmem>>, vector<1x1x384xf32>
    %163 = vector.shape_cast %162 : vector<1x1x384xf32> to vector<1x384xf32>
    %c0_59 = arith.constant 0 : index
    %c0_60 = arith.constant 0 : index
    %c0_61 = arith.constant 0 : index
    %164 = vector.load %arg9[%c0_59, %c0_60, %c0_61] : memref<1x1x384xf32, #tpu.memory_space<vmem>>, vector<1x1x384xf32>
    %165 = vector.shape_cast %164 : vector<1x1x384xf32> to vector<1x384xf32>
    %cst_62 = arith.constant dense<0.000000e+00> : vector<32xf32>
    %166 = vector.multi_reduction <add>, %161, %cst_62 [1] : vector<32x384xf32> to vector<32xf32>
    %167 = vector.shape_cast %166 : vector<32xf32> to vector<32x1xf32>
    %cst_63 = arith.constant 3.840000e+02 : f32
    %168 = vector.broadcast %cst_63 : f32 to vector<32x1xf32>
    %169 = arith.divf %167, %168 : vector<32x1xf32>
    %170 = vector.broadcast %169 : vector<32x1xf32> to vector<32x384xf32>
    %171 = arith.subf %161, %170 : vector<32x384xf32>
    %172 = arith.mulf %171, %171 : vector<32x384xf32>
    %cst_64 = arith.constant dense<0.000000e+00> : vector<32xf32>
    %173 = vector.multi_reduction <add>, %172, %cst_64 [1] : vector<32x384xf32> to vector<32xf32>
    %174 = vector.shape_cast %173 : vector<32xf32> to vector<32x1xf32>
    %cst_65 = arith.constant 3.840000e+02 : f32
    %175 = vector.broadcast %cst_65 : f32 to vector<32x1xf32>
    %176 = arith.divf %174, %175 : vector<32x1xf32>
    %177 = vector.broadcast %169 : vector<32x1xf32> to vector<32x384xf32>
    %178 = arith.subf %161, %177 : vector<32x384xf32>
    %cst_66 = arith.constant 9.99999974E-6 : f32
    %179 = vector.broadcast %cst_66 : f32 to vector<32x1xf32>
    %180 = arith.addf %176, %179 : vector<32x1xf32>
    %181 = math.rsqrt %180 : vector<32x1xf32>
    %182 = vector.broadcast %181 : vector<32x1xf32> to vector<32x384xf32>
    %183 = arith.mulf %178, %182 : vector<32x384xf32>
    %184 = vector.broadcast %163 : vector<1x384xf32> to vector<32x384xf32>
    %185 = arith.mulf %183, %184 : vector<32x384xf32>
    %186 = vector.broadcast %165 : vector<1x384xf32> to vector<32x384xf32>
    %187 = arith.addf %185, %186 : vector<32x384xf32>
    %188 = arith.truncf %187 : vector<32x384xf32> to vector<32x384xbf16>
    %c0_67 = arith.constant 0 : index
    %c0_68 = arith.constant 0 : index
    %c0_69 = arith.constant 0 : index
    %189 = vector.load %arg10[%c0_67, %c0_68, %c0_69] : memref<1x384x1536xbf16, #tpu.memory_space<vmem>>, vector<1x384x1536xbf16>
    %190 = vector.shape_cast %189 : vector<1x384x1536xbf16> to vector<384x1536xbf16>
    %cst_70 = arith.constant dense<0.000000e+00> : vector<32x1536xf32>
    %191 = tpu.matmul %188, %190, %cst_70 {dimension_numbers = #tpu.dot_dimension_numbers<[1], [0], [0], [1], [0, 0, 1, 1], [], []>} : vector<32x384xbf16>, vector<384x1536xbf16>, vector<32x1536xf32> -> vector<32x1536xf32>
    %c0_71 = arith.constant 0 : index
    %c0_72 = arith.constant 0 : index
    %c0_73 = arith.constant 0 : index
    %192 = vector.load %arg11[%c0_71, %c0_72, %c0_73] : memref<1x1x1536xf32, #tpu.memory_space<vmem>>, vector<1x1x1536xf32>
    %193 = vector.shape_cast %192 : vector<1x1x1536xf32> to vector<1x1536xf32>
    %194 = vector.broadcast %193 : vector<1x1536xf32> to vector<32x1536xf32>
    %195 = arith.addf %191, %194 : vector<32x1536xf32>
    %cst_74 = arith.constant 0.000000e+00 : f32
    %196 = vector.broadcast %cst_74 : f32 to vector<32x1536xf32>
    %197 = arith.maximumf %195, %196 : vector<32x1536xf32>
    %198 = arith.truncf %197 : vector<32x1536xf32> to vector<32x1536xbf16>
    %c0_75 = arith.constant 0 : index
    %c0_76 = arith.constant 0 : index
    %c0_77 = arith.constant 0 : index
    %199 = vector.load %arg12[%c0_75, %c0_76, %c0_77] : memref<1x1536x384xbf16, #tpu.memory_space<vmem>>, vector<1x1536x384xbf16>
    %200 = vector.shape_cast %199 : vector<1x1536x384xbf16> to vector<1536x384xbf16>
    %cst_78 = arith.constant dense<0.000000e+00> : vector<32x384xf32>
    %201 = tpu.matmul %198, %200, %cst_78 {dimension_numbers = #tpu.dot_dimension_numbers<[1], [0], [0], [1], [0, 0, 1, 1], [], []>} : vector<32x1536xbf16>, vector<1536x384xbf16>, vector<32x384xf32> -> vector<32x384xf32>
    %c0_79 = arith.constant 0 : index
    %c0_80 = arith.constant 0 : index
    %c0_81 = arith.constant 0 : index
    %202 = vector.load %arg13[%c0_79, %c0_80, %c0_81] : memref<1x1x384xf32, #tpu.memory_space<vmem>>, vector<1x1x384xf32>
    %203 = vector.shape_cast %202 : vector<1x1x384xf32> to vector<1x384xf32>
    %204 = vector.broadcast %203 : vector<1x384xf32> to vector<32x384xf32>
    %205 = arith.addf %201, %204 : vector<32x384xf32>
    %206 = arith.addf %161, %205 : vector<32x384xf32>
    %c0_82 = arith.constant 0 : index
    %c0_83 = arith.constant 0 : index
    %207 = vector.load %arg19[%c0_82, %c0_83] : memref<32x384xf32, #tpu.memory_space<vmem>>, vector<32x384xf32>
    tpu.vector_store %arg19[%c0_82, %c0_83], %206 {strides = array<i32>} : memref<32x384xf32, #tpu.memory_space<vmem>>, vector<32x384xf32>,
    %c5_i32 = arith.constant 5 : i32
    %208 = arith.cmpi eq, %arg1, %c5_i32 : i32
    %209 = arith.extui %208 : i1 to i32
    %c0_i32_84 = arith.constant 0 : i32
    %210 = arith.cmpi ne, %209, %c0_i32_84 : i32
    scf.if %210 {
      %c0_85 = arith.constant 0 : index
      %c0_86 = arith.constant 0 : index
      %211 = vector.load %arg19[%c0_85, %c0_86] : memref<32x384xf32, #tpu.memory_space<vmem>>, vector<32x384xf32>
      %c0_87 = arith.constant 0 : index
      %c0_88 = arith.constant 0 : index
      %212 = vector.load %arg14[%c0_87, %c0_88] : memref<1x384xf32, #tpu.memory_space<vmem>>, vector<1x384xf32>
      %c0_89 = arith.constant 0 : index
      %c0_90 = arith.constant 0 : index
      %213 = vector.load %arg15[%c0_89, %c0_90] : memref<1x384xf32, #tpu.memory_space<vmem>>, vector<1x384xf32>
      %cst_91 = arith.constant dense<0.000000e+00> : vector<32xf32>
      %214 = vector.multi_reduction <add>, %211, %cst_91 [1] : vector<32x384xf32> to vector<32xf32>
      %215 = vector.shape_cast %214 : vector<32xf32> to vector<32x1xf32>
      %cst_92 = arith.constant 3.840000e+02 : f32
      %216 = vector.broadcast %cst_92 : f32 to vector<32x1xf32>
      %217 = arith.divf %215, %216 : vector<32x1xf32>
      %218 = vector.broadcast %217 : vector<32x1xf32> to vector<32x384xf32>
      %219 = arith.subf %211, %218 : vector<32x384xf32>
      %220 = arith.mulf %219, %219 : vector<32x384xf32>
      %cst_93 = arith.constant dense<0.000000e+00> : vector<32xf32>
      %221 = vector.multi_reduction <add>, %220, %cst_93 [1] : vector<32x384xf32> to vector<32xf32>
      %222 = vector.shape_cast %221 : vector<32xf32> to vector<32x1xf32>
      %cst_94 = arith.constant 3.840000e+02 : f32
      %223 = vector.broadcast %cst_94 : f32 to vector<32x1xf32>
      %224 = arith.divf %222, %223 : vector<32x1xf32>
      %225 = vector.broadcast %217 : vector<32x1xf32> to vector<32x384xf32>
      %226 = arith.subf %211, %225 : vector<32x384xf32>
      %cst_95 = arith.constant 9.99999974E-6 : f32
      %227 = vector.broadcast %cst_95 : f32 to vector<32x1xf32>
      %228 = arith.addf %224, %227 : vector<32x1xf32>
      %229 = math.rsqrt %228 : vector<32x1xf32>
      %230 = vector.broadcast %229 : vector<32x1xf32> to vector<32x384xf32>
      %231 = arith.mulf %226, %230 : vector<32x384xf32>
      %232 = vector.broadcast %212 : vector<1x384xf32> to vector<32x384xf32>
      %233 = arith.mulf %231, %232 : vector<32x384xf32>
      %234 = vector.broadcast %213 : vector<1x384xf32> to vector<32x384xf32>
      %235 = arith.addf %233, %234 : vector<32x384xf32>
      %236 = arith.truncf %235 : vector<32x384xf32> to vector<32x384xbf16>
      %c0_96 = arith.constant 0 : index
      %c0_97 = arith.constant 0 : index
      %237 = vector.load %arg16[%c0_96, %c0_97] : memref<384x128xbf16, #tpu.memory_space<vmem>>, vector<384x128xbf16>
      %cst_98 = arith.constant dense<0.000000e+00> : vector<32x128xf32>
      %238 = tpu.matmul %236, %237, %cst_98 {dimension_numbers = #tpu.dot_dimension_numbers<[1], [0], [0], [1], [0, 0, 1, 1], [], []>} : vector<32x384xbf16>, vector<384x128xbf16>, vector<32x128xf32> -> vector<32x128xf32>
      %c0_99 = arith.constant 0 : index
      %c0_100 = arith.constant 0 : index
      %239 = vector.load %arg17[%c0_99, %c0_100] : memref<1x128xf32, #tpu.memory_space<vmem>>, vector<1x128xf32>
      %240 = vector.broadcast %239 : vector<1x128xf32> to vector<32x128xf32>
      %241 = arith.addf %238, %240 : vector<32x128xf32>
      %c0_101 = arith.constant 0 : index
      %c0_102 = arith.constant 0 : index
      %242 = vector.load %arg18[%c0_101, %c0_102] : memref<32x128xf32, #tpu.memory_space<vmem>>, vector<32x128xf32>
      tpu.vector_store %arg18[%c0_101, %c0_102], %241 {strides = array<i32>} : memref<32x128xf32, #tpu.memory_space<vmem>>, vector<32x128xf32>,
    } else {
    }
    return
  }
  func.func @transform_0(%arg0: i32, %arg1: i32) -> (i32, i32) {
    %c0_i32 = arith.constant 0 : i32
    %c0_i32_0 = arith.constant 0 : i32
    return %arg0, %c0_i32 : i32, i32
  }
  func.func @transform_1(%arg0: i32, %arg1: i32) -> (i32, i32, i32) {
    %c0_i32 = arith.constant 0 : i32
    %c0_i32_0 = arith.constant 0 : i32
    %c0_i32_1 = arith.constant 0 : i32
    return %arg1, %c0_i32, %c0_i32_0 : i32, i32, i32
  }
  func.func @transform_2(%arg0: i32, %arg1: i32) -> (i32, i32, i32) {
    %c0_i32 = arith.constant 0 : i32
    %c0_i32_0 = arith.constant 0 : i32
    %c0_i32_1 = arith.constant 0 : i32
    return %arg1, %c0_i32, %c0_i32_0 : i32, i32, i32
  }
  func.func @transform_3(%arg0: i32, %arg1: i32) -> (i32, i32, i32) {
    %c0_i32 = arith.constant 0 : i32
    %c0_i32_0 = arith.constant 0 : i32
    %c0_i32_1 = arith.constant 0 : i32
    return %arg1, %c0_i32, %c0_i32_0 : i32, i32, i32
  }
  func.func @transform_4(%arg0: i32, %arg1: i32) -> (i32, i32, i32) {
    %c0_i32 = arith.constant 0 : i32
    %c0_i32_0 = arith.constant 0 : i32
    %c0_i32_1 = arith.constant 0 : i32
    return %arg1, %c0_i32, %c0_i32_0 : i32, i32, i32
  }
  func.func @transform_5(%arg0: i32, %arg1: i32) -> (i32, i32, i32) {
    %c0_i32 = arith.constant 0 : i32
    %c0_i32_0 = arith.constant 0 : i32
    %c0_i32_1 = arith.constant 0 : i32
    return %arg1, %c0_i32, %c0_i32_0 : i32, i32, i32
  }
  func.func @transform_6(%arg0: i32, %arg1: i32) -> (i32, i32, i32) {
    %c0_i32 = arith.constant 0 : i32
    %c0_i32_0 = arith.constant 0 : i32
    %c0_i32_1 = arith.constant 0 : i32
    return %arg1, %c0_i32, %c0_i32_0 : i32, i32, i32
  }
  func.func @transform_7(%arg0: i32, %arg1: i32) -> (i32, i32, i32) {
    %c0_i32 = arith.constant 0 : i32
    %c0_i32_0 = arith.constant 0 : i32
    %c0_i32_1 = arith.constant 0 : i32
    return %arg1, %c0_i32, %c0_i32_0 : i32, i32, i32
  }
  func.func @transform_8(%arg0: i32, %arg1: i32) -> (i32, i32, i32) {
    %c0_i32 = arith.constant 0 : i32
    %c0_i32_0 = arith.constant 0 : i32
    %c0_i32_1 = arith.constant 0 : i32
    return %arg1, %c0_i32, %c0_i32_0 : i32, i32, i32
  }
  func.func @transform_9(%arg0: i32, %arg1: i32) -> (i32, i32, i32) {
    %c0_i32 = arith.constant 0 : i32
    %c0_i32_0 = arith.constant 0 : i32
    %c0_i32_1 = arith.constant 0 : i32
    return %arg1, %c0_i32, %c0_i32_0 : i32, i32, i32
  }
  func.func @transform_10(%arg0: i32, %arg1: i32) -> (i32, i32, i32) {
    %c0_i32 = arith.constant 0 : i32
    %c0_i32_0 = arith.constant 0 : i32
    %c0_i32_1 = arith.constant 0 : i32
    return %arg1, %c0_i32, %c0_i32_0 : i32, i32, i32
  }
  func.func @transform_11(%arg0: i32, %arg1: i32) -> (i32, i32, i32) {
    %c0_i32 = arith.constant 0 : i32
    %c0_i32_0 = arith.constant 0 : i32
    %c0_i32_1 = arith.constant 0 : i32
    return %arg1, %c0_i32, %c0_i32_0 : i32, i32, i32
  }
  func.func @transform_12(%arg0: i32, %arg1: i32) -> (i32, i32) {
    %c0_i32 = arith.constant 0 : i32
    %c0_i32_0 = arith.constant 0 : i32
    %c0_i32_1 = arith.constant 0 : i32
    return %c0_i32, %c0_i32_0 : i32, i32
  }
  func.func @transform_13(%arg0: i32, %arg1: i32) -> (i32, i32) {
    %c0_i32 = arith.constant 0 : i32
    %c0_i32_0 = arith.constant 0 : i32
    %c0_i32_1 = arith.constant 0 : i32
    return %c0_i32, %c0_i32_0 : i32, i32
  }
  func.func @transform_14(%arg0: i32, %arg1: i32) -> (i32, i32) {
    %c0_i32 = arith.constant 0 : i32
    %c0_i32_0 = arith.constant 0 : i32
    %c0_i32_1 = arith.constant 0 : i32
    return %c0_i32, %c0_i32_0 : i32, i32
  }
  func.func @transform_15(%arg0: i32, %arg1: i32) -> (i32, i32) {
    %c0_i32 = arith.constant 0 : i32
    %c0_i32_0 = arith.constant 0 : i32
    %c0_i32_1 = arith.constant 0 : i32
    return %c0_i32, %c0_i32_0 : i32, i32
  }
  func.func @transform_16(%arg0: i32, %arg1: i32) -> (i32, i32) {
    %c0_i32 = arith.constant 0 : i32
    %c0_i32_0 = arith.constant 0 : i32
    return %arg0, %c0_i32 : i32, i32
  }
}

</mosaic_0001>

<bundles_post_ra>
// kernel: bigram_lm_forward.1
= control target key start
LH: loop header
LB: loop body
LE: loop exit
PB: predicated region body
PF: predicated region fallthrough
CT: control target
= control target key end

     0   :  { %s18964_s0 = inlined_call_operand.vmem [shape: f32[64,384], index: 0, kind: input, shape index: {}]   ;;  %s18965_s1 = inlined_call_operand.vmem [shape: f32[6,1,384], index: 1, kind: input, shape index: {}]   ;;  %s18966_s2 = inlined_call_operand.vmem [shape: f32[6,1,384], index: 2, kind: input, shape index: {}]   ;;  %s18967_s3 = inlined_call_operand.vmem [shape: bf16[6,384,1152], index: 3, kind: input, shape index: {}]   ;;  %s18968_s4 = inlined_call_operand.vmem [shape: bf16[6,384,384], index: 4, kind: input, shape index: {}]   ;;  %s18969_s5 = inlined_call_operand.vmem [shape: f32[6,1,384], index: 5, kind: input, shape index: {}]   ;;  %s18970_s6 = inlined_call_operand.vmem [shape: f32[6,1,384], index: 6, kind: input, shape index: {}]   ;;  %s18971_s7 = inlined_call_operand.vmem [shape: f32[6,1,384], index: 7, kind: input, shape index: {}]   ;;  %s18972_s8 = inlined_call_operand.vmem [shape: bf16[6,384,1536], index: 8, kind: input, shape index: {}]   ;;  %s18973_s9 = inlined_call_operand.vmem [shape: f32[6,1,1536], index: 9, kind: input, shape index: {}]   ;;  %s18974_s10 = inlined_call_operand.vmem [shape: bf16[6,1536,384], index: 10, kind: input, shape index: {}]   ;;  %s18975_s11 = inlined_call_operand.vmem [shape: f32[6,1,384], index: 11, kind: input, shape index: {}]   ;;  %s18976_s12 = inlined_call_operand.vmem [shape: f32[1,384], index: 12, kind: input, shape index: {}]   ;;  %s18977_s13 = inlined_call_operand.vmem [shape: f32[1,384], index: 13, kind: input, shape index: {}]   ;;  %s18978_s14 = inlined_call_operand.vmem [shape: bf16[384,128], index: 14, kind: input, shape index: {}]   ;;  %s18979_s15 = inlined_call_operand.vmem [shape: f32[1,128], index: 15, kind: input, shape index: {}]   ;;  %s18980_s16 = inlined_call_operand.hbm [shape: f32[64,128], index: 16, kind: output, shape index: {}]  }
   0x1   :  { %19023 = sst [smem:[#allocation44_spill]] %s18964_s0 }
   0x2   :  { %19024 = sst [smem:[#allocation45_spill]] %s18967_s3 }
   0x3   :  { %19025 = sst [smem:[#allocation46_spill]] %s18976_s12 }
   0x4   :  { %19026 = sst [smem:[#allocation47_spill]] %s18977_s13 }
   0x5   :  { %19027 = sst [smem:[#allocation48_spill]] %s18978_s14 }
   0x6   :  { %19028 = sst [smem:[#allocation49_spill]] %s18979_s15 }
   0x7   :  { %19029 = sst [smem:[#allocation50_spill]] %s18980_s16 }
   0x8   :  { %21 = vsyncpa [#allocation4], 0 }
   0x9   :  { %23 = vsyncpa [#allocation4 + $0x1], 0  ;;  %s15261_s21 = smov 0   ;;  %s15263_s22 = smov 0  }
   0xa   :  { %s15265_s23 = smov 0   ;;  %s15267_s24 = smov 0  }
   0xb   :  { %s15269_s25 = smov 0   ;;  %s15271_s26 = smov 0  }
   0xc   :  { %s15273_s27 = smov 0   ;;  %s15275_s28 = smov 0  }
   0xd LB: > { %19030 = sst [smem:[#allocation6_spill]] %s15142_s21  ;;  %s10337_s29 = sadd.s32 4294967295, %s15170_s28   ;;  %s15170_s28 = sphi %s15275_s28, %s29_s28   ;;  %s15166_s27 = sphi %s15273_s27, %s19138_s27   ;;  %s15162_s26 = sphi %s15271_s26, %s19137_s26   ;;  %s15158_s25 = sphi %s15269_s25, %s19136_s25   ;;  %s15154_s24 = sphi %s15267_s24, %s19135_s24   ;;  %s15150_s23 = sphi %s15265_s23, %s19134_s23   ;;  %s15146_s22 = sphi %s15263_s22, %s19133_s22   ;;  %s15142_s21 = sphi %s15261_s21, %s19132_s21  }
   0xe   : > { %19031 = sst [smem:[#allocation7_spill]] %s15146_s22  ;;  %s10338_s30 = sadd.s32 4294967294, %s15170_s28  }
   0xf   : > { %19032 = sst [smem:[#allocation8_spill]] %s15150_s23  ;;  %s38_s0 = sadd.s32 1, %s15162_s26 }
  0x10   : > { %19033 = sst [smem:[#allocation9_spill]] %s15154_s24  ;;  %p39_p0 = scmp.ge.s32.totalorder %s38_s0, 6 }
  0x11   : > { %19034 = sst [smem:[#allocation10_spill]] %s15158_s25  ;;  %s41_s17 = sadd.s32 1, %s15166_s27 }
  0x12   : > { %19035 = sst [smem:[#allocation11_spill]] %s15162_s26  ;;  %p454_p1 = scmp.ne.s32.totalorder %s15150_s23, %s15146_s22 }
  0x13   : > { %19036 = sst [smem:[#allocation12_spill]] %s15166_s27  ;;  %p455_p2 = scmp.eq.s32.totalorder %s10337_s29, 11 }
  0x14   : > { %19037 = sst [smem:[#allocation13_spill]] %s15170_s28  ;;  %s19140_s0 = smov (%p39_p0, %s38_s0), 0 }
  0x15   : > { %19038 = sst [smem:[#allocation14_spill]] %s19140_s0  ;;  %s19142_s17 = smov (!%p39_p0, %s41_s17), %s15166_s27 }
  0x16   : > { %p15310_p3 = por %p455_p2, %p454_p1  ;;  %p460_p4 = scmp.ne.s32.totalorder %s15146_s22, %s15142_s21 }
  0x17   : > { %p43_p5 = scmp.ge.s32.totalorder %s19142_s17, 2  ;;  %p461_p6 = scmp.eq.s32.totalorder %s10338_s30, 11 }
  0x18   : > { %s19039_s18 = scalar_select %p15310_p3, 1, 0 }
  0x19   : > { %p10341_p7 = scmp.ge.s32.totalorder %s15170_s28, 1  ;;  %p582_p8 = scmp.lt.s32.totalorder %s15170_s28, 13 }
  0x1a   : > { %19040 = sst [smem:[#allocation15_spill]] %s19039_s18  ;;  %s19144_s17 = smov (%p43_p5, %s19142_s17), 0 }
  0x1b   : > { %19041 = sst [smem:[#allocation16_spill]] %s19144_s17  ;;  %p15320_p9 = por %p461_p6, %p460_p4 }
  0x1c   : > { %p583_p10 = pnand %p10341_p7, %p582_p8  ;;  %s441_s20 = ssub.s32 %s15166_s27, %s19144_s17 }
  0x1d   : > { %s19042_s19 = scalar_select %p15320_p9, 1, 0 }
  0x1e   : > { %s444_s29 = sadd.s32 1, %s15150_s23  ;;  %p442_p11 = scmp.eq.s32.totalorder %s441_s20, 0 }
  0x1f   : > { %19043 = sst [smem:[#allocation17_spill]] %s19042_s19  ;;  %586 = sbr.rel (%p583_p10) target bundleno = 3180 (0xc6c), region = 84 }
  0x20   : > { %s15328_s0 = scalar_select %p442_p11, %s15150_s23, %s444_s29  }
  0x22   : > { %19044 = sst [smem:[#allocation18_spill]] %s15328_s0 }
  0x24   : > { %s18989_s30 = sand.u32 1, %s15146_s22   ;;  %s10343_s26 = sshll.u32 %s15158_s25, 2 }
  0x25   : > { %s10342_s21 = sshll.u32 %s18989_s30, 5  ;;  %p682_p12 = scmp.lt.s32.totalorder %s10343_s26, 7 }
  0x26   : > { %p688_p13 = scmp.lt.s32.totalorder %s15154_s24, 5  ;;  %s19045_s27 = sld [smem:[#allocation44_spill]] }
  0x27   : > { %s19146_s26 = smov (!%p682_p12, %s10343_s26), 7  ;;  %s19047_s3 = sld [smem:[#allocation45_spill]] }
  0x28   : > { %s689_s19 = scalar_select %p688_p13, %s15154_s24, 5 }
  0x29   : > { %s14829_s28 = smul.u32 24, %s19146_s26  ;;  %s15392_s26 = scalar_lea.vmem [#allocation3], %s10342_s21 }
  0x2a   : > { %s15336_s17 = smul.u32 3, %s689_s19  ;;  %s19048_s25 = sld [smem:[#allocation9_spill]] }
  0x2b   : > { %s14831_s23 = smul.u32 1728, %s689_s19 }
  0x2c   : > { %s15341_s0 = scalar_lea.vmem %s19045_s27, %s14829_s28  ;;  %s14832_s29 = smul.u32 576, %s689_s19 }
  0x2d   : > { %19046 = sst [smem:[#allocation19_spill]] %s15341_s0  ;;  %s15354_s20 = scalar_lea.vmem %s19047_s3, %s14831_s23 }
  0x2e   : > { %s15367_s18 = scalar_lea.vmem %s18968_s4, %s14832_s29  ;;  %s717_s13 = scalar_lea.vmem %s18971_s7, %s15336_s17 }
  0x2f   : > { %s14833_s15 = smul.u32 2304, %s689_s19  ;;  %s735_s3 = scalar_lea.vmem %s18975_s11, %s15336_s17 }
  0x30   : > { %s14834_s12 = smul.u32 12, %s689_s19  ;;  %p10349_p0 = scmp.ne.s32.totalorder %s19048_s25, 0 }
  0x31   : > { %s15380_s0 = scalar_lea.vmem %s18972_s8, %s14833_s15  ;;  %s15385_s29 = scalar_lea.vmem %s18974_s10, %s14833_s15 }
  0x32   : > { %s15390_s22 = scalar_lea.vmem %s18973_s9, %s14834_s12  ;;  %741 = sbr.rel (%p10349_p0) target bundleno = 70 (0x46), region = 88 }
  0x33   : > { %s19049_s19 = sld [smem:[#allocation19_spill]] (!%p10349_p0) }
  0x39   : > { %v742_v0 = vld [vmem:[%s19049_s19] sm:$0xff]  ;;  %v743_v1 = vld [vmem:[%s19049_s19 + $0x8] sm:$0xff]  ;;  %v744_v2 = vld [vmem:[%s19049_s19 + $0x10] sm:$0xff] }
  0x3a   : > { %754 = vst [vmem:[#allocation2 + $0x30] sm:$0xff] %v742_v0  ;;  %v745_v3 = vld [vmem:[%s19049_s19 + $0x18] sm:$0xff]  ;;  %v746_v4 = vld [vmem:[%s19049_s19 + $0x20] sm:$0xff]  ;;  %v747_v5 = vld [vmem:[%s19049_s19 + $0x28] sm:$0xff] }
  0x3b   : > { %755 = vst [vmem:[#allocation2] sm:$0xff] %v743_v1  ;;  %v748_v6 = vld [vmem:[%s19049_s19 + $0x30] sm:$0xff]  ;;  %v749_v7 = vld [vmem:[%s19049_s19 + $0x38] sm:$0xff]  ;;  %v750_v8 = vld [vmem:[%s19049_s19 + $0x40] sm:$0xff] }
  0x3c   : > { %756 = vst [vmem:[#allocation2 + $0x58] sm:$0xff] %v744_v2  ;;  %v751_v9 = vld [vmem:[%s19049_s19 + $0x48] sm:$0xff]  ;;  %v752_v10 = vld [vmem:[%s19049_s19 + $0x50] sm:$0xff]  ;;  %v753_v11 = vld [vmem:[%s19049_s19 + $0x58] sm:$0xff] }
  0x3d   : > { %757 = vst [vmem:[#allocation2 + $0x18] sm:$0xff] %v745_v3 }
  0x3e   : > { %758 = vst [vmem:[#allocation2 + $0x50] sm:$0xff] %v746_v4 }
  0x3f   : > { %759 = vst [vmem:[#allocation2 + $0x20] sm:$0xff] %v747_v5 }
  0x40   : > { %760 = vst [vmem:[#allocation2 + $0x8] sm:$0xff] %v748_v6 }
  0x41   : > { %761 = vst [vmem:[#allocation2 + $0x38] sm:$0xff] %v749_v7 }
  0x42   : > { %762 = vst [vmem:[#allocation2 + $0x28] sm:$0xff] %v750_v8 }
  0x43   : > { %763 = vst [vmem:[#allocation2 + $0x48] sm:$0xff] %v751_v9 }
  0x44   : > { %764 = vst [vmem:[#allocation2 + $0x10] sm:$0xff] %v752_v10 }
  0x45   : > { %765 = vst [vmem:[#allocation2 + $0x40] sm:$0xff] %v753_v11 }
  0x46 PF: > { %v1119_v16 = vld [vmem:[#allocation2 + $0x30] sm:$0xff]  ;;  %v1120_v17 = vld [vmem:[#allocation2] sm:$0xff]  ;;  %v1121_v18 = vld [vmem:[#allocation2 + $0x58] sm:$0xff]  ;;  %v15172_v32 = vmov 384.0   ;;  %s19051_s27 = scalar_lea.vmem %s18965_s1, %s15336_s17  ;;  %s19052_s12 = scalar_lea.vmem %s18966_s2, %s15336_s17  ;;  %vm2959_vm13 = vcmask 523264   ;;  %vm2995_vm15 = vcmask 261120  }
  0x47   : > { %v1125_v12 = vld [vmem:[#allocation2 + $0x8] sm:$0xff]  ;;  %v1131_v19 = vadd.f32 %v1120_v17, %v1119_v16  ;;  %v1122_v23 = vld [vmem:[#allocation2 + $0x18] sm:$0xff]  ;;  %v1123_v24 = vld [vmem:[#allocation2 + $0x50] sm:$0xff]  ;;  %14940 = vrcp.f32 %v15172_v32  ;;  %s19067_s28 = scalar_lea.vmem %s18969_s5, %s15336_s17  ;;  %s19078_s25 = scalar_lea.vmem %s18970_s6, %s15336_s17 }
  0x48   : > { %v1126_v13 = vld [vmem:[#allocation2 + $0x38] sm:$0xff]  ;;  %v1135_v28 = vadd.f32 %v1123_v24, %v1122_v23  ;;  %v1124_v29 = vld [vmem:[#allocation2 + $0x20] sm:$0xff]  ;;  %v11144_v32 = vld [vmem:[%s15354_s20 + $0x630] sm:$0xf] }
  0x49   : > { %v1127_v14 = vld [vmem:[#allocation2 + $0x28] sm:$0xff]  ;;  %v1139_v15 = vadd.f32 %v1126_v13, %v1125_v12  ;;  %v1132_v25 = vadd.f32 %v1131_v19, %v1121_v18  ;;  %v14071_v19 = vld [vmem:[%s15354_s20 + $0x458] sm:$0xf0] }
  0x4a   : > { %v1128_v20 = vld [vmem:[#allocation2 + $0x48] sm:$0xff]  ;;  %v1136_v31 = vadd.f32 %v1135_v28, %v1124_v29  ;;  %v13990_v28 = vld [vmem:[%s15354_s20 + $0x1d0] sm:$0xf0] }
  0x4b   : > { %v1129_v21 = vld [vmem:[#allocation2 + $0x10] sm:$0xff]  ;;  %v1140_v22 = vadd.f32 %v1139_v15, %v1127_v14  ;;  %1133 = vadd.xlane.f32.xlu0 %v1132_v25  ;;  %v10604_v15 = vld [vmem:[%s15354_s20 + $0x1f8] sm:$0xf]  ;;  %v10606_v25 = vld [vmem:[%s15354_s20 + $0x21c] sm:$0xf0] }
  0x4c   : > { %v1143_v26 = vadd.f32 %v1129_v21, %v1128_v20  ;;  %v1130_v27 = vld [vmem:[#allocation2 + $0x40] sm:$0xff] }
  0x4d   : > { %1141 = vadd.xlane.f32.xlu1 %v1140_v22  ;;  %v14941_v33 = vpop.eup %14940 }
  0x4e   : > { %v1144_v30 = vadd.f32 %v1143_v26, %v1130_v27  ;;  %v1148_v34 = vmul.f32 384.0, %v14941_v33  ;;  %vm1152_vm0 = vweird.f32 %v14941_v33 }
  0x50   : > { %v1149_v35 = vsub.f32 1.0, %v1148_v34 }
  0x52   : > { %v1150_v36 = vmul.f32 %v14941_v33, %v1149_v35 }
  0x53   : > { %1137 = vadd.xlane.f32.xlu0 %v1136_v31  ;;  %v14062_v31 = vld [vmem:[%s15354_s20 + $0x410] sm:$0xf0] }
  0x54   : > { %v1151_v37 = vadd.f32 %v14941_v33, %v1150_v36  ;;  %v13986_v36 = vld [vmem:[%s15354_s20 + $0x1b4] sm:$0xf] }
  0x55   : > { %1145 = vadd.xlane.f32.xlu1 %v1144_v30 }
  0x56   : > { %v15407_v38 = vsel %vm1152_vm0, %v14941_v33, %v1151_v37  ;;  %v14134_v33 = vld [vmem:[%s15354_s20 + $0x650] sm:$0xf0]  ;;  %v10570_v37 = vld [vmem:[%s15354_s20 + $0x1d4] sm:$0xf0] }
  0x57   : > { %19050 = vst [vmem:[#allocation20_spill] sm:$0xff] %v15407_v38  ;;  %v11145_v35 = vor.u32 %v14134_v33, %v11144_v32  ;;  %v13950_v33 = vld [vmem:[%s15354_s20 + $0x94] sm:$0xf] }
  0xbe   : > { %v1134_v41 = vpop.xlane.xlu0 %1133 }
  0xbf   : > { %v1154_v42 = vmul.f32 %v15407_v38, %v1134_v41  ;;  %v13981_v41 = vld [vmem:[%s15354_s20 + $0x188] sm:$0xf0] }
  0xc0   : > { %v1142_v39 = vpop.xlane.xlu1 %1141 }
  0xc1   : > { %v1156_v40 = vmul.f32 %v15407_v38, %v1142_v39  ;;  %v15417_v46 = vsub.f32 %v1119_v16, %v1154_v42  ;;  %v15419_v47 = vsub.f32 %v1120_v17, %v1154_v42  ;;  %v15421_v48 = vsub.f32 %v1121_v18, %v1154_v42  ;;  %v13999_v16 = vld [vmem:[%s15354_s20 + $0x218] sm:$0xf0]  ;;  %v10892_v17 = vld [vmem:[%s15354_s20 + $0x438] sm:$0xf]  ;;  %v10820_v42 = vld [vmem:[%s15354_s20 + $0x3a8] sm:$0xf] }
  0xc2   : > { %v10605_v18 = vor.u32 %v13999_v16, %v10604_v15  ;;  %v10893_v22 = vor.u32 %v14071_v19, %v10892_v17  ;;  %v10573_v39 = vor.u32 %v13986_v36, %v10570_v37  ;;  %v14035_v15 = vld [vmem:[%s15354_s20 + $0x338] sm:$0xf0]  ;;  %v11036_v17 = vld [vmem:[%s15354_s20 + $0x558] sm:$0xf]  ;;  %v10388_v37 = vld [vmem:[%s15354_s20 + $0x48] sm:$0xf] }
  0xc3   : > { %v15411_v43 = vsub.f32 %v1125_v12, %v1156_v40  ;;  %v15413_v44 = vsub.f32 %v1126_v13, %v1156_v40  ;;  %v15415_v45 = vsub.f32 %v1127_v14, %v1156_v40  ;;  %v1170_v52 = vmul.f32 %v15417_v46, %v15417_v46  ;;  %v10532_v40 = vld [vmem:[%s15354_s20 + $0x168] sm:$0xf]  ;;  %v14107_v19 = vld [vmem:[%s15354_s20 + $0x578] sm:$0xf0] }
  0xc4   : > { %v1171_v53 = vmul.f32 %v15419_v47, %v15419_v47  ;;  %v1172_v56 = vmul.f32 %v15421_v48, %v15421_v48  ;;  %2406 = vmatpush.bf16.msra.mxu0 %v10605_v18  ;;  %2425 = vmatpush.bf16.msra.mxu1 %v10893_v22  ;;  %v11037_v22 = vor.u32 %v14107_v19, %v11036_v17  ;;  %v10894_v19 = vld [vmem:[%s15354_s20 + $0x45c] sm:$0xf0] }
  0xc5   : > { %v1176_v49 = vmul.f32 %v15411_v43, %v15411_v43  ;;  %v1177_v50 = vmul.f32 %v15413_v44, %v15413_v44  ;;  %v1178_v51 = vmul.f32 %v15415_v45, %v15415_v45 }
  0xc6   : > { %v1182_v57 = vadd.f32 %v1171_v53, %v1170_v52  ;;  %v1138_v59 = vpop.xlane.xlu0 %1137  ;;  %v14125_v52 = vld [vmem:[%s15354_s20 + $0x608] sm:$0xf0] }
  0xc7   : > { %v1190_v54 = vadd.f32 %v1177_v50, %v1176_v49  ;;  %v1155_v61 = vmul.f32 %v15407_v38, %v1138_v59  ;;  %v10533_v49 = vor.u32 %v13981_v41, %v10532_v40  ;;  %v14053_v50 = vld [vmem:[%s15354_s20 + $0x3c8] sm:$0xf0]  ;;  %v13972_v59 = vld [vmem:[%s15354_s20 + $0x140] sm:$0xf0]  ;;  %v10676_v40 = vld [vmem:[%s15354_s20 + $0x288] sm:$0xf] }
  0xc8   : > { %v1146_v55 = vpop.xlane.xlu1 %1145  ;;  %v1183_v62 = vadd.f32 %v1182_v57, %v1172_v56  ;;  %v10821_v53 = vor.u32 %v14053_v50, %v10820_v42  ;;  %v10534_v56 = vld [vmem:[%s15354_s20 + $0x18c] sm:$0xf0]  ;;  %v14017_v50 = vld [vmem:[%s15354_s20 + $0x2a8] sm:$0xf0] }
  0xc9   : > { %v1157_v58 = vmul.f32 %v15407_v38, %v1146_v55  ;;  %v1191_v60 = vadd.f32 %v1190_v54, %v1178_v51  ;;  %v15443_v2 = vsub.f32 %v1122_v23, %v1155_v61  ;;  %v15445_v3 = vsub.f32 %v1123_v24, %v1155_v61  ;;  %v13995_v24 = vld [vmem:[%s15354_s20 + $0x1fc] sm:$0xf]  ;;  %v11108_v51 = vld [vmem:[%s15354_s20 + $0x5e8] sm:$0xf]  ;;  %v13977_v55 = vld [vmem:[%s15354_s20 + $0x16c] sm:$0xf] }
  0xca   : > { %v15447_v4 = vsub.f32 %v1124_v29, %v1155_v61  ;;  %1184 = vadd.xlane.f32.xlu2 %v1183_v62  ;;  %v10609_v26 = vor.u32 %v13995_v24, %v10606_v25  ;;  %v10856_v29 = vld [vmem:[%s15354_s20 + $0x3f0] sm:$0xf]  ;;  %v11109_v54 = vor.u32 %v14125_v52, %v11108_v51  ;;  %v10537_v57 = vor.u32 %v13977_v55, %v10534_v56  ;;  %v14044_v62 = vld [vmem:[%s15354_s20 + $0x380] sm:$0xf0]  ;;  %v13954_v25 = vld [vmem:[%s15354_s20 + $0xb0] sm:$0xf0] }
  0xcb   : > { %v15437_v63 = vsub.f32 %v1128_v20, %v1157_v58  ;;  %v15439_v0 = vsub.f32 %v1129_v21, %v1157_v58  ;;  %v15441_v1 = vsub.f32 %v1130_v27, %v1157_v58  ;;  %1192 = vadd.xlane.f32.xlu0 %v1191_v60  ;;  %v1173_v8 = vmul.f32 %v15443_v2, %v15443_v2  ;;  %v11180_v20 = vld [vmem:[%s15354_s20 + $0x678] sm:$0xf]  ;;  %v14143_v21 = vld [vmem:[%s15354_s20 + $0x698] sm:$0xf0]  ;;  %v10568_v27 = vld [vmem:[%s15354_s20 + $0x1b0] sm:$0xf] }
  0xcc   : > { %v1174_v9 = vmul.f32 %v15445_v3, %v15445_v3  ;;  %v1175_v11 = vmul.f32 %v15447_v4, %v15447_v4  ;;  %v11181_v23 = vor.u32 %v14143_v21, %v11180_v20  ;;  %2463 = vmatpush.bf16.msra.mxu3 %v10609_v26  ;;  %v10569_v30 = vor.u32 %v13990_v28, %v10568_v27  ;;  %v10496_v58 = vld [vmem:[%s15354_s20 + $0x120] sm:$0xf]  ;;  %v13959_v20 = vld [vmem:[%s15354_s20 + $0xdc] sm:$0xf]  ;;  %v10424_v24 = vld [vmem:[%s15354_s20 + $0x90] sm:$0xf] }
  0xcd   : > { %v1179_v5 = vmul.f32 %v15437_v63, %v15437_v63  ;;  %v1180_v6 = vmul.f32 %v15439_v0, %v15439_v0  ;;  %v1181_v7 = vmul.f32 %v15441_v1, %v15441_v1  ;;  %v10857_v34 = vor.u32 %v14062_v31, %v10856_v29  ;;  %v10784_v60 = vld [vmem:[%s15354_s20 + $0x360] sm:$0xf]  ;;  %v10712_v26 = vld [vmem:[%s15354_s20 + $0x2d0] sm:$0xf]  ;;  %v14026_v28 = vld [vmem:[%s15354_s20 + $0x2f0] sm:$0xf0] }
  0xce   : > { %v1186_v12 = vadd.f32 %v1174_v9, %v1173_v8  ;;  %2444 = vmatpush.bf16.msra.mxu2 %v11181_v23  ;;  %2407 = vmatpush.bf16.msra.mxu0 %v10569_v30  ;;  %v10497_v61 = vor.u32 %v13972_v59, %v10496_v58  ;;  %v13968_v9 = vld [vmem:[%s15354_s20 + $0x124] sm:$0xf]  ;;  %v10462_v21 = vld [vmem:[%s15354_s20 + $0xfc] sm:$0xf0]  ;;  %v10425_v27 = vor.u32 %v13954_v25, %v10424_v24  ;;  %v11000_v29 = vld [vmem:[%s15354_s20 + $0x510] sm:$0xf] }
  0xcf   : > { %v1194_v10 = vadd.f32 %v1180_v6, %v1179_v5  ;;  %2426 = vmatpush.bf16.msra.mxu1 %v10857_v34  ;;  %v11072_v5 = vld [vmem:[%s15354_s20 + $0x5a0] sm:$0xf]  ;;  %v14116_v6 = vld [vmem:[%s15354_s20 + $0x5c0] sm:$0xf0]  ;;  %v10465_v23 = vor.u32 %v13959_v20, %v10462_v21  ;;  %v14098_v30 = vld [vmem:[%s15354_s20 + $0x530] sm:$0xf0]  ;;  %v10713_v31 = vor.u32 %v14026_v28, %v10712_v26 }
  0xd0   : > { %v1187_v14 = vadd.f32 %v1186_v12, %v1175_v11  ;;  %2464 = vmatpush.bf16.msra.mxu3 %v10573_v39  ;;  %v11073_v8 = vor.u32 %v14116_v6, %v11072_v5  ;;  %v10460_v12 = vld [vmem:[%s15354_s20 + $0xd8] sm:$0xf]  ;;  %v11001_v32 = vor.u32 %v14098_v30, %v11000_v29  ;;  %v13945_v39 = vld [vmem:[%s15354_s20 + $0x68] sm:$0xf0]  ;;  %v10964_v51 = vld [vmem:[%s15354_s20 + $0x4c8] sm:$0xf] }
  0xd1   : > { %v1195_v13 = vadd.f32 %v1194_v10, %v1181_v7  ;;  %v10785_v7 = vor.u32 %v14044_v62, %v10784_v60  ;;  %v10498_v10 = vld [vmem:[%s15354_s20 + $0x144] sm:$0xf0]  ;;  %v10426_v34 = vld [vmem:[%s15354_s20 + $0xb4] sm:$0xf0]  ;;  %v14089_v52 = vld [vmem:[%s15354_s20 + $0x4e8] sm:$0xf0] }
  0xd2   : > { %1188 = vadd.xlane.f32.xlu2 %v1187_v14  ;;  %2445 = vmatpush.bf16.msra.mxu2 %v11145_v35  ;;  %v10501_v11 = vor.u32 %v13968_v9, %v10498_v10  ;;  %v10748_v14 = vld [vmem:[%s15354_s20 + $0x318] sm:$0xf]  ;;  %v10429_v35 = vor.u32 %v13950_v33, %v10426_v34  ;;  %v10965_v55 = vor.u32 %v14089_v52, %v10964_v51  ;;  %v13941_v56 = vld [vmem:[%s15354_s20 + $0x4c] sm:$0xf]  ;;  %v13936_v62 = vld [vmem:[%s15354_s20 + $0x20] sm:$0xf0] }
  0xd3   : > { %1196 = vadd.xlane.f32.xlu1 %v1195_v13  ;;  %2408 = vmatpush.bf16.msra.mxu0 %v10533_v49  ;;  %v13963_v13 = vld [vmem:[%s15354_s20 + $0xf8] sm:$0xf0]  ;;  %v10749_v18 = vor.u32 %v14035_v15, %v10748_v14  ;;  %v10389_v49 = vor.u32 %v13945_v39, %v10388_v37  ;;  %v10640_v6 = vld [vmem:[%s15354_s20 + $0x240] sm:$0xf]  ;;  %v14080_v10 = vld [vmem:[%s15354_s20 + $0x4a0] sm:$0xf0] }
  0xd4   : > { %2427 = vmatpush.bf16.msra.mxu1 %v10821_v53  ;;  %2465 = vmatpush.bf16.msra.mxu3 %v10537_v57  ;;  %v10461_v16 = vor.u32 %v13963_v13, %v10460_v12  ;;  %v10390_v57 = vld [vmem:[%s15354_s20 + $0x6c] sm:$0xf0]  ;;  %v10354_v12 = vld [vmem:[%s15354_s20 + $0x24] sm:$0xf0]  ;;  %v14139_v20 = vld [vmem:[%s15354_s20 + $0x67c] sm:$0xf] }
  0xd5   : > { %v10393_v59 = vor.u32 %v13941_v56, %v10390_v57  ;;  %v10612_v24 = vld [vmem:[%s15354_s20 + $0x200] sm:$0xf]  ;;  %v14000_v25 = vld [vmem:[%s15354_s20 + $0x220] sm:$0xf0]  ;;  %v14058_v34 = vld [vmem:[%s15354_s20 + $0x3f4] sm:$0xf] }
  0xd6   : > { %2446 = vmatpush.bf16.msra.mxu2 %v11109_v54  ;;  %v10677_v54 = vor.u32 %v14017_v50, %v10676_v40  ;;  %v10613_v28 = vor.u32 %v14000_v25, %v10612_v24  ;;  %v10900_v29 = vld [vmem:[%s15354_s20 + $0x440] sm:$0xf]  ;;  %v14072_v30 = vld [vmem:[%s15354_s20 + $0x460] sm:$0xf0]  ;;  %v14130_v39 = vld [vmem:[%s15354_s20 + $0x634] sm:$0xf] }
  0xd7   : > { %2409 = vmatpush.bf16.msra.mxu0 %v10497_v61  ;;  %v10352_v61 = vld [vmem:[%s15354_s20] sm:$0xf]  ;;  %v10901_v33 = vor.u32 %v14072_v30, %v10900_v29  ;;  %v11146_v40 = vld [vmem:[%s15354_s20 + $0x654] sm:$0xf0]  ;;  %v10504_v29 = vld [vmem:[%s15354_s20 + $0x128] sm:$0xf] }
  0xd8   : > { %2428 = vmatpush.bf16.msra.mxu1 %v10785_v7  ;;  %2466 = vmatpush.bf16.msra.mxu3 %v10501_v11  ;;  %v10353_v5 = vor.u32 %v13936_v62, %v10352_v61  ;;  %v14008_v7 = vld [vmem:[%s15354_s20 + $0x260] sm:$0xf0]  ;;  %v11149_v51 = vor.u32 %v14130_v39, %v11146_v40  ;;  %v14121_v61 = vld [vmem:[%s15354_s20 + $0x5ec] sm:$0xf]  ;;  %v778_v24 = vld [vmem:[%s19052_s12] sm:$0x7] }
  0xd9   : > { %v10641_v9 = vor.u32 %v14008_v7, %v10640_v6  ;;  %v13932_v11 = vld [vmem:[%s15354_s20 + $0x4] sm:$0xf]  ;;  %v11110_v6 = vld [vmem:[%s15354_s20 + $0x60c] sm:$0xf0]  ;;  %v13973_v30 = vld [vmem:[%s15354_s20 + $0x148] sm:$0xf0] }
  0xda   : > { %2447 = vmatpush.bf16.msra.mxu2 %v11073_v8  ;;  %v10928_v8 = vld [vmem:[%s15354_s20 + $0x480] sm:$0xf]  ;;  %v10357_v14 = vor.u32 %v13932_v11, %v10354_v12  ;;  %v10540_v7 = vld [vmem:[%s15354_s20 + $0x170] sm:$0xf] }
  0xdb   : > { %2410 = vmatpush.bf16.msra.mxu0 %v10461_v16  ;;  %v10929_v13 = vor.u32 %v14080_v10, %v10928_v8  ;;  %v777_v8 = vld [vmem:[%s19051_s27] sm:$0x7]  ;;  %v13982_v10 = vld [vmem:[%s15354_s20 + $0x190] sm:$0xf0]  ;;  %v10828_v11 = vld [vmem:[%s15354_s20 + $0x3b0] sm:$0xf] }
  0xdc   : > { %2429 = vmatpush.bf16.msra.mxu1 %v10749_v18  ;;  %2467 = vmatpush.bf16.msra.mxu3 %v10465_v23  ;;  %v14067_v18 = vld [vmem:[%s15354_s20 + $0x43c] sm:$0xf]  ;;  %v11182_v23 = vld [vmem:[%s15354_s20 + $0x69c] sm:$0xf0]  ;;  %v15607_v40 = vperm.slane %v777_v8, 2 }
  0xde   : > { %2448 = vmatpush.bf16.msra.mxu2 %v11037_v22  ;;  %v10897_v22 = vor.u32 %v14067_v18, %v10894_v19 }
  0xdf   : > { %2411 = vmatpush.bf16.msra.mxu0 %v10425_v27  ;;  %v11185_v27 = vor.u32 %v14139_v20, %v11182_v23  ;;  %v11074_v23 = vld [vmem:[%s15354_s20 + $0x5c4] sm:$0xf0] }
  0xe0   : > { %2430 = vmatpush.bf16.msra.mxu1 %v10713_v31  ;;  %2468 = vmatpush.bf16.msra.mxu3 %v10429_v35  ;;  %v10858_v35 = vld [vmem:[%s15354_s20 + $0x414] sm:$0xf0] }
  0xe2   : > { %2449 = vmatpush.bf16.msra.mxu2 %v11001_v32 }
  0xe3   : > { %2412 = vmatpush.bf16.msra.mxu0 %v10389_v49  ;;  %v13991_v49 = vld [vmem:[%s15354_s20 + $0x1d8] sm:$0xf0] }
  0xe4   : > { %2431 = vmatpush.bf16.msra.mxu1 %v10677_v54  ;;  %2469 = vmatpush.bf16.msra.mxu3 %v10393_v59  ;;  %v14063_v54 = vld [vmem:[%s15354_s20 + $0x418] sm:$0xf0]  ;;  %v10822_v59 = vld [vmem:[%s15354_s20 + $0x3cc] sm:$0xf0] }
  0xe6   : > { %2450 = vmatpush.bf16.msra.mxu2 %v10965_v55  ;;  %v14049_v55 = vld [vmem:[%s15354_s20 + $0x3ac] sm:$0xf] }
  0xe7   : > { %2413 = vmatpush.bf16.msra.mxu0 %v10353_v5  ;;  %v10825_v5 = vor.u32 %v14049_v55, %v10822_v59  ;;  %v14103_v55 = vld [vmem:[%s15354_s20 + $0x55c] sm:$0xf] }
  0xe8   : > { %2432 = vmatpush.bf16.msra.mxu1 %v10641_v9  ;;  %2470 = vmatpush.bf16.msra.mxu3 %v10357_v14  ;;  %v11113_v9 = vor.u32 %v14121_v61, %v11110_v6  ;;  %v10541_v14 = vor.u32 %v13982_v10, %v10540_v7  ;;  %v14036_v7 = vld [vmem:[%s15354_s20 + $0x340] sm:$0xf0] }
  0xea   : > { %2451 = vmatpush.bf16.msra.mxu2 %v10929_v13 }
  0xeb   : > { %2482 = vmatpush.bf16.msrb.mxu0 %v10897_v22  ;;  %v14112_v22 = vld [vmem:[%s15354_s20 + $0x5a4] sm:$0xf] }
  0xec   : > { %2501 = vmatpush.bf16.msrb.mxu1 %v11185_v27  ;;  %2539 = vmatpush.bf16.msrb.mxu3 %v10901_v33  ;;  %v11077_v33 = vor.u32 %v14112_v22, %v11074_v23  ;;  %v10720_v23 = vld [vmem:[%s15354_s20 + $0x2d8] sm:$0xf] }
  0xee   : > { %2520 = vmatpush.bf16.msrb.mxu2 %v10613_v28 }
  0xf0   : > { %2502 = vmatpush.bf16.msrb.mxu1 %v11149_v51 }
  0xf4   : > { %2503 = vmatpush.bf16.msrb.mxu1 %v11113_v9  ;;  %v10714_v9 = vld [vmem:[%s15354_s20 + $0x2f4] sm:$0xf0] }
  0xf8   : > { %2504 = vmatpush.bf16.msrb.mxu1 %v11077_v33  ;;  %v14085_v33 = vld [vmem:[%s15354_s20 + $0x4cc] sm:$0xf] }
 0x13d   : > { %v1185_v41 = vpop.xlane.xlu2 %1184 }
 0x13e   : > { %v1193_v36 = vpop.xlane.xlu0 %1192  ;;  %v1198_v53 = vmul.f32 %v1185_v41, %v15407_v38  ;;  %v10861_v41 = vor.u32 %v14058_v34, %v10858_v35  ;;  %v10505_v34 = vor.u32 %v13973_v30, %v10504_v29  ;;  %v15602_v35 = vperm.slane %v777_v8, 0  ;;  %v10678_v30 = vld [vmem:[%s15354_s20 + $0x2ac] sm:$0xf0] }
 0x13f   : > { %v1200_v42 = vmul.f32 %v1193_v36, %v15407_v38 }
 0x140   : > { %v15521_v60 = vadd.f32 1e-05, %v1198_v53  ;;  %v10864_v53 = vld [vmem:[%s15354_s20 + $0x3f8] sm:$0xf]  ;;  %2483 = vmatpush.bf16.msrb.mxu0 %v10861_v41  ;;  %v15609_v41 = vperm.slane %v778_v24, 0 }
 0x141   : > { %v15519_v58 = vadd.f32 1e-05, %v1200_v42  ;;  %v10576_v42 = vld [vmem:[%s15354_s20 + $0x1b8] sm:$0xf]  ;;  %v10865_v57 = vor.u32 %v14063_v54, %v10864_v53  ;;  %v14031_v53 = vld [vmem:[%s15354_s20 + $0x31c] sm:$0xf] }
 0x142   : > { %14942 = vrsqrt.f32 %v15521_v60  ;;  %v10577_v52 = vor.u32 %v13991_v49, %v10576_v42  ;;  %vm1212_vm2 = vweird.f32 %v15521_v60  ;;  %v15611_v42 = vperm.slane %v778_v24, 1  ;;  %v10750_v54 = vld [vmem:[%s15354_s20 + $0x33c] sm:$0xf0] }
 0x143   : > { %14944 = vrsqrt.f32 %v15519_v58  ;;  %2540 = vmatpush.bf16.msrb.mxu3 %v10865_v57  ;;  %v10468_v57 = vld [vmem:[%s15354_s20 + $0xe0] sm:$0xf]  ;;  %vm1232_vm7 = vweird.f32 %v15519_v58 }
 0x144   : > { %2521 = vmatpush.bf16.msrb.mxu2 %v10577_v52  ;;  %2484 = vmatpush.bf16.msrb.mxu0 %v10825_v5  ;;  %v14045_v52 = vld [vmem:[%s15354_s20 + $0x388] sm:$0xf0] }
 0x145   : > { %v1189_v17 = vpop.xlane.xlu2 %1188 }
 0x146   : > { %v1197_v15 = vpop.xlane.xlu1 %1196  ;;  %v1199_v21 = vmul.f32 %v1189_v17, %v15407_v38 }
 0x147   : > { %v1201_v16 = vmul.f32 %v1197_v15, %v15407_v38  ;;  %v14054_v15 = vld [vmem:[%s15354_s20 + $0x3d0] sm:$0xf0] }
 0x148   : > { %v15545_v31 = vpop.eup %14942  ;;  %v15547_v32 = vadd.f32 1e-05, %v1199_v21  ;;  %v10829_v20 = vor.u32 %v14054_v15, %v10828_v11  ;;  %v10786_v21 = vld [vmem:[%s15354_s20 + $0x384] sm:$0xf0]  ;;  %2522 = vmatpush.bf16.msrb.mxu2 %v10541_v14  ;;  %v14094_v15 = vld [vmem:[%s15354_s20 + $0x514] sm:$0xf] }
 0x149   : > { %v15541_v26 = vadd.f32 1e-05, %v1201_v16  ;;  %v15551_v36 = vpop.eup %14944  ;;  %v1207_v37 = vmul.f32 %v15545_v31, %v15521_v60  ;;  %v14040_v16 = vld [vmem:[%s15354_s20 + $0x364] sm:$0xf]  ;;  %vm1213_vm1 = vweird.f32 %v15545_v31  ;;  %v10792_v60 = vld [vmem:[%s15354_s20 + $0x368] sm:$0xf] }
 0x14a   : > { %v1227_v56 = vmul.f32 %v15551_v36, %v15519_v58  ;;  %v10789_v28 = vor.u32 %v14040_v16, %v10786_v21  ;;  %2541 = vmatpush.bf16.msrb.mxu3 %v10829_v20  ;;  %vm1214_vm3 = vmor %vm1212_vm2, %vm1213_vm1  ;;  %vm1222_vm5 = vweird.f32 %v15547_v32  ;;  %v10793_v11 = vor.u32 %v14045_v52, %v10792_v60  ;;  %v11002_v16 = vld [vmem:[%s15354_s20 + $0x534] sm:$0xf0]  ;;  %v13955_v21 = vld [vmem:[%s15354_s20 + $0xb8] sm:$0xf0] }
 0x14b   : > { %14946 = vrsqrt.f32 %v15541_v26  ;;  %v1208_v50 = vmul.f32 %v15545_v31, %v1207_v37  ;;  %v15604_v37 = vperm.slane %v777_v8, 1  ;;  %v14022_v8 = vld [vmem:[%s15354_s20 + $0x2d4] sm:$0xf]  ;;  %v10432_v20 = vld [vmem:[%s15354_s20 + $0x98] sm:$0xf]  ;;  %vm1242_vm8 = vweird.f32 %v15541_v26 }
 0x14c   : > { %14948 = vrsqrt.f32 %v15547_v32  ;;  %v1228_v18 = vmul.f32 %v15551_v36, %v1227_v56  ;;  %2485 = vmatpush.bf16.msrb.mxu0 %v10789_v28  ;;  %2523 = vmatpush.bf16.msrb.mxu2 %v10505_v34  ;;  %v11038_v56 = vld [vmem:[%s15354_s20 + $0x57c] sm:$0xf0]  ;;  %v10717_v28 = vor.u32 %v14022_v8, %v10714_v9  ;;  %v11005_v29 = vor.u32 %v14094_v15, %v11002_v16  ;;  %v10966_v34 = vld [vmem:[%s15354_s20 + $0x4ec] sm:$0xf0]  ;;  %v10648_v58 = vld [vmem:[%s15354_s20 + $0x248] sm:$0xf] }
 0x14d   : > { %v1209_v62 = vmul.f32 0.5, %v1208_v50  ;;  %v11041_v14 = vor.u32 %v14103_v55, %v11038_v56  ;;  %v10396_v55 = vld [vmem:[%s15354_s20 + $0x50] sm:$0xf]  ;;  %v13946_v56 = vld [vmem:[%s15354_s20 + $0x70] sm:$0xf0]  ;;  %vm1233_vm10 = vweird.f32 %v15551_v36 }
 0x14e   : > { %v15613_v49 = vmul.f32 0.5, %v1228_v18  ;;  %v15638_v18 = vperm.slane %v778_v24, 2  ;;  %2542 = vmatpush.bf16.msrb.mxu3 %v10793_v11  ;;  %v14027_v24 = vld [vmem:[%s15354_s20 + $0x2f8] sm:$0xf0]  ;;  %v10397_v11 = vor.u32 %v13946_v56, %v10396_v55  ;;  %vm15703_vm12 = vmor %vm1232_vm7, %vm1233_vm10 }
 0x14f   : > { %v1210_v13 = vsub.f32 1.5, %v1209_v62  ;;  %v10756_v62 = vld [vmem:[%s15354_s20 + $0x320] sm:$0xf]  ;;  %2505 = vmatpush.bf16.msrb.mxu1 %v11041_v14 }
 0x150   : > { %v10757_v22 = vor.u32 %v14036_v7, %v10756_v62  ;;  %v14018_v62 = vld [vmem:[%s15354_s20 + $0x2b0] sm:$0xf0] }
 0x151   : > { %v15578_v12 = vpop.eup %14946  ;;  %v1211_v25 = vmul.f32 %v15545_v31, %v1210_v13  ;;  %v10753_v13 = vor.u32 %v14031_v53, %v10750_v54 }
 0x152   : > { %v15582_v17 = vpop.eup %14948  ;;  %v1237_v19 = vmul.f32 %v15578_v12, %v15541_v26  ;;  %vm1243_vm9 = vweird.f32 %v15578_v12  ;;  %2543 = vmatpush.bf16.msrb.mxu3 %v10757_v22  ;;  %v13937_v26 = vld [vmem:[%s15354_s20 + $0x28] sm:$0xf0] }
 0x153   : > { %v1217_v27 = vmul.f32 %v15582_v17, %v15547_v32  ;;  %v1215_v50 = vsel %vm1214_vm3, %v15545_v31, %v1211_v25  ;;  %vm1223_vm4 = vweird.f32 %v15582_v17  ;;  %v13964_v31 = vld [vmem:[%s15354_s20 + $0x100] sm:$0xf0]  ;;  %v14013_v25 = vld [vmem:[%s15354_s20 + $0x28c] sm:$0xf]  ;;  %2486 = vmatpush.bf16.msrb.mxu0 %v10753_v13  ;;  %2506 = vmatpush.bf16.msrb.mxu1 %v11005_v29  ;;  %vm15687_vm11 = vmor %vm1242_vm8, %vm1243_vm9 }
 0x154   : > { %v1238_v39 = vmul.f32 %v15578_v12, %v1237_v19  ;;  %v1246_v5 = vmul.f32 %v1215_v50, %v15417_v46  ;;  %v1247_v6 = vmul.f32 %v1215_v50, %v15419_v47  ;;  %v1248_v46 = vmul.f32 %v1215_v50, %v15421_v48  ;;  %vm15643_vm6 = vmor %vm1222_vm5, %vm1223_vm4  ;;  %v14076_v13 = vld [vmem:[%s15354_s20 + $0x484] sm:$0xf]  ;;  %v10360_v32 = vld [vmem:[%s15354_s20 + $0x8] sm:$0xf] }
 0x155   : > { %v1218_v51 = vmul.f32 %v15582_v17, %v1217_v27  ;;  %v1230_v47 = vsub.f32 1.5, %v15613_v49  ;;  %v10469_v19 = vor.u32 %v13964_v31, %v10468_v57  ;;  %v10433_v50 = vor.u32 %v13955_v21, %v10432_v20  ;;  %v10684_v31 = vld [vmem:[%s15354_s20 + $0x290] sm:$0xf]  ;;  %v11188_v29 = vld [vmem:[%s15354_s20 + $0x680] sm:$0xf] }
 0x156   : > { %v15624_v59 = vmul.f32 0.5, %v1238_v39  ;;  %v1265_v27 = vmul.f32 %v15602_v35, %v1246_v5  ;;  %v1266_v39 = vmul.f32 %v15604_v37, %v1247_v6  ;;  %v14004_v5 = vld [vmem:[%s15354_s20 + $0x244] sm:$0xf]  ;;  %v10642_v6 = vld [vmem:[%s15354_s20 + $0x264] sm:$0xf0]  ;;  %v10685_v20 = vor.u32 %v14018_v62, %v10684_v31 }
 0x157   : > { %v1219_v61 = vmul.f32 0.5, %v1218_v51  ;;  %2524 = vmatpush.bf16.msrb.mxu2 %v10469_v19  ;;  %v1267_v51 = vmul.f32 %v15607_v40, %v1248_v46  ;;  %v1231_v57 = vmul.f32 %v15551_v36, %v1230_v47  ;;  %2487 = vmatpush.bf16.msrb.mxu0 %v10717_v28  ;;  %v10930_v47 = vld [vmem:[%s15354_s20 + $0x4a4] sm:$0xf0]  ;;  %v10645_v21 = vor.u32 %v14004_v5, %v10642_v6  ;;  %v14131_v5 = vld [vmem:[%s15354_s20 + $0x63c] sm:$0xf] }
 0x158   : > { %v1240_v49 = vsub.f32 1.5, %v15624_v59  ;;  %v10721_v59 = vor.u32 %v14027_v24, %v10720_v23  ;;  %v1284_v7 = vadd.f32 %v15609_v41, %v1265_v27  ;;  %v1285_v8 = vadd.f32 %v15611_v42, %v1266_v39  ;;  %v14009_v24 = vld [vmem:[%s15354_s20 + $0x268] sm:$0xf0]  ;;  %v11116_v6 = vld [vmem:[%s15354_s20 + $0x5f0] sm:$0xf] }
 0x159   : > { %v1220_v10 = vsub.f32 1.5, %v1219_v61  ;;  %v10969_v61 = vor.u32 %v14085_v33, %v10966_v34  ;;  %v1286_v14 = vadd.f32 %v15638_v18, %v1267_v51  ;;  %v10933_v27 = vor.u32 %v14076_v13, %v10930_v47  ;;  %v13996_v33 = vld [vmem:[%s15354_s20 + $0x204] sm:$0xf]  ;;  %v14050_v13 = vld [vmem:[%s15354_s20 + $0x3b4] sm:$0xf] }
 0x15a   : > { %v1241_v9 = vmul.f32 %v15578_v12, %v1240_v49  ;;  %2544 = vmatpush.bf16.msrb.mxu3 %v10721_v59  ;;  %v10361_v28 = vor.u32 %v13937_v26, %v10360_v32  ;;  %v1235_v34 = vsel %vm15703_vm12, %v15551_v36, %v1231_v57  ;;  %v14068_v49 = vld [vmem:[%s15354_s20 + $0x444] sm:$0xf]  ;;  %v11190_v36 = vld [vmem:[%s15354_s20 + $0x6a4] sm:$0xf0]  ;;  %v10649_v56 = vor.u32 %v14009_v24, %v10648_v58  ;;  %v14135_v57 = vld [vmem:[%s15354_s20 + $0x658] sm:$0xf0] }
 0x15b   : > { %v1221_v48 = vmul.f32 %v15582_v17, %v1220_v10  ;;  %2525 = vmatpush.bf16.msrb.mxu2 %v10433_v50  ;;  %2507 = vmatpush.bf16.msrb.mxu1 %v10969_v61  ;;  %v13987_v59 = vld [vmem:[%s15354_s20 + $0x1bc] sm:$0xf]  ;;  %v1252_v61 = vmul.f32 %v1235_v34, %v15411_v43  ;;  %v11154_v43 = vld [vmem:[%s15354_s20 + $0x65c] sm:$0xf0]  ;;  %v10542_v10 = vld [vmem:[%s15354_s20 + $0x194] sm:$0xf0] }
 0x15c   : > { %v14122_v26 = vld [vmem:[%s15354_s20 + $0x5f4] sm:$0xf]  ;;  %v11118_v19 = vld [vmem:[%s15354_s20 + $0x614] sm:$0xf0]  ;;  %v11080_v58 = vld [vmem:[%s15354_s20 + $0x5a8] sm:$0xf] }
 0x15d   : > { %v1225_v60 = vsel %vm15643_vm6, %v15582_v17, %v1221_v48  ;;  %v10681_v17 = vor.u32 %v14013_v25, %v10678_v30  ;;  %v1245_v25 = vsel %vm15687_vm11, %v15578_v12, %v1241_v9  ;;  %v14144_v30 = vld [vmem:[%s15354_s20 + $0x6a0] sm:$0xf0]  ;;  %v10614_v12 = vld [vmem:[%s15354_s20 + $0x224] sm:$0xf0]  ;;  %v13978_v9 = vld [vmem:[%s15354_s20 + $0x174] sm:$0xf] }
 0x15e   : > { %v1249_v52 = vmul.f32 %v1225_v60, %v15443_v2  ;;  %v1250_v53 = vmul.f32 %v1225_v60, %v15445_v3  ;;  %v1251_v54 = vmul.f32 %v1225_v60, %v15447_v4  ;;  %v11189_v39 = vor.u32 %v14144_v30, %v11188_v29  ;;  %v10902_v60 = vld [vmem:[%s15354_s20 + $0x464] sm:$0xf0]  ;;  %2545 = vmatpush.bf16.msrb.mxu3 %v10685_v20  ;;  %v14117_v24 = vld [vmem:[%s15354_s20 + $0x5c8] sm:$0xf0]  ;;  %v10506_v29 = vld [vmem:[%s15354_s20 + $0x14c] sm:$0xf0] }
 0x15f   : > { %2488 = vmatpush.bf16.msrb.mxu0 %v10681_v17  ;;  %2526 = vmatpush.bf16.msrb.mxu2 %v10397_v11  ;;  %v10617_v50 = vor.u32 %v13996_v33, %v10614_v12  ;;  %v10905_v51 = vor.u32 %v14068_v49, %v10902_v60  ;;  %v1256_v55 = vmul.f32 %v1245_v25, %v15439_v0  ;;  %v10578_v17 = vld [vmem:[%s15354_s20 + $0x1dc] sm:$0xf0]  ;;  %v14059_v0 = vld [vmem:[%s15354_s20 + $0x3fc] sm:$0xf]  ;;  %v14041_v30 = vld [vmem:[%s15354_s20 + $0x36c] sm:$0xf] }
 0x160   : > { %v1268_v2 = vmul.f32 %v15602_v35, %v1249_v52  ;;  %v1269_v3 = vmul.f32 %v15604_v37, %v1250_v53  ;;  %v1270_v4 = vmul.f32 %v15607_v40, %v1251_v54  ;;  %v14140_v52 = vld [vmem:[%s15354_s20 + $0x684] sm:$0xf]  ;;  %v11152_v53 = vld [vmem:[%s15354_s20 + $0x638] sm:$0xf]  ;;  %v1255_v54 = vmul.f32 %v1245_v25, %v15437_v63  ;;  %2508 = vmatpush.bf16.msrb.mxu1 %v10933_v27  ;;  %v11082_v12 = vld [vmem:[%s15354_s20 + $0x5cc] sm:$0xf0] }
 0x161   : > { %v1257_v31 = vmul.f32 %v1245_v25, %v15441_v1  ;;  %v11193_v63 = vor.u32 %v14140_v52, %v11190_v36  ;;  %v10581_v62 = vor.u32 %v13987_v59, %v10578_v17  ;;  %v1254_v1 = vmul.f32 %v1235_v34, %v15415_v45  ;;  %v14104_v59 = vld [vmem:[%s15354_s20 + $0x564] sm:$0xf]  ;;  %v11046_v17 = vld [vmem:[%s15354_s20 + $0x584] sm:$0xf0] }
 0x162   : > { %v1287_v15 = vadd.f32 %v15609_v41, %v1268_v2  ;;  %v1288_v16 = vadd.f32 %v15611_v42, %v1269_v3  ;;  %v1289_v46 = vadd.f32 %v15638_v18, %v1270_v4  ;;  %v10866_v2 = vld [vmem:[%s15354_s20 + $0x41c] sm:$0xf0]  ;;  %v1253_v3 = vmul.f32 %v1235_v34, %v15413_v44  ;;  %2546 = vmatpush.bf16.msrb.mxu3 %v10649_v56  ;;  %v10794_v34 = vld [vmem:[%s15354_s20 + $0x38c] sm:$0xf0]  ;;  %v14032_v56 = vld [vmem:[%s15354_s20 + $0x324] sm:$0xf] }
 0x163   : > { %2489 = vmatpush.bf16.msrb.mxu0 %v10645_v21  ;;  %2527 = vmatpush.bf16.msrb.mxu2 %v10361_v28  ;;  %v11153_v4 = vor.u32 %v14135_v57, %v11152_v53  ;;  %v1274_v44 = vmul.f32 %v15602_v35, %v1255_v54  ;;  %v1275_v11 = vmul.f32 %v15604_v37, %v1256_v55  ;;  %v13969_v28 = vld [vmem:[%s15354_s20 + $0x12c] sm:$0xf]  ;;  %v11044_v53 = vld [vmem:[%s15354_s20 + $0x560] sm:$0xf]  ;;  %v14108_v54 = vld [vmem:[%s15354_s20 + $0x580] sm:$0xf0] }
 0x164   : > { %v15707_v48 = vpack.c.bf16 %v1287_v15, %v1284_v7  ;;  %v15709_v22 = vpack.c.bf16 %v1288_v16, %v1285_v8  ;;  %v15711_v23 = vpack.c.bf16 %v1289_v46, %v1286_v14  ;;  %v10869_v7 = vor.u32 %v14059_v0, %v10866_v2  ;;  %v14126_v8 = vld [vmem:[%s15354_s20 + $0x610] sm:$0xf0]  ;;  %v10830_v14 = vld [vmem:[%s15354_s20 + $0x3d4] sm:$0xf0]  ;;  %v10470_v55 = vld [vmem:[%s15354_s20 + $0x104] sm:$0xf0] }
 0x165   : > { %v1271_v15 = vmul.f32 %v15602_v35, %v1252_v61  ;;  %v1276_v16 = vmul.f32 %v15607_v40, %v1257_v31  ;;  %v11157_v45 = vor.u32 %v14131_v5, %v11154_v43  ;;  %v1272_v46 = vmul.f32 %v15604_v37, %v1253_v3  ;;  %v10758_v57 = vld [vmem:[%s15354_s20 + $0x344] sm:$0xf0]  ;;  %v14099_v0 = vld [vmem:[%s15354_s20 + $0x538] sm:$0xf0]  ;;  %v10722_v43 = vld [vmem:[%s15354_s20 + $0x2fc] sm:$0xf0] }
 0x166   : > { %2414 = vmatmul.bf16.vlgmr.msra.gmra.mxu0 %v15707_v48  ;;  %2433 = vmatmul.bf16.vlgmr.msra.gmra.mxu1 %v15709_v22  ;;  %v11117_v47 = vor.u32 %v14126_v8, %v11116_v6  ;;  %v10545_v32 = vor.u32 %v13978_v9, %v10542_v10  ;;  %v1273_v20 = vmul.f32 %v15607_v40, %v1254_v1  ;;  %v14023_v5 = vld [vmem:[%s15354_s20 + $0x2dc] sm:$0xf]  ;;  %v11010_v1 = vld [vmem:[%s15354_s20 + $0x53c] sm:$0xf0]  ;;  %v10972_v9 = vld [vmem:[%s15354_s20 + $0x4d0] sm:$0xf] }
 0x167   : > { %2452 = vmatmul.bf16.vlgmr.msra.gmra.mxu2 %v15711_v23  ;;  %2471 = vmatmul.bf16.vlgmr.msra.gmra.mxu3 %v15707_v48  ;;  %v10833_v35 = vor.u32 %v14050_v13, %v10830_v14  ;;  %v1293_v21 = vadd.f32 %v15609_v41, %v1274_v44  ;;  %v1294_v37 = vadd.f32 %v15611_v42, %v1275_v11  ;;  %v14095_v6 = vld [vmem:[%s15354_s20 + $0x51c] sm:$0xf]  ;;  %v14090_v10 = vld [vmem:[%s15354_s20 + $0x4f0] sm:$0xf0]  ;;  %v10398_v14 = vld [vmem:[%s15354_s20 + $0x74] sm:$0xf0] }
 0x168   : > { %2558 = vmatpush.bf16.msra.mxu0 %v11189_v39  ;;  %2577 = vmatpush.bf16.msra.mxu1 %v10617_v50  ;;  %v1295_v25 = vadd.f32 %v15638_v18, %v1276_v16  ;;  %v11121_v27 = vor.u32 %v14122_v26, %v11118_v19  ;;  %v1290_v40 = vadd.f32 %v15609_v41, %v1271_v15  ;;  %v14113_v39 = vld [vmem:[%s15354_s20 + $0x5ac] sm:$0xf]  ;;  %v13942_v13 = vld [vmem:[%s15354_s20 + $0x54] sm:$0xf]  ;;  %v10686_v16 = vld [vmem:[%s15354_s20 + $0x2b4] sm:$0xf0] }
 0x169   : > { %2596 = vmatpush.bf16.msra.mxu2 %v10905_v51  ;;  %2615 = vmatpush.bf16.msra.mxu3 %v11193_v63  ;;  %v1291_v33 = vadd.f32 %v15611_v42, %v1272_v46  ;;  %v1292_v49 = vadd.f32 %v15638_v18, %v1273_v20  ;;  %v11081_v41 = vor.u32 %v14117_v24, %v11080_v58  ;;  %v13960_v18 = vld [vmem:[%s15354_s20 + $0xe4] sm:$0xf]  ;;  %v11008_v63 = vld [vmem:[%s15354_s20 + $0x518] sm:$0xf]  ;;  %v14014_v15 = vld [vmem:[%s15354_s20 + $0x294] sm:$0xf] }
 0x16a   : > { %v15775_v60 = vpack.c.bf16 %v1293_v21, %v1290_v40  ;;  %v10509_v42 = vor.u32 %v13969_v28, %v10506_v29  ;;  %v10797_v52 = vor.u32 %v14041_v30, %v10794_v34  ;;  %v11085_v36 = vor.u32 %v14113_v39, %v11082_v12  ;;  %v10974_v46 = vld [vmem:[%s15354_s20 + $0x4f4] sm:$0xf0]  ;;  %v10936_v26 = vld [vmem:[%s15354_s20 + $0x488] sm:$0xf]  ;;  %v14081_v19 = vld [vmem:[%s15354_s20 + $0x4a8] sm:$0xf0] }
 0x16b   : > { %v15777_v50 = vpack.c.bf16 %v1294_v37, %v1291_v33  ;;  %v15779_v51 = vpack.c.bf16 %v1295_v25, %v1292_v49  ;;  %v11045_v61 = vor.u32 %v14108_v54, %v11044_v53  ;;  %v10473_v31 = vor.u32 %v13960_v18, %v10470_v55  ;;  %v13933_v21 = vld [vmem:[%s15354_s20 + $0xc] sm:$0xf]  ;;  %v10362_v37 = vld [vmem:[%s15354_s20 + $0x2c] sm:$0xf0]  ;;  %v10620_v33 = vld [vmem:[%s15354_s20 + $0x208] sm:$0xf] }
 0x16c   : > { %2559 = vmatpush.bf16.msra.mxu0 %v11153_v4  ;;  %2578 = vmatpush.bf16.msra.mxu1 %v10581_v62  ;;  %v10761_v2 = vor.u32 %v14032_v56, %v10758_v57  ;;  %v11049_v3 = vor.u32 %v14104_v59, %v11046_v17  ;;  %v13951_v4 = vld [vmem:[%s15354_s20 + $0x9c] sm:$0xf]  ;;  %v10434_v62 = vld [vmem:[%s15354_s20 + $0xbc] sm:$0xf0]  ;;  %v10725_v44 = vor.u32 %v14023_v5, %v10722_v43  ;;  %v14005_v58 = vld [vmem:[%s15354_s20 + $0x24c] sm:$0xf] }
 0x16d   : > { %2597 = vmatpush.bf16.msra.mxu2 %v10869_v7  ;;  %2616 = vmatpush.bf16.msra.mxu3 %v11157_v45  ;;  %v11009_v7 = vor.u32 %v14099_v0, %v11008_v63  ;;  %v10437_v8 = vor.u32 %v13951_v4, %v10434_v62  ;;  %v11013_v11 = vor.u32 %v14095_v6, %v11010_v1  ;;  %v14086_v45 = vld [vmem:[%s15354_s20 + $0x4d4] sm:$0xf]  ;;  %v10650_v24 = vld [vmem:[%s15354_s20 + $0x26c] sm:$0xf0]  ;;  %v14077_v25 = vld [vmem:[%s15354_s20 + $0x48c] sm:$0xf] }
 0x16e   : > { %v10689_v20 = vor.u32 %v14014_v15, %v10686_v16  ;;  %v10937_v28 = vor.u32 %v14081_v19, %v10936_v26  ;;  %v10365_v29 = vor.u32 %v13933_v21, %v10362_v37  ;;  %v10653_v30 = vor.u32 %v14005_v58, %v10650_v24  ;;  %v14001_v34 = vld [vmem:[%s15354_s20 + $0x228] sm:$0xf0]  ;;  %v10908_v39 = vld [vmem:[%s15354_s20 + $0x448] sm:$0xf]  ;;  %v10622_v54 = vld [vmem:[%s15354_s20 + $0x22c] sm:$0xf0] }
 0x16f   : > { %v10621_v12 = vor.u32 %v14001_v34, %v10620_v33  ;;  %v14073_v49 = vld [vmem:[%s15354_s20 + $0x468] sm:$0xf0]  ;;  %v10584_v18 = vld [vmem:[%s15354_s20 + $0x1c0] sm:$0xf]  ;;  %v13992_v56 = vld [vmem:[%s15354_s20 + $0x1e0] sm:$0xf0] }
 0x170   : > { %2560 = vmatpush.bf16.msra.mxu0 %v11117_v47  ;;  %2579 = vmatpush.bf16.msra.mxu1 %v10545_v32  ;;  %v10973_v47 = vor.u32 %v14090_v10, %v10972_v9  ;;  %v10401_v32 = vor.u32 %v13942_v13, %v10398_v14  ;;  %v13997_v53 = vld [vmem:[%s15354_s20 + $0x20c] sm:$0xf]  ;;  %v10872_v57 = vld [vmem:[%s15354_s20 + $0x400] sm:$0xf]  ;;  %v14064_v59 = vld [vmem:[%s15354_s20 + $0x420] sm:$0xf0]  ;;  %v10585_v63 = vor.u32 %v13992_v56, %v10584_v18 }
 0x171   : > { %2598 = vmatpush.bf16.msra.mxu2 %v10833_v35  ;;  %2617 = vmatpush.bf16.msra.mxu3 %v11121_v27  ;;  %v10977_v35 = vor.u32 %v14086_v45, %v10974_v46  ;;  %v10938_v27 = vld [vmem:[%s15354_s20 + $0x4ac] sm:$0xf0]  ;;  %v10625_v55 = vor.u32 %v13997_v53, %v10622_v54  ;;  %v11160_v17 = vld [vmem:[%s15354_s20 + $0x640] sm:$0xf]  ;;  %v10873_v0 = vor.u32 %v14064_v59, %v10872_v57  ;;  %v13983_v4 = vld [vmem:[%s15354_s20 + $0x198] sm:$0xf0] }
 0x172   : > { %v10941_v40 = vor.u32 %v14077_v25, %v10938_v27  ;;  %v10836_v43 = vld [vmem:[%s15354_s20 + $0x3b8] sm:$0xf]  ;;  %v14055_v6 = vld [vmem:[%s15354_s20 + $0x3d8] sm:$0xf0]  ;;  %v10550_v9 = vld [vmem:[%s15354_s20 + $0x19c] sm:$0xf0] }
 0x173   : > { %v11124_v1 = vld [vmem:[%s15354_s20 + $0x5f8] sm:$0xf]  ;;  %v10512_v14 = vld [vmem:[%s15354_s20 + $0x130] sm:$0xf]  ;;  %v13974_v15 = vld [vmem:[%s15354_s20 + $0x150] sm:$0xf0] }
 0x174   : > { %2561 = vmatpush.bf16.msra.mxu0 %v11081_v41  ;;  %2580 = vmatpush.bf16.msra.mxu1 %v10509_v42  ;;  %v11196_v41 = vld [vmem:[%s15354_s20 + $0x688] sm:$0xf]  ;;  %v14145_v42 = vld [vmem:[%s15354_s20 + $0x6a8] sm:$0xf0]  ;;  %v10800_v16 = vld [vmem:[%s15354_s20 + $0x370] sm:$0xf]  ;;  %v10513_v19 = vor.u32 %v13974_v15, %v10512_v14 }
 0x175   : > { %2599 = vmatpush.bf16.msra.mxu2 %v10797_v52  ;;  %2618 = vmatpush.bf16.msra.mxu3 %v11085_v36  ;;  %v10909_v52 = vor.u32 %v14073_v49, %v10908_v39  ;;  %v11197_v36 = vor.u32 %v14145_v42, %v11196_v41  ;;  %v14046_v45 = vld [vmem:[%s15354_s20 + $0x390] sm:$0xf0]  ;;  %v11088_v46 = vld [vmem:[%s15354_s20 + $0x5b0] sm:$0xf]  ;;  %v10514_v26 = vld [vmem:[%s15354_s20 + $0x154] sm:$0xf0] }
 0x176   : > { %2419 = vmatmul.bf16.gmra.mxu0 %v15775_v60  ;;  %2438 = vmatmul.bf16.gmra.mxu1 %v15777_v50  ;;  %v10476_v37 = vld [vmem:[%s15354_s20 + $0xe8] sm:$0xf]  ;;  %v13965_v58 = vld [vmem:[%s15354_s20 + $0x108] sm:$0xf0]  ;;  %v10440_v34 = vld [vmem:[%s15354_s20 + $0xa0] sm:$0xf] }
 0x177   : > { %2457 = vmatmul.bf16.gmra.mxu2 %v15779_v51  ;;  %2476 = vmatmul.bf16.gmra.mxu3 %v15775_v60  ;;  %v10764_v24 = vld [vmem:[%s15354_s20 + $0x328] sm:$0xf]  ;;  %v14037_v25 = vld [vmem:[%s15354_s20 + $0x348] sm:$0xf0]  ;;  %v13956_v39 = vld [vmem:[%s15354_s20 + $0xc0] sm:$0xf0] }
 0x178   : > { %2562 = vmatpush.bf16.msra.mxu0 %v11045_v61  ;;  %2581 = vmatpush.bf16.msra.mxu1 %v10473_v31  ;;  %v14136_v61 = vld [vmem:[%s15354_s20 + $0x660] sm:$0xf0]  ;;  %v11052_v27 = vld [vmem:[%s15354_s20 + $0x568] sm:$0xf]  ;;  %v10765_v33 = vor.u32 %v14037_v25, %v10764_v24  ;;  %v10728_v41 = vld [vmem:[%s15354_s20 + $0x2e0] sm:$0xf]  ;;  %v10441_v18 = vor.u32 %v13956_v39, %v10440_v34 }
 0x179   : > { %2600 = vmatpush.bf16.msra.mxu2 %v10761_v2  ;;  %2619 = vmatpush.bf16.msra.mxu3 %v11049_v3  ;;  %v13988_v31 = vld [vmem:[%s15354_s20 + $0x1c4] sm:$0xf]  ;;  %v10586_v2 = vld [vmem:[%s15354_s20 + $0x1e4] sm:$0xf0]  ;;  %v10548_v3 = vld [vmem:[%s15354_s20 + $0x178] sm:$0xf]  ;;  %v11161_v62 = vor.u32 %v14136_v61, %v11160_v17 }
 0x17a   : > { %v10589_v5 = vor.u32 %v13988_v31, %v10586_v2  ;;  %v10549_v10 = vor.u32 %v13983_v4, %v10548_v3  ;;  %v14028_v42 = vld [vmem:[%s15354_s20 + $0x300] sm:$0xf0]  ;;  %v10442_v54 = vld [vmem:[%s15354_s20 + $0xc4] sm:$0xf0]  ;;  %v10404_v56 = vld [vmem:[%s15354_s20 + $0x58] sm:$0xf] }
 0x17b   : > { %v13952_v53 = vld [vmem:[%s15354_s20 + $0xa4] sm:$0xf]  ;;  %v13947_v57 = vld [vmem:[%s15354_s20 + $0x78] sm:$0xf0]  ;;  %v10692_v61 = vld [vmem:[%s15354_s20 + $0x298] sm:$0xf] }
 0x17c   : > { %2563 = vmatpush.bf16.msra.mxu0 %v11009_v7  ;;  %2582 = vmatpush.bf16.msra.mxu1 %v10437_v8  ;;  %v14127_v7 = vld [vmem:[%s15354_s20 + $0x618] sm:$0xf0]  ;;  %v10445_v17 = vor.u32 %v13952_v53, %v10442_v54  ;;  %v10406_v3 = vld [vmem:[%s15354_s20 + $0x7c] sm:$0xf0]  ;;  %v10405_v4 = vor.u32 %v13947_v57, %v10404_v56  ;;  %v14060_v24 = vld [vmem:[%s15354_s20 + $0x404] sm:$0xf] }
 0x17d   : > { %2601 = vmatpush.bf16.msra.mxu2 %v10725_v44  ;;  %2620 = vmatpush.bf16.msra.mxu3 %v11013_v11  ;;  %v13979_v8 = vld [vmem:[%s15354_s20 + $0x17c] sm:$0xf]  ;;  %v10837_v44 = vor.u32 %v14055_v6, %v10836_v43  ;;  %v11125_v11 = vor.u32 %v14127_v7, %v11124_v1  ;;  %v13938_v43 = vld [vmem:[%s15354_s20 + $0x30] sm:$0xf0]  ;;  %v10656_v7 = vld [vmem:[%s15354_s20 + $0x250] sm:$0xf] }
 0x17e   : > { %v10553_v13 = vor.u32 %v13979_v8, %v10550_v9  ;;  %v14019_v31 = vld [vmem:[%s15354_s20 + $0x2b8] sm:$0xf0]  ;;  %v14010_v8 = vld [vmem:[%s15354_s20 + $0x270] sm:$0xf0]  ;;  %v10944_v9 = vld [vmem:[%s15354_s20 + $0x490] sm:$0xf] }
 0x17f   : > { %v13943_v2 = vld [vmem:[%s15354_s20 + $0x5c] sm:$0xf]  ;;  %v10657_v14 = vor.u32 %v14010_v8, %v10656_v7  ;;  %v11126_v53 = vld [vmem:[%s15354_s20 + $0x61c] sm:$0xf0]  ;;  %v14056_v56 = vld [vmem:[%s15354_s20 + $0x3e0] sm:$0xf0] }
 0x180   : > { %2564 = vmatpush.bf16.msra.mxu0 %v10973_v47  ;;  %2583 = vmatpush.bf16.msra.mxu1 %v10401_v32  ;;  %v14118_v47 = vld [vmem:[%s15354_s20 + $0x5d0] sm:$0xf0]  ;;  %v10409_v1 = vor.u32 %v13943_v2, %v10406_v3  ;;  %v10556_v54 = vld [vmem:[%s15354_s20 + $0x180] sm:$0xf]  ;;  %v11090_v2 = vld [vmem:[%s15354_s20 + $0x5d4] sm:$0xf0] }
 0x181   : > { %2602 = vmatpush.bf16.msra.mxu2 %v10689_v20  ;;  %2621 = vmatpush.bf16.msra.mxu3 %v10977_v35  ;;  %v13970_v32 = vld [vmem:[%s15354_s20 + $0x134] sm:$0xf]  ;;  %v10801_v20 = vor.u32 %v14046_v45, %v10800_v16  ;;  %v11089_v35 = vor.u32 %v14118_v47, %v11088_v46  ;;  %v14069_v45 = vld [vmem:[%s15354_s20 + $0x44c] sm:$0xf]  ;;  %v10910_v46 = vld [vmem:[%s15354_s20 + $0x46c] sm:$0xf0] }
 0x182   : > { %v10517_v21 = vor.u32 %v13970_v32, %v10514_v26  ;;  %v14141_v47 = vld [vmem:[%s15354_s20 + $0x68c] sm:$0xf]  ;;  %v10913_v32 = vor.u32 %v14069_v45, %v10910_v46  ;;  %v11198_v26 = vld [vmem:[%s15354_s20 + $0x6ac] sm:$0xf0]  ;;  %v10520_v3 = vld [vmem:[%s15354_s20 + $0x138] sm:$0xf] }
 0x183   : > { %v14033_v8 = vld [vmem:[%s15354_s20 + $0x32c] sm:$0xf]  ;;  %v14024_v46 = vld [vmem:[%s15354_s20 + $0x2e4] sm:$0xf] }
 0x184   : > { %2565 = vmatpush.bf16.msra.mxu0 %v10937_v28  ;;  %2584 = vmatpush.bf16.msra.mxu1 %v10365_v29  ;;  %v14109_v28 = vld [vmem:[%s15354_s20 + $0x588] sm:$0xf0] }
 0x185   : > { %2603 = vmatpush.bf16.msra.mxu2 %v10653_v30  ;;  %2622 = vmatpush.bf16.msra.mxu3 %v10941_v40  ;;  %v13961_v29 = vld [vmem:[%s15354_s20 + $0xec] sm:$0xf]  ;;  %v10478_v30 = vld [vmem:[%s15354_s20 + $0x10c] sm:$0xf0]  ;;  %v10477_v40 = vor.u32 %v13965_v58, %v10476_v37  ;;  %v14074_v58 = vld [vmem:[%s15354_s20 + $0x470] sm:$0xf0] }
 0x186   : > { %2490 = vmatmul.bf16.vlgmr.msrb.gmra.mxu0 %v15709_v22  ;;  %2509 = vmatmul.bf16.vlgmr.msrb.gmra.mxu1 %v15711_v23  ;;  %v10481_v49 = vor.u32 %v13961_v29, %v10478_v30  ;;  %v10916_v37 = vld [vmem:[%s15354_s20 + $0x450] sm:$0xf]  ;;  %v11162_v29 = vld [vmem:[%s15354_s20 + $0x664] sm:$0xf0] }
 0x187   : > { %2528 = vmatmul.bf16.vlgmr.msrb.gmra.mxu2 %v15707_v48  ;;  %2547 = vmatmul.bf16.vlgmr.msrb.gmra.mxu3 %v15709_v22  ;;  %v10917_v25 = vor.u32 %v14074_v58, %v10916_v37  ;;  %v10592_v30 = vld [vmem:[%s15354_s20 + $0x1c8] sm:$0xf]  ;;  %v14029_v58 = vld [vmem:[%s15354_s20 + $0x308] sm:$0xf0] }
 0x188   : > { %2634 = vmatpush.bf16.msrb.mxu0 %v10621_v12  ;;  %2653 = vmatpush.bf16.msrb.mxu1 %v10909_v52  ;;  %v11053_v12 = vor.u32 %v14109_v28, %v11052_v27  ;;  %v11016_v52 = vld [vmem:[%s15354_s20 + $0x520] sm:$0xf]  ;;  %v10874_v27 = vld [vmem:[%s15354_s20 + $0x424] sm:$0xf0]  ;;  %v14132_v28 = vld [vmem:[%s15354_s20 + $0x644] sm:$0xf] }
 0x189   : > { %2672 = vmatpush.bf16.msrb.mxu2 %v11197_v36  ;;  %2691 = vmatpush.bf16.msrb.mxu3 %v10625_v55  ;;  %v14100_v36 = vld [vmem:[%s15354_s20 + $0x540] sm:$0xf0]  ;;  %v10729_v55 = vor.u32 %v14028_v42, %v10728_v41  ;;  %v10877_v34 = vor.u32 %v14060_v24, %v10874_v27  ;;  %v11165_v39 = vor.u32 %v14132_v28, %v11162_v29  ;;  %v10838_v41 = vld [vmem:[%s15354_s20 + $0x3dc] sm:$0xf0]  ;;  %v10736_v37 = vld [vmem:[%s15354_s20 + $0x2e8] sm:$0xf] }
 0x18a   : > { %v11017_v59 = vor.u32 %v14100_v36, %v11016_v52  ;;  %v14123_v36 = vld [vmem:[%s15354_s20 + $0x5fc] sm:$0xf]  ;;  %v10694_v28 = vld [vmem:[%s15354_s20 + $0x2bc] sm:$0xf0] }
 0x18b   : > { %v14015_v27 = vld [vmem:[%s15354_s20 + $0x29c] sm:$0xf] }
 0x18c   : > { %2635 = vmatpush.bf16.msrb.mxu0 %v10585_v63  ;;  %2654 = vmatpush.bf16.msrb.mxu1 %v10873_v0  ;;  %v10980_v63 = vld [vmem:[%s15354_s20 + $0x4d8] sm:$0xf]  ;;  %v14091_v0 = vld [vmem:[%s15354_s20 + $0x4f8] sm:$0xf0] }
 0x18d   : > { %2673 = vmatpush.bf16.msrb.mxu2 %v11161_v62  ;;  %2692 = vmatpush.bf16.msrb.mxu3 %v10589_v5  ;;  %v10693_v62 = vor.u32 %v14019_v31, %v10692_v61  ;;  %v10368_v5 = vld [vmem:[%s15354_s20 + $0x10] sm:$0xf]  ;;  %v10981_v6 = vor.u32 %v14091_v0, %v10980_v63  ;;  %v14042_v31 = vld [vmem:[%s15354_s20 + $0x374] sm:$0xf]  ;;  %v10802_v63 = vld [vmem:[%s15354_s20 + $0x394] sm:$0xf0] }
 0x18e   : > { %v14114_v0 = vld [vmem:[%s15354_s20 + $0x5b4] sm:$0xf] }
 0x190   : > { %2636 = vmatpush.bf16.msrb.mxu0 %v10549_v10  ;;  %2655 = vmatpush.bf16.msrb.mxu1 %v10837_v44  ;;  %v14082_v10 = vld [vmem:[%s15354_s20 + $0x4b0] sm:$0xf0] }
 0x191   : > { %2674 = vmatpush.bf16.msrb.mxu2 %v11125_v11  ;;  %2693 = vmatpush.bf16.msrb.mxu3 %v10553_v13  ;;  %v13934_v44 = vld [vmem:[%s15354_s20 + $0x14] sm:$0xf]  ;;  %v10370_v11 = vld [vmem:[%s15354_s20 + $0x34] sm:$0xf0]  ;;  %v10369_v13 = vor.u32 %v13938_v43, %v10368_v5  ;;  %v10945_v15 = vor.u32 %v14082_v10, %v10944_v9  ;;  %v14047_v5 = vld [vmem:[%s15354_s20 + $0x398] sm:$0xf0]  ;;  %v10805_v43 = vor.u32 %v14042_v31, %v10802_v63 }
 0x192   : > { %v10373_v16 = vor.u32 %v13934_v44, %v10370_v11  ;;  %v10766_v9 = vld [vmem:[%s15354_s20 + $0x34c] sm:$0xf0]  ;;  %v14105_v10 = vld [vmem:[%s15354_s20 + $0x56c] sm:$0xf] }
 0x193   : > { %v11054_v44 = vld [vmem:[%s15354_s20 + $0x58c] sm:$0xf0] }
 0x194   : > { %2637 = vmatpush.bf16.msrb.mxu0 %v10513_v19  ;;  %2656 = vmatpush.bf16.msrb.mxu1 %v10801_v20  ;;  %v10628_v19 = vld [vmem:[%s15354_s20 + $0x210] sm:$0xf]  ;;  %v14002_v20 = vld [vmem:[%s15354_s20 + $0x230] sm:$0xf0]  ;;  %v11057_v45 = vor.u32 %v14105_v10, %v11054_v44  ;;  %v11168_v44 = vld [vmem:[%s15354_s20 + $0x648] sm:$0xf] }
 0x195   : > { %2675 = vmatpush.bf16.msrb.mxu2 %v11089_v35  ;;  %2694 = vmatpush.bf16.msrb.mxu3 %v10517_v21  ;;  %v11201_v35 = vor.u32 %v14141_v47, %v11198_v26  ;;  %v10629_v21 = vor.u32 %v14002_v20, %v10628_v19  ;;  %v10484_v11 = vld [vmem:[%s15354_s20 + $0xf0] sm:$0xf]  ;;  %v10730_v47 = vld [vmem:[%s15354_s20 + $0x304] sm:$0xf0]  ;;  %v14096_v19 = vld [vmem:[%s15354_s20 + $0x524] sm:$0xf] }
 0x196   : > { %2495 = vmatmul.bf16.gmra.mxu0 %v15777_v50  ;;  %2514 = vmatmul.bf16.gmra.mxu1 %v15779_v51  ;;  %v11018_v20 = vld [vmem:[%s15354_s20 + $0x544] sm:$0xf0]  ;;  %v10733_v24 = vor.u32 %v14024_v46, %v10730_v47 }
 0x197   : > { %2533 = vmatmul.bf16.gmra.mxu2 %v15775_v60  ;;  %2552 = vmatmul.bf16.gmra.mxu3 %v15777_v50 }
 0x198   : > { %2638 = vmatpush.bf16.msrb.mxu0 %v10477_v40  ;;  %2657 = vmatpush.bf16.msrb.mxu1 %v10765_v33  ;;  %v13993_v40 = vld [vmem:[%s15354_s20 + $0x1e8] sm:$0xf0]  ;;  %v10880_v33 = vld [vmem:[%s15354_s20 + $0x408] sm:$0xf] }
 0x199   : > { %2676 = vmatpush.bf16.msrb.mxu2 %v11053_v12  ;;  %2695 = vmatpush.bf16.msrb.mxu3 %v10481_v49  ;;  %v14065_v12 = vld [vmem:[%s15354_s20 + $0x428] sm:$0xf0]  ;;  %v14051_v49 = vld [vmem:[%s15354_s20 + $0x3bc] sm:$0xf]  ;;  %v10593_v42 = vor.u32 %v13993_v40, %v10592_v30  ;;  %v10737_v30 = vor.u32 %v14029_v58, %v10736_v37  ;;  %v10558_v37 = vld [vmem:[%s15354_s20 + $0x1a4] sm:$0xf0] }
 0x19a   : > { %v10881_v52 = vor.u32 %v14065_v12, %v10880_v33  ;;  %v10841_v57 = vor.u32 %v14051_v49, %v10838_v41  ;;  %v14087_v40 = vld [vmem:[%s15354_s20 + $0x4dc] sm:$0xf]  ;;  %v10982_v33 = vld [vmem:[%s15354_s20 + $0x4fc] sm:$0xf0]  ;;  %v14020_v49 = vld [vmem:[%s15354_s20 + $0x2c0] sm:$0xf0]  ;;  %v10697_v41 = vor.u32 %v14015_v27, %v10694_v28 }
 0x19b   : > { %v10700_v12 = vld [vmem:[%s15354_s20 + $0x2a0] sm:$0xf]  ;;  %v14052_v58 = vld [vmem:[%s15354_s20 + $0x3c4] sm:$0xf] }
 0x19c   : > { %2639 = vmatpush.bf16.msrb.mxu0 %v10441_v18  ;;  %2658 = vmatpush.bf16.msrb.mxu1 %v10729_v55  ;;  %v13984_v18 = vld [vmem:[%s15354_s20 + $0x1a0] sm:$0xf0]  ;;  %v10844_v55 = vld [vmem:[%s15354_s20 + $0x3c0] sm:$0xf] }
 0x19d   : > { %2677 = vmatpush.bf16.msrb.mxu2 %v11017_v59  ;;  %2696 = vmatpush.bf16.msrb.mxu3 %v10445_v17  ;;  %v11129_v59 = vor.u32 %v14123_v36, %v11126_v53  ;;  %v10557_v17 = vor.u32 %v13984_v18, %v10556_v54  ;;  %v10845_v61 = vor.u32 %v14056_v56, %v10844_v55  ;;  %v14006_v53 = vld [vmem:[%s15354_s20 + $0x254] sm:$0xf]  ;;  %v10658_v54 = vld [vmem:[%s15354_s20 + $0x274] sm:$0xf0]  ;;  %v14124_v28 = vld [vmem:[%s15354_s20 + $0x604] sm:$0xf] }
 0x19e   : > { %v10701_v36 = vor.u32 %v14020_v49, %v10700_v12  ;;  %v14078_v18 = vld [vmem:[%s15354_s20 + $0x494] sm:$0xf]  ;;  %v10946_v55 = vld [vmem:[%s15354_s20 + $0x4b4] sm:$0xf0]  ;;  %v10522_v12 = vld [vmem:[%s15354_s20 + $0x15c] sm:$0xf0] }
 0x19f   : > { %v10376_v56 = vld [vmem:[%s15354_s20 + $0x18] sm:$0xf]  ;;  %v10949_v31 = vor.u32 %v14078_v18, %v10946_v55  ;;  %v14043_v49 = vld [vmem:[%s15354_s20 + $0x37c] sm:$0xf]  ;;  %v11060_v55 = vld [vmem:[%s15354_s20 + $0x570] sm:$0xf] }
 0x1a0   : > { %2640 = vmatpush.bf16.msrb.mxu0 %v10405_v4  ;;  %2659 = vmatpush.bf16.msrb.mxu1 %v10693_v62  ;;  %v13975_v4 = vld [vmem:[%s15354_s20 + $0x158] sm:$0xf0]  ;;  %v10808_v62 = vld [vmem:[%s15354_s20 + $0x378] sm:$0xf] }
 0x1a1   : > { %2678 = vmatpush.bf16.msrb.mxu2 %v10981_v6  ;;  %2697 = vmatpush.bf16.msrb.mxu3 %v10409_v1  ;;  %v11093_v6 = vor.u32 %v14114_v0, %v11090_v2  ;;  %v10521_v1 = vor.u32 %v13975_v4, %v10520_v3  ;;  %v10809_v7 = vor.u32 %v14047_v5, %v10808_v62  ;;  %v11204_v2 = vld [vmem:[%s15354_s20 + $0x690] sm:$0xf]  ;;  %v14146_v3 = vld [vmem:[%s15354_s20 + $0x6b0] sm:$0xf0]  ;;  %v10630_v5 = vld [vmem:[%s15354_s20 + $0x234] sm:$0xf0] }
 0x1a2   : > { %v13998_v4 = vld [vmem:[%s15354_s20 + $0x214] sm:$0xf]  ;;  %v11205_v62 = vor.u32 %v14146_v3, %v11204_v2 }
 0x1a4   : > { %2641 = vmatpush.bf16.msrb.mxu0 %v10369_v13  ;;  %2660 = vmatpush.bf16.msrb.mxu1 %v10657_v14  ;;  %v13966_v13 = vld [vmem:[%s15354_s20 + $0x110] sm:$0xf0]  ;;  %v10772_v14 = vld [vmem:[%s15354_s20 + $0x330] sm:$0xf] }
 0x1a5   : > { %2679 = vmatpush.bf16.msrb.mxu2 %v10945_v15  ;;  %2698 = vmatpush.bf16.msrb.mxu3 %v10373_v16  ;;  %v14038_v15 = vld [vmem:[%s15354_s20 + $0x350] sm:$0xf0]  ;;  %v10769_v16 = vor.u32 %v14033_v8, %v10766_v9  ;;  %v11206_v9 = vld [vmem:[%s15354_s20 + $0x6b4] sm:$0xf0] }
 0x1a6   : > { %2566 = vmatmul.bf16.vlgmr.msra.gmra.mxu0 %v15711_v23  ;;  %2585 = vmatmul.bf16.vlgmr.msra.gmra.mxu1 %v15707_v48  ;;  %v10773_v26 = vor.u32 %v14038_v15, %v10772_v14  ;;  %v14142_v8 = vld [vmem:[%s15354_s20 + $0x694] sm:$0xf]  ;;  %v10594_v15 = vld [vmem:[%s15354_s20 + $0x1ec] sm:$0xf0] }
 0x1a7   : > { %2604 = vmatmul.bf16.vlgmr.msra.gmra.mxu2 %v15709_v22  ;;  %2623 = vmatmul.bf16.vlgmr.msra.gmra.mxu3 %v15711_v23  ;;  %v11209_v10 = vor.u32 %v14142_v8, %v11206_v9  ;;  %v14097_v8 = vld [vmem:[%s15354_s20 + $0x52c] sm:$0xf]  ;;  %v11026_v9 = vld [vmem:[%s15354_s20 + $0x54c] sm:$0xf0] }
 0x1a8   : > { %2710 = vmatpush.bf16.msra.mxu0 %v10913_v32  ;;  %2729 = vmatpush.bf16.msra.mxu1 %v11201_v35  ;;  %v10485_v32 = vor.u32 %v13966_v13, %v10484_v11  ;;  %v10448_v35 = vld [vmem:[%s15354_s20 + $0xa8] sm:$0xf]  ;;  %v14137_v11 = vld [vmem:[%s15354_s20 + $0x668] sm:$0xf0] }
 0x1a9   : > { %2748 = vmatpush.bf16.msra.mxu2 %v10629_v21  ;;  %2767 = vmatpush.bf16.msra.mxu3 %v10917_v25  ;;  %v13957_v21 = vld [vmem:[%s15354_s20 + $0xc8] sm:$0xf0]  ;;  %v11021_v25 = vor.u32 %v14096_v19, %v11018_v20  ;;  %v11169_v14 = vor.u32 %v14137_v11, %v11168_v44  ;;  %v11132_v20 = vld [vmem:[%s15354_s20 + $0x600] sm:$0xf] }
 0x1aa   : > { %v10449_v29 = vor.u32 %v13957_v21, %v10448_v35  ;;  %v13989_v13 = vld [vmem:[%s15354_s20 + $0x1cc] sm:$0xf]  ;;  %v14128_v35 = vld [vmem:[%s15354_s20 + $0x620] sm:$0xf0]  ;;  %v10988_v11 = vld [vmem:[%s15354_s20 + $0x4e0] sm:$0xf] }
 0x1ab   : > { %v10597_v46 = vor.u32 %v13989_v13, %v10594_v15  ;;  %v13980_v21 = vld [vmem:[%s15354_s20 + $0x184] sm:$0xf]  ;;  %v11029_v15 = vor.u32 %v14097_v8, %v11026_v9  ;;  %v14057_v9 = vld [vmem:[%s15354_s20 + $0x3e8] sm:$0xf0] }
 0x1ac   : > { %2711 = vmatpush.bf16.msra.mxu0 %v10877_v34  ;;  %2730 = vmatpush.bf16.msra.mxu1 %v11165_v39  ;;  %v10412_v34 = vld [vmem:[%s15354_s20 + $0x60] sm:$0xf]  ;;  %v13948_v39 = vld [vmem:[%s15354_s20 + $0x80] sm:$0xf0]  ;;  %v10561_v27 = vor.u32 %v13980_v21, %v10558_v37  ;;  %v10952_v37 = vld [vmem:[%s15354_s20 + $0x498] sm:$0xf] }
 0x1ad   : > { %2749 = vmatpush.bf16.msra.mxu2 %v10593_v42  ;;  %2768 = vmatpush.bf16.msra.mxu3 %v10881_v52  ;;  %v10985_v42 = vor.u32 %v14087_v40, %v10982_v33  ;;  %v10413_v52 = vor.u32 %v13948_v39, %v10412_v34  ;;  %v11096_v33 = vld [vmem:[%s15354_s20 + $0x5b8] sm:$0xf]  ;;  %v14119_v34 = vld [vmem:[%s15354_s20 + $0x5d8] sm:$0xf0]  ;;  %v14092_v13 = vld [vmem:[%s15354_s20 + $0x500] sm:$0xf0] }
 0x1ae   : > { %v13971_v39 = vld [vmem:[%s15354_s20 + $0x13c] sm:$0xf] }
 0x1b0   : > { %2712 = vmatpush.bf16.msra.mxu0 %v10841_v57  ;;  %2731 = vmatpush.bf16.msra.mxu1 %v11129_v59  ;;  %v13939_v57 = vld [vmem:[%s15354_s20 + $0x38] sm:$0xf0]  ;;  %v10664_v59 = vld [vmem:[%s15354_s20 + $0x258] sm:$0xf] }
 0x1b1   : > { %2750 = vmatpush.bf16.msra.mxu2 %v10557_v17  ;;  %2769 = vmatpush.bf16.msra.mxu3 %v10845_v61  ;;  %v14011_v17 = vld [vmem:[%s15354_s20 + $0x278] sm:$0xf0]  ;;  %v10661_v61 = vor.u32 %v14006_v53, %v10658_v54  ;;  %v10377_v63 = vor.u32 %v13939_v57, %v10376_v56  ;;  %v10525_v53 = vor.u32 %v13971_v39, %v10522_v12  ;;  %v14110_v56 = vld [vmem:[%s15354_s20 + $0x590] sm:$0xf0] }
 0x1b2   : > { %v10665_v0 = vor.u32 %v14011_v17, %v10664_v59  ;;  %v13962_v57 = vld [vmem:[%s15354_s20 + $0xf4] sm:$0xf]  ;;  %v10486_v59 = vld [vmem:[%s15354_s20 + $0x114] sm:$0xf0] }
 0x1b3   : > { %v14034_v17 = vld [vmem:[%s15354_s20 + $0x334] sm:$0xf]  ;;  %v10489_v2 = vor.u32 %v13962_v57, %v10486_v59  ;;  %v10600_v57 = vld [vmem:[%s15354_s20 + $0x1d0] sm:$0xf] }
 0x1b4   : > { %2713 = vmatpush.bf16.msra.mxu0 %v10805_v43  ;;  %2732 = vmatpush.bf16.msra.mxu1 %v11093_v6  ;;  %v14070_v43 = vld [vmem:[%s15354_s20 + $0x454] sm:$0xf]  ;;  %v10918_v6 = vld [vmem:[%s15354_s20 + $0x474] sm:$0xf0] }
 0x1b5   : > { %2751 = vmatpush.bf16.msra.mxu2 %v10521_v1  ;;  %2770 = vmatpush.bf16.msra.mxu3 %v10809_v7  ;;  %v10633_v1 = vor.u32 %v13998_v4, %v10630_v5  ;;  %v10921_v7 = vor.u32 %v14070_v43, %v10918_v6  ;;  %v14101_v5 = vld [vmem:[%s15354_s20 + $0x548] sm:$0xf0]  ;;  %v10450_v6 = vld [vmem:[%s15354_s20 + $0xcc] sm:$0xf0]  ;;  %v13994_v59 = vld [vmem:[%s15354_s20 + $0x1f0] sm:$0xf0] }
 0x1b6   : > { %2571 = vmatmul.bf16.gmra.mxu0 %v15779_v51  ;;  %2590 = vmatmul.bf16.gmra.mxu1 %v15775_v60  ;;  %v13953_v43 = vld [vmem:[%s15354_s20 + $0xac] sm:$0xf] }
 0x1b7   : > { %2609 = vmatmul.bf16.gmra.mxu2 %v15777_v50  ;;  %2628 = vmatmul.bf16.gmra.mxu3 %v15779_v51  ;;  %v10453_v44 = vor.u32 %v13953_v43, %v10450_v6  ;;  %v10564_v6 = vld [vmem:[%s15354_s20 + $0x188] sm:$0xf] }
 0x1b8   : > { %2714 = vmatpush.bf16.msra.mxu0 %v10769_v16  ;;  %2733 = vmatpush.bf16.msra.mxu1 %v11057_v45  ;;  %v14061_v16 = vld [vmem:[%s15354_s20 + $0x40c] sm:$0xf]  ;;  %v10882_v45 = vld [vmem:[%s15354_s20 + $0x42c] sm:$0xf0] }
 0x1b9   : > { %2752 = vmatpush.bf16.msra.mxu2 %v10485_v32  ;;  %2771 = vmatpush.bf16.msra.mxu3 %v10773_v26  ;;  %v10885_v47 = vor.u32 %v14061_v16, %v10882_v45  ;;  %v14133_v32 = vld [vmem:[%s15354_s20 + $0x64c] sm:$0xf]  ;;  %v11170_v26 = vld [vmem:[%s15354_s20 + $0x66c] sm:$0xf0]  ;;  %v13944_v16 = vld [vmem:[%s15354_s20 + $0x64] sm:$0xf] }
 0x1ba   : > { %v11173_v19 = vor.u32 %v14133_v32, %v11170_v26  ;;  %v10414_v45 = vld [vmem:[%s15354_s20 + $0x84] sm:$0xf0]  ;;  %v14088_v32 = vld [vmem:[%s15354_s20 + $0x4e4] sm:$0xf] }
 0x1bb   : > { %v10990_v26 = vld [vmem:[%s15354_s20 + $0x504] sm:$0xf0] }
 0x1bc   : > { %2715 = vmatpush.bf16.msra.mxu0 %v10733_v24  ;;  %2734 = vmatpush.bf16.msra.mxu1 %v11021_v25  ;;  %v10846_v24 = vld [vmem:[%s15354_s20 + $0x3e4] sm:$0xf0]  ;;  %v11133_v25 = vor.u32 %v14128_v35, %v11132_v20  ;;  %v10417_v20 = vor.u32 %v13944_v16, %v10414_v45  ;;  %v10993_v21 = vor.u32 %v14088_v32, %v10990_v26  ;;  %v10816_v16 = vld [vmem:[%s15354_s20 + $0x380] sm:$0xf]  ;;  %v14120_v26 = vld [vmem:[%s15354_s20 + $0x5e0] sm:$0xf0] }
 0x1bd   : > { %2753 = vmatpush.bf16.msra.mxu2 %v10449_v29  ;;  %2772 = vmatpush.bf16.msra.mxu3 %v10737_v30  ;;  %v11134_v29 = vld [vmem:[%s15354_s20 + $0x624] sm:$0xf0]  ;;  %v10849_v30 = vor.u32 %v14052_v58, %v10846_v24  ;;  %v14083_v58 = vld [vmem:[%s15354_s20 + $0x4b8] sm:$0xf0]  ;;  %v11104_v32 = vld [vmem:[%s15354_s20 + $0x5c0] sm:$0xf] }
 0x1be   : > { %v11137_v40 = vor.u32 %v14124_v28, %v11134_v29  ;;  %v13935_v24 = vld [vmem:[%s15354_s20 + $0x1c] sm:$0xf]  ;;  %v10666_v28 = vld [vmem:[%s15354_s20 + $0x27c] sm:$0xf0] }
 0x1c0   : > { %2716 = vmatpush.bf16.msra.mxu0 %v10697_v41  ;;  %2735 = vmatpush.bf16.msra.mxu1 %v10985_v42  ;;  %v10810_v41 = vld [vmem:[%s15354_s20 + $0x39c] sm:$0xf0]  ;;  %v14115_v42 = vld [vmem:[%s15354_s20 + $0x5bc] sm:$0xf] }
 0x1c1   : > { %2754 = vmatpush.bf16.msra.mxu2 %v10413_v52  ;;  %2773 = vmatpush.bf16.msra.mxu3 %v10701_v36  ;;  %v11098_v52 = vld [vmem:[%s15354_s20 + $0x5dc] sm:$0xf0]  ;;  %v11097_v36 = vor.u32 %v14119_v34, %v11096_v33  ;;  %v10813_v54 = vor.u32 %v14043_v49, %v10810_v41  ;;  %v10953_v34 = vor.u32 %v14083_v58, %v10952_v37  ;;  %v10636_v41 = vld [vmem:[%s15354_s20 + $0x218] sm:$0xf] }
 0x1c2   : > { %v11101_v18 = vor.u32 %v14115_v42, %v11098_v52  ;;  %v10954_v33 = vld [vmem:[%s15354_s20 + $0x4bc] sm:$0xf0]  ;;  %v14003_v42 = vld [vmem:[%s15354_s20 + $0x238] sm:$0xf0]  ;;  %v10924_v52 = vld [vmem:[%s15354_s20 + $0x458] sm:$0xf]  ;;  %v11105_v58 = vor.u32 %v14120_v26, %v11104_v32 }
 0x1c3   : > { %v14012_v32 = vld [vmem:[%s15354_s20 + $0x280] sm:$0xf0]  ;;  %v10960_v26 = vld [vmem:[%s15354_s20 + $0x4a0] sm:$0xf] }
 0x1c4   : > { %2717 = vmatpush.bf16.msra.mxu0 %v10661_v61  ;;  %2736 = vmatpush.bf16.msra.mxu1 %v10949_v31  ;;  %v10774_v61 = vld [vmem:[%s15354_s20 + $0x354] sm:$0xf0]  ;;  %v14106_v31 = vld [vmem:[%s15354_s20 + $0x574] sm:$0xf] }
 0x1c5   : > { %2755 = vmatpush.bf16.msra.mxu2 %v10377_v63  ;;  %2774 = vmatpush.bf16.msra.mxu3 %v10665_v0  ;;  %v11062_v63 = vld [vmem:[%s15354_s20 + $0x594] sm:$0xf0]  ;;  %v11061_v0 = vor.u32 %v14110_v56, %v11060_v55  ;;  %v10777_v3 = vor.u32 %v14034_v17, %v10774_v61  ;;  %v10888_v17 = vld [vmem:[%s15354_s20 + $0x410] sm:$0xf] }
 0x1c6   : > { %2642 = vmatmul.bf16.vlgmr.msrb.gmra.mxu0 %v15707_v48  ;;  %2661 = vmatmul.bf16.vlgmr.msrb.gmra.mxu1 %v15709_v22  ;;  %v11065_v4 = vor.u32 %v14106_v31, %v11062_v63  ;;  %v10601_v63 = vor.u32 %v13994_v59, %v10600_v57  ;;  %v14102_v57 = vld [vmem:[%s15354_s20 + $0x550] sm:$0xf0] }
 0x1c7   : > { %2680 = vmatmul.bf16.vlgmr.msrb.gmra.mxu2 %v15711_v23  ;;  %2699 = vmatmul.bf16.vlgmr.msrb.gmra.mxu3 %v15707_v48 }
 0x1c8   : > { %2786 = vmatpush.bf16.msrb.mxu0 %v11205_v62  ;;  %2805 = vmatpush.bf16.msrb.mxu1 %v10633_v1  ;;  %v11024_v62 = vld [vmem:[%s15354_s20 + $0x528] sm:$0xf]  ;;  %v14025_v1 = vld [vmem:[%s15354_s20 + $0x2ec] sm:$0xf] }
 0x1c9   : > { %2824 = vmatpush.bf16.msrb.mxu2 %v10921_v7  ;;  %2843 = vmatpush.bf16.msrb.mxu3 %v11209_v10  ;;  %v10738_v7 = vld [vmem:[%s15354_s20 + $0x30c] sm:$0xf0]  ;;  %v11025_v10 = vor.u32 %v14101_v5, %v11024_v62 }
 0x1cc   : > { %2787 = vmatpush.bf16.msrb.mxu0 %v11169_v14  ;;  %2806 = vmatpush.bf16.msrb.mxu1 %v10597_v46  ;;  %v10741_v14 = vor.u32 %v14025_v1, %v10738_v7  ;;  %v14016_v46 = vld [vmem:[%s15354_s20 + $0x2a4] sm:$0xf]  ;;  %v13985_v1 = vld [vmem:[%s15354_s20 + $0x1a8] sm:$0xf0]  ;;  %v10852_v7 = vld [vmem:[%s15354_s20 + $0x3c8] sm:$0xf] }
 0x1cd   : > { %2825 = vmatpush.bf16.msrb.mxu2 %v10885_v47  ;;  %2844 = vmatpush.bf16.msrb.mxu3 %v11173_v19  ;;  %v10702_v47 = vld [vmem:[%s15354_s20 + $0x2c4] sm:$0xf0]  ;;  %v10989_v19 = vor.u32 %v14092_v13, %v10988_v11  ;;  %v10565_v8 = vor.u32 %v13985_v1, %v10564_v6  ;;  %v10853_v11 = vor.u32 %v14057_v9, %v10852_v7  ;;  %v14093_v1 = vld [vmem:[%s15354_s20 + $0x508] sm:$0xf0] }
 0x1ce   : > { %v10705_v35 = vor.u32 %v14016_v46, %v10702_v47  ;;  %v14048_v47 = vld [vmem:[%s15354_s20 + $0x3a0] sm:$0xf0]  ;;  %v10996_v6 = vld [vmem:[%s15354_s20 + $0x4e8] sm:$0xf] }
 0x1cf   : > { %v10817_v37 = vor.u32 %v14048_v47, %v10816_v16  ;;  %v10997_v9 = vor.u32 %v14093_v1, %v10996_v6 }
 0x1d0   : > { %2788 = vmatpush.bf16.msrb.mxu0 %v11133_v25  ;;  %2807 = vmatpush.bf16.msrb.mxu1 %v10561_v27  ;;  %v10378_v25 = vld [vmem:[%s15354_s20 + $0x3c] sm:$0xf0]  ;;  %v14007_v27 = vld [vmem:[%s15354_s20 + $0x25c] sm:$0xf] }
 0x1d1   : > { %2826 = vmatpush.bf16.msrb.mxu2 %v10849_v30  ;;  %2845 = vmatpush.bf16.msrb.mxu3 %v11137_v40  ;;  %v14079_v40 = vld [vmem:[%s15354_s20 + $0x49c] sm:$0xf]  ;;  %v10381_v39 = vor.u32 %v13935_v24, %v10378_v25  ;;  %v10669_v12 = vor.u32 %v14007_v27, %v10666_v28  ;;  %v10492_v24 = vld [vmem:[%s15354_s20 + $0xf8] sm:$0xf] }
 0x1d2   : > { %v10957_v49 = vor.u32 %v14079_v40, %v10954_v33  ;;  %v13967_v25 = vld [vmem:[%s15354_s20 + $0x118] sm:$0xf0]  ;;  %v10780_v27 = vld [vmem:[%s15354_s20 + $0x338] sm:$0xf] }
 0x1d3   : > { %v14039_v28 = vld [vmem:[%s15354_s20 + $0x358] sm:$0xf0]  ;;  %v11068_v40 = vld [vmem:[%s15354_s20 + $0x578] sm:$0xf] }
 0x1d4   : > { %2789 = vmatpush.bf16.msrb.mxu0 %v11097_v36  ;;  %2808 = vmatpush.bf16.msrb.mxu1 %v10525_v53  ;;  %v10637_v36 = vor.u32 %v14003_v42, %v10636_v41  ;;  %v14075_v53 = vld [vmem:[%s15354_s20 + $0x478] sm:$0xf0]  ;;  %v10456_v42 = vld [vmem:[%s15354_s20 + $0xb0] sm:$0xf] }
 0x1d5   : > { %2827 = vmatpush.bf16.msrb.mxu2 %v10813_v54  ;;  %2846 = vmatpush.bf16.msrb.mxu3 %v11101_v18  ;;  %v11212_v54 = vld [vmem:[%s15354_s20 + $0x698] sm:$0xf]  ;;  %v14147_v18 = vld [vmem:[%s15354_s20 + $0x6b8] sm:$0xf0]  ;;  %v10925_v55 = vor.u32 %v14075_v53, %v10924_v52  ;;  %v13958_v52 = vld [vmem:[%s15354_s20 + $0xd0] sm:$0xf0] }
 0x1d6   : > { %2647 = vmatmul.bf16.gmra.mxu0 %v15775_v60  ;;  %2666 = vmatmul.bf16.gmra.mxu1 %v15777_v50  ;;  %v11213_v56 = vor.u32 %v14147_v18, %v11212_v54  ;;  %v14111_v33 = vld [vmem:[%s15354_s20 + $0x598] sm:$0xf0] }
 0x1d7   : > { %2685 = vmatmul.bf16.gmra.mxu2 %v15779_v51  ;;  %2704 = vmatmul.bf16.gmra.mxu3 %v15775_v60 }
 0x1d8   : > { %2790 = vmatpush.bf16.msrb.mxu0 %v11061_v0  ;;  %2809 = vmatpush.bf16.msrb.mxu1 %v10489_v2  ;;  %v14066_v0 = vld [vmem:[%s15354_s20 + $0x430] sm:$0xf0]  ;;  %v11176_v2 = vld [vmem:[%s15354_s20 + $0x650] sm:$0xf] }
 0x1d9   : > { %2828 = vmatpush.bf16.msrb.mxu2 %v10777_v3  ;;  %2847 = vmatpush.bf16.msrb.mxu3 %v11065_v4  ;;  %v14138_v3 = vld [vmem:[%s15354_s20 + $0x670] sm:$0xf0]  ;;  %v10889_v5 = vor.u32 %v14066_v0, %v10888_v17  ;;  %v10457_v17 = vor.u32 %v13958_v52, %v10456_v42 }
 0x1da   : > { %v11177_v43 = vor.u32 %v14138_v3, %v11176_v2  ;;  %v10420_v2 = vld [vmem:[%s15354_s20 + $0x68] sm:$0xf]  ;;  %v13949_v3 = vld [vmem:[%s15354_s20 + $0x88] sm:$0xf0] }
 0x1db   : > { %v10421_v7 = vor.u32 %v13949_v3, %v10420_v2 }
 0x1dc   : > { %2791 = vmatpush.bf16.msrb.mxu0 %v11025_v10  ;;  %2810 = vmatpush.bf16.msrb.mxu1 %v10453_v44  ;;  %v11140_v10 = vld [vmem:[%s15354_s20 + $0x608] sm:$0xf]  ;;  %v14129_v44 = vld [vmem:[%s15354_s20 + $0x628] sm:$0xf0] }
 0x1dd   : > { %2829 = vmatpush.bf16.msrb.mxu2 %v10741_v14  ;;  %2848 = vmatpush.bf16.msrb.mxu3 %v11029_v15  ;;  %v11141_v13 = vor.u32 %v14129_v44, %v11140_v10  ;;  %v10528_v14 = vld [vmem:[%s15354_s20 + $0x140] sm:$0xf]  ;;  %v13976_v15 = vld [vmem:[%s15354_s20 + $0x160] sm:$0xf0] }
 0x1e0   : > { %2792 = vmatpush.bf16.msrb.mxu0 %v10989_v19  ;;  %2811 = vmatpush.bf16.msrb.mxu1 %v10417_v20 }
 0x1e1   : > { %2830 = vmatpush.bf16.msrb.mxu2 %v10705_v35  ;;  %2849 = vmatpush.bf16.msrb.mxu3 %v10993_v21  ;;  %v10529_v21 = vor.u32 %v13976_v15, %v10528_v14  ;;  %v10672_v14 = vld [vmem:[%s15354_s20 + $0x260] sm:$0xf] }
 0x1e3   : > { %v16031_v29 = vpop.f32.mrf.mxu0  ;;  %v16033_v30 = vpop.f32.mrf.mxu1 }
 0x1e4   : > { %2793 = vmatpush.bf16.msrb.mxu0 %v10953_v34  ;;  %2812 = vmatpush.bf16.msrb.mxu1 %v10381_v39  ;;  %v10493_v34 = vor.u32 %v13967_v25, %v10492_v24  ;;  %v10781_v39 = vor.u32 %v14039_v28, %v10780_v27 }
 0x1e5   : > { %2831 = vmatpush.bf16.msrb.mxu2 %v10669_v12  ;;  %2850 = vmatpush.bf16.msrb.mxu3 %v10957_v49  ;;  %v11069_v12 = vor.u32 %v14111_v33, %v11068_v40 }
 0x1e6   : > { %2718 = vmatmul.bf16.vlgmr.msra.gmra.mxu0 %v15709_v22  ;;  %2737 = vmatmul.bf16.vlgmr.msra.gmra.mxu1 %v15711_v23 }
 0x1e7   : > { %2756 = vmatmul.bf16.vlgmr.msra.gmra.mxu2 %v15707_v48  ;;  %2775 = vmatmul.bf16.vlgmr.msra.gmra.mxu3 %v15709_v22 }
 0x1e8   : > { %2862 = vmatpush.bf16.msra.mxu0 %v10637_v36  ;;  %2881 = vmatpush.bf16.msra.mxu1 %v10925_v55  ;;  %v10744_v36 = vld [vmem:[%s15354_s20 + $0x2f0] sm:$0xf]  ;;  %v14030_v55 = vld [vmem:[%s15354_s20 + $0x310] sm:$0xf0] }
 0x1e9   : > { %2900 = vmatpush.bf16.msra.mxu2 %v11213_v56  ;;  %v11032_v56 = vld [vmem:[%s15354_s20 + $0x530] sm:$0xf] }
 0x1ea   : > { %v16050_v61 = vpop.f32.mrf.mxu2  ;;  %v16052_v31 = vpop.f32.mrf.mxu3  ;;  %v11033_v0 = vor.u32 %v14102_v57, %v11032_v56 }
 0x1eb   : > { %v16057_v4 = vpop.f32.mrf.mxu0  ;;  %v16059_v62 = vpop.f32.mrf.mxu1 }
 0x1ec   : > { %2863 = vmatpush.bf16.msra.mxu0 %v10601_v63  ;;  %2882 = vmatpush.bf16.msra.mxu1 %v10889_v5  ;;  %v10745_v63 = vor.u32 %v14030_v55, %v10744_v36  ;;  %v10708_v5 = vld [vmem:[%s15354_s20 + $0x2a8] sm:$0xf]  ;;  %v2437_v33 = vadd.f32 %v16059_v62, %v16057_v4 }
 0x1ed   : > { %2901 = vmatpush.bf16.msra.mxu2 %v11177_v43  ;;  %v14021_v43 = vld [vmem:[%s15354_s20 + $0x2c8] sm:$0xf0] }
 0x1f0   : > { %2864 = vmatpush.bf16.msra.mxu0 %v10565_v8  ;;  %2883 = vmatpush.bf16.msra.mxu1 %v10853_v11  ;;  %v10709_v8 = vor.u32 %v14021_v43, %v10708_v5  ;;  %v10384_v11 = vld [vmem:[%s15354_s20 + $0x20] sm:$0xf] }
 0x1f1   : > { %2902 = vmatpush.bf16.msra.mxu2 %v11141_v13  ;;  %v13940_v13 = vld [vmem:[%s15354_s20 + $0x40] sm:$0xf0] }
 0x1f2   : > { %v16070_v45 = vpop.f32.mrf.mxu2  ;;  %v16072_v46 = vpop.f32.mrf.mxu3 }
 0x1f3   : > { %v2420_v19 = vpop.f32.mrf.mxu0  ;;  %v2439_v20 = vpop.f32.mrf.mxu1 }
 0x1f4   : > { %v2440_v35 = vadd.f32 %v2439_v20, %v2420_v19  ;;  %2865 = vmatpush.bf16.msra.mxu0 %v10529_v21  ;;  %2884 = vmatpush.bf16.msra.mxu1 %v10817_v37  ;;  %v14084_v19 = vld [vmem:[%s15354_s20 + $0x4c0] sm:$0xf0]  ;;  %v10385_v20 = vor.u32 %v13940_v13, %v10384_v11  ;;  %s15173_s20 = smov 64  }
 0x1f5   : > { %2903 = vmatpush.bf16.msra.mxu2 %v11105_v58  ;;  %v10961_v21 = vor.u32 %v14084_v19, %v10960_v26  ;;  %v2435_v58 = vadd.f32 %v16033_v30, %v16031_v29 }
 0x1f6   : > { %2723 = vmatmul.bf16.gmra.mxu0 %v15777_v50  ;;  %2742 = vmatmul.bf16.gmra.mxu1 %v15779_v51 }
 0x1f7   : > { %2761 = vmatmul.bf16.gmra.mxu2 %v15775_v60  ;;  %2780 = vmatmul.bf16.gmra.mxu3 %v15777_v50 }
 0x1f8   : > { %2866 = vmatpush.bf16.msra.mxu0 %v10493_v34  ;;  %2885 = vmatpush.bf16.msra.mxu1 %v10781_v39  ;;  %v2456_v39 = vadd.f32 %v16070_v45, %v2437_v33 }
 0x1f9   : > { %2904 = vmatpush.bf16.msra.mxu2 %v11069_v12 }
 0x1fa   : > { %v2458_v49 = vpop.f32.mrf.mxu2  ;;  %v16087_v41 = vpop.f32.mrf.mxu3 }
 0x1fb   : > { %v16092_v53 = vadd.f32 %v2458_v49, %v2440_v35  ;;  %v2422_v54 = vpop.f32.mrf.mxu0  ;;  %v2441_v18 = vpop.f32.mrf.mxu1  ;;  %v10673_v35 = vor.u32 %v14012_v32, %v10672_v14 }
 0x1fc   : > { %v2442_v59 = vadd.f32 %v2441_v18, %v2422_v54  ;;  %2867 = vmatpush.bf16.msra.mxu0 %v10457_v17  ;;  %2886 = vmatpush.bf16.msra.mxu1 %v10745_v63 }
 0x1fd   : > { %2905 = vmatpush.bf16.msra.mxu2 %v11033_v0 }
 0x200   : > { %2868 = vmatpush.bf16.msra.mxu0 %v10421_v7  ;;  %2887 = vmatpush.bf16.msra.mxu1 %v10709_v8 }
 0x201   : > { %2906 = vmatpush.bf16.msra.mxu2 %v10997_v9 }
 0x202   : > { %v2460_v10 = vpop.f32.mrf.mxu2  ;;  %v2479_v44 = vpop.f32.mrf.mxu3 }
 0x203   : > { %v2461_v15 = vadd.f32 %v2460_v10, %v2442_v59  ;;  %v2491_v16 = vpop.f32.mrf.mxu0  ;;  %v2510_v47 = vpop.f32.mrf.mxu1 }
 0x204   : > { %v2492_v37 = vadd.f32 %v2491_v16, %v16052_v31  ;;  %2869 = vmatpush.bf16.msra.mxu0 %v10385_v20  ;;  %2888 = vmatpush.bf16.msra.mxu1 %v10673_v35  ;;  %v2454_v31 = vadd.f32 %v16050_v61, %v2435_v58 }
 0x205   : > { %2907 = vmatpush.bf16.msra.mxu2 %v10961_v21 }
 0x206   : > { %2794 = vmatmul.bf16.vlgmr.msrb.gmra.mxu0 %v15711_v23  ;;  %2813 = vmatmul.bf16.vlgmr.msrb.gmra.mxu1 %v15707_v48  ;;  %v2511_v24 = vadd.f32 %v2510_v47, %v2492_v37 }
 0x207   : > { %2832 = vmatmul.bf16.vlgmr.msrb.gmra.mxu2 %v15709_v22  ;;  %2851 = vmatmul.bf16.vlgmr.msrb.gmra.mxu3 %v15711_v23 }
 0x208   : > { %v2919_v12 = vpack.c.bf16 %v2511_v24, %v2454_v31 }
 0x20a   : > { %v2529_v25 = vpop.f32.mrf.mxu2  ;;  %v2548_v27 = vpop.f32.mrf.mxu3  ;;  %v2943_v52 = vunpack.c.l.b16 %v2919_v12  ;;  %v3199_v59 = vunpack.c.h.b16 %v2919_v12 }
 0x20b   : > { %v2493_v28 = vpop.f32.mrf.mxu0  ;;  %v2512_v40 = vpop.f32.mrf.mxu1  ;;  %v2549_v16 = vadd.f32 %v2548_v27, %v2529_v25 }
 0x20c   : > { %v2494_v34 = vadd.f32 %v2493_v28, %v16072_v46 }
 0x20e   : > { %v2513_v49 = vadd.f32 %v2512_v40, %v2494_v34 }
 0x210   : > { %v2924_v42 = vpack.c.bf16 %v2513_v49, %v2456_v39 }
 0x212   : > { %v2944_v36 = vunpack.c.l.b16 %v2924_v42  ;;  %v2531_v29 = vpop.f32.mrf.mxu2  ;;  %v2550_v30 = vpop.f32.mrf.mxu3  ;;  %v3200_v62 = vunpack.c.h.b16 %v2924_v42 }
 0x213   : > { %v2496_v54 = vpop.f32.mrf.mxu0  ;;  %v2515_v18 = vpop.f32.mrf.mxu1  ;;  %v2551_v19 = vadd.f32 %v2550_v30, %v2531_v29 }
 0x214   : > { %v2497_v55 = vadd.f32 %v2496_v54, %v16087_v41  ;;  %v16122_v56 = vpack.c.b16 %v2944_v36, %v2943_v52  ;;  %v16131_v0 = vpack.c.b16 %v3200_v62, %v3199_v59 }
 0x216   : > { %v2516_v61 = vadd.f32 %v2515_v18, %v2497_v55  ;;  %2799 = vmatmul.bf16.gmra.mxu0 %v15779_v51  ;;  %2818 = vmatmul.bf16.gmra.mxu1 %v15775_v60 }
 0x217   : > { %2837 = vmatmul.bf16.gmra.mxu2 %v15777_v50  ;;  %2856 = vmatmul.bf16.gmra.mxu3 %v15779_v51 }
 0x218   : > { %v2929_v4 = vpack.c.bf16 %v2516_v61, %v16092_v53  ;;  %3079 = vrot.lane.b32.xlu1 %v16122_v56, %s15173_s20 }
 0x21a   : > { %v2534_v45 = vpop.f32.mrf.mxu2  ;;  %v2553_v46 = vpop.f32.mrf.mxu3  ;;  %v2945_v3 = vunpack.c.l.b16 %v2929_v4  ;;  %v3201_v53 = vunpack.c.h.b16 %v2929_v4 }
 0x21b   : > { %v2498_v41 = vpop.f32.mrf.mxu0  ;;  %v2517_v57 = vpop.f32.mrf.mxu1 }
 0x21c   : > { %v2499_v17 = vadd.f32 %v2498_v41, %v2479_v44 }
 0x21e   : > { %v2518_v63 = vadd.f32 %v2517_v57, %v2499_v17 }
 0x220   : > { %v2934_v2 = vpack.c.bf16 %v2518_v63, %v2461_v15  ;;  %3329 = vrot.lane.b32.xlu1 %v16131_v0, %s15173_s20 }
 0x222   : > { %v2946_v5 = vunpack.c.l.b16 %v2934_v2  ;;  %v3202_v43 = vunpack.c.h.b16 %v2934_v2  ;;  %v2536_v6 = vpop.f32.mrf.mxu2  ;;  %v2555_v1 = vpop.f32.mrf.mxu3 }
 0x223   : > { %v2567_v7 = vpop.f32.mrf.mxu0  ;;  %v2586_v8 = vpop.f32.mrf.mxu1  ;;  %v2556_v36 = vadd.f32 %v2555_v1, %v2536_v6 }
 0x224   : > { %v16135_v9 = vpack.c.b16 %v2946_v5, %v2945_v3  ;;  %v16137_v10 = vpack.c.b16 %v3202_v43, %v3201_v53  ;;  %v2568_v20 = vadd.f32 %v2567_v7, %v2549_v16 }
 0x226   : > { %2870 = vmatmul.bf16.vlgmr.msra.gmra.mxu0 %v15707_v48  ;;  %2889 = vmatmul.bf16.vlgmr.msra.gmra.mxu1 %v15709_v22 }
 0x227   : > { %2908 = vmatmul.bf16.vlgmr.msra.gmra.mxu2 %v15711_v23 }
 0x22a   : > { %v2605_v44 = vpop.f32.mrf.mxu2  ;;  %v2624_v11 = vpop.f32.mrf.mxu3 }
 0x22b   : > { %v2569_v13 = vpop.f32.mrf.mxu0  ;;  %v2588_v14 = vpop.f32.mrf.mxu1  ;;  %v2606_v15 = vadd.f32 %v2605_v44, %v2586_v8 }
 0x22c   : > { %v2570_v48 = vadd.f32 %v2569_v13, %v2551_v19 }
 0x22d   : > { %v2625_v47 = vadd.f32 %v2624_v11, %v2606_v15 }
 0x22f   : > { %v2920_v58 = vpack.c.bf16 %v2625_v47, %v2568_v20 }
 0x231   : > { %v2953_v23 = vunpack.c.h.b16 %v2920_v58  ;;  %v3449_v25 = vunpack.c.l.b16 %v2920_v58 }
 0x232   : > { %v2607_v32 = vpop.f32.mrf.mxu2  ;;  %v2626_v26 = vpop.f32.mrf.mxu3 }
 0x233   : > { %v2608_v35 = vadd.f32 %v2607_v32, %v2588_v14  ;;  %v2572_v21 = vpop.f32.mrf.mxu0  ;;  %v2591_v37 = vpop.f32.mrf.mxu1 }
 0x235   : > { %v2627_v24 = vadd.f32 %v2626_v26, %v2608_v35 }
 0x236   : > { %2875 = vmatmul.bf16.gmra.mxu0 %v15775_v60  ;;  %2894 = vmatmul.bf16.gmra.mxu1 %v15777_v50  ;;  %v2554_v60 = vadd.f32 %v2553_v46, %v2534_v45 }
 0x237   : > { %v2925_v22 = vpack.c.bf16 %v2627_v24, %v2570_v48  ;;  %2913 = vmatmul.bf16.gmra.mxu2 %v15779_v51 }
 0x238   : > { %v2573_v51 = vadd.f32 %v2572_v21, %v2554_v60 }
 0x239   : > { %v2954_v27 = vunpack.c.h.b16 %v2925_v22  ;;  %v3450_v28 = vunpack.c.l.b16 %v2925_v22 }
 0x23a   : > { %v2610_v40 = vpop.f32.mrf.mxu2  ;;  %v2629_v31 = vpop.f32.mrf.mxu3 }
 0x23b   : > { %v2574_v33 = vpop.f32.mrf.mxu0  ;;  %v2593_v34 = vpop.f32.mrf.mxu1  ;;  %v2957_v39 = vpack.c.b16 %v2954_v27, %v2953_v23  ;;  %v16145_v12 = vpack.c.b16 %v3450_v28, %v3449_v25  ;;  %v2611_v49 = vadd.f32 %v2610_v40, %v2591_v37 }
 0x23c   : > { %v2575_v55 = vadd.f32 %v2574_v33, %v2556_v36 }
 0x23d   : > { %3083 = vrot.lane.b32.xlu0 %v2957_v39, %s15173_s20  ;;  %v2630_v42 = vadd.f32 %v2629_v31, %v2611_v49  ;;  %v2967_v7 = vsel %vm2959_vm13, %v2957_v39, 0 }
 0x23f   : > { %v2930_v18 = vpack.c.bf16 %v2630_v42, %v2573_v51 }
 0x241   : > { %v2955_v62 = vunpack.c.h.b16 %v2930_v18  ;;  %v3451_v41 = vunpack.c.l.b16 %v2930_v18 }
 0x242   : > { %v2612_v50 = vpop.f32.mrf.mxu2  ;;  %v2631_v52 = vpop.f32.mrf.mxu3 }
 0x243   : > { %v2613_v29 = vadd.f32 %v2612_v50, %v2593_v34  ;;  %v2643_v30 = vpop.f32.mrf.mxu0  ;;  %v2662_v54 = vpop.f32.mrf.mxu1 }
 0x244   : > { %v2663_v26 = vadd.f32 %v2662_v54, %v2643_v30 }
 0x245   : > { %v2632_v61 = vadd.f32 %v2631_v52, %v2613_v29 }
 0x247   : > { %v2935_v4 = vpack.c.bf16 %v2632_v61, %v2575_v55 }
 0x249   : > { %v2956_v57 = vunpack.c.h.b16 %v2935_v4  ;;  %v3452_v59 = vunpack.c.l.b16 %v2935_v4 }
 0x24a   : > { %v2681_v17 = vpop.f32.mrf.mxu2  ;;  %v2700_v63 = vpop.f32.mrf.mxu3 }
 0x24b   : > { %v2645_v2 = vpop.f32.mrf.mxu0  ;;  %v2664_v45 = vpop.f32.mrf.mxu1  ;;  %v2958_v46 = vpack.c.b16 %v2956_v57, %v2955_v62  ;;  %v16148_v3 = vpack.c.b16 %v3452_v59, %v3451_v41  ;;  %v2682_v58 = vadd.f32 %v2681_v17, %v2663_v26 }
 0x24c   : > { %v2665_v48 = vadd.f32 %v2664_v45, %v2645_v2 }
 0x24d   : > { %3085 = vrot.lane.b32.xlu2 %v2958_v46, %s15173_s20  ;;  %v2970_v53 = vsel %vm2959_vm13, %v2958_v46, 0 }
 0x24e   : > { %2978 = vmatpush.bf16.xpose.msra.mxu3 %v2970_v53 }
 0x252   : > { %v2683_v5 = vpop.f32.mrf.mxu2  ;;  %v2702_v43 = vpop.f32.mrf.mxu3 }
 0x253   : > { %v2648_v6 = vpop.f32.mrf.mxu0  ;;  %v2667_v1 = vpop.f32.mrf.mxu1  ;;  %v2684_v22 = vadd.f32 %v2683_v5, %v2665_v48 }
 0x255   : > { %3081 = vrot.lane.b32.xlu2 %v16135_v9, %s15173_s20 }
 0x256   : > { %2979 = vmatpush.bf16.xpose.msra.mxu3 %v2967_v7 }
 0x25a   : > { %v2686_v8 = vpop.f32.mrf.mxu2  ;;  %v2705_v44 = vpop.f32.mrf.mxu3 }
 0x25b   : > { %v2650_v11 = vpop.f32.mrf.mxu0  ;;  %v2669_v13 = vpop.f32.mrf.mxu1 }
 0x25c   : > { %v2670_v18 = vadd.f32 %v2669_v13, %v2650_v11 }
 0x25d   : > { %11214 = vmatmul.msk.bf16.vlgmr.msra.gmra.mxu3 %vm2959_vm13, %v16122_v56 }
 0x262   : > { %v2688_v14 = vpop.f32.mrf.mxu2  ;;  %v2707_v15 = vpop.f32.mrf.mxu3 }
 0x263   : > { %v2719_v16 = vpop.f32.mrf.mxu0  ;;  %v2738_v47 = vpop.f32.mrf.mxu1  ;;  %v2689_v61 = vadd.f32 %v2688_v14, %v2670_v18 }
 0x264   : > { %v2720_v32 = vadd.f32 %v2719_v16, %v2700_v63 }
 0x266   : > { %v2739_v19 = vadd.f32 %v2738_v47, %v2720_v32 }
 0x268   : > { %v2921_v56 = vpack.c.bf16 %v2739_v19, %v2682_v58 }
 0x26a   : > { %v16157_v20 = vpop.f32.mrf.mxu2  ;;  %v2776_v35 = vpop.f32.mrf.mxu3  ;;  %v3209_v27 = vunpack.c.l.b16 %v2921_v56  ;;  %v3455_v28 = vunpack.c.h.b16 %v2921_v56 }
 0x26b   : > { %v2721_v21 = vpop.f32.mrf.mxu0  ;;  %v2740_v37 = vpop.f32.mrf.mxu1 }
 0x26c   : > { %v2722_v24 = vadd.f32 %v2721_v21, %v2702_v43 }
 0x26d   : > { %11215 = vmatmul.msk.bf16.gmra.mxu3 %vm2959_vm13, %v16135_v9  ;;  %v2668_v9 = vadd.f32 %v2667_v1, %v2648_v6 }
 0x26e   : > { %v2741_v23 = vadd.f32 %v2740_v37, %v2722_v24 }
 0x26f   : > { %v2687_v54 = vadd.f32 %v2686_v8, %v2668_v9 }
 0x270   : > { %v2926_v25 = vpack.c.bf16 %v2741_v23, %v2684_v22 }
 0x272   : > { %v3210_v40 = vunpack.c.l.b16 %v2926_v25  ;;  %v3456_v31 = vunpack.c.h.b16 %v2926_v25  ;;  %v2759_v33 = vpop.f32.mrf.mxu2  ;;  %v2778_v34 = vpop.f32.mrf.mxu3 }
 0x273   : > { %v2724_v39 = vpop.f32.mrf.mxu0  ;;  %v2743_v49 = vpop.f32.mrf.mxu1  ;;  %v2779_v32 = vadd.f32 %v2778_v34, %v2759_v33 }
 0x274   : > { %v3459_v60 = vpack.c.b16 %v3456_v31, %v3455_v28  ;;  %v3213_v42 = vpack.c.b16 %v3210_v40, %v3209_v27  ;;  %v2725_v50 = vadd.f32 %v2724_v39, %v2705_v44 }
 0x276   : > { %3583 = vrot.lane.b32.xlu1 %v3459_v60, %s15173_s20  ;;  %3333 = vrot.lane.b32.xlu2 %v3213_v42, %s15173_s20  ;;  %v2744_v52 = vadd.f32 %v2743_v49, %v2725_v50  ;;  %v3222_v13 = vsel %vm2959_vm13, %v3213_v42, 0  ;;  %v3468_v56 = vsel %vm2959_vm13, %v3459_v60, 0 }
 0x278   : > { %v2931_v4 = vpack.c.bf16 %v2744_v52, %v2687_v54 }
 0x27a   : > { %v2762_v36 = vpop.f32.mrf.mxu2  ;;  %v2781_v51 = vpop.f32.mrf.mxu3  ;;  %v3211_v57 = vunpack.c.l.b16 %v2931_v4  ;;  %v3457_v59 = vunpack.c.h.b16 %v2931_v4 }
 0x27b   : > { %v2726_v29 = vpop.f32.mrf.mxu0  ;;  %v2745_v30 = vpop.f32.mrf.mxu1  ;;  %v2782_v31 = vadd.f32 %v2781_v51, %v2762_v36 }
 0x27c   : > { %v2727_v55 = vadd.f32 %v2726_v29, %v2707_v15  ;;  %v2777_v15 = vadd.f32 %v2776_v35, %v16157_v20 }
 0x27e   : > { %v2746_v62 = vadd.f32 %v2745_v30, %v2727_v55 }
 0x280   : > { %v2936_v41 = vpack.c.bf16 %v2746_v62, %v2689_v61 }
 0x282   : > { %v3212_v17 = vunpack.c.l.b16 %v2936_v41  ;;  %v3458_v63 = vunpack.c.h.b16 %v2936_v41  ;;  %v2764_v2 = vpop.f32.mrf.mxu2  ;;  %v2783_v45 = vpop.f32.mrf.mxu3 }
 0x283   : > { %v2795_v46 = vpop.f32.mrf.mxu0  ;;  %v2814_v53 = vpop.f32.mrf.mxu1 }
 0x284   : > { %v3214_v5 = vpack.c.b16 %v3212_v17, %v3211_v57  ;;  %v3460_v43 = vpack.c.b16 %v3458_v63, %v3457_v59  ;;  %v2796_v21 = vadd.f32 %v2795_v46, %v2777_v15 }
 0x286   : > { %3335 = vrot.lane.b32.xlu0 %v3214_v5, %s15173_s20  ;;  %3585 = vrot.lane.b32.xlu2 %v3460_v43, %s15173_s20  ;;  %v3225_v6 = vsel %vm2959_vm13, %v3214_v5, 0  ;;  %v3471_v14 = vsel %vm2959_vm13, %v3460_v43, 0 }
 0x287   : > { %3233 = vmatpush.bf16.xpose.msrb.mxu3 %v3225_v6 }
 0x28a   : > { %v2833_v1 = vpop.f32.mrf.mxu2  ;;  %v2852_v7 = vpop.f32.mrf.mxu3 }
 0x28b   : > { %v2797_v8 = vpop.f32.mrf.mxu0  ;;  %v2834_v44 = vadd.f32 %v2833_v1, %v2814_v53  ;;  %v2816_v11 = vpop.f32.mrf.mxu1 }
 0x28c   : > { %v2798_v37 = vadd.f32 %v2797_v8, %v2779_v32  ;;  %v3080_v63 = vpop.permute.xlu1 %3079 }
 0x28d   : > { %v2853_v16 = vadd.f32 %v2852_v7, %v2834_v44 }
 0x28e   : > { %3331 = vrot.lane.b32.xlu0 %v16137_v10, %s15173_s20  ;;  %3581 = vrot.lane.b32.xlu2 %v16148_v3, %s15173_s20 }
 0x28f   : > { %3234 = vmatpush.bf16.xpose.msrb.mxu3 %v3222_v13  ;;  %v2922_v48 = vpack.c.bf16 %v2853_v16, %v2796_v21 }
 0x291   : > { %v3046_v23 = vunpack.c.l.b16 %v2922_v48 }
 0x292   : > { %v2835_v47 = vpop.f32.mrf.mxu2  ;;  %v2854_v19 = vpop.f32.mrf.mxu3 }
 0x293   : > { %v2836_v26 = vadd.f32 %v2835_v47, %v2816_v11  ;;  %v2800_v22 = vpop.f32.mrf.mxu0  ;;  %v2819_v20 = vpop.f32.mrf.mxu1 }
 0x294   : > { %v2801_v42 = vadd.f32 %v2800_v22, %v2782_v31 }
 0x295   : > { %v2855_v58 = vadd.f32 %v2854_v19, %v2836_v26 }
 0x296   : > { %3579 = vrot.lane.b32.xlu0 %v16145_v12, %s15173_s20  ;;  %11222 = vmatmul.msk.bf16.vlgmr.msrb.gmra.mxu3 %vm2959_vm13, %v16131_v0  ;;  %v2784_v0 = vadd.f32 %v2783_v45, %v2764_v2  ;;  %v766_v45 = vlaneseq }
 0x297   : > { %3479 = vmatpush.bf16.xpose.msra.mxu3 %v3471_v14  ;;  %v2927_v24 = vpack.c.bf16 %v2855_v58, %v2798_v37 }
 0x298   : > { %v767_v46 = vshrl.u32 %v766_v45, 7  ;;  %v772_v53 = vand.u32 127, %v766_v45 }
 0x299   : > { %v3047_v35 = vunpack.c.l.b16 %v2927_v24  ;;  %v3297_v41 = vunpack.c.h.b16 %v2927_v24  ;;  %v3330_v24 = vpop.permute.xlu1 %3329 }
 0x29a   : > { %v2838_v25 = vpop.f32.mrf.mxu2  ;;  %v2857_v27 = vpop.f32.mrf.mxu3  ;;  %vm16196_vm14 = vcmp.le.s32.totalorder %v772_v53, %v767_v46  ;;  %v769_v11 = vadd.s32 16, %v767_v46  ;;  %v770_v47 = vadd.s32 24, %v767_v46 }
 0x29b   : > { %v3050_v28 = vpack.c.b16 %v3047_v35, %v3046_v23  ;;  %v2839_v40 = vadd.f32 %v2838_v25, %v2819_v20  ;;  %v2802_v34 = vpop.f32.mrf.mxu0  ;;  %v2821_v39 = vpop.f32.mrf.mxu1 }
 0x29c   : > { %v2803_v52 = vadd.f32 %v2802_v34, %v2784_v0  ;;  %vm16216_vm1 = vcmp.le.s32.totalorder %v772_v53, %v769_v11  ;;  %vm16226_vm2 = vcmp.le.s32.totalorder %v772_v53, %v770_v47 }
 0x29d   : > { %v2858_v33 = vadd.f32 %v2857_v27, %v2839_v40 }
 0x29e   : > { %3168 = vrot.lane.b32.xlu0 %v3050_v28, %s15173_s20 }
 0x29f   : > { %3480 = vmatpush.bf16.xpose.msra.mxu3 %v3468_v56  ;;  %v2932_v60 = vpack.c.bf16 %v2858_v33, %v2801_v42 }
 0x2a1   : > { %v3048_v55 = vunpack.c.l.b16 %v2932_v60  ;;  %v3298_v4 = vunpack.c.h.b16 %v2932_v60 }
 0x2a2   : > { %v2840_v49 = vpop.f32.mrf.mxu2  ;;  %v2859_v9 = vpop.f32.mrf.mxu3 }
 0x2a3   : > { %v2841_v50 = vadd.f32 %v2840_v49, %v2821_v39  ;;  %v16241_v25 = vpop.f32.mrf.mxu1 }
 0x2a5   : > { %v2860_v29 = vadd.f32 %v2859_v9, %v2841_v50 }
 0x2a6   : > { %11223 = vmatmul.msk.bf16.gmra.mxu3 %vm2959_vm13, %v16137_v10  ;;  %v3296_v10 = vunpack.c.h.b16 %v2922_v48 }
 0x2a7   : > { %v2937_v30 = vpack.c.bf16 %v2860_v29, %v2803_v52  ;;  %v3086_v54 = vpop.permute.xlu2 %3085 }
 0x2a8   : > { %v3097_v18 = vsel %vm2959_vm13, %v3086_v54, 0  ;;  %v16187_v17 = vpack.c.b16 %v3297_v41, %v3296_v10 }
 0x2a9   : > { %v3049_v36 = vunpack.c.l.b16 %v2937_v30  ;;  %3105 = vmatpush.bf16.xpose.msrb.mxu1 %v3097_v18  ;;  %v3299_v61 = vunpack.c.h.b16 %v2937_v30 }
 0x2ab   : > { %v3051_v51 = vpack.c.b16 %v3049_v36, %v3048_v55  ;;  %v16184_v59 = vpack.c.b16 %v3299_v61, %v3298_v4 }
 0x2ad   : > { %3066 = vmatpush.bf16.msrb.mxu0 %v3051_v51  ;;  %3170 = vrot.lane.b32.xlu1 %v3051_v51, %s15173_s20 }
 0x2af   : > { %v3084_v62 = vpop.permute.xlu0 %3083  ;;  %v3082_v2 = vpop.permute.xlu2 %3081 }
 0x2b0   : > { %v3094_v57 = vsel %vm2959_vm13, %v3084_v62, 0 }
 0x2b1   : > { %3067 = vmatpush.bf16.msrb.mxu0 %v3050_v28  ;;  %3106 = vmatpush.bf16.xpose.msrb.mxu1 %v3094_v57  ;;  %v16243_v28 = vpop.f32.mrf.mxu1 }
 0x2b5   : > { %3316 = vmatpush.bf16.msra.mxu0 %v16184_v59 }
 0x2b6   : > { %11230 = vmatmul.msk.bf16.vlgmr.msra.gmra.mxu3 %vm2959_vm13, %v16145_v12 }
 0x2b8   : > { %11218 = vmatmul.msk.bf16.vlgmr.msrb.gmra.mxu1 %vm2959_vm13, %v3080_v63 }
 0x2b9   : > { %3317 = vmatpush.bf16.msra.mxu0 %v16187_v17  ;;  %v16256_v42 = vpop.f32.mrf.mxu1 }
 0x2c1   : > { %v16261_v60 = vpop.f32.mrf.mxu1 }
 0x2c6   : > { %11231 = vmatmul.msk.bf16.gmra.mxu3 %vm2959_vm13, %v16148_v3  ;;  %v768_v3 = vadd.s32 8, %v767_v46 }
 0x2c8   : > { %11219 = vmatmul.msk.bf16.gmra.mxu1 %vm2959_vm13, %v3082_v2  ;;  %vm16206_vm0 = vcmp.le.s32.totalorder %v772_v53, %v768_v3 }
 0x2d0   : > { %v3334_v26 = vpop.permute.xlu2 %3333 }
 0x2d1   : > { %v3344_v56 = vsel %vm2959_vm13, %v3334_v26, 0 }
 0x2e0   : > { %v2981_v43 = vpop.f32.mrf.mxu3  ;;  %v3586_v22 = vpop.permute.xlu2 %3585 }
 0x2e1   : > { %v16202_v12 = vsel %vm16196_vm14, %v2981_v43, -inf  ;;  %v3597_v20 = vsel %vm2959_vm13, %v3586_v22, 0 }
 0x2e2   : > { %v2996_v6 = vsel %vm2995_vm15, %v16202_v12, -inf }
 0x2e3   : > { %2997 = vmax.xlane.f32.xlu1 %v2996_v6 }
 0x2e8   : > { %v2983_v7 = vpop.f32.mrf.mxu3  ;;  %v3584_v35 = vpop.permute.xlu1 %3583 }
 0x2e9   : > { %v16212_v8 = vsel %vm16206_vm0, %v2983_v7, -inf  ;;  %v3594_v23 = vsel %vm2959_vm13, %v3584_v35, 0  ;;  %v3582_v54 = vpop.permute.xlu2 %3581 }
 0x2ea   : > { %v2999_v44 = vsel %vm2995_vm15, %v16212_v8, -inf }
 0x2eb   : > { %3000 = vmax.xlane.f32.xlu0 %v2999_v44 }
 0x2f0   : > { %v2986_v14 = vpop.f32.mrf.mxu3 }
 0x2f1   : > { %v16222_v15 = vsel %vm16216_vm1, %v2986_v14, -inf }
 0x2f2   : > { %v3002_v16 = vsel %vm2995_vm15, %v16222_v15, -inf }
 0x2f3   : > { %3003 = vmax.xlane.f32.xlu0 %v3002_v16 }
 0x2f8   : > { %v2988_v19 = vpop.f32.mrf.mxu3  ;;  %v3336_v21 = vpop.permute.xlu0 %3335 }
 0x2f9   : > { %v3347_v37 = vsel %vm2959_vm13, %v3336_v21, 0  ;;  %v16233_v58 = vsel %vm16226_vm2, %v2988_v19, -inf }
 0x2fa   : > { %3355 = vmatpush.bf16.xpose.msra.mxu1 %v3347_v37  ;;  %v3005_v48 = vsel %vm2995_vm15, %v16233_v58, -inf }
 0x2fb   : > { %3006 = vmax.xlane.f32.xlu2 %v3005_v48 }
 0x300   : > { %v3332_v27 = vpop.permute.xlu0 %3331 }
 0x302   : > { %3356 = vmatpush.bf16.xpose.msra.mxu1 %v3344_v56 }
 0x308   : > { %v3580_v40 = vpop.permute.xlu0 %3579 }
 0x309   : > { %11226 = vmatmul.msk.bf16.vlgmr.msra.gmra.mxu1 %vm2959_vm13, %v3330_v24 }
 0x30a   : > { %3605 = vmatpush.bf16.xpose.msrb.mxu1 %v3597_v20 }
 0x310   : > { %v3169_v50 = vpop.permute.xlu0 %3168 }
 0x312   : > { %3606 = vmatpush.bf16.xpose.msrb.mxu1 %v3594_v23 }
 0x319   : > { %v3236_v31 = vpop.f32.mrf.mxu3  ;;  %11227 = vmatmul.msk.bf16.gmra.mxu1 %vm2959_vm13, %v3332_v27 }
 0x31a   : > { %v16248_v33 = vsel %vm16196_vm14, %v3236_v31, -inf }
 0x31b   : > { %v3250_v34 = vsel %vm2995_vm15, %v16248_v33, -inf }
 0x31c   : > { %3251 = vmax.xlane.f32.xlu0 %v3250_v34 }
 0x31f   : > { %v3171_v39 = vpop.permute.xlu1 %3170 }
 0x320   : > { %3186 = vmatpush.bf16.msrb.mxu2 %v3171_v39 }
 0x321   : > { %v3238_v49 = vpop.f32.mrf.mxu3 }
 0x322   : > { %v16254_v0 = vsel %vm16206_vm0, %v3238_v49, -inf }
 0x323   : > { %v3253_v9 = vsel %vm2995_vm15, %v16254_v0, -inf }
 0x324   : > { %3187 = vmatpush.bf16.msrb.mxu2 %v3169_v50  ;;  %3254 = vmax.xlane.f32.xlu2 %v3253_v9 }
 0x329   : > { %11234 = vmatmul.msk.bf16.vlgmr.msrb.gmra.mxu1 %vm2959_vm13, %v3580_v40 }
 0x335   : > { %v3108_v52 = vpop.f32.mrf.mxu1 }
 0x336   : > { %v3118_v29 = vsel %vm16196_vm14, %v3108_v52, -inf  ;;  %v3241_v52 = vpop.f32.mrf.mxu3 }
 0x337   : > { %v3122_v30 = vsel %vm2995_vm15, %v3118_v29, -inf }
 0x338   : > { %3123 = vmax.xlane.f32.xlu1 %v3122_v30 }
 0x339   : > { %11235 = vmatmul.msk.bf16.gmra.mxu1 %vm2959_vm13, %v3582_v54  ;;  %v16337_v54 = vsel %vm16216_vm1, %v3241_v52, -inf  ;;  %v2871_v52 = vpop.f32.mrf.mxu0 }
 0x33d   : > { %v3110_v18 = vpop.f32.mrf.mxu1 }
 0x33e   : > { %v3119_v55 = vsel %vm16206_vm0, %v3110_v18, -inf }
 0x33f   : > { %v3125_v36 = vsel %vm2995_vm15, %v3119_v55, -inf }
 0x340   : > { %3126 = vmax.xlane.f32.xlu0 %v3125_v36 }
 0x345   : > { %v3113_v51 = vpop.f32.mrf.mxu1 }
 0x346   : > { %v3120_v61 = vsel %vm16216_vm1, %v3113_v51, -inf  ;;  %v3256_v51 = vsel %vm2995_vm15, %v16337_v54, -inf }
 0x347   : > { %v3128_v4 = vsel %vm2995_vm15, %v3120_v61, -inf }
 0x348   : > { %3129 = vmax.xlane.f32.xlu2 %v3128_v4 }
 0x34d   : > { %v3115_v62 = vpop.f32.mrf.mxu1 }
 0x34e   : > { %v16275_v41 = vsel %vm16226_vm2, %v3115_v62, -inf }
 0x34f   : > { %v3131_v57 = vsel %vm2995_vm15, %v16275_v41, -inf }
 0x350   : > { %3132 = vmax.xlane.f32.xlu1 %v3131_v57 }
 0x356   : > { %v2998_v16 = vpop.xlane.xlu1 %2997 }
 0x35e   : > { %v16297_v7 = vpop.xlane.xlu0 %3000 }
 0x366   : > { %v16305_v47 = vpop.xlane.xlu0 %3003 }
 0x36e   : > { %v16313_v37 = vpop.xlane.xlu2 %3006 }
 0x386   : > { %v3358_v10 = vpop.f32.mrf.mxu1 }
 0x387   : > { %v16281_v63 = vsel %vm16196_vm14, %v3358_v10, -inf }
 0x388   : > { %v3372_v2 = vsel %vm2995_vm15, %v16281_v63, -inf }
 0x389   : > { %3373 = vmax.xlane.f32.xlu0 %v3372_v2 }
 0x38e   : > { %v3360_v45 = vpop.f32.mrf.mxu1 }
 0x38f   : > { %v16287_v46 = vsel %vm16206_vm0, %v3360_v45, -inf  ;;  %v16315_v24 = vpop.xlane.xlu0 %3251  ;;  %v3008_v45 = vsub.f32 %v16202_v12, %v2998_v16  ;;  %v3009_v12 = vsub.f32 %v16212_v8, %v16297_v7  ;;  %v3010_v7 = vsub.f32 %v16222_v15, %v16305_v47 }
 0x390   : > { %v3375_v53 = vsel %vm2995_vm15, %v16287_v46, -inf }
 0x391   : > { %3376 = vmax.xlane.f32.xlu2 %v3375_v53 }
 0x396   : > { %v3363_v43 = vpop.f32.mrf.mxu1 }
 0x397   : > { %v16293_v6 = vsel %vm16216_vm1, %v3363_v43, -inf  ;;  %v16323_v27 = vpop.xlane.xlu2 %3254 }
 0x398   : > { %v3378_v3 = vsel %vm2995_vm15, %v16293_v6, -inf }
 0x399   : > { %3379 = vmax.xlane.f32.xlu2 %v3378_v3 }
 0x39e   : > { %v3365_v44 = vpop.f32.mrf.mxu1 }
 0x39f   : > { %v16301_v11 = vsel %vm16226_vm2, %v3365_v44, -inf  ;;  %v3243_v44 = vpop.f32.mrf.mxu3 }
 0x3a0   : > { %v3381_v14 = vsel %vm2995_vm15, %v16301_v11, -inf }
 0x3a1   : > { %3382 = vmax.xlane.f32.xlu1 %v3381_v14  ;;  %v3012_v14 = vmul.f32 1.442695, %v3008_v45 }
 0x3a6   : > { %v3608_v26 = vpop.f32.mrf.mxu1 }
 0x3a7   : > { %v16309_v19 = vsel %vm16196_vm14, %v3608_v26, -inf }
 0x3a8   : > { %v3622_v21 = vsel %vm2995_vm15, %v16309_v19, -inf }
 0x3a9   : > { %3623 = vmax.xlane.f32.xlu2 %v3622_v21 }
 0x3ab   : > { %v3124_v48 = vpop.xlane.xlu1 %3123 }
 0x3ac   : > { %v3134_v22 = vsub.f32 %v3118_v29, %v3124_v48  ;;  %v3014_v48 = vmul.f32 1.442695, %v3009_v12 }
 0x3ae   : > { %v3138_v56 = vmul.f32 1.442695, %v3134_v22  ;;  %v3610_v20 = vpop.f32.mrf.mxu1 }
 0x3af   : > { %v16319_v35 = vsel %vm16206_vm0, %v3610_v20, -inf }
 0x3b0   : > { %14950 = vpow2.f32 %v3138_v56  ;;  %v3625_v23 = vsel %vm2995_vm15, %v16319_v35, -inf  ;;  %v3482_v56 = vpop.f32.mrf.mxu3 }
 0x3b1   : > { %3626 = vmax.xlane.f32.xlu2 %v3625_v23 }
 0x3b3   : > { %v3127_v40 = vpop.xlane.xlu0 %3126 }
 0x3b4   : > { %v3135_v39 = vsub.f32 %v3119_v55, %v3127_v40 }
 0x3b6   : > { %v16325_v31 = vpop.eup %14950  ;;  %v3613_v34 = vpop.f32.mrf.mxu1  ;;  %v3140_v29 = vmul.f32 1.442695, %v3135_v39  ;;  %v3011_v39 = vsub.f32 %v16233_v58, %v16313_v37  ;;  %v16401_v37 = vsel %vm16196_vm14, %v3482_v56, -inf }
 0x3b7   : > { %v16329_v49 = vsel %vm16216_vm1, %v3613_v34, -inf  ;;  %v3146_v50 = vsel %vm2995_vm15, %v16325_v31, 0.0  ;;  %v3016_v34 = vmul.f32 1.442695, %v3010_v7 }
 0x3b8   : > { %3147 = vadd.xlane.f32.xlu0 %v3146_v50  ;;  %v3628_v9 = vsel %vm2995_vm15, %v16329_v49, -inf  ;;  %14952 = vpow2.f32 %v3140_v29  ;;  %v3484_v40 = vpop.f32.mrf.mxu3  ;;  %v3018_v15 = vmul.f32 1.442695, %v3011_v39  ;;  %v3496_v29 = vsel %vm2995_vm15, %v16401_v37, -inf }
 0x3b9   : > { %3629 = vmax.xlane.f32.xlu2 %v3628_v9 }
 0x3bb   : > { %v3130_v30 = vpop.xlane.xlu2 %3129 }
 0x3bc   : > { %v3136_v18 = vsub.f32 %v3120_v61, %v3130_v30  ;;  %v2909_v30 = vpop.f32.mrf.mxu2 }
 0x3be   : > { %v3142_v55 = vmul.f32 1.442695, %v3136_v18  ;;  %v3615_v36 = vpop.f32.mrf.mxu1  ;;  %v16348_v61 = vpop.eup %14952 }
 0x3bf   : > { %v16343_v4 = vsel %vm16226_vm2, %v3615_v36, -inf  ;;  %v3149_v3 = vsel %vm2995_vm15, %v16348_v61, 0.0 }
 0x3c0   : > { %14954 = vpow2.f32 %v3142_v55  ;;  %3257 = vmax.xlane.f32.xlu0 %v3256_v51  ;;  %v3631_v62 = vsel %vm2995_vm15, %v16343_v4, -inf  ;;  %v3487_v18 = vpop.f32.mrf.mxu3 }
 0x3c1   : > { %3632 = vmax.xlane.f32.xlu2 %v3631_v62  ;;  %v16408_v36 = vsel %vm16216_vm1, %v3487_v18, -inf }
 0x3c3   : > { %v3133_v57 = vpop.xlane.xlu1 %3132 }
 0x3c4   : > { %v3137_v10 = vsub.f32 %v16275_v41, %v3133_v57  ;;  %v16359_v41 = vsel %vm16226_vm2, %v3243_v44, -inf  ;;  %v3502_v57 = vsel %vm2995_vm15, %v16408_v36, -inf }
 0x3c5   : > { %v3259_v16 = vsel %vm2995_vm15, %v16359_v41, -inf }
 0x3c6   : > { %v16350_v2 = vpop.eup %14954  ;;  %v3144_v53 = vmul.f32 1.442695, %v3137_v10  ;;  %v2873_v10 = vpop.f32.mrf.mxu0 }
 0x3c7   : > { %v3152_v43 = vsel %vm2995_vm15, %v16350_v2, 0.0 }
 0x3c8   : > { %14956 = vpow2.f32 %v3144_v53  ;;  %3153 = vadd.xlane.f32.xlu1 %v3152_v43  ;;  %v2911_v53 = vpop.f32.mrf.mxu2  ;;  %v2893_v43 = vadd.f32 %v16243_v28, %v2873_v10 }
 0x3c9   : > { %3150 = vadd.xlane.f32.xlu2 %v3149_v3  ;;  %14958 = vpow2.f32 %v3012_v14 }
 0x3ca   : > { %14960 = vpow2.f32 %v3014_v48  ;;  %v2912_v13 = vadd.f32 %v2911_v53, %v2893_v43 }
 0x3cb   : > { %14962 = vpow2.f32 %v3016_v34  ;;  %v3262_v34 = vsub.f32 %v16248_v33, %v16315_v24 }
 0x3cc   : > { %14964 = vpow2.f32 %v3018_v15  ;;  %v3489_v15 = vpop.f32.mrf.mxu3 }
 0x3ce   : > { %v16361_v26 = vpop.eup %14956  ;;  %v2876_v18 = vpop.f32.mrf.mxu0 }
 0x3cf   : > { %v3155_v21 = vsel %vm2995_vm15, %v16361_v26, 0.0  ;;  %v16369_v22 = vpop.eup %14958 }
 0x3d0   : > { %3260 = vmax.xlane.f32.xlu1 %v3259_v16  ;;  %v3020_v20 = vsel %vm2995_vm15, %v16369_v22, 0.0  ;;  %v16375_v8 = vpop.eup %14960 }
 0x3d1   : > { %3156 = vadd.xlane.f32.xlu2 %v3155_v21  ;;  %v3023_v23 = vsel %vm2995_vm15, %v16375_v8, 0.0  ;;  %v16391_v47 = vpop.eup %14962  ;;  %v2928_v21 = vpack.c.bf16 %v2912_v13, %v2912_v13 }
 0x3d2   : > { %v3026_v1 = vsel %vm2995_vm15, %v16391_v47, 0.0  ;;  %v16395_v9 = vpop.eup %14964 }
 0x3d3   : > { %v3029_v58 = vsel %vm2995_vm15, %v16395_v9, 0.0  ;;  %v3547_v56 = vunpack.c.l.b16 %v2928_v21 }
 0x3d4   : > { %3418 = vrot.lane.b32.xlu0 %v16187_v17, %s15173_s20  ;;  %v16383_v17 = vsel %vm16206_vm0, %v3484_v40, -inf }
 0x3d5   : > { %v3499_v50 = vsel %vm2995_vm15, %v16383_v17, -inf }
 0x3d8   : > { %3021 = vadd.xlane.f32.xlu1 %v3020_v20 }
 0x3e0   : > { %3024 = vadd.xlane.f32.xlu1 %v3023_v23 }
 0x3e8   : > { %3500 = vmax.xlane.f32.xlu1 %v3499_v50 }
 0x3e9   : > { %3420 = vrot.lane.b32.xlu2 %v16184_v59, %s15173_s20 }
 0x3f0   : > { %3027 = vadd.xlane.f32.xlu1 %v3026_v1  ;;  %v3266_v1 = vmul.f32 1.442695, %v3262_v34 }
 0x3f8   : > { %3030 = vadd.xlane.f32.xlu1 %v3029_v58 }
 0x3fc   : > { %v3374_v59 = vpop.xlane.xlu0 %3373 }
 0x3fd   : > { %v3384_v55 = vsub.f32 %v16281_v63, %v3374_v59  ;;  %v2891_v63 = vadd.f32 %v16241_v25, %v2871_v52  ;;  %v16438_v52 = vsel %vm16226_vm2, %v3489_v15, -inf }
 0x3fe   : > { %3497 = vmax.xlane.f32.xlu0 %v3496_v29  ;;  %v3505_v29 = vsel %vm2995_vm15, %v16438_v52, -inf }
 0x3ff   : > { %v3388_v51 = vmul.f32 1.442695, %v3384_v55 }
 0x401   : > { %14966 = vpow2.f32 %v3388_v51  ;;  %v2914_v51 = vpop.f32.mrf.mxu2 }
 0x404   : > { %v3377_v62 = vpop.xlane.xlu2 %3376 }
 0x405   : > { %v3385_v5 = vsub.f32 %v16287_v46, %v3377_v62  ;;  %v2910_v46 = vadd.f32 %v2909_v30, %v2891_v63  ;;  %v2878_v63 = vpop.f32.mrf.mxu0 }
 0x406   : > { %3503 = vmax.xlane.f32.xlu0 %v3502_v57  ;;  %v2898_v13 = vadd.f32 %v16261_v60, %v2878_v63 }
 0x407   : > { %v3390_v45 = vmul.f32 1.442695, %v3385_v5  ;;  %v16416_v14 = vpop.eup %14966  ;;  %v2923_v25 = vpack.c.bf16 %v2910_v46, %v2910_v46  ;;  %v3263_v5 = vsub.f32 %v16254_v0, %v16323_v27 }
 0x408   : > { %v3396_v28 = vsel %vm2995_vm15, %v16416_v14, 0.0 }
 0x409   : > { %14968 = vpow2.f32 %v3390_v45  ;;  %v3546_v7 = vunpack.c.l.b16 %v2923_v25  ;;  %v2916_v27 = vpop.f32.mrf.mxu2 }
 0x40a   : > { %v2917_v46 = vadd.f32 %v2916_v27, %v2898_v13 }
 0x40b   : > { %v16429_v39 = vpack.c.b16 %v3547_v56, %v3546_v7 }
 0x40c   : > { %v3380_v3 = vpop.xlane.xlu2 %3379 }
 0x40d   : > { %v3386_v44 = vsub.f32 %v16293_v6, %v3380_v3 }
 0x40f   : > { %v16418_v12 = vpop.eup %14968  ;;  %v3392_v16 = vmul.f32 1.442695, %v3386_v44  ;;  %v2896_v44 = vadd.f32 %v16256_v42, %v2876_v18 }
 0x410   : > { %v3399_v48 = vsel %vm2995_vm15, %v16418_v12, 0.0 }
 0x411   : > { %14970 = vpow2.f32 %v3392_v16  ;;  %3400 = vadd.xlane.f32.xlu1 %v3399_v48  ;;  %v2915_v25 = vadd.f32 %v2914_v51, %v2896_v44 }
 0x412   : > { %3397 = vadd.xlane.f32.xlu2 %v3396_v28 }
 0x413   : > { %v2933_v7 = vpack.c.bf16 %v2915_v25, %v2915_v25 }
 0x414   : > { %v3383_v20 = vpop.xlane.xlu1 %3382 }
 0x415   : > { %v3387_v6 = vsub.f32 %v16301_v11, %v3383_v20  ;;  %v3548_v34 = vunpack.c.l.b16 %v2933_v7 }
 0x417   : > { %v16425_v23 = vpop.eup %14970  ;;  %v3394_v40 = vmul.f32 1.442695, %v3387_v6  ;;  %v2938_v6 = vpack.c.bf16 %v2917_v46, %v2917_v46 }
 0x418   : > { %v3402_v50 = vsel %vm2995_vm15, %v16425_v23, 0.0 }
 0x419   : > { %14972 = vpow2.f32 %v3394_v40  ;;  %v3549_v40 = vunpack.c.l.b16 %v2938_v6 }
 0x41a   : > { %3668 = vrot.lane.b32.xlu0 %v16429_v39, %s15173_s20  ;;  %3403 = vadd.xlane.f32.xlu2 %v3402_v50  ;;  %14974 = vpow2.f32 %v3266_v1 }
 0x41b   : > { %v3551_v15 = vpack.c.b16 %v3549_v40, %v3548_v34 }
 0x41c   : > { %v3624_v11 = vpop.xlane.xlu2 %3623 }
 0x41d   : > { %v3634_v58 = vsub.f32 %v16309_v19, %v3624_v11 }
 0x41f   : > { %v16440_v33 = vpop.eup %14972  ;;  %v3638_v24 = vmul.f32 1.442695, %v3634_v58 }
 0x420   : > { %v3405_v59 = vsel %vm2995_vm15, %v16440_v33, 0.0  ;;  %v16447_v32 = vpop.eup %14974 }
 0x421   : > { %14976 = vpow2.f32 %v3638_v24  ;;  %3406 = vadd.xlane.f32.xlu1 %v3405_v59  ;;  %v3274_v10 = vsel %vm2995_vm15, %v16447_v32, 0.0 }
 0x422   : > { %3506 = vmax.xlane.f32.xlu2 %v3505_v29 }
 0x424   : > { %v3627_v30 = vpop.xlane.xlu2 %3626 }
 0x425   : > { %v3635_v19 = vsub.f32 %v16319_v35, %v3627_v30  ;;  %v3268_v35 = vmul.f32 1.442695, %v3263_v5 }
 0x427   : > { %v16449_v55 = vpop.eup %14976  ;;  %v3640_v62 = vmul.f32 1.442695, %v3635_v19 }
 0x428   : > { %v3646_v57 = vsel %vm2995_vm15, %v16449_v55, 0.0 }
 0x429   : > { %14978 = vpow2.f32 %v3640_v62  ;;  %3647 = vadd.xlane.f32.xlu1 %v3646_v57 }
 0x42a   : > { %3275 = vadd.xlane.f32.xlu2 %v3274_v10  ;;  %14980 = vpow2.f32 %v3268_v35 }
 0x42b   : > { %v3148_v45 = vpop.xlane.xlu0 %3147 }
 0x42c   : > { %v16457_v53 = vpop.xlane.xlu2 %3629 }
 0x42d   : > { %v3636_v44 = vsub.f32 %v16329_v49, %v16457_v53 }
 0x42f   : > { %v16459_v43 = vpop.eup %14978 }
 0x430   : > { %v3649_v0 = vsel %vm2995_vm15, %v16459_v43, 0.0  ;;  %v16467_v28 = vpop.eup %14980 }
 0x431   : > { %v3277_v60 = vsel %vm2995_vm15, %v16467_v28, 0.0 }
 0x432   : > { %3650 = vadd.xlane.f32.xlu2 %v3649_v0 }
 0x433   : > { %v3258_v3 = vpop.xlane.xlu0 %3257 }
 0x434   : > { %v3264_v16 = vsub.f32 %v16337_v54, %v3258_v3  ;;  %v3633_v21 = vpop.xlane.xlu2 %3632 }
 0x435   : > { %v3637_v48 = vsub.f32 %v16343_v4, %v3633_v21 }
 0x436   : > { %v3270_v56 = vmul.f32 1.442695, %v3264_v16 }
 0x437   : > { %v3644_v20 = vmul.f32 1.442695, %v3637_v48 }
 0x439   : > { %14982 = vpow2.f32 %v3644_v20 }
 0x43a   : > { %14984 = vpow2.f32 %v3270_v56  ;;  %3278 = vadd.xlane.f32.xlu2 %v3277_v60 }
 0x43b   : > { %14986 = vrcp.f32 %v3148_v45  ;;  %v3154_v42 = vpop.xlane.xlu1 %3153 }
 0x43c   : > { %v3151_v54 = vpop.xlane.xlu2 %3150 }
 0x43d   : > { %14988 = vrcp.f32 %v3151_v54 }
 0x43f   : > { %v16471_v4 = vpop.eup %14982 }
 0x440   : > { %v16473_v50 = vpop.eup %14984  ;;  %v3655_v1 = vsel %vm2995_vm15, %v16471_v4, 0.0 }
 0x441   : > { %v14987_v11 = vpop.eup %14986  ;;  %v3280_v59 = vsel %vm2995_vm15, %v16473_v50, 0.0 }
 0x442   : > { %3670 = vrot.lane.b32.xlu1 %v3551_v15, %s15173_s20  ;;  %3656 = vadd.xlane.f32.xlu2 %v3655_v1  ;;  %v3162_v29 = vmul.f32 %v14987_v11, %v16325_v31 }
 0x443   : > { %v14989_v58 = vpop.eup %14988  ;;  %v3261_v24 = vpop.xlane.xlu1 %3260 }
 0x444   : > { %v3163_v30 = vmul.f32 %v14989_v58, %v16348_v61  ;;  %v3265_v18 = vsub.f32 %v16359_v41, %v3261_v24  ;;  %3281 = vadd.xlane.f32.xlu0 %v3280_v59  ;;  %v3157_v19 = vpop.xlane.xlu2 %3156 }
 0x446   : > { %v3166_v51 = vpack.c.bf16 %v3163_v30, %v3162_v29  ;;  %v3272_v62 = vmul.f32 1.442695, %v3265_v18  ;;  %v3419_v61 = vpop.permute.xlu0 %3418 }
 0x448   : > { %14990 = vpow2.f32 %v3272_v62  ;;  %11220 = vmatmul.msk.bf16.vlgmr.msrb.gmra.mxu2 %vm2995_vm15, %v3166_v51 }
 0x449   : > { %14992 = vrcp.f32 %v3157_v19 }
 0x44a   : > { %14994 = vrcp.f32 %v3154_v42 }
 0x44b   : > { %v3022_v5 = vpop.xlane.xlu1 %3021 }
 0x44c   : > { %v3421_v57 = vpop.permute.xlu2 %3420  ;;  %14996 = vrcp.f32 %v3022_v5 }
 0x44d   : > { %3436 = vmatpush.bf16.msra.mxu2 %v3421_v57 }
 0x44e   : > { %v16484_v10 = vpop.eup %14990 }
 0x44f   : > { %v14993_v45 = vpop.eup %14992  ;;  %v3283_v31 = vsel %vm2995_vm15, %v16484_v10, 0.0 }
 0x450   : > { %3284 = vadd.xlane.f32.xlu2 %v3283_v31  ;;  %v14995_v41 = vpop.eup %14994  ;;  %v3165_v35 = vmul.f32 %v14993_v45, %v16361_v26  ;;  %v3642_v26 = vmul.f32 1.442695, %v3636_v44 }
 0x451   : > { %3437 = vmatpush.bf16.msra.mxu2 %v3419_v61  ;;  %v3164_v0 = vmul.f32 %v14995_v41, %v16350_v2 }
 0x452   : > { %v14997_v13 = vpop.eup %14996 }
 0x453   : > { %v3025_v63 = vpop.xlane.xlu1 %3024  ;;  %v3167_v27 = vpack.c.bf16 %v3165_v35, %v3164_v0  ;;  %v3036_v46 = vmul.f32 %v14997_v13, %v16369_v22 }
 0x454   : > { %14998 = vrcp.f32 %v3025_v63 }
 0x455   : > { %15000 = vpow2.f32 %v3642_v26 }
 0x458   : > { %11221 = vmatmul.msk.bf16.gmra.mxu2 %vm2995_vm15, %v3167_v27 }
 0x45a   : > { %v14999_v3 = vpop.eup %14998 }
 0x45b   : > { %v3037_v16 = vmul.f32 %v14999_v3, %v16375_v8  ;;  %v3501_v21 = vpop.xlane.xlu1 %3500  ;;  %v16497_v25 = vpop.eup %15000 }
 0x45c   : > { %v3652_v49 = vsel %vm2995_vm15, %v16497_v25, 0.0 }
 0x45d   : > { %v3040_v48 = vpack.c.bf16 %v3037_v16, %v3036_v46 }
 0x45f   : > { %11216 = vmatmul.msk.bf16.vlgmr.msrb.gmra.mxu0 %vm2995_vm15, %v3040_v48 }
 0x460   : > { %3566 = vmatpush.bf16.msrb.mxu0 %v3551_v15 }
 0x463   : > { %v3028_v2 = vpop.xlane.xlu1 %3027 }
 0x464   : > { %3567 = vmatpush.bf16.msrb.mxu0 %v16429_v39  ;;  %15002 = vrcp.f32 %v3028_v2  ;;  %v3509_v39 = vsub.f32 %v16383_v17, %v3501_v21 }
 0x466   : > { %v3514_v40 = vmul.f32 1.442695, %v3509_v39 }
 0x46a   : > { %v15003_v22 = vpop.eup %15002 }
 0x46b   : > { %v3031_v56 = vpop.xlane.xlu1 %3030  ;;  %v3038_v6 = vmul.f32 %v15003_v22, %v16391_v47 }
 0x46c   : > { %15004 = vrcp.f32 %v3031_v56  ;;  %3653 = vadd.xlane.f32.xlu1 %v3652_v49 }
 0x471   : > { %v3498_v8 = vpop.xlane.xlu0 %3497 }
 0x472   : > { %v15005_v53 = vpop.eup %15004  ;;  %v3508_v20 = vsub.f32 %v16401_v37, %v3498_v8 }
 0x473   : > { %v3039_v60 = vmul.f32 %v15005_v53, %v16395_v9 }
 0x474   : > { %v3512_v7 = vmul.f32 1.442695, %v3508_v20 }
 0x475   : > { %v3041_v42 = vpack.c.bf16 %v3039_v60, %v3038_v6 }
 0x476   : > { %15006 = vpow2.f32 %v3512_v7 }
 0x477   : > { %11217 = vmatmul.msk.bf16.gmra.mxu0 %vm2995_vm15, %v3041_v42  ;;  %15008 = vpow2.f32 %v3514_v40 }
 0x479   : > { %v3504_v54 = vpop.xlane.xlu0 %3503 }
 0x47a   : > { %v3510_v15 = vsub.f32 %v16408_v36, %v3504_v54 }
 0x47c   : > { %v16506_v34 = vpop.eup %15006  ;;  %v3516_v47 = vmul.f32 1.442695, %v3510_v15 }
 0x47d   : > { %v3520_v37 = vsel %vm2995_vm15, %v16506_v34, 0.0  ;;  %v16511_v9 = vpop.eup %15008 }
 0x47e   : > { %3521 = vadd.xlane.f32.xlu2 %v3520_v37  ;;  %15010 = vpow2.f32 %v3516_v47  ;;  %v3523_v11 = vsel %vm2995_vm15, %v16511_v9, 0.0 }
 0x484   : > { %v3401_v17 = vpop.xlane.xlu1 %3400  ;;  %v16515_v58 = vpop.eup %15010 }
 0x485   : > { %15012 = vrcp.f32 %v3401_v17  ;;  %v3398_v1 = vpop.xlane.xlu2 %3397  ;;  %v3526_v18 = vsel %vm2995_vm15, %v16515_v58, 0.0  ;;  %v11324_v17 = vld [vmem:[%s15367_s18 + $0xa8] sm:$0xf] }
 0x486   : > { %15014 = vrcp.f32 %v3398_v1  ;;  %3524 = vadd.xlane.f32.xlu2 %v3523_v11  ;;  %v14170_v1 = vld [vmem:[%s15367_s18 + $0xb0] sm:$0xf0]  ;;  %v14169_v11 = vld [vmem:[%s15367_s18 + $0xac] sm:$0xf] }
 0x48b   : > { %v15013_v24 = vpop.eup %15012 }
 0x48c   : > { %v15015_v36 = vpop.eup %15014  ;;  %v3413_v59 = vmul.f32 %v15013_v24, %v16418_v12  ;;  %v3669_v48 = vpop.permute.xlu0 %3668  ;;  %v11325_v24 = vor.u32 %v14170_v1, %v11324_v17 }
 0x48d   : > { %v3412_v29 = vmul.f32 %v15015_v36, %v16416_v14  ;;  %v3404_v30 = vpop.xlane.xlu2 %3403  ;;  %v11326_v36 = vld [vmem:[%s15367_s18 + $0xb4] sm:$0xf0] }
 0x48e   : > { %3527 = vadd.xlane.f32.xlu2 %v3526_v18  ;;  %15016 = vrcp.f32 %v3404_v30  ;;  %4156 = vmatpush.bf16.msrb.mxu3 %v11325_v24  ;;  %v14166_v30 = vld [vmem:[%s15367_s18 + $0x94] sm:$0xf] }
 0x48f   : > { %v3416_v19 = vpack.c.bf16 %v3413_v59, %v3412_v29  ;;  %v11329_v59 = vor.u32 %v14169_v11, %v11326_v36  ;;  %v14167_v29 = vld [vmem:[%s15367_s18 + $0x98] sm:$0xf0] }
 0x491   : > { %11228 = vmatmul.msk.bf16.vlgmr.msra.gmra.mxu2 %vm2995_vm15, %v3416_v19  ;;  %v11314_v19 = vld [vmem:[%s15367_s18 + $0x9c] sm:$0xf0] }
 0x494   : > { %v3407_v51 = vpop.xlane.xlu1 %3406  ;;  %v15017_v45 = vpop.eup %15016 }
 0x495   : > { %15018 = vrcp.f32 %v3407_v51  ;;  %v3507_v62 = vpop.xlane.xlu2 %3506  ;;  %v3414_v14 = vmul.f32 %v15017_v45, %v16425_v23  ;;  %v11317_v51 = vor.u32 %v14166_v30, %v11314_v19 }
 0x496   : > { %v3511_v5 = vsub.f32 %v16438_v52, %v3507_v62  ;;  %v11300_v62 = vld [vmem:[%s15367_s18 + $0x78] sm:$0xf] }
 0x498   : > { %v3518_v57 = vmul.f32 1.442695, %v3511_v5  ;;  %v14164_v5 = vld [vmem:[%s15367_s18 + $0x80] sm:$0xf0] }
 0x499   : > { %v11301_v45 = vor.u32 %v14164_v5, %v11300_v62 }
 0x49a   : > { %15020 = vpow2.f32 %v3518_v57 }
 0x49b   : > { %v15019_v12 = vpop.eup %15018 }
 0x49c   : > { %v3415_v31 = vmul.f32 %v15019_v12, %v16440_v33  ;;  %v3648_v52 = vpop.xlane.xlu1 %3647  ;;  %v14163_v12 = vld [vmem:[%s15367_s18 + $0x7c] sm:$0xf] }
 0x49d   : > { %v3276_v61 = vpop.xlane.xlu2 %3275 }
 0x49e   : > { %v3417_v41 = vpack.c.bf16 %v3415_v31, %v3414_v14  ;;  %15022 = vrcp.f32 %v3276_v61  ;;  %v11302_v14 = vld [vmem:[%s15367_s18 + $0x84] sm:$0xf0] }
 0x49f   : > { %v11305_v31 = vor.u32 %v14163_v12, %v11302_v14  ;;  %v14194_v12 = vld [vmem:[%s15367_s18 + $0x170] sm:$0xf0]  ;;  %v14193_v14 = vld [vmem:[%s15367_s18 + $0x16c] sm:$0xf] }
 0x4a0   : > { %v16525_v35 = vpop.eup %15020 }
 0x4a1   : > { %11229 = vmatmul.msk.bf16.gmra.mxu2 %vm2995_vm15, %v3417_v41  ;;  %v3529_v63 = vsel %vm2995_vm15, %v16525_v35, 0.0 }
 0x4a2   : > { %3530 = vadd.xlane.f32.xlu1 %v3529_v63 }
 0x4a4   : > { %v15023_v23 = vpop.eup %15022 }
 0x4a5   : > { %v3651_v0 = vpop.xlane.xlu2 %3650  ;;  %v3290_v46 = vmul.f32 %v15023_v23, %v16447_v32 }
 0x4a6   : > { %15024 = vrcp.f32 %v3651_v0  ;;  %v11288_v0 = vld [vmem:[%s15367_s18 + $0x60] sm:$0xf] }
 0x4ac   : > { %v15025_v13 = vpop.eup %15024 }
 0x4ad   : > { %v3279_v27 = vpop.xlane.xlu2 %3278  ;;  %v3663_v21 = vmul.f32 %v15025_v13, %v16459_v43  ;;  %v11290_v13 = vld [vmem:[%s15367_s18 + $0x6c] sm:$0xf0] }
 0x4ae   : > { %15026 = vrcp.f32 %v3279_v27  ;;  %v14160_v27 = vld [vmem:[%s15367_s18 + $0x64] sm:$0xf] }
 0x4af   : > { %15028 = vrcp.f32 %v3648_v52  ;;  %v14161_v52 = vld [vmem:[%s15367_s18 + $0x68] sm:$0xf0] }
 0x4b0   : > { %v11289_v23 = vor.u32 %v14161_v52, %v11288_v0  ;;  %v14195_v0 = vld [vmem:[%s15367_s18 + $0x178] sm:$0xf0] }
 0x4b4   : > { %v15027_v33 = vpop.eup %15026  ;;  %v3671_v3 = vpop.permute.xlu1 %3670 }
 0x4b5   : > { %v15029_v44 = vpop.eup %15028  ;;  %v3291_v16 = vmul.f32 %v15027_v33, %v16467_v28  ;;  %3686 = vmatpush.bf16.msrb.mxu2 %v3671_v3  ;;  %v3657_v49 = vpop.xlane.xlu2 %3656  ;;  %v11293_v3 = vor.u32 %v14160_v27, %v11290_v13 }
 0x4b6   : > { %v3662_v2 = vmul.f32 %v15029_v44, %v16449_v55  ;;  %v11276_v44 = vld [vmem:[%s15367_s18 + $0x48] sm:$0xf] }
 0x4b7   : > { %v3294_v26 = vpack.c.bf16 %v3291_v16, %v3290_v46  ;;  %v3282_v22 = vpop.xlane.xlu0 %3281  ;;  %v14158_v46 = vld [vmem:[%s15367_s18 + $0x50] sm:$0xf0]  ;;  %v14157_v16 = vld [vmem:[%s15367_s18 + $0x4c] sm:$0xf] }
 0x4b8   : > { %v3666_v56 = vpack.c.bf16 %v3663_v21, %v3662_v2  ;;  %15030 = vrcp.f32 %v3282_v22  ;;  %v14154_v2 = vld [vmem:[%s15367_s18 + $0x34] sm:$0xf] }
 0x4b9   : > { %11224 = vmatmul.msk.bf16.vlgmr.msra.gmra.mxu0 %vm2995_vm15, %v3294_v26  ;;  %3687 = vmatpush.bf16.msrb.mxu2 %v3669_v48  ;;  %v11264_v48 = vld [vmem:[%s15367_s18 + $0x30] sm:$0xf]  ;;  %v14155_v26 = vld [vmem:[%s15367_s18 + $0x38] sm:$0xf0] }
 0x4bc   : > { %11236 = vmatmul.msk.bf16.vlgmr.msrb.gmra.mxu2 %vm2995_vm15, %v3666_v56  ;;  %v11266_v56 = vld [vmem:[%s15367_s18 + $0x3c] sm:$0xf0] }
 0x4bd   : > { %4213 = vmatpush.bf16.msra.mxu2 %v11329_v59  ;;  %v11269_v22 = vor.u32 %v14154_v2, %v11266_v56  ;;  %v11396_v56 = vld [vmem:[%s15367_s18 + $0x138] sm:$0xf] }
 0x4be   : > { %v15031_v32 = vpop.eup %15030 }
 0x4bf   : > { %v3292_v53 = vmul.f32 %v15031_v32, %v16473_v50  ;;  %v14152_v32 = vld [vmem:[%s15367_s18 + $0x20] sm:$0xf0] }
 0x4c1   : > { %4214 = vmatpush.bf16.msra.mxu2 %v11317_v51 }
 0x4c3   : > { %v3285_v8 = vpop.xlane.xlu2 %3284 }
 0x4c4   : > { %15032 = vrcp.f32 %v3285_v8  ;;  %v11252_v8 = vld [vmem:[%s15367_s18 + $0x18] sm:$0xf] }
 0x4c5   : > { %15034 = vrcp.f32 %v3657_v49  ;;  %4215 = vmatpush.bf16.msra.mxu2 %v11305_v31  ;;  %v11265_v49 = vor.u32 %v14155_v26, %v11264_v48 }
 0x4c9   : > { %4216 = vmatpush.bf16.msra.mxu2 %v11293_v3  ;;  %v14191_v3 = vld [vmem:[%s15367_s18 + $0x158] sm:$0xf0] }
 0x4ca   : > { %v15033_v28 = vpop.eup %15032 }
 0x4cb   : > { %v3293_v43 = vmul.f32 %v15033_v28, %v16484_v10  ;;  %v3189_v20 = vpop.f32.mrf.mxu2  ;;  %v15035_v50 = vpop.eup %15034  ;;  %v11253_v28 = vor.u32 %v14152_v32, %v11252_v8  ;;  %v14188_v8 = vld [vmem:[%s15367_s18 + $0x140] sm:$0xf0]  ;;  %v14187_v32 = vld [vmem:[%s15367_s18 + $0x13c] sm:$0xf] }
 0x4cc   : > { %v3665_v54 = vmul.f32 %v15035_v50, %v16471_v4 }
 0x4cd   : > { %v3295_v6 = vpack.c.bf16 %v3293_v43, %v3292_v53  ;;  %v14151_v53 = vld [vmem:[%s15367_s18 + $0x1c] sm:$0xf]  ;;  %v11254_v43 = vld [vmem:[%s15367_s18 + $0x24] sm:$0xf0] }
 0x4cf   : > { %11225 = vmatmul.msk.bf16.gmra.mxu0 %vm2995_vm15, %v3295_v6 }
 0x4d3   : > { %v3191_v55 = vpop.f32.mrf.mxu2 }
 0x4d4   : > { %v14910_v60 = vpack.i.bf16 %v3191_v55, %v3189_v20  ;;  %v11257_v20 = vor.u32 %v14151_v53, %v11254_v43  ;;  %v11240_v55 = vld [vmem:[%s15367_s18] sm:$0xf]  ;;  %v14189_v43 = vld [vmem:[%s15367_s18 + $0x148] sm:$0xf0] }
 0x4d5   : > { %v11404_v53 = vld [vmem:[%s15367_s18 + $0x140] sm:$0xf] }
 0x4d6   : > { %14911 = vrot.lane.b32.xlu2 %v14910_v60, %s15173_s20  ;;  %v14149_v60 = vld [vmem:[%s15367_s18 + $0x8] sm:$0xf0] }
 0x4db   : > { %v3194_v39 = vpop.f32.mrf.mxu2 }
 0x4dc   : > { %v3069_v36 = vpop.f32.mrf.mxu0 }
 0x4df   : > { %v3654_v7 = vpop.xlane.xlu1 %3653 }
 0x4e0   : > { %15036 = vrcp.f32 %v3654_v7  ;;  %v11241_v7 = vor.u32 %v14149_v60, %v11240_v55  ;;  %v11405_v55 = vor.u32 %v14189_v43, %v11404_v53  ;;  %v11384_v60 = vld [vmem:[%s15367_s18 + $0x120] sm:$0xf]  ;;  %v14209_v43 = vld [vmem:[%s15367_s18 + $0x1e8] sm:$0xf0] }
 0x4e1   : > { %v11480_v53 = vld [vmem:[%s15367_s18 + $0x1e0] sm:$0xf] }
 0x4e3   : > { %v3196_v42 = vpop.f32.mrf.mxu2 }
 0x4e4   : > { %v14915_v40 = vpack.i.bf16 %v3196_v42, %v3194_v39  ;;  %v14148_v39 = vld [vmem:[%s15367_s18 + $0x4] sm:$0xf]  ;;  %v11242_v42 = vld [vmem:[%s15367_s18 + $0xc] sm:$0xf0]  ;;  %v3071_v30 = vpop.f32.mrf.mxu0 }
 0x4e6   : > { %v15037_v10 = vpop.eup %15036  ;;  %14916 = vrot.lane.b32.xlu0 %v14915_v40, %s15173_s20  ;;  %v11245_v40 = vor.u32 %v14148_v39, %v11242_v42  ;;  %v14185_v39 = vld [vmem:[%s15367_s18 + $0x128] sm:$0xf0] }
 0x4e7   : > { %v3664_v15 = vmul.f32 %v15037_v10, %v16497_v25  ;;  %v11312_v25 = vld [vmem:[%s15367_s18 + $0x90] sm:$0xf]  ;;  %v11385_v42 = vor.u32 %v14185_v39, %v11384_v60  ;;  %v11518_v60 = vld [vmem:[%s15367_s18 + $0x234] sm:$0xf0] }
 0x4e8   : > { %v11313_v18 = vor.u32 %v14167_v29, %v11312_v25  ;;  %v11524_v39 = vld [vmem:[%s15367_s18 + $0x230] sm:$0xf] }
 0x4e9   : > { %v3667_v37 = vpack.c.bf16 %v3665_v54, %v3664_v15 }
 0x4ea   : > { %4157 = vmatpush.bf16.msrb.mxu3 %v11313_v18 }
 0x4eb   : > { %11237 = vmatmul.msk.bf16.gmra.mxu2 %vm2995_vm15, %v3667_v37 }
 0x4ee   : > { %4158 = vmatpush.bf16.msrb.mxu3 %v11301_v45  ;;  %v11420_v45 = vld [vmem:[%s15367_s18 + $0x168] sm:$0xf] }
 0x4f1   : > { %v3522_v47 = vpop.xlane.xlu2 %3521 }
 0x4f2   : > { %15038 = vrcp.f32 %v3522_v47  ;;  %4159 = vmatpush.bf16.msrb.mxu3 %v11289_v23 }
 0x4f8   : > { %v15039_v57 = vpop.eup %15038 }
 0x4f9   : > { %v3525_v4 = vpop.xlane.xlu2 %3524  ;;  %v3536_v41 = vmul.f32 %v15039_v57, %v16506_v34  ;;  %v11277_v34 = vor.u32 %v14158_v46, %v11276_v44  ;;  %v3074_v57 = vpop.f32.mrf.mxu0  ;;  %v14190_v44 = vld [vmem:[%s15367_s18 + $0x154] sm:$0xf] }
 0x4fa   : > { %15040 = vrcp.f32 %v3525_v4 }
 0x4fb   : > { %4160 = vmatpush.bf16.msrb.mxu3 %v11277_v34  ;;  %v11410_v34 = vld [vmem:[%s15367_s18 + $0x15c] sm:$0xf0] }
 0x4fc   : > { %v11413_v2 = vor.u32 %v14190_v44, %v11410_v34 }
 0x4ff   : > { %4161 = vmatpush.bf16.msrb.mxu3 %v11265_v49 }
 0x500   : > { %v15041_v61 = vpop.eup %15040 }
 0x501   : > { %v3537_v63 = vmul.f32 %v15041_v61, %v16511_v9  ;;  %v11278_v9 = vld [vmem:[%s15367_s18 + $0x54] sm:$0xf0]  ;;  %v3528_v6 = vpop.xlane.xlu2 %3527  ;;  %v11421_v61 = vor.u32 %v14194_v12, %v11420_v45  ;;  %v3076_v46 = vpop.f32.mrf.mxu0  ;;  %v14180_v45 = vld [vmem:[%s15367_s18 + $0x100] sm:$0xf0]  ;;  %v11504_v12 = vld [vmem:[%s15367_s18 + $0x210] sm:$0xf] }
 0x502   : > { %v11281_v21 = vor.u32 %v14157_v16, %v11278_v9  ;;  %15042 = vrcp.f32 %v3528_v6  ;;  %v11416_v9 = vld [vmem:[%s15367_s18 + $0x158] sm:$0xf] }
 0x503   : > { %v3540_v33 = vpack.c.bf16 %v3537_v63, %v3536_v41  ;;  %4162 = vmatpush.bf16.msrb.mxu3 %v11253_v28  ;;  %v11422_v41 = vld [vmem:[%s15367_s18 + $0x174] sm:$0xf0]  ;;  %v11428_v63 = vld [vmem:[%s15367_s18 + $0x170] sm:$0xf]  ;;  %4175 = vmatpush.bf16.msra.mxu0 %v11421_v61  ;;  %v11398_v28 = vld [vmem:[%s15367_s18 + $0x144] sm:$0xf0] }
 0x504   : > { %4217 = vmatpush.bf16.msra.mxu2 %v11281_v21  ;;  %v11425_v23 = vor.u32 %v14193_v14, %v11422_v41  ;;  %v11429_v13 = vor.u32 %v14195_v0, %v11428_v63  ;;  %v14192_v21 = vld [vmem:[%s15367_s18 + $0x160] sm:$0xf0]  ;;  %v11401_v6 = vor.u32 %v14187_v32, %v11398_v28  ;;  %v11348_v61 = vld [vmem:[%s15367_s18 + $0xd8] sm:$0xf] }
 0x505   : > { %11232 = vmatmul.msk.bf16.vlgmr.msrb.gmra.mxu0 %vm2995_vm15, %v3540_v33  ;;  %v11408_v33 = vld [vmem:[%s15367_s18 + $0x150] sm:$0xf]  ;;  %v14176_v41 = vld [vmem:[%s15367_s18 + $0xe0] sm:$0xf0] }
 0x506   : > { %v11409_v16 = vor.u32 %v14191_v3, %v11408_v33  ;;  %v14177_v3 = vld [vmem:[%s15367_s18 + $0xe8] sm:$0xf0] }
 0x507   : > { %4163 = vmatpush.bf16.msrb.mxu3 %v11241_v7  ;;  %v14184_v7 = vld [vmem:[%s15367_s18 + $0x124] sm:$0xf] }
 0x508   : > { %4218 = vmatpush.bf16.msra.mxu2 %v11269_v22  ;;  %v15043_v54 = vpop.eup %15042  ;;  %v11417_v22 = vor.u32 %v14192_v21, %v11416_v9  ;;  %4176 = vmatpush.bf16.msra.mxu0 %v11409_v16  ;;  %v14212_v16 = vld [vmem:[%s15367_s18 + $0x200] sm:$0xf0]  ;;  %v11336_v9 = vld [vmem:[%s15367_s18 + $0xc0] sm:$0xf]  ;;  %v14173_v21 = vld [vmem:[%s15367_s18 + $0xc8] sm:$0xf0] }
 0x509   : > { %v3538_v47 = vmul.f32 %v15043_v54, %v16515_v58 }
 0x50b   : > { %4232 = vmatpush.bf16.msra.mxu3 %v11425_v23  ;;  %v11356_v23 = vld [vmem:[%s15367_s18 + $0xe0] sm:$0xf] }
 0x50c   : > { %4219 = vmatpush.bf16.msra.mxu2 %v11257_v20  ;;  %v11397_v20 = vor.u32 %v14188_v8, %v11396_v56  ;;  %v11357_v44 = vor.u32 %v14177_v3, %v11356_v23  ;;  %v11344_v56 = vld [vmem:[%s15367_s18 + $0xc8] sm:$0xf]  ;;  %v11470_v23 = vld [vmem:[%s15367_s18 + $0x1d4] sm:$0xf0]  ;;  %v14207_v3 = vld [vmem:[%s15367_s18 + $0x1d8] sm:$0xf0] }
 0x50e   : > { %4177 = vmatpush.bf16.msra.mxu0 %v11397_v20 }
 0x50f   : > { %4233 = vmatpush.bf16.msra.mxu3 %v11413_v2  ;;  %v11338_v2 = vld [vmem:[%s15367_s18 + $0xcc] sm:$0xf0] }
 0x510   : > { %4220 = vmatpush.bf16.msra.mxu2 %v11245_v40  ;;  %v11392_v40 = vld [vmem:[%s15367_s18 + $0x128] sm:$0xf] }
 0x512   : > { %4178 = vmatpush.bf16.msra.mxu0 %v11385_v42 }
 0x513   : > { %4234 = vmatpush.bf16.msra.mxu3 %v11401_v6  ;;  %v11481_v6 = vor.u32 %v14209_v43, %v11480_v53  ;;  %v14196_v53 = vld [vmem:[%s15367_s18 + $0x184] sm:$0xf]  ;;  %v11434_v43 = vld [vmem:[%s15367_s18 + $0x18c] sm:$0xf0] }
 0x514   : > { %v3439_v50 = vpop.f32.mrf.mxu2  ;;  %4289 = vmatpush.bf16.msrb.mxu2 %v11429_v13  ;;  %v11349_v13 = vor.u32 %v14176_v41, %v11348_v61 }
 0x515   : > { %v3531_v10 = vpop.xlane.xlu1 %3530 }
 0x516   : > { %15044 = vrcp.f32 %v3531_v10  ;;  %v14186_v10 = vld [vmem:[%s15367_s18 + $0x130] sm:$0xf0] }
 0x518   : > { %4290 = vmatpush.bf16.msrb.mxu2 %v11417_v22  ;;  %v14174_v22 = vld [vmem:[%s15367_s18 + $0xd0] sm:$0xf0] }
 0x519   : > { %v11345_v32 = vor.u32 %v14174_v22, %v11344_v56  ;;  %v11452_v22 = vld [vmem:[%s15367_s18 + $0x1a0] sm:$0xf] }
 0x51c   : > { %v15045_v15 = vpop.eup %15044  ;;  %v3441_v37 = vpop.f32.mrf.mxu2  ;;  %4291 = vmatpush.bf16.msrb.mxu2 %v11405_v55  ;;  %v14217_v55 = vld [vmem:[%s15367_s18 + $0x22c] sm:$0xf] }
 0x51d   : > { %v3539_v17 = vmul.f32 %v15045_v15, %v16525_v35  ;;  %v14920_v1 = vpack.i.bf16 %v3441_v37, %v3439_v50  ;;  %v11386_v50 = vld [vmem:[%s15367_s18 + $0x12c] sm:$0xf0]  ;;  %v11393_v15 = vor.u32 %v14186_v10, %v11392_v40  ;;  %v11372_v37 = vld [vmem:[%s15367_s18 + $0x108] sm:$0xf]  ;;  %v11521_v42 = vor.u32 %v14217_v55, %v11518_v60  ;;  %v14206_v10 = vld [vmem:[%s15367_s18 + $0x1d0] sm:$0xf0] }
 0x51e   : > { %v11389_v54 = vor.u32 %v14184_v7, %v11386_v50  ;;  %v14219_v50 = vld [vmem:[%s15367_s18 + $0x238] sm:$0xf0]  ;;  %v11468_v40 = vld [vmem:[%s15367_s18 + $0x1c8] sm:$0xf]  ;;  %v14198_v55 = vld [vmem:[%s15367_s18 + $0x190] sm:$0xf0] }
 0x51f   : > { %14921 = vrot.lane.b32.xlu1 %v14920_v1, %s15173_s20  ;;  %v3541_v11 = vpack.c.bf16 %v3539_v17, %v3538_v47  ;;  %v14182_v47 = vld [vmem:[%s15367_s18 + $0x110] sm:$0xf0]  ;;  %v14181_v17 = vld [vmem:[%s15367_s18 + $0x10c] sm:$0xf]  ;;  %v11374_v1 = vld [vmem:[%s15367_s18 + $0x114] sm:$0xf0] }
 0x520   : > { %4235 = vmatpush.bf16.msra.mxu3 %v11389_v54  ;;  %4292 = vmatpush.bf16.msrb.mxu2 %v11393_v15  ;;  %v11525_v54 = vor.u32 %v14219_v50, %v11524_v39  ;;  %v11469_v15 = vor.u32 %v14206_v10, %v11468_v40 }
 0x521   : > { %11233 = vmatmul.msk.bf16.gmra.mxu0 %vm2995_vm15, %v3541_v11  ;;  %v11380_v11 = vld [vmem:[%s15367_s18 + $0x110] sm:$0xf] }
 0x524   : > { %v3444_v24 = vpop.f32.mrf.mxu2 }
 0x52c   : > { %v3446_v59 = vpop.f32.mrf.mxu2 }
 0x52d   : > { %v14930_v4 = vpack.i.bf16 %v3446_v59, %v3444_v24  ;;  %v14183_v24 = vld [vmem:[%s15367_s18 + $0x118] sm:$0xf0]  ;;  %v11377_v59 = vor.u32 %v14181_v17, %v11374_v1  ;;  %v11512_v17 = vld [vmem:[%s15367_s18 + $0x218] sm:$0xf] }
 0x52f   : > { %14931 = vrot.lane.b32.xlu0 %v14930_v4, %s15173_s20  ;;  %v11381_v4 = vor.u32 %v14183_v24, %v11380_v11  ;;  %4236 = vmatpush.bf16.msra.mxu3 %v11377_v59  ;;  %v14216_v11 = vld [vmem:[%s15367_s18 + $0x220] sm:$0xf0]  ;;  %v14203_v59 = vld [vmem:[%s15367_s18 + $0x1b8] sm:$0xf0] }
 0x530   : > { %v14912_v25 = vpop.permute.xlu2 %14911  ;;  %v11513_v24 = vor.u32 %v14216_v11, %v11512_v17 }
 0x531   : > { %v14914_v29 = vunpack.i.h.bf16 %v14912_v25  ;;  %v14913_v58 = vunpack.i.l.bf16 %v14912_v25  ;;  %v11516_v25 = vld [vmem:[%s15367_s18 + $0x228] sm:$0xf]  ;;  %4293 = vmatpush.bf16.msrb.mxu2 %v11381_v4  ;;  %v14211_v4 = vld [vmem:[%s15367_s18 + $0x1fc] sm:$0xf] }
 0x533   : > { %v3748_v35 = vsel %vm2959_vm13, %v3071_v30, %v14914_v29  ;;  %v3747_v18 = vsel %vm2959_vm13, %v3069_v36, %v14913_v58  ;;  %v11373_v36 = vor.u32 %v14182_v47, %v11372_v37  ;;  %v14218_v29 = vld [vmem:[%s15367_s18 + $0x230] sm:$0xf0]  ;;  %v11360_v58 = vld [vmem:[%s15367_s18 + $0xf0] sm:$0xf]  ;;  %v11506_v47 = vld [vmem:[%s15367_s18 + $0x21c] sm:$0xf0] }
 0x534   : > { %v16586_v19 = vpack.c.bf16 %v3748_v35, %v3747_v18  ;;  %v11517_v30 = vor.u32 %v14218_v29, %v11516_v25  ;;  %v14179_v35 = vld [vmem:[%s15367_s18 + $0xf8] sm:$0xf0]  ;;  %v14178_v18 = vld [vmem:[%s15367_s18 + $0xf4] sm:$0xf]  ;;  %v11494_v29 = vld [vmem:[%s15367_s18 + $0x204] sm:$0xf0] }
 0x535   : > { %4179 = vmatpush.bf16.msra.mxu0 %v11373_v36  ;;  %v14214_v37 = vld [vmem:[%s15367_s18 + $0x214] sm:$0xf]  ;;  %v11456_v36 = vld [vmem:[%s15367_s18 + $0x1b0] sm:$0xf] }
 0x536   : > { %4164 = vmatmul.bf16.vlgmr.msrb.gmra.mxu3 %v16586_v19  ;;  %4221 = vmatmul.bf16.vlgmr.msra.gmra.mxu2 %v16586_v19  ;;  %v16656_v7 = vpop.f32.mrf.mxu0  ;;  %v11509_v1 = vor.u32 %v14214_v37, %v11506_v47  ;;  %v11457_v25 = vor.u32 %v14203_v59, %v11456_v36 }
 0x537   : > { %4194 = vmatpush.bf16.msra.mxu1 %v11517_v30  ;;  %v14213_v30 = vld [vmem:[%s15367_s18 + $0x208] sm:$0xf0] }
 0x53f   : > { %v3689_v51 = vpop.f32.mrf.mxu2 }
 0x547   : > { %v3691_v62 = vpop.f32.mrf.mxu2 }
 0x548   : > { %v14925_v5 = vpack.i.bf16 %v3691_v62, %v3689_v51  ;;  %v11362_v51 = vld [vmem:[%s15367_s18 + $0xfc] sm:$0xf0]  ;;  %v11361_v62 = vor.u32 %v14179_v35, %v11360_v58  ;;  %v11497_v35 = vor.u32 %v14211_v4, %v11494_v29 }
 0x549   : > { %v11500_v58 = vld [vmem:[%s15367_s18 + $0x200] sm:$0xf] }
 0x54a   : > { %14926 = vrot.lane.b32.xlu2 %v14925_v5, %s15173_s20  ;;  %v11365_v5 = vor.u32 %v14178_v18, %v11362_v51  ;;  %4180 = vmatpush.bf16.msra.mxu0 %v11361_v62  ;;  %v11501_v18 = vor.u32 %v14213_v30, %v11500_v58  ;;  %v3321_v51 = vpop.f32.mrf.mxu0  ;;  %v11444_v62 = vld [vmem:[%s15367_s18 + $0x198] sm:$0xf] }
 0x54c   : > { %4237 = vmatpush.bf16.msra.mxu3 %v11365_v5  ;;  %v14200_v5 = vld [vmem:[%s15367_s18 + $0x1a0] sm:$0xf0] }
 0x54e   : > { %4181 = vmatpush.bf16.msra.mxu0 %v11349_v13  ;;  %v11476_v13 = vld [vmem:[%s15367_s18 + $0x1d0] sm:$0xf] }
 0x558   : > { %v14917_v31 = vpop.permute.xlu0 %14916 }
 0x559   : > { %v14919_v52 = vunpack.i.h.bf16 %v14917_v31  ;;  %v14918_v27 = vunpack.i.l.bf16 %v14917_v31  ;;  %v14215_v31 = vld [vmem:[%s15367_s18 + $0x218] sm:$0xf0] }
 0x55a   : > { %v11505_v0 = vor.u32 %v14215_v31, %v11504_v12  ;;  %v14210_v12 = vld [vmem:[%s15367_s18 + $0x1f0] sm:$0xf0]  ;;  %v11482_v31 = vld [vmem:[%s15367_s18 + $0x1ec] sm:$0xf0] }
 0x55b   : > { %v3749_v48 = vsel %vm2959_vm13, %v3074_v57, %v14918_v27  ;;  %v3750_v26 = vsel %vm2959_vm13, %v3076_v46, %v14919_v52  ;;  %v11368_v57 = vld [vmem:[%s15367_s18 + $0xf8] sm:$0xf]  ;;  %v14175_v52 = vld [vmem:[%s15367_s18 + $0xdc] sm:$0xf]  ;;  %v11350_v27 = vld [vmem:[%s15367_s18 + $0xe4] sm:$0xf0] }
 0x55c   : > { %v16606_v49 = vpack.c.bf16 %v3750_v26, %v3749_v48  ;;  %v11369_v14 = vor.u32 %v14180_v45, %v11368_v57  ;;  %v11353_v33 = vor.u32 %v14175_v52, %v11350_v27  ;;  %4195 = vmatpush.bf16.msra.mxu1 %v11505_v0  ;;  %v11492_v46 = vld [vmem:[%s15367_s18 + $0x1f8] sm:$0xf]  ;;  %v14172_v48 = vld [vmem:[%s15367_s18 + $0xc4] sm:$0xf]  ;;  %v11337_v26 = vor.u32 %v14173_v21, %v11336_v9  ;;  %v11488_v57 = vld [vmem:[%s15367_s18 + $0x1e8] sm:$0xf] }
 0x55d   : > { %v11493_v34 = vor.u32 %v14212_v16, %v11492_v46  ;;  %v11341_v8 = vor.u32 %v14172_v48, %v11338_v2  ;;  %v11445_v45 = vor.u32 %v14200_v5, %v11444_v62  ;;  %v11489_v61 = vor.u32 %v14210_v12, %v11488_v57  ;;  %v14197_v0 = vld [vmem:[%s15367_s18 + $0x188] sm:$0xf0]  ;;  %v3324_v46 = vpop.f32.mrf.mxu0  ;;  %v14202_v16 = vld [vmem:[%s15367_s18 + $0x1b4] sm:$0xf]  ;;  %v11464_v9 = vld [vmem:[%s15367_s18 + $0x1b8] sm:$0xf] }
 0x55e   : > { %4169 = vmatmul.bf16.gmra.mxu3 %v16606_v49  ;;  %4226 = vmatmul.bf16.gmra.mxu2 %v16606_v49  ;;  %v14205_v27 = vld [vmem:[%s15367_s18 + $0x1cc] sm:$0xf]  ;;  %v14204_v48 = vld [vmem:[%s15367_s18 + $0x1c0] sm:$0xf0]  ;;  %v11446_v2 = vld [vmem:[%s15367_s18 + $0x1a4] sm:$0xf0] }
 0x55f   : > { %4294 = vmatpush.bf16.msrb.mxu2 %v11369_v14  ;;  %4238 = vmatpush.bf16.msra.mxu3 %v11353_v33  ;;  %v14208_v14 = vld [vmem:[%s15367_s18 + $0x1e4] sm:$0xf]  ;;  %v11473_v33 = vor.u32 %v14205_v27, %v11470_v23  ;;  %v11465_v56 = vor.u32 %v14204_v48, %v11464_v9  ;;  %v11320_v62 = vld [vmem:[%s15367_s18 + $0x98] sm:$0xf]  ;;  %v14165_v12 = vld [vmem:[%s15367_s18 + $0x88] sm:$0xf0] }
 0x560   : > { %4196 = vmatpush.bf16.msra.mxu1 %v11493_v34  ;;  %4182 = vmatpush.bf16.msra.mxu0 %v11337_v26  ;;  %v11485_v41 = vor.u32 %v14208_v14, %v11482_v31  ;;  %v11458_v34 = vld [vmem:[%s15367_s18 + $0x1bc] sm:$0xf0]  ;;  %v14199_v26 = vld [vmem:[%s15367_s18 + $0x19c] sm:$0xf]  ;;  %v14168_v5 = vld [vmem:[%s15367_s18 + $0xa0] sm:$0xf0] }
 0x561   : > { %v11461_v21 = vor.u32 %v14202_v16, %v11458_v34  ;;  %v11321_v57 = vor.u32 %v14168_v5, %v11320_v62  ;;  %v11296_v31 = vld [vmem:[%s15367_s18 + $0x68] sm:$0xf]  ;;  %v11272_v27 = vld [vmem:[%s15367_s18 + $0x38] sm:$0xf]  ;;  %v14156_v23 = vld [vmem:[%s15367_s18 + $0x40] sm:$0xf0] }
 0x562   : > { %v14150_v16 = vld [vmem:[%s15367_s18 + $0x10] sm:$0xf0] }
 0x563   : > { %4295 = vmatpush.bf16.msrb.mxu2 %v11357_v44  ;;  %4239 = vmatpush.bf16.msra.mxu3 %v11341_v8  ;;  %v11477_v44 = vor.u32 %v14207_v3, %v11476_v13  ;;  %v14201_v8 = vld [vmem:[%s15367_s18 + $0x1a8] sm:$0xf0]  ;;  %v11273_v13 = vor.u32 %v14156_v23, %v11272_v27 }
 0x564   : > { %4197 = vmatpush.bf16.msra.mxu1 %v11481_v6  ;;  %4251 = vmatpush.bf16.msrb.mxu0 %v11521_v42  ;;  %v11440_v6 = vld [vmem:[%s15367_s18 + $0x188] sm:$0xf]  ;;  %v11437_v42 = vor.u32 %v14196_v53, %v11434_v43  ;;  %v14153_v3 = vld [vmem:[%s15367_s18 + $0x28] sm:$0xf0] }
 0x565   : > { %v3326_v50 = vpop.f32.mrf.mxu0 }
 0x567   : > { %4296 = vmatpush.bf16.msrb.mxu2 %v11345_v32  ;;  %4308 = vmatpush.bf16.msrb.mxu3 %v11525_v54  ;;  %v11449_v32 = vor.u32 %v14199_v26, %v11446_v2  ;;  %v11441_v54 = vor.u32 %v14198_v55, %v11440_v6 }
 0x568   : > { %4198 = vmatpush.bf16.msra.mxu1 %v11469_v15  ;;  %4252 = vmatpush.bf16.msrb.mxu0 %v11509_v1 }
 0x56b   : > { %4309 = vmatpush.bf16.msrb.mxu3 %v11513_v24 }
 0x56c   : > { %4199 = vmatpush.bf16.msra.mxu1 %v11457_v25  ;;  %4253 = vmatpush.bf16.msrb.mxu0 %v11497_v35  ;;  %v11332_v35 = vld [vmem:[%s15367_s18 + $0xb0] sm:$0xf] }
 0x56e   : > { %v3694_v63 = vpop.f32.mrf.mxu2 }
 0x56f   : > { %4310 = vmatpush.bf16.msrb.mxu3 %v11501_v18  ;;  %v14171_v18 = vld [vmem:[%s15367_s18 + $0xb8] sm:$0xf0] }
 0x570   : > { %4200 = vmatpush.bf16.msra.mxu1 %v11445_v45  ;;  %4254 = vmatpush.bf16.msrb.mxu0 %v11485_v41  ;;  %v11308_v45 = vld [vmem:[%s15367_s18 + $0x80] sm:$0xf] }
 0x571   : > { %v11309_v14 = vor.u32 %v14165_v12, %v11308_v45  ;;  %v15054_v45 = vld [vmem:[#allocation2] sm:$0xff] }
 0x573   : > { %4311 = vmatpush.bf16.msrb.mxu3 %v11489_v61  ;;  %v14162_v61 = vld [vmem:[%s15367_s18 + $0x70] sm:$0xf0] }
 0x574   : > { %4255 = vmatpush.bf16.msrb.mxu0 %v11473_v33  ;;  %v11297_v41 = vor.u32 %v14162_v61, %v11296_v31  ;;  %v11260_v33 = vld [vmem:[%s15367_s18 + $0x20] sm:$0xf] }
 0x576   : > { %v3696_v28 = vpop.f32.mrf.mxu2 }
 0x577   : > { %v14935_v20 = vpack.i.bf16 %v3696_v28, %v3694_v63  ;;  %v11432_v63 = vld [vmem:[%s15367_s18 + $0x180] sm:$0xf]  ;;  %4312 = vmatpush.bf16.msrb.mxu3 %v11477_v44  ;;  %v11453_v28 = vor.u32 %v14201_v8, %v11452_v22  ;;  %v11261_v44 = vor.u32 %v14153_v3, %v11260_v33 }
 0x578   : > { %v11433_v52 = vor.u32 %v14197_v0, %v11432_v63  ;;  %4256 = vmatpush.bf16.msrb.mxu0 %v11461_v21  ;;  %v11284_v63 = vld [vmem:[%s15367_s18 + $0x50] sm:$0xf]  ;;  %v14159_v0 = vld [vmem:[%s15367_s18 + $0x58] sm:$0xf0] }
 0x579   : > { %14936 = vrot.lane.b32.xlu1 %v14935_v20, %s15173_s20 }
 0x57a   : > { %4201 = vmatpush.bf16.msra.mxu1 %v11433_v52  ;;  %v11285_v52 = vor.u32 %v14159_v0, %v11284_v63 }
 0x57b   : > { %4313 = vmatpush.bf16.msrb.mxu3 %v11465_v56 }
 0x57c   : > { %4257 = vmatpush.bf16.msrb.mxu0 %v11449_v32 }
 0x57f   : > { %4314 = vmatpush.bf16.msrb.mxu3 %v11453_v28 }
 0x580   : > { %4258 = vmatpush.bf16.msrb.mxu0 %v11437_v42 }
 0x582   : > { %v3569_v37 = vpop.f32.mrf.mxu0 }
 0x583   : > { %4315 = vmatpush.bf16.msrb.mxu3 %v11441_v54 }
 0x58a   : > { %v3571_v25 = vpop.f32.mrf.mxu0 }
 0x591   : > { %v14922_v20 = vpop.permute.xlu1 %14921 }
 0x592   : > { %v14924_v60 = vunpack.i.h.bf16 %v14922_v20  ;;  %v14923_v39 = vunpack.i.l.bf16 %v14922_v20 }
 0x594   : > { %v3752_v40 = vsel %vm2959_vm13, %v3321_v51, %v14924_v60  ;;  %v3751_v10 = vsel %vm2959_vm13, %v16656_v7, %v14923_v39  ;;  %v11333_v51 = vor.u32 %v14171_v18, %v11332_v35 }
 0x595   : > { %v3760_v15 = vpack.c.bf16 %v3752_v40, %v3751_v10 }
 0x596   : > { %4270 = vmatpush.bf16.msrb.mxu1 %v11333_v51 }
 0x597   : > { %4183 = vmatmul.bf16.vlgmr.msra.gmra.mxu0 %v3760_v15  ;;  %4240 = vmatmul.bf16.vlgmr.msra.gmra.mxu3 %v3760_v15 }
 0x598   : > { %4297 = vmatmul.bf16.vlgmr.msrb.gmra.mxu2 %v3760_v15 }
 0x59a   : > { %4271 = vmatpush.bf16.msrb.mxu1 %v11321_v57 }
 0x59e   : > { %4272 = vmatpush.bf16.msrb.mxu1 %v11309_v14  ;;  %v3574_v9 = vpop.f32.mrf.mxu0 }
 0x5a1   : > { %v14932_v47 = vpop.permute.xlu0 %14931 }
 0x5a2   : > { %v14934_v17 = vunpack.i.h.bf16 %v14932_v47  ;;  %v14933_v1 = vunpack.i.l.bf16 %v14932_v47  ;;  %4273 = vmatpush.bf16.msrb.mxu1 %v11297_v41  ;;  %v15055_v41 = vld [vmem:[#allocation2 + $0x30] sm:$0xff] }
 0x5a4   : > { %v14927_v11 = vpop.permute.xlu2 %14926  ;;  %v3753_v24 = vsel %vm2959_vm13, %v3324_v46, %v14933_v1  ;;  %v3754_v36 = vsel %vm2959_vm13, %v3326_v50, %v14934_v17  ;;  %v11248_v46 = vld [vmem:[%s15367_s18 + $0x8] sm:$0xf] }
 0x5a5   : > { %v14929_v59 = vunpack.i.h.bf16 %v14927_v11  ;;  %v14928_v7 = vunpack.i.l.bf16 %v14927_v11  ;;  %v3763_v4 = vpack.c.bf16 %v3754_v36, %v3753_v24  ;;  %v11249_v34 = vor.u32 %v14150_v16, %v11248_v46 }
 0x5a6   : > { %4274 = vmatpush.bf16.msrb.mxu1 %v11285_v52  ;;  %v3576_v2 = vpop.f32.mrf.mxu0 }
 0x5a7   : > { %v3755_v29 = vsel %vm2959_vm13, %v3569_v37, %v14928_v7  ;;  %v3756_v58 = vsel %vm2959_vm13, %v3571_v25, %v14929_v59  ;;  %4188 = vmatmul.bf16.gmra.mxu0 %v3763_v4  ;;  %4245 = vmatmul.bf16.gmra.mxu3 %v3763_v4  ;;  %v1115_v37 = vld [vmem:[%s19067_s28] sm:$0x7] }
 0x5a8   : > { %v3761_v30 = vpack.c.bf16 %v3756_v58, %v3755_v29  ;;  %4302 = vmatmul.bf16.gmra.mxu2 %v3763_v4  ;;  %v3767_v1 = vperm.slane %v1115_v37, 1  ;;  %v3766_v36 = vperm.slane %v1115_v37, 0  ;;  %v16736_v29 = vperm.slane %v1115_v37, 2 }
 0x5aa   : > { %4202 = vmatmul.bf16.vlgmr.msra.gmra.mxu1 %v3761_v30 }
 0x5ab   : > { %4275 = vmatpush.bf16.msrb.mxu1 %v11273_v13  ;;  %v15056_v13 = vld [vmem:[#allocation2 + $0x58] sm:$0xff] }
 0x5af   : > { %4276 = vmatpush.bf16.msrb.mxu1 %v11261_v44 }
 0x5b3   : > { %4277 = vmatpush.bf16.msrb.mxu1 %v11249_v34 }
 0x5b7   : > { %4259 = vmatmul.bf16.vlgmr.msrb.gmra.mxu0 %v3761_v30  ;;  %4316 = vmatmul.bf16.vlgmr.msrb.gmra.mxu3 %v3761_v30 }
 0x5b9   : > { %v4165_v32 = vpop.f32.mrf.mxu3  ;;  %v4222_v6 = vpop.f32.mrf.mxu2 }
 0x5ba   : > { %v4223_v59 = vadd.f32 %v4222_v6, %v3767_v1  ;;  %v4166_v4 = vadd.f32 %v4165_v32, %v3766_v36 }
 0x5c1   : > { %v4167_v28 = vpop.f32.mrf.mxu3  ;;  %v4224_v42 = vpop.f32.mrf.mxu2 }
 0x5c2   : > { %v4225_v57 = vadd.f32 %v4224_v42, %v3767_v1  ;;  %v4168_v31 = vadd.f32 %v4167_v28, %v3766_v36  ;;  %v15058_v28 = vld [vmem:[#allocation2 + $0x18] sm:$0xff] }
 0x5e1   : > { %v4170_v53 = vpop.f32.mrf.mxu3  ;;  %v4227_v54 = vpop.f32.mrf.mxu2 }
 0x5e9   : > { %v16723_v43 = vpop.f32.mrf.mxu3  ;;  %v4229_v47 = vpop.f32.mrf.mxu2 }
 0x5eb   : > { %v14937_v21 = vpop.permute.xlu1 %14936 }
 0x5ec   : > { %v14939_v48 = vunpack.i.h.bf16 %v14937_v21  ;;  %v14938_v26 = vunpack.i.l.bf16 %v14937_v21 }
 0x5ee   : > { %v3757_v56 = vsel %vm2959_vm13, %v3574_v9, %v14938_v26  ;;  %v3758_v22 = vsel %vm2959_vm13, %v3576_v2, %v14939_v48  ;;  %v4171_v48 = vadd.f32 %v4170_v53, %v3766_v36  ;;  %v4228_v26 = vadd.f32 %v4227_v54, %v3767_v1  ;;  %v15057_v2 = vld [vmem:[#allocation2 + $0x50] sm:$0xff] }
 0x5ef   : > { %v3764_v8 = vpack.c.bf16 %v3758_v22, %v3757_v56 }
 0x5f1   : > { %4207 = vmatmul.bf16.gmra.mxu1 %v3764_v8  ;;  %4264 = vmatmul.bf16.gmra.mxu0 %v3764_v8 }
 0x5f2   : > { %4321 = vmatmul.bf16.gmra.mxu3 %v3764_v8 }
 0x601   : > { %4278 = vmatmul.bf16.vlgmr.msrb.gmra.mxu1 %v16586_v19 }
 0x611   : > { %4283 = vmatmul.bf16.gmra.mxu1 %v16606_v49 }
 0x614   : > { %v4184_v20 = vpop.f32.mrf.mxu0 }
 0x615   : > { %v4185_v58 = vadd.f32 %v4184_v20, %v4166_v4 }
 0x61a   : > { %v4241_v55 = vpop.f32.mrf.mxu3 }
 0x61b   : > { %v4298_v7 = vpop.f32.mrf.mxu2  ;;  %v4242_v25 = vadd.f32 %v4241_v55, %v4223_v59  ;;  %v15060_v59 = vld [vmem:[#allocation2 + $0x8] sm:$0xff] }
 0x61c   : > { %v4186_v60 = vpop.f32.mrf.mxu0 }
 0x61d   : > { %v4187_v27 = vadd.f32 %v4186_v60, %v4168_v31 }
 0x622   : > { %v4243_v50 = vpop.f32.mrf.mxu3 }
 0x623   : > { %v4244_v61 = vadd.f32 %v4243_v50, %v4225_v57  ;;  %v4300_v52 = vpop.f32.mrf.mxu2 }
 0x624   : > { %v4189_v40 = vpop.f32.mrf.mxu0 }
 0x625   : > { %v4190_v8 = vadd.f32 %v4189_v40, %v4171_v48  ;;  %v4173_v40 = vadd.f32 %v16723_v43, %v3766_v36  ;;  %v15062_v43 = vld [vmem:[#allocation2 + $0x28] sm:$0xff] }
 0x627   : > { %v4203_v39 = vpop.f32.mrf.mxu1 }
 0x628   : > { %v4204_v51 = vadd.f32 %v4203_v39, %v4185_v58  ;;  %v15059_v39 = vld [vmem:[#allocation2 + $0x20] sm:$0xff] }
 0x62a   : > { %v4246_v15 = vpop.f32.mrf.mxu3  ;;  %v16741_v63 = vadd.f32 %v15055_v41, %v4204_v51 }
 0x62b   : > { %v4247_v32 = vadd.f32 %v4246_v15, %v4228_v26  ;;  %v4303_v50 = vpop.f32.mrf.mxu2 }
 0x62c   : > { %v16725_v19 = vpop.f32.mrf.mxu0 }
 0x62f   : > { %v4205_v10 = vpop.f32.mrf.mxu1 }
 0x630   : > { %v4206_v46 = vadd.f32 %v4205_v10, %v4187_v27 }
 0x632   : > { %v16732_v17 = vpop.f32.mrf.mxu3  ;;  %v16751_v20 = vadd.f32 %v15058_v28, %v4206_v46 }
 0x634   : > { %v4260_v11 = vpop.f32.mrf.mxu0 }
 0x635   : > { %v4261_v30 = vadd.f32 %v4260_v11, %v4242_v25  ;;  %v4230_v11 = vadd.f32 %v4229_v47, %v3767_v1 }
 0x637   : > { %v16739_v12 = vadd.f32 %v15054_v45, %v4261_v30  ;;  %v4192_v30 = vadd.f32 %v16725_v19, %v4173_v40  ;;  %v4305_v45 = vpop.f32.mrf.mxu2 }
 0x639   : > { %19068 = vst [vmem:[#allocation21_spill] sm:$0xff] %v16739_v12  ;;  %v4365_v3 = vadd.f32 %v16739_v12, %v16741_v63 }
 0x63a   : > { %v4317_v35 = vpop.f32.mrf.mxu3 }
 0x63c   : > { %v4262_v5 = vpop.f32.mrf.mxu0 }
 0x63d   : > { %v4263_v23 = vadd.f32 %v4262_v5, %v4244_v61 }
 0x63f   : > { %v16749_v56 = vadd.f32 %v15057_v2, %v4263_v23 }
 0x641   : > { %19070 = vst [vmem:[#allocation23_spill] sm:$0xff] %v16749_v56  ;;  %v4369_v53 = vadd.f32 %v16749_v56, %v16751_v20 }
 0x642   : > { %v4319_v9 = vpop.f32.mrf.mxu3 }
 0x66e   : > { %v4208_v49 = vpop.f32.mrf.mxu1  ;;  %v4265_v21 = vpop.f32.mrf.mxu0 }
 0x66f   : > { %v4209_v55 = vadd.f32 %v4208_v49, %v4190_v8  ;;  %v4266_v60 = vadd.f32 %v4265_v21, %v4247_v32  ;;  %v15061_v49 = vld [vmem:[#allocation2 + $0x38] sm:$0xff] }
 0x671   : > { %v16762_v4 = vadd.f32 %v15061_v49, %v4266_v60 }
 0x673   : > { %19073 = vst [vmem:[#allocation26_spill] sm:$0xff] %v16762_v4 }
 0x675   : > { %v4322_v15 = vpop.f32.mrf.mxu3 }
 0x676   : > { %v16734_v24 = vpop.f32.mrf.mxu1  ;;  %v4267_v58 = vpop.f32.mrf.mxu0 }
 0x677   : > { %v4211_v51 = vadd.f32 %v16734_v24, %v4192_v30 }
 0x67d   : > { %v4324_v61 = vpop.f32.mrf.mxu3 }
 0x67e   : > { %v4279_v18 = vpop.f32.mrf.mxu1 }
 0x67f   : > { %v4280_v62 = vadd.f32 %v4279_v18, %v16736_v29 }
 0x681   : > { %v4299_v14 = vadd.f32 %v4298_v7, %v4280_v62  ;;  %v16760_v7 = vadd.f32 %v15060_v59, %v4209_v55 }
 0x683   : > { %v4318_v0 = vadd.f32 %v4317_v35, %v4299_v14  ;;  %19072 = vst [vmem:[#allocation25_spill] sm:$0xff] %v16760_v7  ;;  %v4249_v35 = vadd.f32 %v16732_v17, %v4230_v11  ;;  %v4373_v47 = vadd.f32 %v16762_v4, %v16760_v7  ;;  %v15063_v14 = vld [vmem:[#allocation2 + $0x48] sm:$0xff]  ;;  %v15064_v17 = vld [vmem:[#allocation2 + $0x10] sm:$0xff] }
 0x684   : > { %v16773_v19 = vadd.f32 %v15063_v14, %v4211_v51 }
 0x685   : > { %v16743_v33 = vadd.f32 %v15056_v13, %v4318_v0  ;;  %v4268_v62 = vadd.f32 %v4267_v58, %v4249_v35  ;;  %v15065_v0 = vld [vmem:[#allocation2 + $0x40] sm:$0xff] }
 0x686   : > { %v4281_v44 = vpop.f32.mrf.mxu1  ;;  %19075 = vst [vmem:[#allocation28_spill] sm:$0xff] %v16773_v19 }
 0x687   : > { %19069 = vst [vmem:[#allocation22_spill] sm:$0xff] %v16743_v33  ;;  %v4282_v16 = vadd.f32 %v4281_v44, %v16736_v29  ;;  %v4366_v34 = vadd.f32 %v4365_v3, %v16743_v33  ;;  %v16775_v31 = vadd.f32 %v15064_v17, %v4268_v62  ;;  %v14406_v17 = vld [vmem:[%s15380_s0 + $0x5cc] sm:$0xf0] }
 0x689   : > { %v4301_v22 = vadd.f32 %v4300_v52, %v4282_v16  ;;  %4367 = vadd.xlane.f32.xlu2 %v4366_v34  ;;  %19076 = vst [vmem:[#allocation29_spill] sm:$0xff] %v16775_v31  ;;  %v4377_v27 = vadd.f32 %v16775_v31, %v16773_v19 }
 0x68b   : > { %v4320_v6 = vadd.f32 %v4319_v9, %v4301_v22 }
 0x68d   : > { %v16753_v42 = vadd.f32 %v15059_v39, %v4320_v6 }
 0x68e   : > { %v4284_v10 = vpop.f32.mrf.mxu1 }
 0x68f   : > { %19071 = vst [vmem:[#allocation24_spill] sm:$0xff] %v16753_v42  ;;  %v4285_v54 = vadd.f32 %v4284_v10, %v16736_v29  ;;  %v4370_v37 = vadd.f32 %v4369_v53, %v16753_v42 }
 0x691   : > { %v4304_v25 = vadd.f32 %v4303_v50, %v4285_v54  ;;  %4371 = vadd.xlane.f32.xlu0 %v4370_v37 }
 0x693   : > { %v4323_v18 = vadd.f32 %v4322_v15, %v4304_v25 }
 0x695   : > { %v16767_v36 = vadd.f32 %v15062_v43, %v4323_v18 }
 0x696   : > { %v4286_v1 = vpop.f32.mrf.mxu1 }
 0x697   : > { %19074 = vst [vmem:[#allocation27_spill] sm:$0xff] %v16767_v36  ;;  %v4287_v5 = vadd.f32 %v4286_v1, %v16736_v29  ;;  %v4374_v57 = vadd.f32 %v4373_v47, %v16767_v36 }
 0x699   : > { %v4306_v24 = vadd.f32 %v4305_v45, %v4287_v5  ;;  %4375 = vadd.xlane.f32.xlu1 %v4374_v57  ;;  %v11864_v5 = vld [vmem:[%s15380_s0 + $0x2a0] sm:$0xf]  ;;  %v14310_v57 = vld [vmem:[%s15380_s0 + $0x2cc] sm:$0xf0] }
 0x69a   : > { %v12248_v45 = vld [vmem:[%s15380_s0 + $0x5a0] sm:$0xf]  ;;  %v11865_v14 = vor.u32 %v14310_v57, %v11864_v5  ;;  %v14370_v57 = vld [vmem:[%s15380_s0 + $0x4ac] sm:$0xf0] }
 0x69b   : > { %v4325_v41 = vadd.f32 %v4324_v61, %v4306_v24  ;;  %v12632_v24 = vld [vmem:[%s15380_s0 + $0x8a0] sm:$0xf]  ;;  %v14502_v61 = vld [vmem:[%s15380_s0 + $0x8cc] sm:$0xf0] }
 0x69c   : > { %6285 = vmatpush.bf16.msra.mxu0 %v11865_v14  ;;  %v14466_v14 = vld [vmem:[%s15380_s0 + $0x7ac] sm:$0xf0] }
 0x69d   : > { %v16777_v52 = vadd.f32 %v15065_v0, %v4325_v41  ;;  %v12249_v41 = vor.u32 %v14406_v17, %v12248_v45  ;;  %v12633_v0 = vor.u32 %v14502_v61, %v12632_v24  ;;  %v12488_v45 = vld [vmem:[%s15380_s0 + $0x780] sm:$0xf]  ;;  %v14268_v61 = vld [vmem:[%s15380_s0 + $0x184] sm:$0xf] }
 0x69e   : > { %v12489_v24 = vor.u32 %v14466_v14, %v12488_v45 }
 0x69f   : > { %19077 = vst [vmem:[#allocation30_spill] sm:$0xff] %v16777_v52  ;;  %v4378_v29 = vadd.f32 %v4377_v27, %v16777_v52  ;;  %v14304_v27 = vld [vmem:[%s15380_s0 + $0x2a4] sm:$0xf]  ;;  %6304 = vmatpush.bf16.msra.mxu1 %v12249_v41  ;;  %6323 = vmatpush.bf16.msra.mxu2 %v12633_v0  ;;  %v11722_v41 = vld [vmem:[%s15380_s0 + $0x1b0] sm:$0xf0] }
 0x6a0   : > { %v11725_v0 = vor.u32 %v14268_v61, %v11722_v41  ;;  %v11578_v61 = vld [vmem:[%s15380_s0 + $0x90] sm:$0xf0] }
 0x6a1   : > { %4379 = vadd.xlane.f32.xlu2 %v4378_v29  ;;  %v11866_v29 = vld [vmem:[%s15380_s0 + $0x2d0] sm:$0xf0] }
 0x6fc   : > { %v4368_v23 = vpop.xlane.xlu2 %4367 }
 0x6fd   : > { %v4381_v13 = vmul.f32 %v4368_v23, %v15407_v38  ;;  %v11869_v23 = vor.u32 %v14304_v27, %v11866_v29  ;;  %v11672_v27 = vld [vmem:[%s15380_s0 + $0x120] sm:$0xf]  ;;  %v14262_v29 = vld [vmem:[%s15380_s0 + $0x14c] sm:$0xf0] }
 0x6ff   : > { %v16784_v3 = vsub.f32 %v16741_v63, %v4381_v13  ;;  %v16787_v44 = vsub.f32 %v16739_v12, %v4381_v13  ;;  %v16790_v46 = vsub.f32 %v16743_v33, %v4381_v13  ;;  %v11816_v13 = vld [vmem:[%s15380_s0 + $0x240] sm:$0xf]  ;;  %6342 = vmatpush.bf16.msra.mxu3 %v11869_v23  ;;  %v14570_v12 = vld [vmem:[%s15385_s29 + $0x1f0] sm:$0xf0] }
 0x700   : > { %v12056_v23 = vld [vmem:[%s15380_s0 + $0x420] sm:$0xf] }
 0x701   : > { %v4397_v16 = vmul.f32 %v16784_v3, %v16784_v3  ;;  %v4398_v34 = vmul.f32 %v16787_v44, %v16787_v44  ;;  %v4399_v9 = vmul.f32 %v16790_v46, %v16790_v46 }
 0x703   : > { %v4409_v21 = vadd.f32 %v4398_v34, %v4397_v16  ;;  %v14298_v16 = vld [vmem:[%s15380_s0 + $0x26c] sm:$0xf0]  ;;  %v12200_v34 = vld [vmem:[%s15380_s0 + $0x540] sm:$0xf] }
 0x704   : > { %v4372_v48 = vpop.xlane.xlu0 %4371 }
 0x705   : > { %v4382_v26 = vmul.f32 %v4372_v48, %v15407_v38  ;;  %v4410_v2 = vadd.f32 %v4409_v21, %v4399_v9  ;;  %v11817_v9 = vor.u32 %v14298_v16, %v11816_v13  ;;  %v14394_v21 = vld [vmem:[%s15380_s0 + $0x56c] sm:$0xf0]  ;;  %v12584_v48 = vld [vmem:[%s15380_s0 + $0x840] sm:$0xf]  ;;  %v11673_v13 = vor.u32 %v14262_v29, %v11672_v27 }
 0x706   : > { %v14358_v16 = vld [vmem:[%s15380_s0 + $0x44c] sm:$0xf0]  ;;  %v11528_v27 = vld [vmem:[%s15380_s0] sm:$0xf] }
 0x707   : > { %v16800_v22 = vsub.f32 %v16751_v20, %v4382_v26  ;;  %v16803_v8 = vsub.f32 %v16749_v56, %v4382_v26  ;;  %v16806_v32 = vsub.f32 %v16753_v42, %v4382_v26  ;;  %4411 = vadd.xlane.f32.xlu0 %v4410_v2  ;;  %v14490_v26 = vld [vmem:[%s15380_s0 + $0x86c] sm:$0xf0]  ;;  %v12201_v2 = vor.u32 %v14394_v21, %v12200_v34  ;;  %v12440_v34 = vld [vmem:[%s15380_s0 + $0x720] sm:$0xf] }
 0x708   : > { %6286 = vmatpush.bf16.msra.mxu0 %v11817_v9  ;;  %v14454_v9 = vld [vmem:[%s15380_s0 + $0x74c] sm:$0xf0]  ;;  %v12057_v21 = vor.u32 %v14358_v16, %v12056_v23 }
 0x709   : > { %v4400_v28 = vmul.f32 %v16800_v22, %v16800_v22  ;;  %v4401_v6 = vmul.f32 %v16803_v8, %v16803_v8  ;;  %v4402_v55 = vmul.f32 %v16806_v32, %v16806_v32  ;;  %6305 = vmatpush.bf16.msra.mxu1 %v12201_v2  ;;  %v11674_v2 = vld [vmem:[%s15380_s0 + $0x150] sm:$0xf0]  ;;  %v14226_v29 = vld [vmem:[%s15380_s0 + $0x2c] sm:$0xf0] }
 0x70a   : > { %v11529_v23 = vor.u32 %v14226_v29, %v11528_v27  ;;  %v14322_v16 = vld [vmem:[%s15380_s0 + $0x32c] sm:$0xf0]  ;;  %v12208_v27 = vld [vmem:[%s15380_s0 + $0x548] sm:$0xf] }
 0x70b   : > { %v4413_v60 = vadd.f32 %v4401_v6, %v4400_v28  ;;  %v12585_v28 = vor.u32 %v14490_v26, %v12584_v48  ;;  %v14292_v6 = vld [vmem:[%s15380_s0 + $0x244] sm:$0xf]  ;;  %v12441_v48 = vor.u32 %v14454_v9, %v12440_v34  ;;  %v12296_v34 = vld [vmem:[%s15380_s0 + $0x600] sm:$0xf] }
 0x70c   : > { %v4376_v39 = vpop.xlane.xlu1 %4375  ;;  %v14256_v26 = vld [vmem:[%s15380_s0 + $0x124] sm:$0xf] }
 0x70d   : > { %v4383_v53 = vmul.f32 %v4376_v39, %v15407_v38  ;;  %v4414_v50 = vadd.f32 %v4413_v60, %v4402_v55  ;;  %v11818_v55 = vld [vmem:[%s15380_s0 + $0x270] sm:$0xf0]  ;;  %6324 = vmatpush.bf16.msra.mxu2 %v12585_v28  ;;  %v11768_v39 = vld [vmem:[%s15380_s0 + $0x1e0] sm:$0xf]  ;;  %v11677_v28 = vor.u32 %v14256_v26, %v11674_v2 }
 0x70e   : > { %v11821_v60 = vor.u32 %v14292_v6, %v11818_v55  ;;  %v11624_v6 = vld [vmem:[%s15380_s0 + $0xc0] sm:$0xf]  ;;  %v14250_v55 = vld [vmem:[%s15380_s0 + $0xec] sm:$0xf0]  ;;  %v11530_v26 = vld [vmem:[%s15380_s0 + $0x30] sm:$0xf0] }
 0x70f   : > { %v16816_v10 = vsub.f32 %v16760_v7, %v4383_v53  ;;  %v16819_v54 = vsub.f32 %v16762_v4, %v4383_v53  ;;  %v16822_v37 = vsub.f32 %v16767_v36, %v4383_v53  ;;  %4415 = vadd.xlane.f32.xlu2 %v4414_v50  ;;  %v14286_v53 = vld [vmem:[%s15380_s0 + $0x20c] sm:$0xf0]  ;;  %v12152_v50 = vld [vmem:[%s15380_s0 + $0x4e0] sm:$0xf]  ;;  %v12928_v4 = vld [vmem:[%s15385_s29 + $0x1e8] sm:$0xf] }
 0x710   : > { %6343 = vmatpush.bf16.msra.mxu3 %v11821_v60  ;;  %v12008_v60 = vld [vmem:[%s15380_s0 + $0x3c0] sm:$0xf]  ;;  %v13432_v7 = vld [vmem:[%s15385_s29 + $0x5d8] sm:$0xf] }
 0x711   : > { %v4403_v40 = vmul.f32 %v16816_v10, %v16816_v10  ;;  %v4404_v15 = vmul.f32 %v16819_v54, %v16819_v54  ;;  %v4405_v11 = vmul.f32 %v16822_v37, %v16822_v37  ;;  %v13762_v36 = vld [vmem:[%s15385_s29 + $0x87c] sm:$0xf0] }
 0x713   : > { %v4417_v59 = vadd.f32 %v4404_v15, %v4403_v40  ;;  %v11769_v40 = vor.u32 %v14286_v53, %v11768_v39  ;;  %v14382_v15 = vld [vmem:[%s15380_s0 + $0x50c] sm:$0xf0]  ;;  %v11625_v39 = vor.u32 %v14250_v55, %v11624_v6  ;;  %v14400_v6 = vld [vmem:[%s15380_s0 + $0x5a4] sm:$0xf]  ;;  %v12250_v55 = vld [vmem:[%s15380_s0 + $0x5d0] sm:$0xf0] }
 0x714   : > { %v4380_v49 = vpop.xlane.xlu2 %4379  ;;  %v14346_v53 = vld [vmem:[%s15380_s0 + $0x3ec] sm:$0xf0] }
 0x715   : > { %v4384_v25 = vmul.f32 %v4380_v49, %v15407_v38  ;;  %v4418_v58 = vadd.f32 %v4417_v59, %v4405_v11  ;;  %v12536_v11 = vld [vmem:[%s15380_s0 + $0x7e0] sm:$0xf]  ;;  %v14478_v59 = vld [vmem:[%s15380_s0 + $0x80c] sm:$0xf0]  ;;  %v12153_v49 = vor.u32 %v14382_v15, %v12152_v50  ;;  %6287 = vmatpush.bf16.msra.mxu0 %v11769_v40  ;;  %v12009_v15 = vor.u32 %v14346_v53, %v12008_v60  ;;  %v14496_v60 = vld [vmem:[%s15380_s0 + $0x8a4] sm:$0xf] }
 0x716   : > { %v12392_v50 = vld [vmem:[%s15380_s0 + $0x6c0] sm:$0xf]  ;;  %v14442_v40 = vld [vmem:[%s15380_s0 + $0x6ec] sm:$0xf0]  ;;  %v12253_v53 = vor.u32 %v14400_v6, %v12250_v55  ;;  %v12538_v55 = vld [vmem:[%s15380_s0 + $0x810] sm:$0xf0] }
 0x717   : > { %v16832_v30 = vsub.f32 %v16773_v19, %v4384_v25  ;;  %v16835_v35 = vsub.f32 %v16775_v31, %v4384_v25  ;;  %v16838_v18 = vsub.f32 %v16777_v52, %v4384_v25  ;;  %4419 = vadd.xlane.f32.xlu1 %v4418_v58  ;;  %v12537_v25 = vor.u32 %v14478_v59, %v12536_v11  ;;  %v14280_v58 = vld [vmem:[%s15380_s0 + $0x1e4] sm:$0xf]  ;;  %v14778_v52 = vld [vmem:[%s15385_s29 + $0x874] sm:$0xf]  ;;  %v14645_v31 = vld [vmem:[%s15385_s29 + $0x448] sm:$0xf0] }
 0x718   : > { %6306 = vmatpush.bf16.msra.mxu1 %v12153_v49  ;;  %v12393_v11 = vor.u32 %v14442_v40, %v12392_v50  ;;  %v14244_v59 = vld [vmem:[%s15380_s0 + $0xc4] sm:$0xf]  ;;  %v11626_v49 = vld [vmem:[%s15380_s0 + $0xf0] sm:$0xf0]  ;;  %v11872_v40 = vld [vmem:[%s15380_s0 + $0x2a8] sm:$0xf] }
 0x719   : > { %v4406_v51 = vmul.f32 %v16832_v30, %v16832_v30  ;;  %v4407_v62 = vmul.f32 %v16835_v35, %v16835_v35  ;;  %v4408_v43 = vmul.f32 %v16838_v18, %v16838_v18  ;;  %6325 = vmatpush.bf16.msra.mxu2 %v12537_v25  ;;  %v11629_v25 = vor.u32 %v14244_v59, %v11626_v49  ;;  %v12634_v50 = vld [vmem:[%s15380_s0 + $0x8d0] sm:$0xf0]  ;;  %v14600_v19 = vld [vmem:[%s15385_s29 + $0x2e0] sm:$0xf0] }
 0x71a   : > { %v12637_v59 = vor.u32 %v14496_v60, %v12634_v50  ;;  %v11776_v60 = vld [vmem:[%s15380_s0 + $0x1e8] sm:$0xf]  ;;  %v14287_v50 = vld [vmem:[%s15380_s0 + $0x214] sm:$0xf0] }
 0x71b   : > { %v4421_v47 = vadd.f32 %v4407_v62, %v4406_v51  ;;  %v11770_v51 = vld [vmem:[%s15380_s0 + $0x210] sm:$0xf0] }
 0x71c   : > { %v11773_v62 = vor.u32 %v14280_v58, %v11770_v51  ;;  %v11576_v58 = vld [vmem:[%s15380_s0 + $0x60] sm:$0xf]  ;;  %v14238_v51 = vld [vmem:[%s15380_s0 + $0x8c] sm:$0xf0] }
 0x71d   : > { %v4422_v1 = vadd.f32 %v4421_v47, %v4408_v43  ;;  %v11720_v43 = vld [vmem:[%s15380_s0 + $0x180] sm:$0xf]  ;;  %v14274_v47 = vld [vmem:[%s15380_s0 + $0x1ac] sm:$0xf0]  ;;  %6326 = vmatpush.bf16.msra.mxu2 %v12489_v24  ;;  %v14232_v24 = vld [vmem:[%s15380_s0 + $0x64] sm:$0xf] }
 0x71e   : > { %6344 = vmatpush.bf16.msra.mxu3 %v11773_v62  ;;  %v11721_v5 = vor.u32 %v14274_v47, %v11720_v43  ;;  %v11960_v62 = vld [vmem:[%s15380_s0 + $0x360] sm:$0xf]  ;;  %v11577_v47 = vor.u32 %v14238_v51, %v11576_v58  ;;  %v11581_v41 = vor.u32 %v14232_v24, %v11578_v61  ;;  %v14407_v58 = vld [vmem:[%s15380_s0 + $0x5d4] sm:$0xf0]  ;;  %v11824_v24 = vld [vmem:[%s15380_s0 + $0x248] sm:$0xf] }
 0x71f   : > { %4423 = vadd.xlane.f32.xlu0 %v4422_v1  ;;  %v12104_v1 = vld [vmem:[%s15380_s0 + $0x480] sm:$0xf] }
 0x720   : > { %v12105_v17 = vor.u32 %v14370_v57, %v12104_v1  ;;  %6288 = vmatpush.bf16.msra.mxu0 %v11721_v5  ;;  %v14334_v1 = vld [vmem:[%s15380_s0 + $0x38c] sm:$0xf0]  ;;  %v12344_v5 = vld [vmem:[%s15380_s0 + $0x660] sm:$0xf] }
 0x721   : > { %6327 = vmatpush.bf16.msra.mxu2 %v12441_v48  ;;  %v14430_v57 = vld [vmem:[%s15380_s0 + $0x68c] sm:$0xf0]  ;;  %v11961_v14 = vor.u32 %v14334_v1, %v11960_v62  ;;  %v14220_v48 = vld [vmem:[%s15380_s0 + $0x4] sm:$0xf]  ;;  %v4363_v51 = vld [vmem:[%s19078_s25] sm:$0x7] }
 0x722   : > { %6307 = vmatpush.bf16.msra.mxu1 %v12105_v17  ;;  %6345 = vmatpush.bf16.msra.mxu3 %v11725_v0  ;;  %v12345_v17 = vor.u32 %v14430_v57, %v12344_v5  ;;  %v14388_v1 = vld [vmem:[%s15380_s0 + $0x544] sm:$0xf]  ;;  %v12202_v5 = vld [vmem:[%s15380_s0 + $0x570] sm:$0xf0]  ;;  %v16942_v29 = vperm.slane %v4363_v51, 0 }
 0x724   : > { %6289 = vmatpush.bf16.msra.mxu0 %v11673_v13  ;;  %v11912_v13 = vld [vmem:[%s15380_s0 + $0x300] sm:$0xf] }
 0x725   : > { %6328 = vmatpush.bf16.msra.mxu2 %v12393_v11  ;;  %v11913_v9 = vor.u32 %v14322_v16, %v11912_v13  ;;  %v14395_v16 = vld [vmem:[%s15380_s0 + $0x574] sm:$0xf0] }
 0x726   : > { %6308 = vmatpush.bf16.msra.mxu1 %v12057_v21  ;;  %6346 = vmatpush.bf16.msra.mxu3 %v11677_v28  ;;  %v14418_v21 = vld [vmem:[%s15380_s0 + $0x62c] sm:$0xf0]  ;;  %v11533_v28 = vor.u32 %v14220_v48, %v11530_v26  ;;  %v14472_v48 = vld [vmem:[%s15380_s0 + $0x7e4] sm:$0xf]  ;;  %v16949_v26 = vperm.slane %v4363_v51, 1 }
 0x727   : > { %v12297_v2 = vor.u32 %v14418_v21, %v12296_v34  ;;  %v12209_v34 = vor.u32 %v14395_v16, %v12208_v27  ;;  %v12154_v21 = vld [vmem:[%s15380_s0 + $0x510] sm:$0xf0] }
 0x728   : > { %6290 = vmatpush.bf16.msra.mxu0 %v11625_v39 }
 0x729   : > { %6329 = vmatpush.bf16.msra.mxu2 %v12345_v17  ;;  %v12586_v17 = vld [vmem:[%s15380_s0 + $0x870] sm:$0xf0] }
 0x72a   : > { %6309 = vmatpush.bf16.msra.mxu1 %v12009_v15  ;;  %6347 = vmatpush.bf16.msra.mxu3 %v11629_v25  ;;  %v14311_v15 = vld [vmem:[%s15380_s0 + $0x2d4] sm:$0xf0]  ;;  %v12256_v25 = vld [vmem:[%s15380_s0 + $0x5a8] sm:$0xf] }
 0x72b   : > { %v11873_v49 = vor.u32 %v14311_v15, %v11872_v40  ;;  %v12257_v62 = vor.u32 %v14407_v58, %v12256_v25  ;;  %v12160_v40 = vld [vmem:[%s15380_s0 + $0x4e8] sm:$0xf]  ;;  %v14383_v15 = vld [vmem:[%s15380_s0 + $0x514] sm:$0xf0] }
 0x72c   : > { %6291 = vmatpush.bf16.msra.mxu0 %v11577_v47  ;;  %v12161_v25 = vor.u32 %v14383_v15, %v12160_v40  ;;  %v11680_v40 = vld [vmem:[%s15380_s0 + $0x128] sm:$0xf] }
 0x72d   : > { %6330 = vmatpush.bf16.msra.mxu2 %v12297_v2 }
 0x72e   : > { %6310 = vmatpush.bf16.msra.mxu1 %v11961_v14  ;;  %6348 = vmatpush.bf16.msra.mxu3 %v11581_v41  ;;  %v14484_v14 = vld [vmem:[%s15380_s0 + $0x844] sm:$0xf]  ;;  %v14299_v41 = vld [vmem:[%s15380_s0 + $0x274] sm:$0xf0] }
 0x72f   : > { %v12589_v61 = vor.u32 %v14484_v14, %v12586_v17  ;;  %v11825_v13 = vor.u32 %v14299_v41, %v11824_v24  ;;  %v14460_v17 = vld [vmem:[%s15380_s0 + $0x784] sm:$0xf]  ;;  %v12490_v24 = vld [vmem:[%s15380_s0 + $0x7b0] sm:$0xf0]  ;;  %v16976_v41 = vperm.slane %v4363_v51, 2 }
 0x730   : > { %6292 = vmatpush.bf16.msra.mxu0 %v11529_v23 }
 0x731   : > { %6399 = vmatpush.bf16.msrb.mxu2 %v11873_v49  ;;  %v11777_v49 = vor.u32 %v14287_v50, %v11776_v60  ;;  %v12442_v50 = vld [vmem:[%s15380_s0 + $0x750] sm:$0xf0] }
 0x732   : > { %6311 = vmatpush.bf16.msra.mxu1 %v11913_v9  ;;  %6349 = vmatpush.bf16.msra.mxu3 %v11533_v28  ;;  %v14376_v9 = vld [vmem:[%s15380_s0 + $0x4e4] sm:$0xf] }
 0x733   : > { %v12157_v6 = vor.u32 %v14376_v9, %v12154_v21  ;;  %v14371_v21 = vld [vmem:[%s15380_s0 + $0x4b4] sm:$0xf0] }
 0x734   : > { %6361 = vmatpush.bf16.msrb.mxu0 %v12253_v53  ;;  %v12541_v53 = vor.u32 %v14472_v48, %v12538_v55  ;;  %v14448_v55 = vld [vmem:[%s15380_s0 + $0x724] sm:$0xf] }
 0x735   : > { %6400 = vmatpush.bf16.msrb.mxu2 %v11825_v13  ;;  %v12112_v13 = vld [vmem:[%s15380_s0 + $0x488] sm:$0xf] }
 0x736   : > { %6380 = vmatpush.bf16.msrb.mxu1 %v12637_v59  ;;  %6418 = vmatpush.bf16.msrb.mxu3 %v12257_v62 }
 0x739   : > { %6401 = vmatpush.bf16.msrb.mxu2 %v11777_v49  ;;  %v12064_v49 = vld [vmem:[%s15380_s0 + $0x428] sm:$0xf] }
 0x73a   : > { %6381 = vmatpush.bf16.msrb.mxu1 %v12589_v61  ;;  %6419 = vmatpush.bf16.msrb.mxu3 %v12209_v34  ;;  %v11728_v61 = vld [vmem:[%s15380_s0 + $0x188] sm:$0xf] }
 0x73e   : > { %6382 = vmatpush.bf16.msrb.mxu1 %v12541_v53  ;;  %6420 = vmatpush.bf16.msrb.mxu3 %v12161_v25  ;;  %v14359_v25 = vld [vmem:[%s15380_s0 + $0x454] sm:$0xf0] }
 0x77a   : > { %v4412_v43 = vpop.xlane.xlu0 %4411 }
 0x77b   : > { %v4425_v45 = vmul.f32 %v4412_v43, %v15407_v38 }
 0x77d   : > { %v16903_v0 = vadd.f32 1e-05, %v4425_v45  ;;  %v12205_v45 = vor.u32 %v14388_v1, %v12202_v5  ;;  %v14364_v1 = vld [vmem:[%s15380_s0 + $0x484] sm:$0xf]  ;;  %v12106_v5 = vld [vmem:[%s15380_s0 + $0x4b0] sm:$0xf0] }
 0x77e   : > { %v12109_v14 = vor.u32 %v14364_v1, %v12106_v5  ;;  %v12445_v5 = vor.u32 %v14448_v55, %v12442_v50  ;;  %v11962_v50 = vld [vmem:[%s15380_s0 + $0x390] sm:$0xf0] }
 0x77f   : > { %15046 = vrsqrt.f32 %v16903_v0  ;;  %6362 = vmatpush.bf16.msrb.mxu0 %v12205_v45  ;;  %vm4439_vm4 = vweird.f32 %v16903_v0 }
 0x782   : > { %v4416_v39 = vpop.xlane.xlu2 %4415 }
 0x783   : > { %v4426_v11 = vmul.f32 %v4416_v39, %v15407_v38  ;;  %6363 = vmatpush.bf16.msrb.mxu0 %v12157_v6  ;;  %v12058_v6 = vld [vmem:[%s15380_s0 + $0x450] sm:$0xf0] }
 0x785   : > { %v16928_v43 = vpop.eup %15046  ;;  %v16930_v47 = vadd.f32 1e-05, %v4426_v11  ;;  %v4364_v11 = vld [vmem:[%s717_s13] sm:$0x7] }
 0x786   : > { %v4434_v57 = vmul.f32 %v16928_v43, %v16903_v0  ;;  %vm4440_vm3 = vweird.f32 %v16928_v43  ;;  %v16978_v27 = vperm.slane %v4364_v11, 0  ;;  %v12493_v0 = vor.u32 %v14460_v17, %v12490_v24 }
 0x787   : > { %15048 = vrsqrt.f32 %v16930_v47  ;;  %vm4441_vm5 = vmor %vm4439_vm4, %vm4440_vm3  ;;  %v16985_v16 = vperm.slane %v4364_v11, 1  ;;  %6364 = vmatpush.bf16.msrb.mxu0 %v12109_v14  ;;  %v16994_v60 = vperm.slane %v4364_v11, 2  ;;  %v14263_v11 = vld [vmem:[%s15380_s0 + $0x154] sm:$0xf0]  ;;  %vm4449_vm7 = vweird.f32 %v16930_v47 }
 0x788   : > { %v4435_v23 = vmul.f32 %v16928_v43, %v4434_v57  ;;  %6383 = vmatpush.bf16.msrb.mxu1 %v12493_v0  ;;  %v12394_v0 = vld [vmem:[%s15380_s0 + $0x6f0] sm:$0xf0] }
 0x78a   : > { %v4436_v2 = vmul.f32 0.5, %v4435_v23  ;;  %v4420_v28 = vpop.xlane.xlu1 %4419  ;;  %v14275_v23 = vld [vmem:[%s15380_s0 + $0x1b4] sm:$0xf0] }
 0x78b   : > { %v4427_v39 = vmul.f32 %v4420_v28, %v15407_v38  ;;  %v11729_v9 = vor.u32 %v14275_v23, %v11728_v61  ;;  %v14352_v28 = vld [vmem:[%s15380_s0 + $0x424] sm:$0xf] }
 0x78c   : > { %v4437_v59 = vsub.f32 1.5, %v4436_v2  ;;  %v12113_v2 = vor.u32 %v14371_v21, %v12112_v13  ;;  %v12061_v53 = vor.u32 %v14352_v28, %v12058_v6  ;;  %v14436_v61 = vld [vmem:[%s15380_s0 + $0x6c4] sm:$0xf]  ;;  %6384 = vmatpush.bf16.msrb.mxu1 %v12445_v5  ;;  %v12016_v21 = vld [vmem:[%s15380_s0 + $0x3c8] sm:$0xf] }
 0x78d   : > { %v16963_v58 = vpop.eup %15048  ;;  %v16965_v62 = vadd.f32 1e-05, %v4427_v39  ;;  %6402 = vmatpush.bf16.msrb.mxu2 %v11729_v9  ;;  %v14251_v9 = vld [vmem:[%s15380_s0 + $0xf4] sm:$0xf0]  ;;  %v14328_v6 = vld [vmem:[%s15380_s0 + $0x364] sm:$0xf] }
 0x78e   : > { %v4438_v57 = vmul.f32 %v16928_v43, %v4437_v59  ;;  %v4444_v45 = vmul.f32 %v16963_v58, %v16930_v47  ;;  %vm4450_vm6 = vweird.f32 %v16963_v58  ;;  %6421 = vmatpush.bf16.msrb.mxu3 %v12113_v2  ;;  %6365 = vmatpush.bf16.msrb.mxu0 %v12061_v53  ;;  %v12397_v47 = vor.u32 %v14436_v61, %v12394_v0  ;;  %v14347_v28 = vld [vmem:[%s15380_s0 + $0x3f4] sm:$0xf0] }
 0x78f   : > { %15050 = vrsqrt.f32 %v16965_v62  ;;  %vm4451_vm8 = vmor %vm4449_vm7, %vm4450_vm6  ;;  %v12017_v53 = vor.u32 %v14347_v28, %v12016_v21  ;;  %v11536_v21 = vld [vmem:[%s15380_s0 + $0x8] sm:$0xf]  ;;  %vm4459_vm10 = vweird.f32 %v16965_v62 }
 0x790   : > { %v4442_v34 = vsel %vm4441_vm5, %v16928_v43, %v4438_v57  ;;  %v4445_v51 = vmul.f32 %v16963_v58, %v4444_v45  ;;  %v11681_v57 = vor.u32 %v14263_v11, %v11680_v40  ;;  %v12065_v45 = vor.u32 %v14359_v25, %v12064_v49  ;;  %v14424_v40 = vld [vmem:[%s15380_s0 + $0x664] sm:$0xf]  ;;  %6385 = vmatpush.bf16.msrb.mxu1 %v12397_v47  ;;  %v14227_v47 = vld [vmem:[%s15380_s0 + $0x34] sm:$0xf0] }
 0x791   : > { %v4473_v48 = vmul.f32 %v4442_v34, %v16784_v3  ;;  %v4474_v3 = vmul.f32 %v4442_v34, %v16787_v44  ;;  %v4475_v15 = vmul.f32 %v4442_v34, %v16790_v46  ;;  %v14340_v44 = vld [vmem:[%s15380_s0 + $0x3c4] sm:$0xf]  ;;  %v12010_v46 = vld [vmem:[%s15380_s0 + $0x3f0] sm:$0xf0]  ;;  %v11965_v25 = vor.u32 %v14328_v6, %v11962_v50  ;;  %v14323_v50 = vld [vmem:[%s15380_s0 + $0x334] sm:$0xf0] }
 0x792   : > { %v4446_v43 = vmul.f32 0.5, %v4445_v51  ;;  %v4424_v39 = vpop.xlane.xlu0 %4423  ;;  %6403 = vmatpush.bf16.msrb.mxu2 %v11681_v57  ;;  %v12013_v34 = vor.u32 %v14340_v44, %v12010_v46  ;;  %v11632_v51 = vld [vmem:[%s15380_s0 + $0xc8] sm:$0xf]  ;;  %6422 = vmatpush.bf16.msrb.mxu3 %v12065_v45 }
 0x793   : > { %v4428_v59 = vmul.f32 %v4424_v39, %v15407_v38  ;;  %v4492_v17 = vmul.f32 %v16942_v29, %v4473_v48  ;;  %v4493_v48 = vmul.f32 %v16949_v26, %v4474_v3  ;;  %v11633_v2 = vor.u32 %v14251_v9, %v11632_v51  ;;  %v12346_v3 = vld [vmem:[%s15380_s0 + $0x690] sm:$0xf0]  ;;  %v13642_v38 = vld [vmem:[%s15385_s29 + $0x78c] sm:$0xf0] }
 0x794   : > { %v4447_v1 = vsub.f32 1.5, %v4446_v43  ;;  %v4494_v55 = vmul.f32 %v16976_v41, %v4475_v15  ;;  %6366 = vmatpush.bf16.msrb.mxu0 %v12013_v34  ;;  %v14239_v15 = vld [vmem:[%s15380_s0 + $0x94] sm:$0xf0]  ;;  %v12349_v45 = vor.u32 %v14424_v40, %v12346_v3 }
 0x795   : > { %v17007_v14 = vpop.eup %15050  ;;  %v17010_v24 = vadd.f32 1e-05, %v4428_v59  ;;  %v4511_v5 = vadd.f32 %v16978_v27, %v4492_v17  ;;  %v14412_v17 = vld [vmem:[%s15380_s0 + $0x604] sm:$0xf]  ;;  %v4512_v34 = vadd.f32 %v16985_v16, %v4493_v48 }
 0x796   : > { %v4448_v23 = vmul.f32 %v16963_v58, %v4447_v1  ;;  %v4454_v13 = vmul.f32 %v17007_v14, %v16965_v62  ;;  %v11584_v1 = vld [vmem:[%s15380_s0 + $0x68] sm:$0xf]  ;;  %6404 = vmatpush.bf16.msrb.mxu2 %v11633_v2  ;;  %6423 = vmatpush.bf16.msrb.mxu3 %v12017_v53  ;;  %vm4460_vm9 = vweird.f32 %v17007_v14  ;;  %v4513_v28 = vadd.f32 %v16994_v60, %v4494_v55 }
 0x797   : > { %15052 = vrsqrt.f32 %v17010_v24  ;;  %v11585_v44 = vor.u32 %v14239_v15, %v11584_v1  ;;  %v11920_v53 = vld [vmem:[%s15380_s0 + $0x308] sm:$0xf]  ;;  %6386 = vmatpush.bf16.msrb.mxu1 %v12349_v45  ;;  %vm4461_vm11 = vmor %vm4459_vm10, %vm4460_vm9  ;;  %v11537_v62 = vor.u32 %v14227_v47, %v11536_v21  ;;  %v11874_v45 = vld [vmem:[%s15380_s0 + $0x2d8] sm:$0xf0]  ;;  %vm4469_vm13 = vweird.f32 %v17010_v24 }
 0x798   : > { %v4452_v43 = vsel %vm4451_vm8, %v16963_v58, %v4448_v23  ;;  %v4455_v39 = vmul.f32 %v17007_v14, %v4454_v13  ;;  %v11968_v58 = vld [vmem:[%s15380_s0 + $0x368] sm:$0xf]  ;;  %v11914_v23 = vld [vmem:[%s15380_s0 + $0x330] sm:$0xf0]  ;;  %6367 = vmatpush.bf16.msrb.mxu0 %v11965_v25  ;;  %v11921_v1 = vor.u32 %v14323_v50, %v11920_v53  ;;  %v11826_v21 = vld [vmem:[%s15380_s0 + $0x278] sm:$0xf0] }
 0x799   : > { %v4476_v59 = vmul.f32 %v4452_v43, %v16800_v22  ;;  %v4477_v11 = vmul.f32 %v4452_v43, %v16803_v8  ;;  %v4478_v49 = vmul.f32 %v4452_v43, %v16806_v32  ;;  %v14335_v22 = vld [vmem:[%s15380_s0 + $0x394] sm:$0xf0]  ;;  %v14316_v8 = vld [vmem:[%s15380_s0 + $0x304] sm:$0xf]  ;;  %v12298_v13 = vld [vmem:[%s15380_s0 + $0x630] sm:$0xf0] }
 0x79a   : > { %v4456_v57 = vmul.f32 0.5, %v4455_v39  ;;  %v11969_v0 = vor.u32 %v14335_v22, %v11968_v58  ;;  %v11917_v9 = vor.u32 %v14316_v8, %v11914_v23  ;;  %6405 = vmatpush.bf16.msrb.mxu2 %v11585_v44  ;;  %v12301_v55 = vor.u32 %v14412_v17, %v12298_v13  ;;  %v12640_v15 = vld [vmem:[%s15380_s0 + $0x8a8] sm:$0xf]  ;;  %v14503_v58 = vld [vmem:[%s15380_s0 + $0x8d4] sm:$0xf0] }
 0x79b   : > { %v4495_v32 = vmul.f32 %v16942_v29, %v4476_v59  ;;  %v4496_v46 = vmul.f32 %v16949_v26, %v4477_v11  ;;  %v4497_v61 = vmul.f32 %v16976_v41, %v4478_v49  ;;  %v14401_v44 = vld [vmem:[%s15380_s0 + $0x5ac] sm:$0xf]  ;;  %v12592_v17 = vld [vmem:[%s15380_s0 + $0x848] sm:$0xf]  ;;  %v14491_v13 = vld [vmem:[%s15380_s0 + $0x874] sm:$0xf0] }
 0x79c   : > { %v4457_v51 = vsub.f32 1.5, %v4456_v57  ;;  %6424 = vmatpush.bf16.msrb.mxu3 %v11969_v0  ;;  %6368 = vmatpush.bf16.msrb.mxu0 %v11917_v9  ;;  %v14293_v9 = vld [vmem:[%s15380_s0 + $0x24c] sm:$0xf]  ;;  %v12594_v53 = vld [vmem:[%s15380_s0 + $0x878] sm:$0xf0] }
 0x79d   : > { %v17052_v2 = vpop.eup %15052  ;;  %v4514_v6 = vadd.f32 %v16978_v27, %v4495_v32  ;;  %v4515_v43 = vadd.f32 %v16985_v16, %v4496_v46  ;;  %v4516_v39 = vadd.f32 %v16994_v60, %v4497_v61  ;;  %6387 = vmatpush.bf16.msrb.mxu1 %v12301_v55  ;;  %v12258_v32 = vld [vmem:[%s15380_s0 + $0x5d8] sm:$0xf0]  ;;  %v14497_v46 = vld [vmem:[%s15380_s0 + $0x8ac] sm:$0xf] }
 0x79e   : > { %v4458_v48 = vmul.f32 %v17007_v14, %v4457_v51  ;;  %v4464_v40 = vmul.f32 %v17052_v2, %v17010_v24  ;;  %vm4470_vm12 = vweird.f32 %v17052_v2  ;;  %6406 = vmatpush.bf16.msrb.mxu2 %v11537_v62  ;;  %v12642_v61 = vld [vmem:[%s15380_s0 + $0x8d8] sm:$0xf0]  ;;  %v12593_v51 = vor.u32 %v14491_v13, %v12592_v17  ;;  %v14389_v47 = vld [vmem:[%s15380_s0 + $0x54c] sm:$0xf] }
 0x79f   : > { %v17064_v3 = vpack.c.bf16 %v4514_v6, %v4511_v5  ;;  %v17066_v59 = vpack.c.bf16 %v4515_v43, %v4512_v34  ;;  %v17068_v11 = vpack.c.bf16 %v4516_v39, %v4513_v28  ;;  %v14305_v5 = vld [vmem:[%s15380_s0 + $0x2ac] sm:$0xf]  ;;  %vm17092_vm14 = vmor %vm4469_vm13, %vm4470_vm12  ;;  %v12645_v24 = vor.u32 %v14497_v46, %v12642_v61  ;;  %v12210_v43 = vld [vmem:[%s15380_s0 + $0x578] sm:$0xf0] }
 0x7a0   : > { %v4462_v49 = vsel %vm4461_vm11, %v17007_v14, %v4458_v48  ;;  %v4465_v25 = vmul.f32 %v17052_v2, %v4464_v40  ;;  %v12641_v14 = vor.u32 %v14503_v58, %v12640_v15  ;;  %6425 = vmatpush.bf16.msrb.mxu3 %v11921_v1  ;;  %v11829_v6 = vor.u32 %v14293_v9, %v11826_v21  ;;  %v14485_v39 = vld [vmem:[%s15380_s0 + $0x84c] sm:$0xf]  ;;  %v12544_v48 = vld [vmem:[%s15380_s0 + $0x7e8] sm:$0xf]  ;;  %v14479_v40 = vld [vmem:[%s15380_s0 + $0x814] sm:$0xf0] }
 0x7a1   : > { %6293 = vmatmul.bf16.vlgmr.msra.gmra.mxu0 %v17064_v3  ;;  %6312 = vmatmul.bf16.vlgmr.msra.gmra.mxu1 %v17066_v59  ;;  %v4479_v22 = vmul.f32 %v4462_v49, %v16816_v10  ;;  %v4480_v8 = vmul.f32 %v4462_v49, %v16819_v54  ;;  %v11877_v10 = vor.u32 %v14305_v5, %v11874_v45  ;;  %v14281_v55 = vld [vmem:[%s15380_s0 + $0x1ec] sm:$0xf]  ;;  %v11778_v15 = vld [vmem:[%s15380_s0 + $0x218] sm:$0xf0]  ;;  %v14467_v61 = vld [vmem:[%s15380_s0 + $0x7b4] sm:$0xf0] }
 0x7a2   : > { %v4466_v57 = vmul.f32 0.5, %v4465_v25  ;;  %6331 = vmatmul.bf16.vlgmr.msra.gmra.mxu2 %v17068_v11  ;;  %6350 = vmatmul.bf16.vlgmr.msra.gmra.mxu3 %v17064_v3  ;;  %v12261_v54 = vor.u32 %v14401_v44, %v12258_v32  ;;  %v4481_v34 = vmul.f32 %v4462_v49, %v16822_v37  ;;  %v12213_v50 = vor.u32 %v14389_v47, %v12210_v43  ;;  %v14377_v58 = vld [vmem:[%s15380_s0 + $0x4ec] sm:$0xf]  ;;  %v12162_v5 = vld [vmem:[%s15380_s0 + $0x518] sm:$0xf0] }
 0x7a3   : > { %6437 = vmatpush.bf16.msra.mxu0 %v12641_v14  ;;  %6456 = vmatpush.bf16.msra.mxu1 %v11877_v10  ;;  %v12597_v37 = vor.u32 %v14485_v39, %v12594_v53  ;;  %v4498_v62 = vmul.f32 %v16942_v29, %v4479_v22  ;;  %v4499_v49 = vmul.f32 %v16949_v26, %v4480_v8  ;;  %v14473_v22 = vld [vmem:[%s15380_s0 + $0x7ec] sm:$0xf]  ;;  %v12546_v8 = vld [vmem:[%s15380_s0 + $0x818] sm:$0xf0]  ;;  %v12496_v32 = vld [vmem:[%s15380_s0 + $0x788] sm:$0xf] }
 0x7a4   : > { %v4467_v0 = vsub.f32 1.5, %v4466_v57  ;;  %6475 = vmatpush.bf16.msra.mxu2 %v12261_v54  ;;  %6494 = vmatpush.bf16.msra.mxu3 %v12645_v24  ;;  %v12545_v1 = vor.u32 %v14479_v40, %v12544_v48  ;;  %v4500_v57 = vmul.f32 %v16976_v41, %v4481_v34  ;;  %v12165_v46 = vor.u32 %v14377_v58, %v12162_v5  ;;  %v14269_v23 = vld [vmem:[%s15380_s0 + $0x18c] sm:$0xf]  ;;  %v11730_v10 = vld [vmem:[%s15380_s0 + $0x1b8] sm:$0xf0] }
 0x7a5   : > { %v4517_v54 = vadd.f32 %v16978_v27, %v4498_v62  ;;  %v4518_v24 = vadd.f32 %v16985_v16, %v4499_v49  ;;  %v12497_v17 = vor.u32 %v14467_v61, %v12496_v32  ;;  %v14365_v13 = vld [vmem:[%s15380_s0 + $0x48c] sm:$0xf]  ;;  %v12114_v34 = vld [vmem:[%s15380_s0 + $0x4b8] sm:$0xf0]  ;;  %v11733_v47 = vor.u32 %v14269_v23, %v11730_v10  ;;  %v12448_v43 = vld [vmem:[%s15380_s0 + $0x728] sm:$0xf] }
 0x7a6   : > { %v4468_v28 = vmul.f32 %v17052_v2, %v4467_v0  ;;  %v14461_v9 = vld [vmem:[%s15380_s0 + $0x78c] sm:$0xf]  ;;  %v12498_v21 = vld [vmem:[%s15380_s0 + $0x7b8] sm:$0xf0]  ;;  %v14455_v39 = vld [vmem:[%s15380_s0 + $0x754] sm:$0xf0] }
 0x7a7   : > { %6438 = vmatpush.bf16.msra.mxu0 %v12593_v51  ;;  %6457 = vmatpush.bf16.msra.mxu1 %v11829_v6  ;;  %v14257_v53 = vld [vmem:[%s15380_s0 + $0x12c] sm:$0xf]  ;;  %v12066_v40 = vld [vmem:[%s15380_s0 + $0x458] sm:$0xf0]  ;;  %v14443_v58 = vld [vmem:[%s15380_s0 + $0x6f4] sm:$0xf0] }
 0x7a8   : > { %v4472_v25 = vsel %vm17092_vm14, %v17052_v2, %v4468_v28  ;;  %6476 = vmatpush.bf16.msra.mxu2 %v12213_v50  ;;  %v11781_v2 = vor.u32 %v14281_v55, %v11778_v15  ;;  %6495 = vmatpush.bf16.msra.mxu3 %v12597_v37  ;;  %v12449_v50 = vor.u32 %v14455_v39, %v12448_v43  ;;  %v11682_v37 = vld [vmem:[%s15380_s0 + $0x158] sm:$0xf0]  ;;  %v14353_v48 = vld [vmem:[%s15380_s0 + $0x42c] sm:$0xf]  ;;  %v12352_v32 = vld [vmem:[%s15380_s0 + $0x668] sm:$0xf] }
 0x7a9   : > { %v4482_v14 = vmul.f32 %v4472_v25, %v16832_v30  ;;  %v4483_v45 = vmul.f32 %v4472_v25, %v16835_v35  ;;  %v4484_v44 = vmul.f32 %v4472_v25, %v16838_v18  ;;  %v12549_v18 = vor.u32 %v14473_v22, %v12546_v8  ;;  %v14449_v49 = vld [vmem:[%s15380_s0 + $0x72c] sm:$0xf]  ;;  %v12450_v25 = vld [vmem:[%s15380_s0 + $0x758] sm:$0xf0] }
 0x7aa   : > { %v11685_v55 = vor.u32 %v14257_v53, %v11682_v37  ;;  %v12069_v62 = vor.u32 %v14353_v48, %v12066_v40  ;;  %v12453_v15 = vor.u32 %v14449_v49, %v12450_v25  ;;  %v14245_v5 = vld [vmem:[%s15380_s0 + $0xcc] sm:$0xf]  ;;  %v12402_v8 = vld [vmem:[%s15380_s0 + $0x6f8] sm:$0xf0]  ;;  %v14312_v37 = vld [vmem:[%s15380_s0 + $0x2dc] sm:$0xf0] }
 0x7ab   : > { %v4501_v0 = vmul.f32 %v16942_v29, %v4482_v14  ;;  %v4502_v30 = vmul.f32 %v16949_v26, %v4483_v45  ;;  %v4503_v35 = vmul.f32 %v16976_v41, %v4484_v44  ;;  %6439 = vmatpush.bf16.msra.mxu0 %v12545_v1  ;;  %v4519_v29 = vadd.f32 %v16994_v60, %v4500_v57  ;;  %v12400_v1 = vld [vmem:[%s15380_s0 + $0x6c8] sm:$0xf]  ;;  %v11634_v57 = vld [vmem:[%s15380_s0 + $0xf8] sm:$0xf0]  ;;  %v14341_v45 = vld [vmem:[%s15380_s0 + $0x3cc] sm:$0xf] }
 0x7ac   : > { %6458 = vmatpush.bf16.msra.mxu1 %v11781_v2  ;;  %6477 = vmatpush.bf16.msra.mxu2 %v12165_v46  ;;  %v12401_v14 = vor.u32 %v14443_v58, %v12400_v1  ;;  %v12018_v44 = vld [vmem:[%s15380_s0 + $0x3f8] sm:$0xf0]  ;;  %v14437_v22 = vld [vmem:[%s15380_s0 + $0x6cc] sm:$0xf]  ;;  %v14431_v2 = vld [vmem:[%s15380_s0 + $0x694] sm:$0xf0]  ;;  %v11637_v46 = vor.u32 %v14245_v5, %v11634_v57 }
 0x7ad   : > { %v4520_v26 = vadd.f32 %v16978_v27, %v4501_v0  ;;  %v4521_v51 = vadd.f32 %v16985_v16, %v4502_v30  ;;  %v4522_v41 = vadd.f32 %v16994_v60, %v4503_v35  ;;  %6496 = vmatpush.bf16.msra.mxu3 %v12549_v18  ;;  %v12117_v16 = vor.u32 %v14365_v13, %v12114_v34  ;;  %v14233_v0 = vld [vmem:[%s15380_s0 + $0x6c] sm:$0xf]  ;;  %v11586_v30 = vld [vmem:[%s15380_s0 + $0x98] sm:$0xf0]  ;;  %v14419_v13 = vld [vmem:[%s15380_s0 + $0x634] sm:$0xf0] }
 0x7ae   : > { %v12501_v60 = vor.u32 %v14461_v9, %v12498_v21  ;;  %v12021_v61 = vor.u32 %v14341_v45, %v12018_v44  ;;  %v12405_v35 = vor.u32 %v14437_v22, %v12402_v8  ;;  %v12353_v18 = vor.u32 %v14431_v2, %v12352_v32  ;;  %v14329_v23 = vld [vmem:[%s15380_s0 + $0x36c] sm:$0xf]  ;;  %v11970_v10 = vld [vmem:[%s15380_s0 + $0x398] sm:$0xf0]  ;;  %v12264_v48 = vld [vmem:[%s15380_s0 + $0x5b0] sm:$0xf] }
 0x7af   : > { %v17140_v28 = vpack.c.bf16 %v4520_v26, %v4517_v54  ;;  %v17142_v6 = vpack.c.bf16 %v4521_v51, %v4518_v24  ;;  %v17144_v27 = vpack.c.bf16 %v4522_v41, %v4519_v29  ;;  %6440 = vmatpush.bf16.msra.mxu0 %v12497_v17  ;;  %v14425_v54 = vld [vmem:[%s15380_s0 + $0x66c] sm:$0xf]  ;;  %v12354_v24 = vld [vmem:[%s15380_s0 + $0x698] sm:$0xf0]  ;;  %v12304_v17 = vld [vmem:[%s15380_s0 + $0x608] sm:$0xf]  ;;  %v11589_v34 = vor.u32 %v14233_v0, %v11586_v30 }
 0x7b0   : > { %6459 = vmatpush.bf16.msra.mxu1 %v11733_v47  ;;  %6478 = vmatpush.bf16.msra.mxu2 %v12117_v16  ;;  %v11973_v29 = vor.u32 %v14329_v23, %v11970_v10  ;;  %v14221_v26 = vld [vmem:[%s15380_s0 + $0xc] sm:$0xf]  ;;  %v12357_v51 = vor.u32 %v14425_v54, %v12354_v24  ;;  %v12305_v41 = vor.u32 %v14419_v13, %v12304_v17  ;;  %v11538_v9 = vld [vmem:[%s15380_s0 + $0x38] sm:$0xf0]  ;;  %v14504_v49 = vld [vmem:[%s15380_s0 + $0x8dc] sm:$0xf0] }
 0x7b1   : > { %6298 = vmatmul.bf16.gmra.mxu0 %v17140_v28  ;;  %6317 = vmatmul.bf16.gmra.mxu1 %v17142_v6  ;;  %v14317_v21 = vld [vmem:[%s15380_s0 + $0x30c] sm:$0xf]  ;;  %v11922_v47 = vld [vmem:[%s15380_s0 + $0x338] sm:$0xf0]  ;;  %v11541_v43 = vor.u32 %v14221_v26, %v11538_v9  ;;  %v11882_v58 = vld [vmem:[%s15380_s0 + $0x2e0] sm:$0xf0] }
 0x7b2   : > { %6336 = vmatmul.bf16.gmra.mxu2 %v17144_v27  ;;  %6355 = vmatmul.bf16.gmra.mxu3 %v17140_v28  ;;  %v14413_v16 = vld [vmem:[%s15380_s0 + $0x60c] sm:$0xf]  ;;  %v11925_v39 = vor.u32 %v14317_v21, %v11922_v47  ;;  %v11832_v5 = vld [vmem:[%s15380_s0 + $0x250] sm:$0xf]  ;;  %v14396_v44 = vld [vmem:[%s15380_s0 + $0x57c] sm:$0xf0] }
 0x7b3   : > { %6497 = vmatpush.bf16.msra.mxu3 %v12501_v60  ;;  %6441 = vmatpush.bf16.msra.mxu0 %v12449_v50  ;;  %v12306_v60 = vld [vmem:[%s15380_s0 + $0x638] sm:$0xf0]  ;;  %v11880_v50 = vld [vmem:[%s15380_s0 + $0x2b0] sm:$0xf]  ;;  %v14492_v2 = vld [vmem:[%s15380_s0 + $0x87c] sm:$0xf0] }
 0x7b4   : > { %6460 = vmatpush.bf16.msra.mxu1 %v11685_v55  ;;  %6479 = vmatpush.bf16.msra.mxu2 %v12069_v62  ;;  %v12309_v53 = vor.u32 %v14413_v16, %v12306_v60  ;;  %v11881_v40 = vor.u32 %v14312_v37, %v11880_v50  ;;  %v14408_v55 = vld [vmem:[%s15380_s0 + $0x5dc] sm:$0xf0]  ;;  %v12648_v62 = vld [vmem:[%s15380_s0 + $0x8b0] sm:$0xf]  ;;  %v11834_v0 = vld [vmem:[%s15380_s0 + $0x280] sm:$0xf0] }
 0x7b5   : > { %v12265_v25 = vor.u32 %v14408_v55, %v12264_v48  ;;  %v12649_v1 = vor.u32 %v14504_v49, %v12648_v62  ;;  %v12216_v45 = vld [vmem:[%s15380_s0 + $0x550] sm:$0xf]  ;;  %v14384_v10 = vld [vmem:[%s15380_s0 + $0x51c] sm:$0xf0]  ;;  %v14282_v13 = vld [vmem:[%s15380_s0 + $0x1f4] sm:$0xf] }
 0x7b6   : > { %v12217_v8 = vor.u32 %v14396_v44, %v12216_v45  ;;  %v12600_v32 = vld [vmem:[%s15380_s0 + $0x850] sm:$0xf]  ;;  %v14480_v17 = vld [vmem:[%s15380_s0 + $0x81c] sm:$0xf0] }
 0x7b7   : > { %6498 = vmatpush.bf16.msra.mxu3 %v12453_v15  ;;  %6442 = vmatpush.bf16.msra.mxu0 %v12401_v14  ;;  %v14306_v15 = vld [vmem:[%s15380_s0 + $0x2b4] sm:$0xf]  ;;  %v14300_v14 = vld [vmem:[%s15380_s0 + $0x27c] sm:$0xf0]  ;;  %v11784_v30 = vld [vmem:[%s15380_s0 + $0x1f0] sm:$0xf] }
 0x7b8   : > { %6461 = vmatpush.bf16.msra.mxu1 %v11637_v46  ;;  %6480 = vmatpush.bf16.msra.mxu2 %v12021_v61  ;;  %v11885_v57 = vor.u32 %v14306_v15, %v11882_v58  ;;  %v11833_v22 = vor.u32 %v14300_v14, %v11832_v5  ;;  %v14294_v46 = vld [vmem:[%s15380_s0 + $0x254] sm:$0xf]  ;;  %v12601_v61 = vor.u32 %v14492_v2, %v12600_v32  ;;  %v12168_v23 = vld [vmem:[%s15380_s0 + $0x4f0] sm:$0xf]  ;;  %v14372_v16 = vld [vmem:[%s15380_s0 + $0x4bc] sm:$0xf0] }
 0x7b9   : > { %v12552_v54 = vld [vmem:[%s15380_s0 + $0x7f0] sm:$0xf]  ;;  %v14264_v55 = vld [vmem:[%s15380_s0 + $0x15c] sm:$0xf0]  ;;  %v11690_v14 = vld [vmem:[%s15380_s0 + $0x160] sm:$0xf0] }
 0x7ba   : > { %v12553_v26 = vor.u32 %v14480_v17, %v12552_v54  ;;  %v12120_v21 = vld [vmem:[%s15380_s0 + $0x490] sm:$0xf]  ;;  %v14456_v15 = vld [vmem:[%s15380_s0 + $0x75c] sm:$0xf0] }
 0x7bb   : > { %6499 = vmatpush.bf16.msra.mxu3 %v12405_v35  ;;  %6443 = vmatpush.bf16.msra.mxu0 %v12353_v18  ;;  %v14288_v35 = vld [vmem:[%s15380_s0 + $0x21c] sm:$0xf0]  ;;  %v11837_v18 = vor.u32 %v14294_v46, %v11834_v0  ;;  %v12504_v60 = vld [vmem:[%s15380_s0 + $0x790] sm:$0xf]  ;;  %v12121_v50 = vor.u32 %v14372_v16, %v12120_v21  ;;  %v14246_v0 = vld [vmem:[%s15380_s0 + $0xd4] sm:$0xf] }
 0x7bc   : > { %6462 = vmatpush.bf16.msra.mxu1 %v11589_v34  ;;  %6481 = vmatpush.bf16.msra.mxu2 %v11973_v29  ;;  %v11785_v24 = vor.u32 %v14288_v35, %v11784_v30  ;;  %v11786_v34 = vld [vmem:[%s15380_s0 + $0x220] sm:$0xf0]  ;;  %v12169_v29 = vor.u32 %v14384_v10, %v12168_v23  ;;  %v12072_v62 = vld [vmem:[%s15380_s0 + $0x430] sm:$0xf]  ;;  %v14348_v32 = vld [vmem:[%s15380_s0 + $0x3fc] sm:$0xf0] }
 0x7bd   : > { %v11789_v9 = vor.u32 %v14282_v13, %v11786_v34  ;;  %v11640_v45 = vld [vmem:[%s15380_s0 + $0xd0] sm:$0xf]  ;;  %v11642_v30 = vld [vmem:[%s15380_s0 + $0x100] sm:$0xf0] }
 0x7be   : > { %v12408_v46 = vld [vmem:[%s15380_s0 + $0x6d0] sm:$0xf]  ;;  %v11645_v17 = vor.u32 %v14246_v0, %v11642_v30 }
 0x7bf   : > { %6500 = vmatpush.bf16.msra.mxu3 %v12357_v51  ;;  %6444 = vmatpush.bf16.msra.mxu0 %v12305_v41  ;;  %v11736_v51 = vld [vmem:[%s15380_s0 + $0x190] sm:$0xf]  ;;  %v14276_v41 = vld [vmem:[%s15380_s0 + $0x1bc] sm:$0xf0] }
 0x7c0   : > { %6463 = vmatpush.bf16.msra.mxu1 %v11541_v43  ;;  %6482 = vmatpush.bf16.msra.mxu2 %v11925_v39  ;;  %v11737_v47 = vor.u32 %v14276_v41, %v11736_v51  ;;  %v14468_v43 = vld [vmem:[%s15380_s0 + $0x7bc] sm:$0xf0]  ;;  %v14270_v39 = vld [vmem:[%s15380_s0 + $0x194] sm:$0xf]  ;;  %v11592_v35 = vld [vmem:[%s15380_s0 + $0x70] sm:$0xf] }
 0x7c1   : > { %6369 = vmatmul.bf16.vlgmr.msrb.gmra.mxu0 %v17066_v59  ;;  %6388 = vmatmul.bf16.vlgmr.msrb.gmra.mxu1 %v17068_v11  ;;  %v12505_v37 = vor.u32 %v14468_v43, %v12504_v60  ;;  %v11976_v54 = vld [vmem:[%s15380_s0 + $0x370] sm:$0xf]  ;;  %v11594_v51 = vld [vmem:[%s15380_s0 + $0xa0] sm:$0xf0] }
 0x7c2   : > { %6407 = vmatmul.bf16.vlgmr.msrb.gmra.mxu2 %v17064_v3  ;;  %6426 = vmatmul.bf16.vlgmr.msrb.gmra.mxu3 %v17066_v59  ;;  %v12360_v34 = vld [vmem:[%s15380_s0 + $0x670] sm:$0xf] }
 0x7c3   : > { %6501 = vmatpush.bf16.msra.mxu3 %v12309_v53  ;;  %6513 = vmatpush.bf16.msrb.mxu0 %v11881_v40  ;;  %v11738_v53 = vld [vmem:[%s15380_s0 + $0x1c0] sm:$0xf0]  ;;  %v11688_v40 = vld [vmem:[%s15380_s0 + $0x130] sm:$0xf] }
 0x7c4   : > { %6532 = vmatpush.bf16.msrb.mxu1 %v12265_v25  ;;  %6551 = vmatpush.bf16.msrb.mxu2 %v12649_v1  ;;  %v11741_v48 = vor.u32 %v14270_v39, %v11738_v53  ;;  %v11689_v49 = vor.u32 %v14264_v55, %v11688_v40  ;;  %v14360_v25 = vld [vmem:[%s15380_s0 + $0x45c] sm:$0xf0]  ;;  %v12456_v1 = vld [vmem:[%s15380_s0 + $0x730] sm:$0xf] }
 0x7c5   : > { %v12073_v58 = vor.u32 %v14360_v25, %v12072_v62  ;;  %v12457_v5 = vor.u32 %v14456_v15, %v12456_v1  ;;  %v11544_v41 = vld [vmem:[%s15380_s0 + $0x10] sm:$0xf]  ;;  %v14324_v39 = vld [vmem:[%s15380_s0 + $0x33c] sm:$0xf0]  ;;  %v12266_v25 = vld [vmem:[%s15380_s0 + $0x5e0] sm:$0xf0] }
 0x7c6   : > { %v11928_v16 = vld [vmem:[%s15380_s0 + $0x310] sm:$0xf]  ;;  %v14498_v1 = vld [vmem:[%s15380_s0 + $0x8b4] sm:$0xf] }
 0x7c7   : > { %6570 = vmatpush.bf16.msrb.mxu3 %v11885_v57  ;;  %6514 = vmatpush.bf16.msrb.mxu0 %v11833_v22  ;;  %v14258_v57 = vld [vmem:[%s15380_s0 + $0x134] sm:$0xf]  ;;  %v14252_v22 = vld [vmem:[%s15380_s0 + $0xfc] sm:$0xf0]  ;;  %v12312_v53 = vld [vmem:[%s15380_s0 + $0x610] sm:$0xf]  ;;  %v11929_v40 = vor.u32 %v14324_v39, %v11928_v16 }
 0x7c8   : > { %6533 = vmatpush.bf16.msrb.mxu1 %v12217_v8  ;;  %6552 = vmatpush.bf16.msrb.mxu2 %v12601_v61  ;;  %v11693_v44 = vor.u32 %v14258_v57, %v11690_v14  ;;  %v12024_v8 = vld [vmem:[%s15380_s0 + $0x3d0] sm:$0xf]  ;;  %v11641_v2 = vor.u32 %v14252_v22, %v11640_v45  ;;  %v14444_v61 = vld [vmem:[%s15380_s0 + $0x6fc] sm:$0xf0]  ;;  %v14313_v57 = vld [vmem:[%s15380_s0 + $0x2e4] sm:$0xf0] }
 0x7c9   : > { %v12025_v23 = vor.u32 %v14348_v32, %v12024_v8  ;;  %v12409_v10 = vor.u32 %v14444_v61, %v12408_v46  ;;  %v14409_v22 = vld [vmem:[%s15380_s0 + $0x5e4] sm:$0xf0]  ;;  %v14390_v8 = vld [vmem:[%s15380_s0 + $0x554] sm:$0xf]  ;;  %v12602_v61 = vld [vmem:[%s15380_s0 + $0x880] sm:$0xf0] }
 0x7ca   : > { %v14486_v46 = vld [vmem:[%s15380_s0 + $0x854] sm:$0xf] }
 0x7cb   : > { %6571 = vmatpush.bf16.msrb.mxu3 %v11837_v18  ;;  %6515 = vmatpush.bf16.msrb.mxu0 %v11785_v24  ;;  %v14240_v18 = vld [vmem:[%s15380_s0 + $0x9c] sm:$0xf0]  ;;  %v12605_v30 = vor.u32 %v14486_v46, %v12602_v61  ;;  %v14342_v46 = vld [vmem:[%s15380_s0 + $0x3d4] sm:$0xf] }
 0x7cc   : > { %6534 = vmatpush.bf16.msrb.mxu1 %v12169_v29  ;;  %6553 = vmatpush.bf16.msrb.mxu2 %v12553_v26  ;;  %v14336_v24 = vld [vmem:[%s15380_s0 + $0x39c] sm:$0xf0]  ;;  %v11593_v13 = vor.u32 %v14240_v18, %v11592_v35  ;;  %v14234_v26 = vld [vmem:[%s15380_s0 + $0x74] sm:$0xf]  ;;  %v11840_v35 = vld [vmem:[%s15380_s0 + $0x258] sm:$0xf] }
 0x7cd   : > { %v14432_v29 = vld [vmem:[%s15380_s0 + $0x69c] sm:$0xf0]  ;;  %v11977_v21 = vor.u32 %v14336_v24, %v11976_v54  ;;  %v11597_v60 = vor.u32 %v14234_v26, %v11594_v51  ;;  %v14301_v18 = vld [vmem:[%s15380_s0 + $0x284] sm:$0xf0]  ;;  %v14378_v24 = vld [vmem:[%s15380_s0 + $0x4f4] sm:$0xf] }
 0x7ce   : > { %v14397_v54 = vld [vmem:[%s15380_s0 + $0x584] sm:$0xf0]  ;;  %v11792_v26 = vld [vmem:[%s15380_s0 + $0x1f8] sm:$0xf] }
 0x7cf   : > { %6572 = vmatpush.bf16.msrb.mxu3 %v11789_v9  ;;  %6516 = vmatpush.bf16.msrb.mxu0 %v11737_v47  ;;  %v14228_v9 = vld [vmem:[%s15380_s0 + $0x3c] sm:$0xf0]  ;;  %v12361_v47 = vor.u32 %v14432_v29, %v12360_v34  ;;  %v14474_v34 = vld [vmem:[%s15380_s0 + $0x7f4] sm:$0xf]  ;;  %v12554_v29 = vld [vmem:[%s15380_s0 + $0x820] sm:$0xf0] }
 0x7d0   : > { %6535 = vmatpush.bf16.msrb.mxu1 %v12121_v50  ;;  %6554 = vmatpush.bf16.msrb.mxu2 %v12505_v37  ;;  %v11545_v43 = vor.u32 %v14228_v9, %v11544_v41  ;;  %v14420_v50 = vld [vmem:[%s15380_s0 + $0x63c] sm:$0xf0]  ;;  %v14222_v37 = vld [vmem:[%s15380_s0 + $0x14] sm:$0xf]  ;;  %v14289_v41 = vld [vmem:[%s15380_s0 + $0x224] sm:$0xf0] }
 0x7d1   : > { %6374 = vmatmul.bf16.gmra.mxu0 %v17142_v6  ;;  %6393 = vmatmul.bf16.gmra.mxu1 %v17144_v27  ;;  %v12313_v55 = vor.u32 %v14420_v50, %v12312_v53  ;;  %v12176_v9 = vld [vmem:[%s15380_s0 + $0x4f8] sm:$0xf]  ;;  %v11793_v16 = vor.u32 %v14289_v41, %v11792_v26  ;;  %v14462_v53 = vld [vmem:[%s15380_s0 + $0x794] sm:$0xf] }
 0x7d2   : > { %6412 = vmatmul.bf16.gmra.mxu2 %v17140_v28  ;;  %6431 = vmatmul.bf16.gmra.mxu3 %v17142_v6  ;;  %v14426_v26 = vld [vmem:[%s15380_s0 + $0x674] sm:$0xf] }
 0x7d3   : > { %6573 = vmatpush.bf16.msrb.mxu3 %v11741_v48  ;;  %6517 = vmatpush.bf16.msrb.mxu0 %v11689_v49  ;;  %v11546_v48 = vld [vmem:[%s15380_s0 + $0x40] sm:$0xf0]  ;;  %v14402_v49 = vld [vmem:[%s15380_s0 + $0x5b4] sm:$0xf] }
 0x7d4   : > { %6536 = vmatpush.bf16.msrb.mxu1 %v12073_v58  ;;  %6555 = vmatpush.bf16.msrb.mxu2 %v12457_v5  ;;  %v11549_v62 = vor.u32 %v14222_v37, %v11546_v48  ;;  %v12269_v15 = vor.u32 %v14402_v49, %v12266_v25  ;;  %v12650_v58 = vld [vmem:[%s15380_s0 + $0x8e0] sm:$0xf0]  ;;  %v11888_v5 = vld [vmem:[%s15380_s0 + $0x2b8] sm:$0xf] }
 0x7d5   : > { %v12653_v14 = vor.u32 %v14498_v1, %v12650_v58  ;;  %v11889_v45 = vor.u32 %v14313_v57, %v11888_v5  ;;  %v12506_v37 = vld [vmem:[%s15380_s0 + $0x7c0] sm:$0xf0]  ;;  %v11744_v48 = vld [vmem:[%s15380_s0 + $0x198] sm:$0xf]  ;;  %v14450_v5 = vld [vmem:[%s15380_s0 + $0x734] sm:$0xf] }
 0x7d6   : > { %v12509_v49 = vor.u32 %v14462_v53, %v12506_v37  ;;  %v12074_v58 = vld [vmem:[%s15380_s0 + $0x460] sm:$0xf0] }
 0x7d7   : > { %6574 = vmatpush.bf16.msrb.mxu3 %v11693_v44  ;;  %6518 = vmatpush.bf16.msrb.mxu0 %v11641_v2  ;;  %v12272_v44 = vld [vmem:[%s15380_s0 + $0x5b8] sm:$0xf]  ;;  %v12218_v2 = vld [vmem:[%s15380_s0 + $0x580] sm:$0xf0] }
 0x7d8   : > { %6537 = vmatpush.bf16.msrb.mxu1 %v12025_v23  ;;  %6556 = vmatpush.bf16.msrb.mxu2 %v12409_v10  ;;  %v12273_v32 = vor.u32 %v14409_v22, %v12272_v44  ;;  %v12221_v0 = vor.u32 %v14390_v8, %v12218_v2  ;;  %v12224_v23 = vld [vmem:[%s15380_s0 + $0x558] sm:$0xf]  ;;  %v11841_v10 = vor.u32 %v14301_v18, %v11840_v35  ;;  %v14265_v44 = vld [vmem:[%s15380_s0 + $0x164] sm:$0xf0]  ;;  %v12410_v35 = vld [vmem:[%s15380_s0 + $0x700] sm:$0xf0] }
 0x7d9   : > { %v14361_v2 = vld [vmem:[%s15380_s0 + $0x464] sm:$0xf0]  ;;  %v11930_v37 = vld [vmem:[%s15380_s0 + $0x340] sm:$0xf0] }
 0x7db   : > { %6575 = vmatpush.bf16.msrb.mxu3 %v11645_v17  ;;  %6519 = vmatpush.bf16.msrb.mxu0 %v11593_v13  ;;  %v12170_v17 = vld [vmem:[%s15380_s0 + $0x520] sm:$0xf0]  ;;  %v12225_v13 = vor.u32 %v14397_v54, %v12224_v23  ;;  %v11648_v23 = vld [vmem:[%s15380_s0 + $0xd8] sm:$0xf] }
 0x7dc   : > { %6538 = vmatpush.bf16.msrb.mxu1 %v11977_v21  ;;  %6557 = vmatpush.bf16.msrb.mxu2 %v12361_v47  ;;  %v12173_v51 = vor.u32 %v14378_v24, %v12170_v17  ;;  %v14385_v21 = vld [vmem:[%s15380_s0 + $0x524] sm:$0xf0]  ;;  %v12557_v47 = vor.u32 %v14474_v34, %v12554_v29  ;;  %v12032_v54 = vld [vmem:[%s15380_s0 + $0x3d8] sm:$0xf]  ;;  %v14330_v17 = vld [vmem:[%s15380_s0 + $0x374] sm:$0xf] }
 0x7dd   : > { %v12177_v39 = vor.u32 %v14385_v21, %v12176_v9  ;;  %v14349_v24 = vld [vmem:[%s15380_s0 + $0x404] sm:$0xf0]  ;;  %v12362_v9 = vld [vmem:[%s15380_s0 + $0x6a0] sm:$0xf0]  ;;  %v11600_v21 = vld [vmem:[%s15380_s0 + $0x78] sm:$0xf] }
 0x7df   : > { %6576 = vmatpush.bf16.msrb.mxu3 %v11597_v60  ;;  %6520 = vmatpush.bf16.msrb.mxu0 %v11545_v43  ;;  %v14366_v60 = vld [vmem:[%s15380_s0 + $0x494] sm:$0xf]  ;;  %v12122_v43 = vld [vmem:[%s15380_s0 + $0x4c0] sm:$0xf0] }
 0x7e0   : > { %6539 = vmatpush.bf16.msrb.mxu1 %v11929_v40  ;;  %6558 = vmatpush.bf16.msrb.mxu2 %v12313_v55  ;;  %v12125_v50 = vor.u32 %v14366_v60, %v12122_v43  ;;  %v14277_v40 = vld [vmem:[%s15380_s0 + $0x1c4] sm:$0xf0]  ;;  %v12128_v55 = vld [vmem:[%s15380_s0 + $0x498] sm:$0xf]  ;;  %v12365_v43 = vor.u32 %v14426_v26, %v12362_v9 }
 0x7e1   : > { %6445 = vmatmul.bf16.vlgmr.msra.gmra.mxu0 %v17068_v11  ;;  %6464 = vmatmul.bf16.vlgmr.msra.gmra.mxu1 %v17064_v3  ;;  %v11745_v25 = vor.u32 %v14277_v40, %v11744_v48  ;;  %v14337_v60 = vld [vmem:[%s15380_s0 + $0x3a4] sm:$0xf0]  ;;  %v14414_v48 = vld [vmem:[%s15380_s0 + $0x614] sm:$0xf] }
 0x7e2   : > { %6483 = vmatmul.bf16.vlgmr.msra.gmra.mxu2 %v17066_v59  ;;  %6502 = vmatmul.bf16.vlgmr.msra.gmra.mxu3 %v17068_v11  ;;  %v14481_v9 = vld [vmem:[%s15380_s0 + $0x824] sm:$0xf0] }
 0x7e3   : > { %6577 = vmatpush.bf16.msrb.mxu3 %v11549_v62  ;;  %6589 = vmatpush.bf16.msra.mxu0 %v12269_v15  ;;  %v14373_v62 = vld [vmem:[%s15380_s0 + $0x4c4] sm:$0xf0]  ;;  %v14354_v15 = vld [vmem:[%s15380_s0 + $0x434] sm:$0xf] }
 0x7e4   : > { %6608 = vmatpush.bf16.msra.mxu1 %v12653_v14  ;;  %6627 = vmatpush.bf16.msra.mxu2 %v11889_v45  ;;  %v12129_v1 = vor.u32 %v14373_v62, %v12128_v55  ;;  %v12077_v57 = vor.u32 %v14354_v15, %v12074_v58  ;;  %v12458_v14 = vld [vmem:[%s15380_s0 + $0x760] sm:$0xf0]  ;;  %v11696_v45 = vld [vmem:[%s15380_s0 + $0x138] sm:$0xf]  ;;  %v14325_v58 = vld [vmem:[%s15380_s0 + $0x344] sm:$0xf0] }
 0x7e5   : > { %v12461_v22 = vor.u32 %v14450_v5, %v12458_v14  ;;  %v11697_v8 = vor.u32 %v14265_v44, %v11696_v45  ;;  %v12314_v55 = vld [vmem:[%s15380_s0 + $0x640] sm:$0xf0]  ;;  %v11552_v62 = vld [vmem:[%s15380_s0 + $0x18] sm:$0xf]  ;;  %v14505_v14 = vld [vmem:[%s15380_s0 + $0x8e4] sm:$0xf0] }
 0x7e6   : > { %v11936_v15 = vld [vmem:[%s15380_s0 + $0x318] sm:$0xf]  ;;  %v14307_v45 = vld [vmem:[%s15380_s0 + $0x2bc] sm:$0xf] }
 0x7e7   : > { %6646 = vmatpush.bf16.msra.mxu3 %v12273_v32  ;;  %6590 = vmatpush.bf16.msra.mxu0 %v12221_v0  ;;  %v12080_v32 = vld [vmem:[%s15380_s0 + $0x438] sm:$0xf]  ;;  %v12026_v0 = vld [vmem:[%s15380_s0 + $0x400] sm:$0xf0]  ;;  %v11937_v5 = vor.u32 %v14325_v58, %v11936_v15  ;;  %v12130_v15 = vld [vmem:[%s15380_s0 + $0x4c8] sm:$0xf0] }
 0x7e8   : > { %6609 = vmatpush.bf16.msra.mxu1 %v12605_v30  ;;  %6628 = vmatpush.bf16.msra.mxu2 %v11841_v10  ;;  %v12081_v61 = vor.u32 %v14361_v2, %v12080_v32  ;;  %v14438_v30 = vld [vmem:[%s15380_s0 + $0x6d4] sm:$0xf]  ;;  %v12029_v18 = vor.u32 %v14342_v46, %v12026_v0  ;;  %v14253_v10 = vld [vmem:[%s15380_s0 + $0x104] sm:$0xf0]  ;;  %v12274_v32 = vld [vmem:[%s15380_s0 + $0x5e8] sm:$0xf0] }
 0x7e9   : > { %v12413_v34 = vor.u32 %v14438_v30, %v12410_v35  ;;  %v11649_v29 = vor.u32 %v14253_v10, %v11648_v23  ;;  %v12658_v0 = vld [vmem:[%s15380_s0 + $0x8e8] sm:$0xf0]  ;;  %v12608_v35 = vld [vmem:[%s15380_s0 + $0x858] sm:$0xf]  ;;  %v14295_v10 = vld [vmem:[%s15380_s0 + $0x25c] sm:$0xf] }
 0x7eb   : > { %6647 = vmatpush.bf16.msra.mxu3 %v12225_v13  ;;  %6591 = vmatpush.bf16.msra.mxu0 %v12173_v51  ;;  %v11978_v13 = vld [vmem:[%s15380_s0 + $0x3a0] sm:$0xf0]  ;;  %v12033_v51 = vor.u32 %v14349_v24, %v12032_v54  ;;  %v11842_v54 = vld [vmem:[%s15380_s0 + $0x288] sm:$0xf0]  ;;  %v14391_v24 = vld [vmem:[%s15380_s0 + $0x55c] sm:$0xf] }
 0x7ec   : > { %6610 = vmatpush.bf16.msra.mxu1 %v12557_v47  ;;  %6629 = vmatpush.bf16.msra.mxu2 %v11793_v16  ;;  %v11981_v41 = vor.u32 %v14330_v17, %v11978_v13  ;;  %v14241_v47 = vld [vmem:[%s15380_s0 + $0xa4] sm:$0xf0]  ;;  %v11984_v16 = vld [vmem:[%s15380_s0 + $0x378] sm:$0xf]  ;;  %v11845_v17 = vor.u32 %v14295_v10, %v11842_v54  ;;  %v12226_v13 = vld [vmem:[%s15380_s0 + $0x588] sm:$0xf0] }
 0x7ed   : > { %v11985_v53 = vor.u32 %v14337_v60, %v11984_v16  ;;  %v12229_v26 = vor.u32 %v14391_v24, %v12226_v13  ;;  %v11794_v16 = vld [vmem:[%s15380_s0 + $0x228] sm:$0xf0]  ;;  %v14379_v60 = vld [vmem:[%s15380_s0 + $0x4fc] sm:$0xf]  ;;  %v12416_v10 = vld [vmem:[%s15380_s0 + $0x6d8] sm:$0xf] }
 0x7ee   : > { %v14445_v54 = vld [vmem:[%s15380_s0 + $0x704] sm:$0xf0]  ;;  %v14247_v24 = vld [vmem:[%s15380_s0 + $0xdc] sm:$0xf]  ;;  %v11650_v13 = vld [vmem:[%s15380_s0 + $0x108] sm:$0xf0] }
 0x7ef   : > { %6648 = vmatpush.bf16.msra.mxu3 %v12177_v39  ;;  %6592 = vmatpush.bf16.msra.mxu0 %v12125_v50  ;;  %v11601_v39 = vor.u32 %v14241_v47, %v11600_v21  ;;  %v14318_v50 = vld [vmem:[%s15380_s0 + $0x314] sm:$0xf]  ;;  %v14283_v21 = vld [vmem:[%s15380_s0 + $0x1fc] sm:$0xf] }
 0x7f0   : > { %6611 = vmatpush.bf16.msra.mxu1 %v12509_v49  ;;  %6630 = vmatpush.bf16.msra.mxu2 %v11745_v25  ;;  %v11933_v40 = vor.u32 %v14318_v50, %v11930_v37  ;;  %v14229_v49 = vld [vmem:[%s15380_s0 + $0x44] sm:$0xf0]  ;;  %v12317_v25 = vor.u32 %v14414_v48, %v12314_v55  ;;  %v14475_v50 = vld [vmem:[%s15380_s0 + $0x7fc] sm:$0xf]  ;;  %v12562_v37 = vld [vmem:[%s15380_s0 + $0x828] sm:$0xf0] }
 0x7f1   : > { %6450 = vmatmul.bf16.gmra.mxu0 %v17144_v27  ;;  %6469 = vmatmul.bf16.gmra.mxu1 %v17140_v28  ;;  %v12565_v48 = vor.u32 %v14475_v50, %v12562_v37  ;;  %v14469_v55 = vld [vmem:[%s15380_s0 + $0x7c4] sm:$0xf0]  ;;  %v14331_v50 = vld [vmem:[%s15380_s0 + $0x37c] sm:$0xf]  ;;  %v11986_v37 = vld [vmem:[%s15380_s0 + $0x3a8] sm:$0xf0] }
 0x7f2   : > { %6488 = vmatmul.bf16.gmra.mxu2 %v17142_v6  ;;  %6507 = vmatmul.bf16.gmra.mxu3 %v17144_v27 }
 0x7f3   : > { %6649 = vmatpush.bf16.msra.mxu3 %v12129_v1  ;;  %6593 = vmatpush.bf16.msra.mxu0 %v12077_v57  ;;  %v11553_v1 = vor.u32 %v14229_v49, %v11552_v62  ;;  %v12656_v57 = vld [vmem:[%s15380_s0 + $0x8b8] sm:$0xf]  ;;  %v14271_v62 = vld [vmem:[%s15380_s0 + $0x19c] sm:$0xf] }
 0x7f4   : > { %6612 = vmatpush.bf16.msra.mxu1 %v12461_v22  ;;  %6631 = vmatpush.bf16.msra.mxu2 %v11697_v8  ;;  %v12657_v44 = vor.u32 %v14505_v14, %v12656_v57  ;;  %v11890_v22 = vld [vmem:[%s15380_s0 + $0x2e8] sm:$0xf0]  ;;  %v14403_v8 = vld [vmem:[%s15380_s0 + $0x5bc] sm:$0xf] }
 0x7f5   : > { %v11893_v2 = vor.u32 %v14307_v45, %v11890_v22  ;;  %v12277_v46 = vor.u32 %v14403_v8, %v12274_v32  ;;  %v14463_v57 = vld [vmem:[%s15380_s0 + $0x79c] sm:$0xf]  ;;  %v12514_v14 = vld [vmem:[%s15380_s0 + $0x7c8] sm:$0xf0]  ;;  %v14457_v22 = vld [vmem:[%s15380_s0 + $0x764] sm:$0xf0] }
 0x7f6   : > { %v12517_v45 = vor.u32 %v14463_v57, %v12514_v14  ;;  %v14259_v8 = vld [vmem:[%s15380_s0 + $0x13c] sm:$0xf] }
 0x7f7   : > { %6650 = vmatpush.bf16.msra.mxu3 %v12081_v61  ;;  %6594 = vmatpush.bf16.msra.mxu0 %v12029_v18  ;;  %v14499_v61 = vld [vmem:[%s15380_s0 + $0x8bc] sm:$0xf]  ;;  %v14493_v18 = vld [vmem:[%s15380_s0 + $0x884] sm:$0xf0] }
 0x7f8   : > { %6613 = vmatpush.bf16.msra.mxu1 %v12413_v34  ;;  %6632 = vmatpush.bf16.msra.mxu2 %v11649_v29  ;;  %v12661_v30 = vor.u32 %v14499_v61, %v12658_v0  ;;  %v12609_v23 = vor.u32 %v14493_v18, %v12608_v35  ;;  %v14487_v34 = vld [vmem:[%s15380_s0 + $0x85c] sm:$0xf]  ;;  %v12610_v29 = vld [vmem:[%s15380_s0 + $0x888] sm:$0xf0] }
 0x7f9   : > { %v12082_v61 = vld [vmem:[%s15380_s0 + $0x468] sm:$0xf0]  ;;  %v14451_v35 = vld [vmem:[%s15380_s0 + $0x73c] sm:$0xf] }
 0x7fa   : > { %v12466_v18 = vld [vmem:[%s15380_s0 + $0x768] sm:$0xf0] }
 0x7fb   : > { %6651 = vmatpush.bf16.msra.mxu3 %v12033_v51  ;;  %6595 = vmatpush.bf16.msra.mxu0 %v11981_v41  ;;  %v12613_v51 = vor.u32 %v14487_v34, %v12610_v29  ;;  %v12560_v41 = vld [vmem:[%s15380_s0 + $0x7f8] sm:$0xf]  ;;  %v14343_v34 = vld [vmem:[%s15380_s0 + $0x3dc] sm:$0xf]  ;;  %v12034_v29 = vld [vmem:[%s15380_s0 + $0x408] sm:$0xf0] }
 0x7fc   : > { %6614 = vmatpush.bf16.msra.mxu1 %v12365_v43  ;;  %6633 = vmatpush.bf16.msra.mxu2 %v11601_v39  ;;  %v12561_v47 = vor.u32 %v14481_v9, %v12560_v41  ;;  %v12178_v43 = vld [vmem:[%s15380_s0 + $0x528] sm:$0xf0]  ;;  %v11797_v39 = vor.u32 %v14283_v21, %v11794_v16  ;;  %v14439_v41 = vld [vmem:[%s15380_s0 + $0x6dc] sm:$0xf]  ;;  %v17383_v21 = vld [vmem:[%s15390_s22] sm:$0xff] }
 0x7fd   : > { %v12418_v9 = vld [vmem:[%s15380_s0 + $0x708] sm:$0xf0]  ;;  %v12368_v16 = vld [vmem:[%s15380_s0 + $0x678] sm:$0xf] }
 0x7ff   : > { %6652 = vmatpush.bf16.msra.mxu3 %v11985_v53  ;;  %6596 = vmatpush.bf16.msra.mxu0 %v11933_v40  ;;  %v12181_v53 = vor.u32 %v14379_v60, %v12178_v43  ;;  %v12512_v40 = vld [vmem:[%s15380_s0 + $0x798] sm:$0xf]  ;;  %v14433_v60 = vld [vmem:[%s15380_s0 + $0x6a4] sm:$0xf0]  ;;  %v14235_v43 = vld [vmem:[%s15380_s0 + $0x7c] sm:$0xf] }
 0x800   : > { %6615 = vmatpush.bf16.msra.mxu1 %v12317_v25  ;;  %6634 = vmatpush.bf16.msra.mxu2 %v11553_v1  ;;  %v12513_v49 = vor.u32 %v14469_v55, %v12512_v40  ;;  %v11746_v25 = vld [vmem:[%s15380_s0 + $0x1c8] sm:$0xf0]  ;;  %v14367_v1 = vld [vmem:[%s15380_s0 + $0x49c] sm:$0xf]  ;;  %v11989_v55 = vor.u32 %v14331_v50, %v11986_v37  ;;  %v14398_v37 = vld [vmem:[%s15380_s0 + $0x58c] sm:$0xf0] }
 0x801   : > { %6521 = vmatmul.bf16.vlgmr.msrb.gmra.mxu0 %v17064_v3  ;;  %6540 = vmatmul.bf16.vlgmr.msrb.gmra.mxu1 %v17066_v59  ;;  %v11749_v58 = vor.u32 %v14271_v62, %v11746_v25  ;;  %v14427_v62 = vld [vmem:[%s15380_s0 + $0x67c] sm:$0xf] }
 0x802   : > { %6559 = vmatmul.bf16.vlgmr.msrb.gmra.mxu2 %v17068_v11  ;;  %6578 = vmatmul.bf16.vlgmr.msrb.gmra.mxu3 %v17064_v3 }
 0x803   : > { %6653 = vmatpush.bf16.msra.mxu3 %v11937_v5  ;;  %6665 = vmatpush.bf16.msrb.mxu0 %v12657_v44  ;;  %v12133_v5 = vor.u32 %v14367_v1, %v12130_v15  ;;  %v12464_v44 = vld [vmem:[%s15380_s0 + $0x738] sm:$0xf]  ;;  %v14421_v15 = vld [vmem:[%s15380_s0 + $0x644] sm:$0xf0] }
 0x804   : > { %6684 = vmatpush.bf16.msrb.mxu1 %v11893_v2  ;;  %6703 = vmatpush.bf16.msrb.mxu2 %v12277_v46  ;;  %v12465_v32 = vor.u32 %v14457_v22, %v12464_v44  ;;  %v11698_v2 = vld [vmem:[%s15380_s0 + $0x168] sm:$0xf0]  ;;  %v14355_v46 = vld [vmem:[%s15380_s0 + $0x43c] sm:$0xf]  ;;  %v12320_v1 = vld [vmem:[%s15380_s0 + $0x618] sm:$0xf] }
 0x805   : > { %v11701_v0 = vor.u32 %v14259_v8, %v11698_v2  ;;  %v12321_v14 = vor.u32 %v14421_v15, %v12320_v1  ;;  %v14319_v44 = vld [vmem:[%s15380_s0 + $0x31c] sm:$0xf]  ;;  %v11938_v22 = vld [vmem:[%s15380_s0 + $0x348] sm:$0xf0]  ;;  %v14296_v1 = vld [vmem:[%s15380_s0 + $0x264] sm:$0xf] }
 0x806   : > { %v11941_v2 = vor.u32 %v14319_v44, %v11938_v22  ;;  %v11850_v15 = vld [vmem:[%s15380_s0 + $0x290] sm:$0xf0]  ;;  %v14386_v22 = vld [vmem:[%s15380_s0 + $0x52c] sm:$0xf0] }
 0x807   : > { %6722 = vmatpush.bf16.msrb.mxu3 %v12661_v30  ;;  %6666 = vmatpush.bf16.msrb.mxu0 %v12609_v23  ;;  %v12085_v30 = vor.u32 %v14355_v46, %v12082_v61  ;;  %v12469_v23 = vor.u32 %v14451_v35, %v12466_v18  ;;  %v14415_v46 = vld [vmem:[%s15380_s0 + $0x61c] sm:$0xf]  ;;  %v12322_v61 = vld [vmem:[%s15380_s0 + $0x648] sm:$0xf0]  ;;  %v11896_v35 = vld [vmem:[%s15380_s0 + $0x2c0] sm:$0xf] }
 0x808   : > { %6685 = vmatpush.bf16.msrb.mxu1 %v11845_v17  ;;  %6704 = vmatpush.bf16.msrb.mxu2 %v12229_v26  ;;  %v12417_v17 = vor.u32 %v14445_v54, %v12416_v10  ;;  %v11653_v26 = vor.u32 %v14247_v24, %v11650_v13  ;;  %v14314_v18 = vld [vmem:[%s15380_s0 + $0x2ec] sm:$0xf0]  ;;  %v12664_v24 = vld [vmem:[%s15380_s0 + $0x8c0] sm:$0xf] }
 0x809   : > { %v11897_v10 = vor.u32 %v14314_v18, %v11896_v35  ;;  %v14410_v54 = vld [vmem:[%s15380_s0 + $0x5ec] sm:$0xf0] }
 0x80b   : > { %6723 = vmatpush.bf16.msrb.mxu3 %v12613_v51  ;;  %6667 = vmatpush.bf16.msrb.mxu0 %v12561_v47  ;;  %v12037_v51 = vor.u32 %v14343_v34, %v12034_v29  ;;  %v12421_v47 = vor.u32 %v14439_v41, %v12418_v9  ;;  %v14308_v29 = vld [vmem:[%s15380_s0 + $0x2c4] sm:$0xf] }
 0x80c   : > { %6686 = vmatpush.bf16.msrb.mxu1 %v11797_v39  ;;  %6705 = vmatpush.bf16.msrb.mxu2 %v12181_v53  ;;  %v12369_v39 = vor.u32 %v14433_v60, %v12368_v16  ;;  %v11602_v53 = vld [vmem:[%s15380_s0 + $0xa8] sm:$0xf0]  ;;  %v14302_v16 = vld [vmem:[%s15380_s0 + $0x28c] sm:$0xf0]  ;;  %v12232_v60 = vld [vmem:[%s15380_s0 + $0x560] sm:$0xf] }
 0x80d   : > { %v11605_v40 = vor.u32 %v14235_v43, %v11602_v53 }
 0x80f   : > { %6724 = vmatpush.bf16.msrb.mxu3 %v12565_v48  ;;  %6668 = vmatpush.bf16.msrb.mxu0 %v12513_v49  ;;  %v17392_v48 = vperm.slane %v17383_v21, 0  ;;  %v12370_v49 = vld [vmem:[%s15380_s0 + $0x6a8] sm:$0xf0] }
 0x810   : > { %6687 = vmatpush.bf16.msrb.mxu1 %v11749_v58  ;;  %6706 = vmatpush.bf16.msrb.mxu2 %v12133_v5  ;;  %v12373_v25 = vor.u32 %v14427_v62, %v12370_v49  ;;  %v14223_v58 = vld [vmem:[%s15380_s0 + $0x1c] sm:$0xf]  ;;  %v12233_v49 = vor.u32 %v14398_v37, %v12232_v60  ;;  %v14272_v60 = vld [vmem:[%s15380_s0 + $0x1a4] sm:$0xf] }
 0x811   : > { %6526 = vmatmul.bf16.gmra.mxu0 %v17140_v28  ;;  %6545 = vmatmul.bf16.gmra.mxu1 %v17142_v6 }
 0x812   : > { %6564 = vmatmul.bf16.gmra.mxu2 %v17144_v27  ;;  %6583 = vmatmul.bf16.gmra.mxu3 %v17140_v28 }
 0x813   : > { %6725 = vmatpush.bf16.msrb.mxu3 %v12517_v45  ;;  %6669 = vmatpush.bf16.msrb.mxu0 %v12465_v32  ;;  %v11554_v45 = vld [vmem:[%s15380_s0 + $0x48] sm:$0xf0] }
 0x814   : > { %6688 = vmatpush.bf16.msrb.mxu1 %v11701_v0  ;;  %6707 = vmatpush.bf16.msrb.mxu2 %v12085_v30  ;;  %v11557_v32 = vor.u32 %v14223_v58, %v11554_v45  ;;  %v12325_v0 = vor.u32 %v14415_v46, %v12322_v61  ;;  %v11853_v58 = vor.u32 %v14296_v1, %v11850_v15  ;;  %v12184_v45 = vld [vmem:[%s15380_s0 + $0x500] sm:$0xf]  ;;  %v14284_v61 = vld [vmem:[%s15380_s0 + $0x204] sm:$0xf]  ;;  %v14362_v1 = vld [vmem:[%s15380_s0 + $0x46c] sm:$0xf0] }
 0x815   : > { %v12472_v15 = vld [vmem:[%s15380_s0 + $0x740] sm:$0xf] }
 0x817   : > { %6726 = vmatpush.bf16.msrb.mxu3 %v12469_v23  ;;  %6670 = vmatpush.bf16.msrb.mxu0 %v12417_v17  ;;  %v12280_v23 = vld [vmem:[%s15380_s0 + $0x5c0] sm:$0xf]  ;;  %v14506_v17 = vld [vmem:[%s15380_s0 + $0x8ec] sm:$0xf0] }
 0x818   : > { %6689 = vmatpush.bf16.msrb.mxu1 %v11653_v26  ;;  %6708 = vmatpush.bf16.msrb.mxu2 %v12037_v51  ;;  %v12281_v13 = vor.u32 %v14410_v54, %v12280_v23  ;;  %v12665_v34 = vor.u32 %v14506_v17, %v12664_v24  ;;  %v11898_v26 = vld [vmem:[%s15380_s0 + $0x2f0] sm:$0xf0]  ;;  %v11752_v23 = vld [vmem:[%s15380_s0 + $0x1a0] sm:$0xf] }
 0x819   : > { %v11901_v51 = vor.u32 %v14308_v29, %v11898_v26  ;;  %v12136_v54 = vld [vmem:[%s15380_s0 + $0x4a0] sm:$0xf]  ;;  %v14374_v29 = vld [vmem:[%s15380_s0 + $0x4cc] sm:$0xf0] }
 0x81a   : > { %v12520_v26 = vld [vmem:[%s15380_s0 + $0x7a0] sm:$0xf] }
 0x81b   : > { %6727 = vmatpush.bf16.msrb.mxu3 %v12421_v47  ;;  %6671 = vmatpush.bf16.msrb.mxu0 %v12369_v39  ;;  %v11848_v47 = vld [vmem:[%s15380_s0 + $0x260] sm:$0xf] }
 0x81c   : > { %6690 = vmatpush.bf16.msrb.mxu1 %v11605_v40  ;;  %6709 = vmatpush.bf16.msrb.mxu2 %v11989_v55  ;;  %v11849_v50 = vor.u32 %v14302_v16, %v11848_v47  ;;  %v12616_v40 = vld [vmem:[%s15380_s0 + $0x860] sm:$0xf]  ;;  %v14494_v55 = vld [vmem:[%s15380_s0 + $0x88c] sm:$0xf0]  ;;  %v12137_v47 = vor.u32 %v14374_v29, %v12136_v54  ;;  %v11658_v29 = vld [vmem:[%s15380_s0 + $0x110] sm:$0xf0] }
 0x81d   : > { %v14446_v54 = vld [vmem:[%s15380_s0 + $0x70c] sm:$0xf0] }
 0x81e   : > { %v6294_v5 = vpop.f32.mrf.mxu0  ;;  %v6313_v57 = vpop.f32.mrf.mxu1 }
 0x81f   : > { %v6295_v8 = vadd.f32 %v6294_v5, %v17392_v48  ;;  %6728 = vmatpush.bf16.msrb.mxu3 %v12373_v25  ;;  %6672 = vmatpush.bf16.msrb.mxu0 %v12321_v14  ;;  %v12617_v25 = vor.u32 %v14494_v55, %v12616_v40  ;;  %v14290_v14 = vld [vmem:[%s15380_s0 + $0x22c] sm:$0xf0]  ;;  %v11704_v55 = vld [vmem:[%s15380_s0 + $0x140] sm:$0xf] }
 0x820   : > { %6691 = vmatpush.bf16.msrb.mxu1 %v11557_v32  ;;  %6710 = vmatpush.bf16.msrb.mxu2 %v11941_v2  ;;  %v14482_v32 = vld [vmem:[%s15380_s0 + $0x82c] sm:$0xf0]  ;;  %v12185_v2 = vor.u32 %v14386_v22, %v12184_v45  ;;  %v11706_v45 = vld [vmem:[%s15380_s0 + $0x170] sm:$0xf0] }
 0x821   : > { %v6314_v30 = vadd.f32 %v6313_v57, %v6295_v8  ;;  %6597 = vmatmul.bf16.vlgmr.msra.gmra.mxu0 %v17066_v59  ;;  %6616 = vmatmul.bf16.vlgmr.msra.gmra.mxu1 %v17068_v11  ;;  %v11800_v57 = vld [vmem:[%s15380_s0 + $0x200] sm:$0xf] }
 0x822   : > { %6635 = vmatmul.bf16.vlgmr.msra.gmra.mxu2 %v17064_v3  ;;  %6654 = vmatmul.bf16.vlgmr.msra.gmra.mxu3 %v17066_v59  ;;  %v11801_v44 = vor.u32 %v14290_v14, %v11800_v57  ;;  %v12568_v8 = vld [vmem:[%s15380_s0 + $0x800] sm:$0xf]  ;;  %v14260_v14 = vld [vmem:[%s15380_s0 + $0x144] sm:$0xf] }
 0x823   : > { %6729 = vmatpush.bf16.msrb.mxu3 %v12325_v0  ;;  %6741 = vmatpush.bf16.msra.mxu0 %v11897_v10  ;;  %v12569_v46 = vor.u32 %v14482_v32, %v12568_v8  ;;  %v11802_v0 = vld [vmem:[%s15380_s0 + $0x230] sm:$0xf0]  ;;  %v14278_v10 = vld [vmem:[%s15380_s0 + $0x1cc] sm:$0xf0]  ;;  %v11656_v32 = vld [vmem:[%s15380_s0 + $0xe0] sm:$0xf] }
 0x824   : > { %6760 = vmatpush.bf16.msra.mxu1 %v12281_v13  ;;  %6779 = vmatpush.bf16.msra.mxu2 %v12665_v34  ;;  %v11753_v34 = vor.u32 %v14278_v10, %v11752_v23  ;;  %v14350_v23 = vld [vmem:[%s15380_s0 + $0x40c] sm:$0xf0]  ;;  %v12424_v10 = vld [vmem:[%s15380_s0 + $0x6e0] sm:$0xf] }
 0x825   : > { %v6332_v41 = vpop.f32.mrf.mxu2  ;;  %v17417_v9 = vpop.f32.mrf.mxu3 }
 0x826   : > { %v17422_v43 = vadd.f32 %v6332_v41, %v6314_v30  ;;  %v6296_v39 = vpop.f32.mrf.mxu0  ;;  %v6315_v53 = vpop.f32.mrf.mxu1  ;;  %v11805_v30 = vor.u32 %v14284_v61, %v11802_v0 }
 0x827   : > { %6798 = vmatpush.bf16.msra.mxu3 %v11901_v51  ;;  %v6297_v62 = vadd.f32 %v6296_v39, %v17392_v48  ;;  %6742 = vmatpush.bf16.msra.mxu0 %v11849_v50  ;;  %v14470_v51 = vld [vmem:[%s15380_s0 + $0x7cc] sm:$0xf0]  ;;  %v11754_v39 = vld [vmem:[%s15380_s0 + $0x1d0] sm:$0xf0] }
 0x828   : > { %6761 = vmatpush.bf16.msra.mxu1 %v12233_v49  ;;  %6780 = vmatpush.bf16.msra.mxu2 %v12617_v25  ;;  %v12521_v16 = vor.u32 %v14470_v51, %v12520_v26  ;;  %v11757_v37 = vor.u32 %v14272_v60, %v11754_v39  ;;  %v12088_v49 = vld [vmem:[%s15380_s0 + $0x440] sm:$0xf]  ;;  %v17478_v26 = vperm.slane %v17383_v21, 1  ;;  %v14338_v39 = vld [vmem:[%s15380_s0 + $0x3ac] sm:$0xf0] }
 0x829   : > { %v6316_v5 = vadd.f32 %v6315_v53, %v6297_v62  ;;  %v6969_v53 = vmax.f32 %v17422_v43, 0.0  ;;  %v14266_v62 = vld [vmem:[%s15380_s0 + $0x16c] sm:$0xf0] }
 0x82a   : > { %v11705_v43 = vor.u32 %v14266_v62, %v11704_v55  ;;  %v14236_v55 = vld [vmem:[%s15380_s0 + $0x84] sm:$0xf]  ;;  %v11610_v62 = vld [vmem:[%s15380_s0 + $0xb0] sm:$0xf0] }
 0x82b   : > { %6799 = vmatpush.bf16.msra.mxu3 %v11853_v58  ;;  %6743 = vmatpush.bf16.msra.mxu0 %v11801_v44  ;;  %v14458_v58 = vld [vmem:[%s15380_s0 + $0x76c] sm:$0xf0]  ;;  %v11709_v44 = vor.u32 %v14260_v14, %v11706_v45 }
 0x82c   : > { %6762 = vmatpush.bf16.msra.mxu1 %v12185_v2  ;;  %6781 = vmatpush.bf16.msra.mxu2 %v12569_v46  ;;  %v12473_v57 = vor.u32 %v14458_v58, %v12472_v15  ;;  %v14254_v2 = vld [vmem:[%s15380_s0 + $0x10c] sm:$0xf0]  ;;  %v12040_v46 = vld [vmem:[%s15380_s0 + $0x3e0] sm:$0xf] }
 0x82d   : > { %v6334_v35 = vpop.f32.mrf.mxu2  ;;  %v17438_v18 = vpop.f32.mrf.mxu3  ;;  %v11560_v58 = vld [vmem:[%s15380_s0 + $0x20] sm:$0xf] }
 0x82e   : > { %v6335_v24 = vadd.f32 %v6334_v35, %v6316_v5  ;;  %v6299_v17 = vpop.f32.mrf.mxu0  ;;  %v6318_v13 = vpop.f32.mrf.mxu1  ;;  %v12089_v5 = vor.u32 %v14362_v1, %v12088_v49  ;;  %v11657_v35 = vor.u32 %v14254_v2, %v11656_v32  ;;  %v11613_v49 = vor.u32 %v14236_v55, %v11610_v62  ;;  %v14326_v32 = vld [vmem:[%s15380_s0 + $0x34c] sm:$0xf0]  ;;  %v12328_v2 = vld [vmem:[%s15380_s0 + $0x620] sm:$0xf] }
 0x82f   : > { %6800 = vmatpush.bf16.msra.mxu3 %v11805_v30  ;;  %v6300_v41 = vadd.f32 %v6299_v17, %v17392_v48  ;;  %6744 = vmatpush.bf16.msra.mxu0 %v11753_v34  ;;  %v12041_v17 = vor.u32 %v14350_v23, %v12040_v46  ;;  %v14248_v34 = vld [vmem:[%s15380_s0 + $0xe4] sm:$0xf]  ;;  %v14422_v46 = vld [vmem:[%s15380_s0 + $0x64c] sm:$0xf0]  ;;  %v11562_v23 = vld [vmem:[%s15380_s0 + $0x50] sm:$0xf0] }
 0x830   : > { %v6981_v50 = vmax.f32 %v6335_v24, 0.0  ;;  %6763 = vmatpush.bf16.msra.mxu1 %v12137_v47  ;;  %6782 = vmatpush.bf16.msra.mxu2 %v12521_v16  ;;  %v11661_v51 = vor.u32 %v14248_v34, %v11658_v29  ;;  %v11608_v47 = vld [vmem:[%s15380_s0 + $0x80] sm:$0xf]  ;;  %v14404_v34 = vld [vmem:[%s15380_s0 + $0x5c4] sm:$0xf] }
 0x831   : > { %v6319_v40 = vadd.f32 %v6318_v13, %v6300_v41  ;;  %6602 = vmatmul.bf16.gmra.mxu0 %v17142_v6  ;;  %6621 = vmatmul.bf16.gmra.mxu1 %v17144_v27  ;;  %v12425_v13 = vor.u32 %v14446_v54, %v12424_v10  ;;  %v11992_v16 = vld [vmem:[%s15380_s0 + $0x380] sm:$0xf]  ;;  %v12282_v29 = vld [vmem:[%s15380_s0 + $0x5f0] sm:$0xf0] }
 0x832   : > { %v17455_v25 = vpack.c.bf16 %v6981_v50, %v6969_v53  ;;  %6640 = vmatmul.bf16.gmra.mxu2 %v17140_v28  ;;  %6659 = vmatmul.bf16.gmra.mxu3 %v17142_v6  ;;  %v12376_v53 = vld [vmem:[%s15380_s0 + $0x680] sm:$0xf]  ;;  %v14434_v50 = vld [vmem:[%s15380_s0 + $0x6ac] sm:$0xf0] }
 0x833   : > { %6801 = vmatpush.bf16.msra.mxu3 %v11757_v37  ;;  %6745 = vmatpush.bf16.msra.mxu0 %v11705_v43  ;;  %v11993_v37 = vor.u32 %v14338_v39, %v11992_v16  ;;  %v6352_v43 = vadd.f32 %v17417_v9, %v17478_v26 }
 0x834   : > { %6764 = vmatpush.bf16.msra.mxu1 %v12089_v5  ;;  %6783 = vmatpush.bf16.msra.mxu2 %v12473_v57  ;;  %v14230_v5 = vld [vmem:[%s15380_s0 + $0x4c] sm:$0xf0]  ;;  %v11944_v57 = vld [vmem:[%s15380_s0 + $0x320] sm:$0xf] }
 0x835   : > { %v6337_v22 = vpop.f32.mrf.mxu2  ;;  %v17464_v8 = vpop.f32.mrf.mxu3  ;;  %v11945_v9 = vor.u32 %v14326_v32, %v11944_v57 }
 0x836   : > { %v17469_v61 = vadd.f32 %v6337_v22, %v6319_v40  ;;  %v6301_v0 = vpop.f32.mrf.mxu0  ;;  %v6320_v30 = vpop.f32.mrf.mxu1  ;;  %v12377_v40 = vor.u32 %v14434_v50, %v12376_v53  ;;  %v11561_v22 = vor.u32 %v14230_v5, %v11560_v58  ;;  %v12288_v53 = vld [vmem:[%s15380_s0 + $0x5c8] sm:$0xf]  ;;  %v14411_v50 = vld [vmem:[%s15380_s0 + $0x5f4] sm:$0xf0] }
 0x837   : > { %v6302_v24 = vadd.f32 %v6301_v0, %v17392_v48  ;;  %6802 = vmatpush.bf16.msra.mxu3 %v11709_v44  ;;  %6746 = vmatpush.bf16.msra.mxu0 %v11657_v35  ;;  %v14242_v48 = vld [vmem:[%s15380_s0 + $0xac] sm:$0xf0]  ;;  %v14224_v35 = vld [vmem:[%s15380_s0 + $0x24] sm:$0xf] }
 0x838   : > { %v11609_v60 = vor.u32 %v14242_v48, %v11608_v47  ;;  %6765 = vmatpush.bf16.msra.mxu1 %v12041_v17  ;;  %6784 = vmatpush.bf16.msra.mxu2 %v12425_v13  ;;  %v6993_v10 = vmax.f32 %v17469_v61, 0.0  ;;  %v11565_v17 = vor.u32 %v14224_v35, %v11562_v23  ;;  %v14500_v61 = vld [vmem:[%s15380_s0 + $0x8c4] sm:$0xf]  ;;  %v11904_v47 = vld [vmem:[%s15380_s0 + $0x2c8] sm:$0xf] }
 0x839   : > { %v6321_v41 = vadd.f32 %v6320_v30, %v6302_v24  ;;  %v12329_v30 = vor.u32 %v14422_v46, %v12328_v2  ;;  %v17502_v24 = vperm.slane %v17383_v21, 2  ;;  %v14315_v48 = vld [vmem:[%s15380_s0 + $0x2f4] sm:$0xf0]  ;;  %v12240_v46 = vld [vmem:[%s15380_s0 + $0x568] sm:$0xf] }
 0x83a   : > { %v11905_v39 = vor.u32 %v14315_v48, %v11904_v47  ;;  %v14380_v23 = vld [vmem:[%s15380_s0 + $0x504] sm:$0xf] }
 0x83b   : > { %6803 = vmatpush.bf16.msra.mxu3 %v11661_v51  ;;  %6747 = vmatpush.bf16.msra.mxu0 %v11609_v60  ;;  %v12285_v51 = vor.u32 %v14404_v34, %v12282_v29  ;;  %v12570_v34 = vld [vmem:[%s15380_s0 + $0x830] sm:$0xf0]  ;;  %v11808_v29 = vld [vmem:[%s15380_s0 + $0x208] sm:$0xf] }
 0x83c   : > { %6766 = vmatpush.bf16.msra.mxu1 %v11993_v37  ;;  %6785 = vmatpush.bf16.msra.mxu2 %v12377_v40  ;;  %v12289_v37 = vor.u32 %v14411_v50, %v12288_v53  ;;  %v6354_v40 = vadd.f32 %v17438_v18, %v17478_v26  ;;  %v11856_v18 = vld [vmem:[%s15380_s0 + $0x268] sm:$0xf]  ;;  %v6357_v50 = vadd.f32 %v17464_v8, %v17478_v26  ;;  %v12522_v8 = vld [vmem:[%s15380_s0 + $0x7d0] sm:$0xf0] }
 0x83d   : > { %v6339_v1 = vpop.f32.mrf.mxu2  ;;  %v17490_v15 = vpop.f32.mrf.mxu3 }
 0x83e   : > { %v6340_v14 = vadd.f32 %v6339_v1, %v6321_v41  ;;  %v6370_v45 = vpop.f32.mrf.mxu0  ;;  %v6389_v44 = vpop.f32.mrf.mxu1  ;;  %v12666_v41 = vld [vmem:[%s15380_s0 + $0x8f0] sm:$0xf0]  ;;  %v14488_v1 = vld [vmem:[%s15380_s0 + $0x864] sm:$0xf] }
 0x83f   : > { %v6371_v0 = vadd.f32 %v6370_v45, %v6352_v43  ;;  %6804 = vmatpush.bf16.msra.mxu3 %v11613_v49  ;;  %6748 = vmatpush.bf16.msra.mxu0 %v11561_v22  ;;  %v12669_v60 = vor.u32 %v14500_v61, %v12666_v41  ;;  %v14392_v49 = vld [vmem:[%s15380_s0 + $0x564] sm:$0xf]  ;;  %v12234_v43 = vld [vmem:[%s15380_s0 + $0x590] sm:$0xf0]  ;;  %v14291_v61 = vld [vmem:[%s15380_s0 + $0x234] sm:$0xf0] }
 0x840   : > { %v7005_v54 = vmax.f32 %v6340_v14, 0.0  ;;  %6767 = vmatpush.bf16.msra.mxu1 %v11945_v9  ;;  %6786 = vmatpush.bf16.msra.mxu2 %v12329_v30  ;;  %v12237_v14 = vor.u32 %v14392_v49, %v12234_v43  ;;  %v12618_v45 = vld [vmem:[%s15380_s0 + $0x890] sm:$0xf0]  ;;  %v11809_v48 = vor.u32 %v14291_v61, %v11808_v29  ;;  %v14464_v49 = vld [vmem:[%s15380_s0 + $0x7a4] sm:$0xf] }
 0x841   : > { %v17504_v13 = vadd.f32 %v6389_v44, %v6371_v0  ;;  %6673 = vmatmul.bf16.vlgmr.msrb.gmra.mxu0 %v17068_v11  ;;  %6692 = vmatmul.bf16.vlgmr.msrb.gmra.mxu1 %v17064_v3  ;;  %v14303_v44 = vld [vmem:[%s15380_s0 + $0x294] sm:$0xf0]  ;;  %v12621_v32 = vor.u32 %v14488_v1, %v12618_v45 }
 0x842   : > { %6711 = vmatmul.bf16.vlgmr.msrb.gmra.mxu2 %v17066_v59  ;;  %6730 = vmatmul.bf16.vlgmr.msrb.gmra.mxu3 %v17068_v11  ;;  %v17516_v16 = vpack.c.bf16 %v7005_v54, %v6993_v10  ;;  %v11857_v2 = vor.u32 %v14303_v44, %v11856_v18  ;;  %v14399_v0 = vld [vmem:[%s15380_s0 + $0x594] sm:$0xf0]  ;;  %v12186_v10 = vld [vmem:[%s15380_s0 + $0x530] sm:$0xf0]  ;;  %v14476_v54 = vld [vmem:[%s15380_s0 + $0x804] sm:$0xf]  ;;  %v12525_v18 = vor.u32 %v14464_v49, %v12522_v8 }
 0x843   : > { %6805 = vmatpush.bf16.msra.mxu3 %v11565_v17  ;;  %6817 = vmatpush.bf16.msrb.mxu0 %v12285_v51  ;;  %v12241_v30 = vor.u32 %v14399_v0, %v12240_v46  ;;  %v12189_v17 = vor.u32 %v14380_v23, %v12186_v10  ;;  %v6970_v51 = vmax.f32 %v17504_v13, 0.0  ;;  %v12573_v47 = vor.u32 %v14476_v54, %v12570_v34  ;;  %v14368_v13 = vld [vmem:[%s15380_s0 + $0x4a4] sm:$0xf]  ;;  %v12474_v54 = vld [vmem:[%s15380_s0 + $0x770] sm:$0xf0] }
 0x844   : > { %6836 = vmatpush.bf16.msrb.mxu1 %v12669_v60  ;;  %6855 = vmatpush.bf16.msrb.mxu2 %v11905_v39  ;;  %v12192_v60 = vld [vmem:[%s15380_s0 + $0x508] sm:$0xf]  ;;  %v14387_v39 = vld [vmem:[%s15380_s0 + $0x534] sm:$0xf0]  ;;  %v14452_v23 = vld [vmem:[%s15380_s0 + $0x744] sm:$0xf] }
 0x845   : > { %v6408_v55 = vpop.f32.mrf.mxu2  ;;  %v6427_v62 = vpop.f32.mrf.mxu3  ;;  %v12193_v53 = vor.u32 %v14387_v39, %v12192_v60  ;;  %v14267_v34 = vld [vmem:[%s15380_s0 + $0x174] sm:$0xf0]  ;;  %v12477_v29 = vor.u32 %v14452_v23, %v12474_v54  ;;  %v12048_v8 = vld [vmem:[%s15380_s0 + $0x3e8] sm:$0xf] }
 0x846   : > { %v6409_v58 = vadd.f32 %v6408_v55, %v17502_v24  ;;  %v6372_v5 = vpop.f32.mrf.mxu0  ;;  %v6391_v57 = vpop.f32.mrf.mxu1  ;;  %v14243_v23 = vld [vmem:[%s15380_s0 + $0xb4] sm:$0xf0] }
 0x847   : > { %6874 = vmatpush.bf16.msrb.mxu3 %v12289_v37  ;;  %v6373_v22 = vadd.f32 %v6372_v5, %v6354_v40  ;;  %6818 = vmatpush.bf16.msrb.mxu0 %v12237_v14  ;;  %v14279_v14 = vld [vmem:[%s15380_s0 + $0x1d4] sm:$0xf0] }
 0x848   : > { %v17531_v9 = vadd.f32 %v6427_v62, %v6409_v58  ;;  %6837 = vmatpush.bf16.msrb.mxu1 %v12621_v32  ;;  %6856 = vmatpush.bf16.msrb.mxu2 %v11857_v2  ;;  %v12138_v62 = vld [vmem:[%s15380_s0 + $0x4d0] sm:$0xf0]  ;;  %v14375_v32 = vld [vmem:[%s15380_s0 + $0x4d4] sm:$0xf0] }
 0x849   : > { %v6392_v35 = vadd.f32 %v6391_v57, %v6373_v22  ;;  %v12141_v5 = vor.u32 %v14368_v13, %v12138_v62  ;;  %v11760_v57 = vld [vmem:[%s15380_s0 + $0x1a8] sm:$0xf] }
 0x84a   : > { %v11761_v44 = vor.u32 %v14279_v14, %v11760_v57  ;;  %v12144_v22 = vld [vmem:[%s15380_s0 + $0x4a8] sm:$0xf]  ;;  %v14351_v57 = vld [vmem:[%s15380_s0 + $0x414] sm:$0xf0] }
 0x84b   : > { %6875 = vmatpush.bf16.msrb.mxu3 %v12241_v30  ;;  %v6982_v41 = vmax.f32 %v6392_v35, 0.0  ;;  %6819 = vmatpush.bf16.msrb.mxu0 %v12189_v17  ;;  %v12145_v46 = vor.u32 %v14375_v32, %v12144_v22  ;;  %v14356_v30 = vld [vmem:[%s15380_s0 + $0x444] sm:$0xf]  ;;  %v12090_v35 = vld [vmem:[%s15380_s0 + $0x470] sm:$0xf0] }
 0x84c   : > { %6838 = vmatpush.bf16.msrb.mxu1 %v12573_v47  ;;  %6857 = vmatpush.bf16.msrb.mxu2 %v11809_v48  ;;  %v12093_v10 = vor.u32 %v14356_v30, %v12090_v35  ;;  %v11712_v17 = vld [vmem:[%s15380_s0 + $0x148] sm:$0xf]  ;;  %v6359_v48 = vadd.f32 %v17490_v15, %v17478_v26  ;;  %v11994_v22 = vld [vmem:[%s15380_s0 + $0x3b0] sm:$0xf0]  ;;  %v14428_v32 = vld [vmem:[%s15380_s0 + $0x684] sm:$0xf] }
 0x84d   : > { %v17544_v37 = vpack.c.bf16 %v6982_v41, %v6970_v51  ;;  %v6410_v40 = vpop.f32.mrf.mxu2  ;;  %v6429_v55 = vpop.f32.mrf.mxu3  ;;  %v11713_v61 = vor.u32 %v14267_v34, %v11712_v17  ;;  %v12096_v51 = vld [vmem:[%s15380_s0 + $0x448] sm:$0xf]  ;;  %v14363_v41 = vld [vmem:[%s15380_s0 + $0x474] sm:$0xf0]  ;;  %v12378_v30 = vld [vmem:[%s15380_s0 + $0x6b0] sm:$0xf0] }
 0x84e   : > { %v6411_v43 = vadd.f32 %v6410_v40, %v17502_v24  ;;  %v6375_v1 = vpop.f32.mrf.mxu0  ;;  %v6394_v58 = vpop.f32.mrf.mxu1  ;;  %v12097_v47 = vor.u32 %v14363_v41, %v12096_v51  ;;  %v14440_v40 = vld [vmem:[%s15380_s0 + $0x6e4] sm:$0xf]  ;;  %v11616_v35 = vld [vmem:[%s15380_s0 + $0x88] sm:$0xf]  ;;  %v12381_v17 = vor.u32 %v14428_v32, %v12378_v30  ;;  %v12290_v32 = vld [vmem:[%s15380_s0 + $0x5f8] sm:$0xf0] }
 0x84f   : > { %6876 = vmatpush.bf16.msrb.mxu3 %v12193_v53  ;;  %v6376_v45 = vadd.f32 %v6375_v1, %v6357_v50  ;;  %6820 = vmatpush.bf16.msrb.mxu0 %v12141_v5  ;;  %v14344_v53 = vld [vmem:[%s15380_s0 + $0x3e4] sm:$0xf]  ;;  %v12042_v50 = vld [vmem:[%s15380_s0 + $0x410] sm:$0xf0]  ;;  %v11664_v1 = vld [vmem:[%s15380_s0 + $0xe8] sm:$0xf]  ;;  %v11617_v34 = vor.u32 %v14243_v23, %v11616_v35 }
 0x850   : > { %v17555_v2 = vadd.f32 %v6429_v55, %v6411_v43  ;;  %6839 = vmatpush.bf16.msrb.mxu1 %v12525_v18  ;;  %6858 = vmatpush.bf16.msrb.mxu2 %v11761_v44  ;;  %v12045_v49 = vor.u32 %v14344_v53, %v12042_v50  ;;  %v12426_v43 = vld [vmem:[%s15380_s0 + $0x710] sm:$0xf0]  ;;  %v14332_v44 = vld [vmem:[%s15380_s0 + $0x384] sm:$0xf]  ;;  %v12674_v30 = vld [vmem:[%s15380_s0 + $0x8f8] sm:$0xf0] }
 0x851   : > { %v17557_v0 = vadd.f32 %v6394_v58, %v6376_v45  ;;  %6678 = vmatmul.bf16.gmra.mxu0 %v17144_v27  ;;  %6697 = vmatmul.bf16.gmra.mxu1 %v17140_v28  ;;  %v14255_v58 = vld [vmem:[%s15380_s0 + $0x114] sm:$0xf0]  ;;  %v12429_v26 = vor.u32 %v14440_v40, %v12426_v43  ;;  %v12049_v45 = vor.u32 %v14351_v57, %v12048_v8  ;;  %v12672_v8 = vld [vmem:[%s15380_s0 + $0x8c8] sm:$0xf] }
 0x852   : > { %6716 = vmatmul.bf16.gmra.mxu2 %v17142_v6  ;;  %6735 = vmatmul.bf16.gmra.mxu3 %v17144_v27  ;;  %v11665_v15 = vor.u32 %v14255_v58, %v11664_v1  ;;  %v11952_v58 = vld [vmem:[%s15380_s0 + $0x328] sm:$0xf]  ;;  %v14507_v57 = vld [vmem:[%s15380_s0 + $0x8f4] sm:$0xf0] }
 0x853   : > { %6877 = vmatpush.bf16.msrb.mxu3 %v12145_v46  ;;  %6821 = vmatpush.bf16.msrb.mxu0 %v12093_v10  ;;  %v11997_v46 = vor.u32 %v14332_v44, %v11994_v22  ;;  %v6994_v10 = vmax.f32 %v17557_v0, 0.0  ;;  %v14416_v0 = vld [vmem:[%s15380_s0 + $0x624] sm:$0xf]  ;;  %v14405_v44 = vld [vmem:[%s15380_s0 + $0x5cc] sm:$0xf] }
 0x854   : > { %6840 = vmatpush.bf16.msrb.mxu1 %v12477_v29  ;;  %6859 = vmatpush.bf16.msrb.mxu2 %v11713_v61  ;;  %v12000_v29 = vld [vmem:[%s15380_s0 + $0x388] sm:$0xf]  ;;  %v14339_v61 = vld [vmem:[%s15380_s0 + $0x3b4] sm:$0xf0]  ;;  %v12293_v23 = vor.u32 %v14405_v44, %v12290_v32  ;;  %v12194_v44 = vld [vmem:[%s15380_s0 + $0x538] sm:$0xf0] }
 0x855   : > { %v6413_v60 = vpop.f32.mrf.mxu2  ;;  %v6432_v39 = vpop.f32.mrf.mxu3  ;;  %v12001_v51 = vor.u32 %v14339_v61, %v12000_v29  ;;  %v14495_v29 = vld [vmem:[%s15380_s0 + $0x894] sm:$0xf0] }
 0x856   : > { %v6414_v55 = vadd.f32 %v6413_v60, %v17502_v24  ;;  %v6377_v13 = vpop.f32.mrf.mxu0  ;;  %v6396_v62 = vpop.f32.mrf.mxu1  ;;  %v11946_v60 = vld [vmem:[%s15380_s0 + $0x350] sm:$0xf0] }
 0x857   : > { %v6378_v5 = vadd.f32 %v6377_v13, %v6359_v48  ;;  %6878 = vmatpush.bf16.msrb.mxu3 %v12097_v47  ;;  %6822 = vmatpush.bf16.msrb.mxu0 %v12045_v49  ;;  %v14320_v48 = vld [vmem:[%s15380_s0 + $0x324] sm:$0xf]  ;;  %v12330_v13 = vld [vmem:[%s15380_s0 + $0x650] sm:$0xf0]  ;;  %v14231_v49 = vld [vmem:[%s15380_s0 + $0x54] sm:$0xf0] }
 0x858   : > { %v17582_v14 = vadd.f32 %v6432_v39, %v6414_v55  ;;  %6841 = vmatpush.bf16.msrb.mxu1 %v12429_v26  ;;  %6860 = vmatpush.bf16.msrb.mxu2 %v11665_v15  ;;  %v11949_v55 = vor.u32 %v14320_v48, %v11946_v60  ;;  %v12333_v1 = vor.u32 %v14416_v0, %v12330_v13  ;;  %v17610_v26 = vperm.slane %v17383_v21, 3  ;;  %v14309_v21 = vld [vmem:[%s15380_s0 + $0x2cc] sm:$0xf]  ;;  %v11858_v60 = vld [vmem:[%s15380_s0 + $0x298] sm:$0xf0] }
 0x859   : > { %v6397_v18 = vadd.f32 %v6396_v62, %v6378_v5  ;;  %v11568_v62 = vld [vmem:[%s15380_s0 + $0x28] sm:$0xf]  ;;  %v14327_v5 = vld [vmem:[%s15380_s0 + $0x354] sm:$0xf0]  ;;  %v14297_v48 = vld [vmem:[%s15380_s0 + $0x26c] sm:$0xf] }
 0x85a   : > { %v11569_v15 = vor.u32 %v14231_v49, %v11568_v62  ;;  %v14393_v0 = vld [vmem:[%s15380_s0 + $0x56c] sm:$0xf]  ;;  %v12626_v13 = vld [vmem:[%s15380_s0 + $0x898] sm:$0xf0] }
 0x85b   : > { %v7006_v54 = vmax.f32 %v6397_v18, 0.0  ;;  %6879 = vmatpush.bf16.msrb.mxu3 %v12049_v45  ;;  %6823 = vmatpush.bf16.msrb.mxu0 %v11997_v46  ;;  %v12673_v45 = vor.u32 %v14507_v57, %v12672_v8  ;;  %v11906_v18 = vld [vmem:[%s15380_s0 + $0x2f8] sm:$0xf0]  ;;  %v14501_v46 = vld [vmem:[%s15380_s0 + $0x8cc] sm:$0xf] }
 0x85c   : > { %6842 = vmatpush.bf16.msrb.mxu1 %v12381_v17  ;;  %6861 = vmatpush.bf16.msrb.mxu2 %v11617_v34  ;;  %v11909_v22 = vor.u32 %v14309_v21, %v11906_v18  ;;  %v12624_v34 = vld [vmem:[%s15380_s0 + $0x868] sm:$0xf]  ;;  %v14285_v8 = vld [vmem:[%s15380_s0 + $0x20c] sm:$0xf]  ;;  %v11810_v57 = vld [vmem:[%s15380_s0 + $0x238] sm:$0xf0] }
 0x85d   : > { %v6415_v41 = vpop.f32.mrf.mxu2  ;;  %v6434_v47 = vpop.f32.mrf.mxu3  ;;  %v17596_v39 = vpack.c.bf16 %v7006_v54, %v6994_v10  ;;  %v12677_v10 = vor.u32 %v14501_v46, %v12674_v30  ;;  %v11813_v21 = vor.u32 %v14285_v8, %v11810_v57  ;;  %v14381_v18 = vld [vmem:[%s15380_s0 + $0x50c] sm:$0xf]  ;;  %v12578_v46 = vld [vmem:[%s15380_s0 + $0x838] sm:$0xf0] }
 0x85e   : > { %v6416_v53 = vadd.f32 %v6415_v41, %v17502_v24  ;;  %v6446_v50 = vpop.f32.mrf.mxu0  ;;  %v6465_v40 = vpop.f32.mrf.mxu1  ;;  %v12197_v32 = vor.u32 %v14381_v18, %v12194_v44  ;;  %v14357_v8 = vld [vmem:[%s15380_s0 + $0x44c] sm:$0xf]  ;;  %v12098_v57 = vld [vmem:[%s15380_s0 + $0x478] sm:$0xf0] }
 0x85f   : > { %v17603_v43 = vadd.f32 %v6446_v50, %v17531_v9  ;;  %6880 = vmatpush.bf16.msrb.mxu3 %v12001_v51  ;;  %6824 = vmatpush.bf16.msrb.mxu0 %v11949_v55  ;;  %v11953_v9 = vor.u32 %v14327_v5, %v11952_v58  ;;  %v6466_v35 = vadd.f32 %v6465_v40, %v17610_v26  ;;  %v12242_v40 = vld [vmem:[%s15380_s0 + $0x598] sm:$0xf0]  ;;  %v14489_v55 = vld [vmem:[%s15380_s0 + $0x86c] sm:$0xf] }
 0x860   : > { %v17607_v24 = vadd.f32 %v6434_v47, %v6416_v53  ;;  %6843 = vmatpush.bf16.msrb.mxu1 %v12333_v1  ;;  %6862 = vmatpush.bf16.msrb.mxu2 %v11569_v15  ;;  %v12625_v47 = vor.u32 %v14495_v29, %v12624_v34  ;;  %v11861_v50 = vor.u32 %v14297_v48, %v11858_v60  ;;  %v14483_v15 = vld [vmem:[%s15380_s0 + $0x834] sm:$0xf0]  ;;  %v12146_v48 = vld [vmem:[%s15380_s0 + $0x4d8] sm:$0xf0] }
 0x861   : > { %6749 = vmatmul.bf16.vlgmr.msra.gmra.mxu0 %v17064_v3  ;;  %6768 = vmatmul.bf16.vlgmr.msra.gmra.mxu1 %v17066_v59  ;;  %v12245_v49 = vor.u32 %v14393_v0, %v12242_v40  ;;  %v12629_v1 = vor.u32 %v14489_v55, %v12626_v13  ;;  %v6971_v58 = vmax.f32 %v17603_v43, 0.0  ;;  %v12530_v40 = vld [vmem:[%s15380_s0 + $0x7d8] sm:$0xf0]  ;;  %v12101_v44 = vor.u32 %v14357_v8, %v12098_v57  ;;  %v14429_v8 = vld [vmem:[%s15380_s0 + $0x68c] sm:$0xf] }
 0x862   : > { %6787 = vmatmul.bf16.vlgmr.msra.gmra.mxu2 %v17068_v11  ;;  %6806 = vmatmul.bf16.vlgmr.msra.gmra.mxu3 %v17064_v3 }
 0x863   : > { %6881 = vmatpush.bf16.msrb.mxu3 %v11953_v9  ;;  %6893 = vmatpush.bf16.msra.mxu0 %v12673_v45 }
 0x864   : > { %6912 = vmatpush.bf16.msra.mxu1 %v11909_v22  ;;  %6931 = vmatpush.bf16.msra.mxu2 %v12293_v23  ;;  %v14477_v22 = vld [vmem:[%s15380_s0 + $0x80c] sm:$0xf] }
 0x865   : > { %v6484_v54 = vpop.f32.mrf.mxu2  ;;  %v6503_v17 = vpop.f32.mrf.mxu3  ;;  %v12581_v23 = vor.u32 %v14477_v22, %v12578_v46  ;;  %v12482_v22 = vld [vmem:[%s15380_s0 + $0x778] sm:$0xf0] }
 0x866   : > { %v6485_v61 = vadd.f32 %v6484_v54, %v6466_v35  ;;  %v6448_v51 = vpop.f32.mrf.mxu0  ;;  %v6467_v41 = vpop.f32.mrf.mxu1  ;;  %v14471_v54 = vld [vmem:[%s15380_s0 + $0x7d4] sm:$0xf0] }
 0x867   : > { %6950 = vmatpush.bf16.msra.mxu3 %v12677_v10  ;;  %v6449_v53 = vadd.f32 %v6448_v51, %v17555_v2  ;;  %6894 = vmatpush.bf16.msra.mxu0 %v12625_v47  ;;  %v12576_v2 = vld [vmem:[%s15380_s0 + $0x808] sm:$0xf]  ;;  %v6468_v43 = vadd.f32 %v6467_v41, %v17610_v26  ;;  %v11762_v41 = vld [vmem:[%s15380_s0 + $0x1d8] sm:$0xf0]  ;;  %v14369_v47 = vld [vmem:[%s15380_s0 + $0x4ac] sm:$0xf] }
 0x868   : > { %v17634_v62 = vadd.f32 %v6503_v17, %v6485_v61  ;;  %6913 = vmatpush.bf16.msra.mxu1 %v11861_v50  ;;  %6932 = vmatpush.bf16.msra.mxu2 %v12245_v49  ;;  %v12577_v9 = vor.u32 %v14483_v15, %v12576_v2  ;;  %v12528_v10 = vld [vmem:[%s15380_s0 + $0x7a8] sm:$0xf]  ;;  %v14273_v17 = vld [vmem:[%s15380_s0 + $0x1ac] sm:$0xf]  ;;  %v11714_v15 = vld [vmem:[%s15380_s0 + $0x178] sm:$0xf0] }
 0x869   : > { %v6983_v5 = vmax.f32 %v6449_v53, 0.0  ;;  %v12529_v51 = vor.u32 %v14471_v54, %v12528_v10  ;;  %v11765_v0 = vor.u32 %v14273_v17, %v11762_v41  ;;  %v12149_v53 = vor.u32 %v14369_v47, %v12146_v48  ;;  %v14465_v50 = vld [vmem:[%s15380_s0 + $0x7ac] sm:$0xf]  ;;  %v12480_v49 = vld [vmem:[%s15380_s0 + $0x748] sm:$0xf] }
 0x86a   : > { %v12533_v13 = vor.u32 %v14465_v50, %v12530_v40  ;;  %v14261_v2 = vld [vmem:[%s15380_s0 + $0x14c] sm:$0xf] }
 0x86b   : > { %6951 = vmatpush.bf16.msra.mxu3 %v12629_v1  ;;  %v17641_v45 = vpack.c.bf16 %v6983_v5, %v6971_v58  ;;  %6895 = vmatpush.bf16.msra.mxu0 %v12577_v9  ;;  %v6972_v1 = vmax.f32 %v17634_v62, 0.0  ;;  %v11717_v9 = vor.u32 %v14261_v2, %v11714_v15  ;;  %v14441_v48 = vld [vmem:[%s15380_s0 + $0x6ec] sm:$0xf]  ;;  %v11618_v2 = vld [vmem:[%s15380_s0 + $0xb8] sm:$0xf0] }
 0x86c   : > { %6914 = vmatpush.bf16.msra.mxu1 %v11813_v21  ;;  %6933 = vmatpush.bf16.msra.mxu2 %v12197_v32  ;;  %v14453_v21 = vld [vmem:[%s15380_s0 + $0x74c] sm:$0xf] }
 0x86d   : > { %v6486_v30 = vpop.f32.mrf.mxu2  ;;  %v6505_v35 = vpop.f32.mrf.mxu3  ;;  %v12485_v46 = vor.u32 %v14453_v21, %v12482_v22 }
 0x86e   : > { %v6487_v34 = vadd.f32 %v6486_v30, %v6468_v43  ;;  %v6451_v29 = vpop.f32.mrf.mxu0  ;;  %v6470_v61 = vpop.f32.mrf.mxu1  ;;  %v12432_v30 = vld [vmem:[%s15380_s0 + $0x6e8] sm:$0xf] }
 0x86f   : > { %v17655_v60 = vadd.f32 %v6451_v29, %v17582_v14  ;;  %6952 = vmatpush.bf16.msra.mxu3 %v12581_v23  ;;  %6896 = vmatpush.bf16.msra.mxu0 %v12529_v51  ;;  %v14459_v14 = vld [vmem:[%s15380_s0 + $0x774] sm:$0xf0]  ;;  %v6471_v62 = vadd.f32 %v6470_v61, %v17610_v26  ;;  %v14249_v23 = vld [vmem:[%s15380_s0 + $0xec] sm:$0xf]  ;;  %v11666_v29 = vld [vmem:[%s15380_s0 + $0x118] sm:$0xf0] }
 0x870   : > { %v6506_v55 = vadd.f32 %v6505_v35, %v6487_v34  ;;  %v12481_v5 = vor.u32 %v14459_v14, %v12480_v49  ;;  %6915 = vmatpush.bf16.msra.mxu1 %v11765_v0  ;;  %6934 = vmatpush.bf16.msra.mxu2 %v12149_v53  ;;  %v14447_v35 = vld [vmem:[%s15380_s0 + $0x714] sm:$0xf0]  ;;  %v14345_v61 = vld [vmem:[%s15380_s0 + $0x3ec] sm:$0xf]  ;;  %v12050_v51 = vld [vmem:[%s15380_s0 + $0x418] sm:$0xf0]  ;;  %v11669_v47 = vor.u32 %v14249_v23, %v11666_v29 }
 0x871   : > { %6754 = vmatmul.bf16.gmra.mxu0 %v17140_v28  ;;  %6773 = vmatmul.bf16.gmra.mxu1 %v17142_v6  ;;  %v12433_v34 = vor.u32 %v14447_v35, %v12432_v30  ;;  %v12434_v0 = vld [vmem:[%s15380_s0 + $0x718] sm:$0xf0]  ;;  %v12053_v50 = vor.u32 %v14345_v61, %v12050_v51  ;;  %v14435_v49 = vld [vmem:[%s15380_s0 + $0x6b4] sm:$0xf0]  ;;  %v17690_v14 = vld [vmem:[%s15390_s22] sm:$0xff] }
 0x872   : > { %v6984_v58 = vmax.f32 %v6506_v55, 0.0  ;;  %6792 = vmatmul.bf16.gmra.mxu2 %v17144_v27  ;;  %6811 = vmatmul.bf16.gmra.mxu3 %v17140_v28  ;;  %v12437_v40 = vor.u32 %v14441_v48, %v12434_v0  ;;  %v6995_v55 = vmax.f32 %v17655_v60, 0.0  ;;  %v12002_v60 = vld [vmem:[%s15380_s0 + $0x3b8] sm:$0xf0]  ;;  %v14423_v30 = vld [vmem:[%s15380_s0 + $0x654] sm:$0xf0] }
 0x873   : > { %6953 = vmatpush.bf16.msra.mxu3 %v12533_v13  ;;  %6897 = vmatpush.bf16.msra.mxu0 %v12481_v5  ;;  %v14237_v5 = vld [vmem:[%s15380_s0 + $0x8c] sm:$0xf]  ;;  %v11570_v29 = vld [vmem:[%s15380_s0 + $0x58] sm:$0xf0] }
 0x874   : > { %v17671_v18 = vpack.c.bf16 %v6984_v58, %v6972_v1  ;;  %6916 = vmatpush.bf16.msra.mxu1 %v11717_v9  ;;  %6935 = vmatpush.bf16.msra.mxu2 %v12101_v44  ;;  %v17693_v1 = vperm.slane %v17690_v14, 4  ;;  %v11621_v15 = vor.u32 %v14237_v5, %v11618_v2  ;;  %v14333_v9 = vld [vmem:[%s15380_s0 + $0x38c] sm:$0xf]  ;;  %v12386_v44 = vld [vmem:[%s15380_s0 + $0x6b8] sm:$0xf0] }
 0x875   : > { %v6489_v43 = vpop.f32.mrf.mxu2  ;;  %v6508_v32 = vpop.f32.mrf.mxu3  ;;  %v14225_v35 = vld [vmem:[%s15380_s0 + $0x2c] sm:$0xf]  ;;  %v12338_v48 = vld [vmem:[%s15380_s0 + $0x658] sm:$0xf0]  ;;  %v14554_v2 = vld [vmem:[%s15385_s29 + $0x170] sm:$0xf0] }
 0x876   : > { %v6490_v10 = vadd.f32 %v6489_v43, %v6471_v62  ;;  %v6453_v54 = vpop.f32.mrf.mxu0  ;;  %v6472_v17 = vpop.f32.mrf.mxu1  ;;  %v12005_v62 = vor.u32 %v14333_v9, %v12002_v60  ;;  %v11573_v51 = vor.u32 %v14225_v35, %v11570_v29  ;;  %v14578_v60 = vld [vmem:[%s15385_s29 + $0x230] sm:$0xf0]  ;;  %v12944_v29 = vld [vmem:[%s15385_s29 + $0x210] sm:$0xf] }
 0x877   : > { %v6454_v41 = vadd.f32 %v6453_v54, %v17607_v24  ;;  %6954 = vmatpush.bf16.msra.mxu3 %v12485_v46  ;;  %6898 = vmatpush.bf16.msra.mxu0 %v12433_v34  ;;  %v12384_v24 = vld [vmem:[%s15380_s0 + $0x688] sm:$0xf]  ;;  %v6473_v21 = vadd.f32 %v6472_v17, %v17610_v26  ;;  %v14321_v26 = vld [vmem:[%s15380_s0 + $0x32c] sm:$0xf]  ;;  %v11954_v17 = vld [vmem:[%s15380_s0 + $0x358] sm:$0xf0] }
 0x878   : > { %v17684_v53 = vadd.f32 %v6508_v32, %v6490_v10  ;;  %v12385_v58 = vor.u32 %v14435_v49, %v12384_v24  ;;  %6917 = vmatpush.bf16.msra.mxu1 %v11669_v47  ;;  %6936 = vmatpush.bf16.msra.mxu2 %v12053_v50  ;;  %v12389_v32 = vor.u32 %v14429_v8, %v12386_v44  ;;  %v12336_v46 = vld [vmem:[%s15380_s0 + $0x628] sm:$0xf]  ;;  %v14417_v47 = vld [vmem:[%s15380_s0 + $0x62c] sm:$0xf] }
 0x879   : > { %v7007_v13 = vmax.f32 %v6454_v41, 0.0  ;;  %v12337_v34 = vor.u32 %v14423_v30, %v12336_v46  ;;  %v11957_v41 = vor.u32 %v14321_v26, %v11954_v17  ;;  %v12341_v50 = vor.u32 %v14417_v47, %v12338_v48  ;;  %v12860_v24 = vld [vmem:[%s15385_s29 + $0x168] sm:$0xf]  ;;  %v14527_v46 = vld [vmem:[%s15385_s29 + $0x98] sm:$0xf0] }
 0x87a   : > { %v6996_v49 = vmax.f32 %v17684_v53, 0.0  ;;  %v12861_v9 = vor.u32 %v14554_v2, %v12860_v24  ;;  %v13052_v8 = vld [vmem:[%s15385_s29 + $0x2e8] sm:$0xf]  ;;  %v12848_v30 = vld [vmem:[%s15385_s29 + $0x150] sm:$0xf] }
 0x87b   : > { %v17700_v57 = vpack.c.bf16 %v7007_v13, %v6995_v55  ;;  %6955 = vmatpush.bf16.msra.mxu3 %v12437_v40  ;;  %6899 = vmatpush.bf16.msra.mxu0 %v12385_v58  ;;  %v12764_v55 = vld [vmem:[%s15385_s29 + $0xa8] sm:$0xf]  ;;  %v14530_v13 = vld [vmem:[%s15385_s29 + $0xb0] sm:$0xf0]  ;;  %v14575_v26 = vld [vmem:[%s15385_s29 + $0x218] sm:$0xf0] }
 0x87c   : > { %6918 = vmatpush.bf16.msra.mxu1 %v11621_v15  ;;  %6937 = vmatpush.bf16.msra.mxu2 %v12005_v62  ;;  %v12765_v5 = vor.u32 %v14530_v13, %v12764_v55  ;;  %v12956_v15 = vld [vmem:[%s15385_s29 + $0x228] sm:$0xf]  ;;  %v14599_v47 = vld [vmem:[%s15385_s29 + $0x2d8] sm:$0xf0]  ;;  %v12836_v55 = vld [vmem:[%s15385_s29 + $0x138] sm:$0xf] }
 0x87d   : > { %v6491_v22 = vpop.f32.mrf.mxu2  ;;  %v6510_v43 = vpop.f32.mrf.mxu3  ;;  %v12957_v53 = vor.u32 %v14578_v60, %v12956_v15  ;;  %v14548_v24 = vld [vmem:[%s15385_s29 + $0x140] sm:$0xf0]  ;;  %v13028_v15 = vld [vmem:[%s15385_s29 + $0x2b8] sm:$0xf] }
 0x87e   : > { %v6492_v23 = vadd.f32 %v6491_v22, %v6473_v21  ;;  %v6522_v10 = vpop.f32.mrf.mxu0  ;;  %v6541_v54 = vpop.f32.mrf.mxu1  ;;  %v14602_v21 = vld [vmem:[%s15385_s29 + $0x2f0] sm:$0xf0] }
 0x87f   : > { %v6523_v61 = vadd.f32 %v6522_v10, %v17693_v1  ;;  %6956 = vmatpush.bf16.msra.mxu3 %v12389_v32  ;;  %6900 = vmatpush.bf16.msra.mxu0 %v12337_v34  ;;  %v13053_v62 = vor.u32 %v14602_v21, %v13052_v8  ;;  %v12752_v32 = vld [vmem:[%s15385_s29 + $0x90] sm:$0xf]  ;;  %v14551_v34 = vld [vmem:[%s15385_s29 + $0x158] sm:$0xf0] }
 0x880   : > { %v6511_v0 = vadd.f32 %v6510_v43, %v6492_v23  ;;  %6919 = vmatpush.bf16.msra.mxu1 %v11573_v51  ;;  %6938 = vmatpush.bf16.msra.mxu2 %v11957_v41  ;;  %v12945_v51 = vor.u32 %v14575_v26, %v12944_v29  ;;  %v13040_v41 = vld [vmem:[%s15385_s29 + $0x2d0] sm:$0xf] }
 0x881   : > { %v6542_v40 = vadd.f32 %v6541_v54, %v6523_v61  ;;  %6825 = vmatmul.bf16.vlgmr.msrb.gmra.mxu0 %v17066_v59  ;;  %6844 = vmatmul.bf16.vlgmr.msrb.gmra.mxu1 %v17068_v11  ;;  %v12753_v54 = vor.u32 %v14527_v46, %v12752_v32  ;;  %v12849_v61 = vor.u32 %v14551_v34, %v12848_v30  ;;  %v14569_v34 = vld [vmem:[%s15385_s29 + $0x1e8] sm:$0xf0] }
 0x882   : > { %v7008_v58 = vmax.f32 %v6511_v0, 0.0  ;;  %6863 = vmatmul.bf16.vlgmr.msrb.gmra.mxu2 %v17064_v3  ;;  %6882 = vmatmul.bf16.vlgmr.msrb.gmra.mxu3 %v17066_v59  ;;  %v13041_v48 = vor.u32 %v14599_v47, %v13040_v41 }
 0x883   : > { %6957 = vmatpush.bf16.msra.mxu3 %v12341_v50  ;;  %8969 = vmatpush.bf16.msrb.mxu0 %v12765_v5  ;;  %v12740_v50 = vld [vmem:[%s15385_s29 + $0x78] sm:$0xf]  ;;  %v12837_v5 = vor.u32 %v14548_v24, %v12836_v55  ;;  %v12812_v55 = vld [vmem:[%s15385_s29 + $0x108] sm:$0xf]  ;;  %v14542_v24 = vld [vmem:[%s15385_s29 + $0x110] sm:$0xf0] }
 0x884   : > { %v17726_v44 = vpack.c.bf16 %v7008_v58, %v6996_v49  ;;  %8988 = vmatpush.bf16.msrb.mxu1 %v12861_v9  ;;  %9007 = vmatpush.bf16.msrb.mxu2 %v12957_v53  ;;  %v12932_v49 = vld [vmem:[%s15385_s29 + $0x1f8] sm:$0xf]  ;;  %v14572_v58 = vld [vmem:[%s15385_s29 + $0x200] sm:$0xf0]  ;;  %v12728_v53 = vld [vmem:[%s15385_s29 + $0x60] sm:$0xf] }
 0x885   : > { %v6560_v22 = vpop.f32.mrf.mxu2  ;;  %v17728_v43 = vpop.f32.mrf.mxu3  ;;  %v12933_v2 = vor.u32 %v14572_v58, %v12932_v49  ;;  %v14596_v9 = vld [vmem:[%s15385_s29 + $0x2c0] sm:$0xf0]  ;;  %v12908_v49 = vld [vmem:[%s15385_s29 + $0x1c8] sm:$0xf]  ;;  %v14566_v58 = vld [vmem:[%s15385_s29 + $0x1d0] sm:$0xf0] }
 0x886   : > { %19081 = vst [vmem:[#allocation31_spill] sm:$0xff] %v17726_v44  ;;  %v17733_v35 = vadd.f32 %v6560_v22, %v6542_v40  ;;  %v6524_v23 = vpop.f32.mrf.mxu0  ;;  %v6543_v10 = vpop.f32.mrf.mxu1  ;;  %v14524_v40 = vld [vmem:[%s15385_s29 + $0x80] sm:$0xf0]  ;;  %v13029_v60 = vor.u32 %v14596_v9, %v13028_v15  ;;  %v12824_v22 = vld [vmem:[%s15385_s29 + $0x120] sm:$0xf] }
 0x887   : > { %9026 = vmatpush.bf16.msrb.mxu3 %v13053_v62  ;;  %v6525_v17 = vadd.f32 %v6524_v23, %v17693_v1  ;;  %8970 = vmatpush.bf16.msrb.mxu0 %v12753_v54  ;;  %v12741_v13 = vor.u32 %v14524_v40, %v12740_v50  ;;  %v14521_v62 = vld [vmem:[%s15385_s29 + $0x68] sm:$0xf0]  ;;  %v12920_v54 = vld [vmem:[%s15385_s29 + $0x1e0] sm:$0xf]  ;;  %v12716_v50 = vld [vmem:[%s15385_s29 + $0x48] sm:$0xf] }
 0x888   : > { %8989 = vmatpush.bf16.msrb.mxu1 %v12849_v61  ;;  %9008 = vmatpush.bf16.msrb.mxu2 %v12945_v51  ;;  %v12729_v23 = vor.u32 %v14521_v62, %v12728_v53  ;;  %v13016_v61 = vld [vmem:[%s15385_s29 + $0x2a0] sm:$0xf]  ;;  %v14593_v51 = vld [vmem:[%s15385_s29 + $0x2a8] sm:$0xf0]  ;;  %v6973_v41 = vmax.f32 %v17733_v35, 0.0 }
 0x889   : > { %v6544_v0 = vadd.f32 %v6543_v10, %v6525_v17  ;;  %v14545_v10 = vld [vmem:[%s15385_s29 + $0x128] sm:$0xf0]  ;;  %v12921_v17 = vor.u32 %v14569_v34, %v12920_v54  ;;  %v14518_v40 = vld [vmem:[%s15385_s29 + $0x50] sm:$0xf0]  ;;  %v13004_v15 = vld [vmem:[%s15385_s29 + $0x288] sm:$0xf] }
 0x88a   : > { %v12825_v26 = vor.u32 %v14545_v10, %v12824_v22  ;;  %v12717_v35 = vor.u32 %v14518_v40, %v12716_v50  ;;  %v14590_v9 = vld [vmem:[%s15385_s29 + $0x290] sm:$0xf0]  ;;  %v12704_v62 = vld [vmem:[%s15385_s29 + $0x30] sm:$0xf]  ;;  %v14515_v22 = vld [vmem:[%s15385_s29 + $0x38] sm:$0xf0] }
 0x88b   : > { %9027 = vmatpush.bf16.msrb.mxu3 %v13041_v48  ;;  %8971 = vmatpush.bf16.msrb.mxu0 %v12741_v13  ;;  %v13017_v48 = vor.u32 %v14593_v51, %v13016_v61  ;;  %v12705_v10 = vor.u32 %v14515_v22, %v12704_v62  ;;  %v14539_v54 = vld [vmem:[%s15385_s29 + $0xf8] sm:$0xf0]  ;;  %v12896_v34 = vld [vmem:[%s15385_s29 + $0x1b0] sm:$0xf]  ;;  %v14512_v50 = vld [vmem:[%s15385_s29 + $0x20] sm:$0xf0] }
 0x88c   : > { %8990 = vmatpush.bf16.msrb.mxu1 %v12837_v5  ;;  %9009 = vmatpush.bf16.msrb.mxu2 %v12933_v2  ;;  %v12813_v5 = vor.u32 %v14542_v24, %v12812_v55  ;;  %v12909_v2 = vor.u32 %v14566_v58, %v12908_v49  ;;  %v12992_v51 = vld [vmem:[%s15385_s29 + $0x270] sm:$0xf]  ;;  %v12788_v40 = vld [vmem:[%s15385_s29 + $0xd8] sm:$0xf]  ;;  %v14560_v24 = vld [vmem:[%s15385_s29 + $0x1a0] sm:$0xf0] }
 0x88d   : > { %v6562_v8 = vpop.f32.mrf.mxu2  ;;  %v17749_v21 = vpop.f32.mrf.mxu3  ;;  %v12680_v62 = vld [vmem:[%s15385_s29] sm:$0xf]  ;;  %v14509_v22 = vld [vmem:[%s15385_s29 + $0x8] sm:$0xf0] }
 0x88e   : > { %v6563_v32 = vadd.f32 %v6562_v8, %v6544_v0  ;;  %v6527_v46 = vpop.f32.mrf.mxu0  ;;  %v6546_v30 = vpop.f32.mrf.mxu1 }
 0x88f   : > { %9028 = vmatpush.bf16.msrb.mxu3 %v13029_v60  ;;  %v6528_v29 = vadd.f32 %v6527_v46, %v17693_v1  ;;  %8972 = vmatpush.bf16.msrb.mxu0 %v12729_v23  ;;  %v13005_v60 = vor.u32 %v14590_v9, %v13004_v15  ;;  %v17797_v15 = vperm.slane %v17690_v14, 5 }
 0x890   : > { %v6985_v47 = vmax.f32 %v6563_v32, 0.0  ;;  %8991 = vmatpush.bf16.msrb.mxu1 %v12825_v26  ;;  %9010 = vmatpush.bf16.msrb.mxu2 %v12921_v17  ;;  %v12800_v32 = vld [vmem:[%s15385_s29 + $0xf0] sm:$0xf] }
 0x891   : > { %v6547_v0 = vadd.f32 %v6546_v30, %v6528_v29  ;;  %6830 = vmatmul.bf16.gmra.mxu0 %v17142_v6  ;;  %6849 = vmatmul.bf16.gmra.mxu1 %v17144_v27  ;;  %v14563_v29 = vld [vmem:[%s15385_s29 + $0x1b8] sm:$0xf0]  ;;  %v12801_v17 = vor.u32 %v14539_v54, %v12800_v32  ;;  %v12776_v32 = vld [vmem:[%s15385_s29 + $0xc0] sm:$0xf]  ;;  %v12681_v54 = vor.u32 %v14509_v22, %v12680_v62  ;;  %v13136_v22 = vld [vmem:[%s15385_s29 + $0x390] sm:$0xf] }
 0x892   : > { %v17766_v13 = vpack.c.bf16 %v6985_v47, %v6973_v41  ;;  %6868 = vmatmul.bf16.gmra.mxu2 %v17140_v28  ;;  %6887 = vmatmul.bf16.gmra.mxu3 %v17142_v6  ;;  %v12897_v61 = vor.u32 %v14563_v29, %v12896_v34  ;;  %v14587_v41 = vld [vmem:[%s15385_s29 + $0x278] sm:$0xf0]  ;;  %v14533_v34 = vld [vmem:[%s15385_s29 + $0xc8] sm:$0xf0]  ;;  %v12872_v29 = vld [vmem:[%s15385_s29 + $0x180] sm:$0xf] }
 0x893   : > { %9029 = vmatpush.bf16.msrb.mxu3 %v13017_v48  ;;  %8973 = vmatpush.bf16.msrb.mxu0 %v12717_v35  ;;  %v12993_v47 = vor.u32 %v14587_v41, %v12992_v51  ;;  %v12884_v35 = vld [vmem:[%s15385_s29 + $0x198] sm:$0xf]  ;;  %v12968_v51 = vld [vmem:[%s15385_s29 + $0x240] sm:$0xf]  ;;  %v14581_v41 = vld [vmem:[%s15385_s29 + $0x248] sm:$0xf0] }
 0x894   : > { %8992 = vmatpush.bf16.msrb.mxu1 %v12813_v5  ;;  %9011 = vmatpush.bf16.msrb.mxu2 %v12909_v2  ;;  %v12885_v58 = vor.u32 %v14560_v24, %v12884_v35  ;;  %v12980_v5 = vld [vmem:[%s15385_s29 + $0x258] sm:$0xf]  ;;  %v14584_v2 = vld [vmem:[%s15385_s29 + $0x260] sm:$0xf0]  ;;  %v14650_v35 = vld [vmem:[%s15385_s29 + $0x470] sm:$0xf0] }
 0x895   : > { %v6565_v8 = vpop.f32.mrf.mxu2  ;;  %v17775_v53 = vpop.f32.mrf.mxu3  ;;  %v12981_v9 = vor.u32 %v14584_v2, %v12980_v5  ;;  %v13340_v24 = vld [vmem:[%s15385_s29 + $0x528] sm:$0xf] }
 0x896   : > { %v17780_v46 = vadd.f32 %v6565_v8, %v6547_v0  ;;  %v6529_v30 = vpop.f32.mrf.mxu0  ;;  %v6548_v23 = vpop.f32.mrf.mxu1  ;;  %v12692_v0 = vld [vmem:[%s15385_s29 + $0x18] sm:$0xf]  ;;  %v13436_v2 = vld [vmem:[%s15385_s29 + $0x5e8] sm:$0xf] }
 0x897   : > { %v6530_v26 = vadd.f32 %v6529_v30, %v17693_v1  ;;  %9030 = vmatpush.bf16.msrb.mxu3 %v13005_v60  ;;  %8974 = vmatpush.bf16.msrb.mxu0 %v12705_v10  ;;  %v12693_v55 = vor.u32 %v14512_v50, %v12692_v0  ;;  %v14536_v1 = vld [vmem:[%s15385_s29 + $0xe0] sm:$0xf0]  ;;  %v12969_v0 = vor.u32 %v14581_v41, %v12968_v51 }
 0x898   : > { %8993 = vmatpush.bf16.msrb.mxu1 %v12801_v17  ;;  %9012 = vmatpush.bf16.msrb.mxu2 %v12897_v61  ;;  %v12789_v49 = vor.u32 %v14536_v1, %v12788_v40  ;;  %v12777_v17 = vor.u32 %v14533_v34, %v12776_v32  ;;  %v6580_v50 = vadd.f32 %v17728_v43, %v17797_v15  ;;  %v13148_v40 = vld [vmem:[%s15385_s29 + $0x3a8] sm:$0xf]  ;;  %v14623_v32 = vld [vmem:[%s15385_s29 + $0x398] sm:$0xf0] }
 0x899   : > { %v6549_v48 = vadd.f32 %v6548_v23, %v6530_v26  ;;  %v14557_v26 = vld [vmem:[%s15385_s29 + $0x188] sm:$0xf0]  ;;  %v13244_v1 = vld [vmem:[%s15385_s29 + $0x468] sm:$0xf]  ;;  %v13137_v34 = vor.u32 %v14623_v32, %v13136_v22 }
 0x89a   : > { %v12873_v61 = vor.u32 %v14557_v26, %v12872_v29  ;;  %v14647_v29 = vld [vmem:[%s15385_s29 + $0x458] sm:$0xf0] }
 0x89b   : > { %9031 = vmatpush.bf16.msrb.mxu3 %v12993_v47  ;;  %8975 = vmatpush.bf16.msrb.mxu0 %v12693_v55  ;;  %v6997_v47 = vmax.f32 %v17780_v46, 0.0  ;;  %v14626_v55 = vld [vmem:[%s15385_s29 + $0x3b0] sm:$0xf0]  ;;  %v14671_v26 = vld [vmem:[%s15385_s29 + $0x518] sm:$0xf0] }
 0x89c   : > { %8994 = vmatpush.bf16.msrb.mxu1 %v12789_v49  ;;  %9013 = vmatpush.bf16.msrb.mxu2 %v12885_v58  ;;  %v13149_v46 = vor.u32 %v14626_v55, %v13148_v40  ;;  %v14674_v49 = vld [vmem:[%s15385_s29 + $0x530] sm:$0xf0]  ;;  %v13124_v40 = vld [vmem:[%s15385_s29 + $0x378] sm:$0xf]  ;;  %v14620_v55 = vld [vmem:[%s15385_s29 + $0x380] sm:$0xf0] }
 0x89d   : > { %v6567_v60 = vpop.f32.mrf.mxu2  ;;  %v17799_v8 = vpop.f32.mrf.mxu3  ;;  %v13341_v5 = vor.u32 %v14674_v49, %v13340_v24  ;;  %v14668_v24 = vld [vmem:[%s15385_s29 + $0x500] sm:$0xf0] }
 0x89e   : > { %v6568_v30 = vadd.f32 %v6567_v60, %v6549_v48  ;;  %v6598_v23 = vpop.f32.mrf.mxu0  ;;  %v6617_v10 = vpop.f32.mrf.mxu1 }
 0x89f   : > { %9032 = vmatpush.bf16.msrb.mxu3 %v12981_v9  ;;  %8976 = vmatpush.bf16.msrb.mxu0 %v12681_v54  ;;  %v6599_v43 = vadd.f32 %v6598_v23, %v6580_v50  ;;  %v14698_v9 = vld [vmem:[%s15385_s29 + $0x5f0] sm:$0xf0] }
 0x8a0   : > { %v7009_v48 = vmax.f32 %v6568_v30, 0.0  ;;  %8995 = vmatpush.bf16.msrb.mxu1 %v12777_v17  ;;  %9014 = vmatpush.bf16.msrb.mxu2 %v12873_v61  ;;  %v13232_v30 = vld [vmem:[%s15385_s29 + $0x450] sm:$0xf] }
 0x8a1   : > { %6901 = vmatmul.bf16.vlgmr.msra.gmra.mxu0 %v17068_v11  ;;  %6920 = vmatmul.bf16.vlgmr.msra.gmra.mxu1 %v17064_v3  ;;  %v13245_v3 = vor.u32 %v14650_v35, %v13244_v1  ;;  %v6618_v17 = vadd.f32 %v6617_v10, %v6599_v43  ;;  %v13233_v51 = vor.u32 %v14647_v29, %v13232_v30  ;;  %v13220_v1 = vld [vmem:[%s15385_s29 + $0x438] sm:$0xf]  ;;  %v13112_v30 = vld [vmem:[%s15385_s29 + $0x360] sm:$0xf] }
 0x8a2   : > { %6939 = vmatmul.bf16.vlgmr.msra.gmra.mxu2 %v17066_v59  ;;  %6958 = vmatmul.bf16.vlgmr.msra.gmra.mxu3 %v17068_v11  ;;  %v17822_v58 = vpack.c.bf16 %v7009_v48, %v6997_v47  ;;  %v13437_v59 = vor.u32 %v14698_v9, %v13436_v2  ;;  %v6582_v11 = vadd.f32 %v17749_v21, %v17797_v15  ;;  %v13328_v21 = vld [vmem:[%s15385_s29 + $0x510] sm:$0xf]  ;;  %v14695_v48 = vld [vmem:[%s15385_s29 + $0x5d8] sm:$0xf0]  ;;  %v13316_v35 = vld [vmem:[%s15385_s29 + $0x4f8] sm:$0xf] }
 0x8a3   : > { %9033 = vmatpush.bf16.msrb.mxu3 %v12969_v0  ;;  %9045 = vmatpush.bf16.msra.mxu0 %v13149_v46  ;;  %v13329_v41 = vor.u32 %v14671_v26, %v13328_v21  ;;  %v13424_v47 = vld [vmem:[%s15385_s29 + $0x5d0] sm:$0xf]  ;;  %v13125_v10 = vor.u32 %v14620_v55, %v13124_v40  ;;  %v14644_v46 = vld [vmem:[%s15385_s29 + $0x440] sm:$0xf0]  ;;  %v6974_v49 = vmax.f32 %v6618_v17, 0.0 }
 0x8a4   : > { %9064 = vmatpush.bf16.msra.mxu1 %v13245_v3  ;;  %9083 = vmatpush.bf16.msra.mxu2 %v13341_v5  ;;  %v13425_v0 = vor.u32 %v14695_v48, %v13424_v47  ;;  %v13221_v3 = vor.u32 %v14644_v46, %v13220_v1  ;;  %v13317_v5 = vor.u32 %v14668_v24, %v13316_v35  ;;  %v13412_v2 = vld [vmem:[%s15385_s29 + $0x5b8] sm:$0xf]  ;;  %v14692_v9 = vld [vmem:[%s15385_s29 + $0x5c0] sm:$0xf0]  ;;  %v14641_v26 = vld [vmem:[%s15385_s29 + $0x428] sm:$0xf0] }
 0x8a5   : > { %v17828_v60 = vpop.f32.mrf.mxu2  ;;  %v17830_v62 = vpop.f32.mrf.mxu3  ;;  %v13304_v17 = vld [vmem:[%s15385_s29 + $0x4e0] sm:$0xf]  ;;  %v14689_v48 = vld [vmem:[%s15385_s29 + $0x5a8] sm:$0xf0]  ;;  %v13100_v40 = vld [vmem:[%s15385_s29 + $0x348] sm:$0xf] }
 0x8a6   : > { %v6600_v23 = vpop.f32.mrf.mxu0  ;;  %v6619_v54 = vpop.f32.mrf.mxu1  ;;  %v13400_v47 = vld [vmem:[%s15385_s29 + $0x5a0] sm:$0xf]  ;;  %v14614_v55 = vld [vmem:[%s15385_s29 + $0x350] sm:$0xf0]  ;;  %v13196_v1 = vld [vmem:[%s15385_s29 + $0x408] sm:$0xf] }
 0x8a7   : > { %9102 = vmatpush.bf16.msra.mxu3 %v13437_v59  ;;  %v6601_v61 = vadd.f32 %v6600_v23, %v6582_v11  ;;  %9046 = vmatpush.bf16.msra.mxu0 %v13137_v34  ;;  %v13413_v59 = vor.u32 %v14692_v9, %v13412_v2  ;;  %v14617_v23 = vld [vmem:[%s15385_s29 + $0x368] sm:$0xf0]  ;;  %v13101_v46 = vor.u32 %v14614_v55, %v13100_v40  ;;  %v14638_v35 = vld [vmem:[%s15385_s29 + $0x410] sm:$0xf0]  ;;  %v13088_v9 = vld [vmem:[%s15385_s29 + $0x330] sm:$0xf] }
 0x8a8   : > { %9065 = vmatpush.bf16.msra.mxu1 %v13233_v51  ;;  %9084 = vmatpush.bf16.msra.mxu2 %v13329_v41  ;;  %v13113_v21 = vor.u32 %v14617_v23, %v13112_v30  ;;  %v14662_v24 = vld [vmem:[%s15385_s29 + $0x4d0] sm:$0xf0]  ;;  %v13184_v30 = vld [vmem:[%s15385_s29 + $0x3f0] sm:$0xf]  ;;  %v13172_v40 = vld [vmem:[%s15385_s29 + $0x3d8] sm:$0xf] }
 0x8a9   : > { %v6620_v50 = vadd.f32 %v6619_v54, %v6601_v61  ;;  %v13208_v54 = vld [vmem:[%s15385_s29 + $0x420] sm:$0xf]  ;;  %v14665_v61 = vld [vmem:[%s15385_s29 + $0x4e8] sm:$0xf0] }
 0x8aa   : > { %v13209_v51 = vor.u32 %v14641_v26, %v13208_v54  ;;  %v13305_v41 = vor.u32 %v14665_v61, %v13304_v17  ;;  %v14635_v26 = vld [vmem:[%s15385_s29 + $0x3f8] sm:$0xf0]  ;;  %v13280_v17 = vld [vmem:[%s15385_s29 + $0x4b0] sm:$0xf] }
 0x8ab   : > { %9103 = vmatpush.bf16.msra.mxu3 %v13425_v0  ;;  %v6986_v43 = vmax.f32 %v6620_v50, 0.0  ;;  %9047 = vmatpush.bf16.msra.mxu0 %v13125_v10  ;;  %v6585_v0 = vadd.f32 %v17775_v53, %v17797_v15  ;;  %v13401_v50 = vor.u32 %v14689_v48, %v13400_v47  ;;  %v13292_v53 = vld [vmem:[%s15385_s29 + $0x4c8] sm:$0xf]  ;;  %v14659_v61 = vld [vmem:[%s15385_s29 + $0x4b8] sm:$0xf0] }
 0x8ac   : > { %9066 = vmatpush.bf16.msra.mxu1 %v13221_v3  ;;  %9085 = vmatpush.bf16.msra.mxu2 %v13317_v5  ;;  %v14686_v3 = vld [vmem:[%s15385_s29 + $0x590] sm:$0xf0]  ;;  %v14683_v47 = vld [vmem:[%s15385_s29 + $0x578] sm:$0xf0] }
 0x8ad   : > { %v17848_v11 = vpack.c.bf16 %v6986_v43, %v6974_v49  ;;  %v17850_v22 = vpop.f32.mrf.mxu2  ;;  %v17852_v32 = vpop.f32.mrf.mxu3  ;;  %v13197_v49 = vor.u32 %v14638_v35, %v13196_v1  ;;  %v13388_v43 = vld [vmem:[%s15385_s29 + $0x588] sm:$0xf]  ;;  %v14632_v1 = vld [vmem:[%s15385_s29 + $0x3e0] sm:$0xf0] }
 0x8ae   : > { %v6603_v34 = vpop.f32.mrf.mxu0  ;;  %v6622_v29 = vpop.f32.mrf.mxu1 }
 0x8af   : > { %9104 = vmatpush.bf16.msra.mxu3 %v13413_v59  ;;  %9048 = vmatpush.bf16.msra.mxu0 %v13113_v21  ;;  %v6604_v10 = vadd.f32 %v6603_v34, %v6585_v0  ;;  %v14611_v59 = vld [vmem:[%s15385_s29 + $0x338] sm:$0xf0]  ;;  %v13076_v0 = vld [vmem:[%s15385_s29 + $0x318] sm:$0xf] }
 0x8b0   : > { %9067 = vmatpush.bf16.msra.mxu1 %v13209_v51  ;;  %9086 = vmatpush.bf16.msra.mxu2 %v13305_v41  ;;  %v13089_v21 = vor.u32 %v14611_v59, %v13088_v9  ;;  %v13281_v51 = vor.u32 %v14659_v61, %v13280_v17  ;;  %v13376_v41 = vld [vmem:[%s15385_s29 + $0x570] sm:$0xf]  ;;  %v13064_v9 = vld [vmem:[%s15385_s29 + $0x300] sm:$0xf]  ;;  %v14605_v59 = vld [vmem:[%s15385_s29 + $0x308] sm:$0xf0] }
 0x8b1   : > { %6906 = vmatmul.bf16.gmra.mxu0 %v17144_v27  ;;  %6925 = vmatmul.bf16.gmra.mxu1 %v17140_v28  ;;  %v13293_v28 = vor.u32 %v14662_v24, %v13292_v53  ;;  %v6623_v23 = vadd.f32 %v6622_v29, %v6604_v10  ;;  %v13377_v29 = vor.u32 %v14683_v47, %v13376_v41  ;;  %v13268_v10 = vld [vmem:[%s15385_s29 + $0x498] sm:$0xf]  ;;  %v13256_v17 = vld [vmem:[%s15385_s29 + $0x480] sm:$0xf]  ;;  %v14677_v41 = vld [vmem:[%s15385_s29 + $0x548] sm:$0xf0] }
 0x8b2   : > { %6944 = vmatmul.bf16.gmra.mxu2 %v17142_v6  ;;  %6963 = vmatmul.bf16.gmra.mxu3 %v17144_v27  ;;  %v13389_v6 = vor.u32 %v14686_v3, %v13388_v43  ;;  %v6587_v27 = vadd.f32 %v17799_v8, %v17797_v15  ;;  %v13185_v8 = vor.u32 %v14635_v26, %v13184_v30  ;;  %v14680_v43 = vld [vmem:[%s15385_s29 + $0x560] sm:$0xf0]  ;;  %v13160_v30 = vld [vmem:[%s15385_s29 + $0x3c0] sm:$0xf]  ;;  %v14629_v26 = vld [vmem:[%s15385_s29 + $0x3c8] sm:$0xf0] }
 0x8b3   : > { %9105 = vmatpush.bf16.msra.mxu3 %v13401_v50  ;;  %9049 = vmatpush.bf16.msra.mxu0 %v13101_v46  ;;  %v14608_v50 = vld [vmem:[%s15385_s29 + $0x320] sm:$0xf0]  ;;  %v6998_v35 = vmax.f32 %v6623_v23, 0.0  ;;  %v13173_v24 = vor.u32 %v14632_v1, %v13172_v40  ;;  %v13161_v61 = vor.u32 %v14629_v26, %v13160_v30  ;;  %v14719_v1 = vld [vmem:[%s15385_s29 + $0x698] sm:$0xf0] }
 0x8b4   : > { %9068 = vmatpush.bf16.msra.mxu1 %v13197_v49  ;;  %9087 = vmatpush.bf16.msra.mxu2 %v13293_v28  ;;  %v13077_v55 = vor.u32 %v14608_v50, %v13076_v0  ;;  %v14656_v46 = vld [vmem:[%s15385_s29 + $0x4a0] sm:$0xf0]  ;;  %v13364_v28 = vld [vmem:[%s15385_s29 + $0x558] sm:$0xf]  ;;  %v13628_v26 = vld [vmem:[%s15385_s29 + $0x768] sm:$0xf] }
 0x8b5   : > { %v17878_v5 = vpop.f32.mrf.mxu2  ;;  %v17880_v2 = vpop.f32.mrf.mxu3  ;;  %v13269_v49 = vor.u32 %v14656_v46, %v13268_v10  ;;  %v13365_v3 = vor.u32 %v14680_v43, %v13364_v28 }
 0x8b6   : > { %v6605_v54 = vpop.f32.mrf.mxu0  ;;  %v6624_v34 = vpop.f32.mrf.mxu1 }
 0x8b7   : > { %v6606_v15 = vadd.f32 %v6605_v54, %v6587_v27  ;;  %9106 = vmatpush.bf16.msra.mxu3 %v13389_v6  ;;  %9050 = vmatpush.bf16.msra.mxu0 %v13089_v21  ;;  %v13065_v21 = vor.u32 %v14605_v59, %v13064_v9  ;;  %v14713_v9 = vld [vmem:[%s15385_s29 + $0x668] sm:$0xf0] }
 0x8b8   : > { %9069 = vmatpush.bf16.msra.mxu1 %v13185_v8  ;;  %9088 = vmatpush.bf16.msra.mxu2 %v13281_v51  ;;  %v13352_v8 = vld [vmem:[%s15385_s29 + $0x540] sm:$0xf] }
 0x8b9   : > { %v6625_v48 = vadd.f32 %v6624_v34, %v6606_v15  ;;  %v14653_v15 = vld [vmem:[%s15385_s29 + $0x488] sm:$0xf0]  ;;  %v13353_v47 = vor.u32 %v14677_v41, %v13352_v8  ;;  %v14710_v41 = vld [vmem:[%s15385_s29 + $0x650] sm:$0xf0] }
 0x8ba   : > { %v13257_v51 = vor.u32 %v14653_v15, %v13256_v17  ;;  %v14746_v17 = vld [vmem:[%s15385_s29 + $0x770] sm:$0xf0]  ;;  %v17938_v15 = vperm.slane %v17690_v14, 7 }
 0x8bb   : > { %v7010_v53 = vmax.f32 %v6625_v48, 0.0  ;;  %9107 = vmatpush.bf16.msra.mxu3 %v13377_v29  ;;  %9051 = vmatpush.bf16.msra.mxu0 %v13077_v55  ;;  %v13532_v29 = vld [vmem:[%s15385_s29 + $0x6a8] sm:$0xf]  ;;  %v14722_v48 = vld [vmem:[%s15385_s29 + $0x6b0] sm:$0xf0]  ;;  %v13629_v8 = vor.u32 %v14746_v17, %v13628_v26 }
 0x8bc   : > { %9070 = vmatpush.bf16.msra.mxu1 %v13173_v24  ;;  %9089 = vmatpush.bf16.msra.mxu2 %v13269_v49  ;;  %v13533_v0 = vor.u32 %v14722_v48, %v13532_v29  ;;  %v13520_v55 = vld [vmem:[%s15385_s29 + $0x690] sm:$0xf]  ;;  %v14716_v24 = vld [vmem:[%s15385_s29 + $0x680] sm:$0xf0] }
 0x8bd   : > { %v17898_v6 = vpop.f32.mrf.mxu2  ;;  %v17900_v27 = vpop.f32.mrf.mxu3  ;;  %v17905_v23 = vpack.c.bf16 %v7010_v53, %v6998_v35  ;;  %v13521_v35 = vor.u32 %v14719_v1, %v13520_v55  ;;  %v13508_v53 = vld [vmem:[%s15385_s29 + $0x678] sm:$0xf]  ;;  %v13616_v48 = vld [vmem:[%s15385_s29 + $0x750] sm:$0xf] }
 0x8be   : > { %v17907_v54 = vpop.f32.mrf.mxu0  ;;  %v17909_v34 = vpop.f32.mrf.mxu1  ;;  %v13509_v49 = vor.u32 %v14716_v24, %v13508_v53  ;;  %v13472_v24 = vld [vmem:[%s15385_s29 + $0x630] sm:$0xf] }
 0x8bf   : > { %9108 = vmatpush.bf16.msra.mxu3 %v13365_v3  ;;  %9052 = vmatpush.bf16.msra.mxu0 %v13065_v21  ;;  %v13496_v3 = vld [vmem:[%s15385_s29 + $0x660] sm:$0xf]  ;;  %v6694_v1 = vadd.f32 %v17909_v34, %v17938_v15  ;;  %v13604_v34 = vld [vmem:[%s15385_s29 + $0x738] sm:$0xf] }
 0x8c0   : > { %9071 = vmatpush.bf16.msra.mxu1 %v13161_v61  ;;  %9090 = vmatpush.bf16.msra.mxu2 %v13257_v51  ;;  %v13497_v21 = vor.u32 %v14713_v9, %v13496_v3  ;;  %v17935_v61 = vperm.slane %v17690_v14, 6  ;;  %v13484_v51 = vld [vmem:[%s15385_s29 + $0x648] sm:$0xf] }
 0x8c1   : > { %8977 = vmatmul.bf16.vlgmr.msrb.gmra.mxu0 %v17455_v25  ;;  %8996 = vmatmul.bf16.vlgmr.msrb.gmra.mxu1 %v17544_v37  ;;  %v13485_v14 = vor.u32 %v14710_v41, %v13484_v51 }
 0x8c2   : > { %9015 = vmatmul.bf16.vlgmr.msrb.gmra.mxu2 %v17641_v45  ;;  %9034 = vmatmul.bf16.vlgmr.msrb.gmra.mxu3 %v17671_v18  ;;  %v6637_v55 = vadd.f32 %v17828_v60, %v17935_v61 }
 0x8c3   : > { %9109 = vmatpush.bf16.msra.mxu3 %v13353_v47  ;;  %9121 = vmatpush.bf16.msrb.mxu0 %v13533_v0  ;;  %v6639_v47 = vadd.f32 %v17850_v22, %v17935_v61  ;;  %v14743_v0 = vld [vmem:[%s15385_s29 + $0x758] sm:$0xf0] }
 0x8c4   : > { %9140 = vmatpush.bf16.msrb.mxu1 %v13629_v8  ;;  %v6656_v17 = vadd.f32 %v17830_v62, %v6637_v55  ;;  %v13448_v55 = vld [vmem:[%s15385_s29 + $0x600] sm:$0xf] }
 0x8c5   : > { %v6712_v50 = vpop.f32.mrf.mxu2  ;;  %v6731_v40 = vpop.f32.mrf.mxu3  ;;  %v6658_v3 = vadd.f32 %v17852_v32, %v6639_v47  ;;  %v14704_v32 = vld [vmem:[%s15385_s29 + $0x620] sm:$0xf0] }
 0x8c6   : > { %v6676_v10 = vpop.f32.mrf.mxu0  ;;  %v6695_v46 = vpop.f32.mrf.mxu1  ;;  %v6713_v9 = vadd.f32 %v6712_v50, %v6694_v1  ;;  %v6675_v50 = vadd.f32 %v17907_v54, %v6656_v17 }
 0x8c7   : > { %9122 = vmatpush.bf16.msrb.mxu0 %v13521_v35  ;;  %v6696_v29 = vadd.f32 %v6695_v46, %v17938_v15  ;;  %v13617_v35 = vor.u32 %v14743_v0, %v13616_v48  ;;  %v6677_v8 = vadd.f32 %v6676_v10, %v6658_v3  ;;  %v13592_v48 = vld [vmem:[%s15385_s29 + $0x720] sm:$0xf]  ;;  %v14737_v0 = vld [vmem:[%s15385_s29 + $0x728] sm:$0xf0] }
 0x8c8   : > { %v6732_v47 = vadd.f32 %v6731_v40, %v6713_v9  ;;  %v13593_v62 = vor.u32 %v14737_v0, %v13592_v48  ;;  %v13580_v9 = vld [vmem:[%s15385_s29 + $0x708] sm:$0xf] }
 0x8c9   : > { %9141 = vmatpush.bf16.msrb.mxu1 %v13617_v35  ;;  %v6987_v1 = vmax.f32 %v6677_v8, 0.0  ;;  %v14529_v8 = vld [vmem:[%s15385_s29 + $0xac] sm:$0xf] }
 0x8cb   : > { %9123 = vmatpush.bf16.msrb.mxu0 %v13509_v49  ;;  %v14707_v49 = vld [vmem:[%s15385_s29 + $0x638] sm:$0xf0] }
 0x8cc   : > { %v13473_v26 = vor.u32 %v14707_v49, %v13472_v24  ;;  %v6975_v24 = vmax.f32 %v6675_v50, 0.0  ;;  %v6976_v49 = vmax.f32 %v6732_v47, 0.0  ;;  %v13568_v50 = vld [vmem:[%s15385_s29 + $0x6f0] sm:$0xf]  ;;  %v14731_v47 = vld [vmem:[%s15385_s29 + $0x6f8] sm:$0xf0] }
 0x8cd   : > { %v6714_v28 = vpop.f32.mrf.mxu2  ;;  %v6733_v43 = vpop.f32.mrf.mxu3  ;;  %v13569_v0 = vor.u32 %v14731_v47, %v13568_v50  ;;  %v13724_v47 = vld [vmem:[%s15385_s29 + $0x828] sm:$0xf] }
 0x8ce   : > { %v17928_v59 = vpop.f32.mrf.mxu0  ;;  %v17930_v30 = vpop.f32.mrf.mxu1  ;;  %v6715_v22 = vadd.f32 %v6714_v28, %v6696_v29  ;;  %v14740_v28 = vld [vmem:[%s15385_s29 + $0x740] sm:$0xf0]  ;;  %v13460_v29 = vld [vmem:[%s15385_s29 + $0x618] sm:$0xf] }
 0x8cf   : > { %9124 = vmatpush.bf16.msrb.mxu0 %v13497_v21  ;;  %v13605_v41 = vor.u32 %v14740_v28, %v13604_v34  ;;  %v17980_v34 = vpack.c.bf16 %v6987_v1, %v6975_v24  ;;  %v6699_v48 = vadd.f32 %v17930_v30, %v17938_v15  ;;  %v13556_v30 = vld [vmem:[%s15385_s29 + $0x6d8] sm:$0xf] }
 0x8d0   : > { %v6734_v51 = vadd.f32 %v6733_v43, %v6715_v22  ;;  %v14701_v22 = vld [vmem:[%s15385_s29 + $0x608] sm:$0xf0] }
 0x8d1   : > { %8982 = vmatmul.bf16.gmra.mxu0 %v17516_v16  ;;  %9001 = vmatmul.bf16.gmra.mxu1 %v17596_v39  ;;  %v13449_v3 = vor.u32 %v14701_v22, %v13448_v55  ;;  %19082 = vst [vmem:[#allocation32_spill] sm:$0xff] %v17980_v34 }
 0x8d2   : > { %9020 = vmatmul.bf16.gmra.mxu2 %v17700_v57  ;;  %9039 = vmatmul.bf16.gmra.mxu3 %v17726_v44  ;;  %v6988_v35 = vmax.f32 %v6734_v51, 0.0  ;;  %v12766_v51 = vld [vmem:[%s15385_s29 + $0xb4] sm:$0xf0] }
 0x8d3   : > { %9125 = vmatpush.bf16.msrb.mxu0 %v13485_v14  ;;  %v13461_v14 = vor.u32 %v14704_v32, %v13460_v29  ;;  %9142 = vmatpush.bf16.msrb.mxu1 %v13605_v41  ;;  %v6644_v41 = vadd.f32 %v17898_v6, %v17935_v61  ;;  %v12769_v32 = vor.u32 %v14529_v8, %v12766_v51  ;;  %v18016_v51 = vld [vmem:[%s15390_s22 + $0x8] sm:$0xf] }
 0x8d4   : > { %v17982_v28 = vpack.c.bf16 %v6988_v35, %v6976_v49  ;;  %v14526_v35 = vld [vmem:[%s15385_s29 + $0x94] sm:$0xf] }
 0x8d5   : > { %v17955_v46 = vpop.f32.mrf.mxu2  ;;  %v17957_v53 = vpop.f32.mrf.mxu3  ;;  %v6663_v55 = vadd.f32 %v17900_v27, %v6644_v41  ;;  %v14523_v27 = vld [vmem:[%s15385_s29 + $0x7c] sm:$0xf]  ;;  %v13544_v41 = vld [vmem:[%s15385_s29 + $0x6c0] sm:$0xf] }
 0x8d6   : > { %v17962_v21 = vpop.f32.mrf.mxu0  ;;  %v6700_v60 = vpop.f32.mrf.mxu1  ;;  %19083 = vst [vmem:[#allocation33_spill] sm:$0xff] %v17982_v28  ;;  %v6718_v22 = vadd.f32 %v17955_v46, %v6699_v48  ;;  %v12742_v46 = vld [vmem:[%s15385_s29 + $0x84] sm:$0xf0] }
 0x8d7   : > { %9126 = vmatpush.bf16.msrb.mxu0 %v13473_v26  ;;  %9143 = vmatpush.bf16.msrb.mxu1 %v13593_v62  ;;  %v14734_v26 = vld [vmem:[%s15385_s29 + $0x710] sm:$0xf0]  ;;  %v6701_v29 = vadd.f32 %v6700_v60, %v17938_v15  ;;  %v12754_v62 = vld [vmem:[%s15385_s29 + $0x9c] sm:$0xf0]  ;;  %v14728_v15 = vld [vmem:[%s15385_s29 + $0x6e0] sm:$0xf0]  ;;  %v6682_v49 = vadd.f32 %v17962_v21, %v6663_v55  ;;  %v12745_v8 = vor.u32 %v14523_v27, %v12742_v46 }
 0x8d8   : > { %v13581_v17 = vor.u32 %v14734_v26, %v13580_v9  ;;  %v12757_v24 = vor.u32 %v14526_v35, %v12754_v62  ;;  %v13557_v9 = vor.u32 %v14728_v15, %v13556_v30  ;;  %v12730_v55 = vld [vmem:[%s15385_s29 + $0x6c] sm:$0xf0]  ;;  %v12862_v30 = vld [vmem:[%s15385_s29 + $0x174] sm:$0xf0]  ;;  %v14767_v27 = vld [vmem:[%s15385_s29 + $0x818] sm:$0xf0] }
 0x8d9   : > { %v7011_v21 = vmax.f32 %v6682_v49, 0.0  ;;  %v14517_v46 = vld [vmem:[%s15385_s29 + $0x4c] sm:$0xf] }
 0x8db   : > { %9127 = vmatpush.bf16.msrb.mxu0 %v13461_v14  ;;  %9144 = vmatpush.bf16.msrb.mxu1 %v13581_v17  ;;  %v6642_v14 = vadd.f32 %v17878_v5, %v17935_v61  ;;  %v6737_v17 = vadd.f32 %v17957_v53, %v6718_v22 }
 0x8dd   : > { %v6719_v10 = vpop.f32.mrf.mxu2  ;;  %v6738_v43 = vpop.f32.mrf.mxu3  ;;  %v7000_v48 = vmax.f32 %v6737_v17, 0.0 }
 0x8de   : > { %v17974_v54 = vpop.f32.mrf.mxu0  ;;  %v17976_v40 = vpop.f32.mrf.mxu1  ;;  %v6720_v6 = vadd.f32 %v6719_v10, %v6701_v29  ;;  %v6661_v10 = vadd.f32 %v17880_v2, %v6642_v14  ;;  %v14725_v2 = vld [vmem:[%s15385_s29 + $0x6c8] sm:$0xf0]  ;;  %v14520_v14 = vld [vmem:[%s15385_s29 + $0x64] sm:$0xf] }
 0x8df   : > { %9128 = vmatpush.bf16.msrb.mxu0 %v13449_v3  ;;  %9145 = vmatpush.bf16.msrb.mxu1 %v13569_v0  ;;  %v13545_v29 = vor.u32 %v14725_v2, %v13544_v41  ;;  %v12733_v22 = vor.u32 %v14520_v14, %v12730_v55  ;;  %v14550_v41 = vld [vmem:[%s15385_s29 + $0x154] sm:$0xf]  ;;  %v12850_v2 = vld [vmem:[%s15385_s29 + $0x15c] sm:$0xf0]  ;;  %v13820_v14 = vld [vmem:[%s15385_s29 + $0x8e8] sm:$0xf] }
 0x8e0   : > { %v6739_v3 = vadd.f32 %v6738_v43, %v6720_v6  ;;  %v6680_v26 = vadd.f32 %v17928_v59, %v6661_v10  ;;  %v14770_v59 = vld [vmem:[%s15385_s29 + $0x830] sm:$0xf0]  ;;  %v18026_v6 = vperm.slane %v18016_v51, 0 }
 0x8e1   : > { %9053 = vmatmul.bf16.vlgmr.msra.gmra.mxu0 %v17766_v13  ;;  %9072 = vmatmul.bf16.vlgmr.msra.gmra.mxu1 %v17848_v11  ;;  %v13725_v62 = vor.u32 %v14770_v59, %v13724_v47  ;;  %v13700_v47 = vld [vmem:[%s15385_s29 + $0x7f8] sm:$0xf]  ;;  %v14764_v59 = vld [vmem:[%s15385_s29 + $0x800] sm:$0xf0] }
 0x8e2   : > { %9091 = vmatmul.bf16.vlgmr.msra.gmra.mxu2 %v17980_v34  ;;  %9110 = vmatmul.bf16.vlgmr.msra.gmra.mxu3 %v17982_v28  ;;  %v7012_v43 = vmax.f32 %v6739_v3, 0.0  ;;  %v6999_v53 = vmax.f32 %v6680_v26, 0.0  ;;  %v6751_v26 = vadd.f32 %v17974_v54, %v18026_v6  ;;  %v13701_v55 = vor.u32 %v14764_v59, %v13700_v47  ;;  %v14544_v47 = vld [vmem:[%s15385_s29 + $0x124] sm:$0xf]  ;;  %v12826_v59 = vld [vmem:[%s15385_s29 + $0x12c] sm:$0xf0] }
 0x8e3   : > { %9197 = vmatpush.bf16.msra.mxu0 %v12769_v32  ;;  %9146 = vmatpush.bf16.msrb.mxu1 %v13557_v9  ;;  %v13712_v9 = vld [vmem:[%s15385_s29 + $0x810] sm:$0xf] }
 0x8e4   : > { %v18035_v15 = vpack.c.bf16 %v7011_v21, %v6999_v53  ;;  %v18037_v10 = vpack.c.bf16 %v7012_v43, %v7000_v48  ;;  %9159 = vmatpush.bf16.msrb.mxu2 %v13725_v62  ;;  %v13713_v17 = vor.u32 %v14767_v27, %v13712_v9  ;;  %v12853_v21 = vor.u32 %v14550_v41, %v12850_v2  ;;  %v14547_v9 = vld [vmem:[%s15385_s29 + $0x13c] sm:$0xf] }
 0x8e5   : > { %v17999_v60 = vpop.f32.mrf.mxu2  ;;  %v18001_v1 = vpop.f32.mrf.mxu3  ;;  %v6770_v53 = vadd.f32 %v17976_v40, %v6751_v26  ;;  %v12838_v40 = vld [vmem:[%s15385_s29 + $0x144] sm:$0xf0]  ;;  %v13688_v26 = vld [vmem:[%s15385_s29 + $0x7e0] sm:$0xf]  ;;  %v14511_v2 = vld [vmem:[%s15385_s29 + $0x1c] sm:$0xf] }
 0x8e6   : > { %v6752_v5 = vpop.f32.mrf.mxu0  ;;  %v6771_v61 = vpop.f32.mrf.mxu1  ;;  %19084 = vst [vmem:[#allocation34_spill] sm:$0xff] %v18035_v15 }
 0x8e7   : > { %9198 = vmatpush.bf16.msra.mxu0 %v12757_v24  ;;  %9147 = vmatpush.bf16.msrb.mxu1 %v13545_v29  ;;  %v14553_v24 = vld [vmem:[%s15385_s29 + $0x16c] sm:$0xf]  ;;  %19085 = vst [vmem:[#allocation35_spill] sm:$0xff] %v18037_v10  ;;  %v6753_v3 = vadd.f32 %v6752_v5, %v18026_v6  ;;  %v6789_v27 = vadd.f32 %v17999_v60, %v6770_v53  ;;  %v18077_v53 = vperm.slane %v18016_v51, 1 }
 0x8e8   : > { %v12865_v49 = vor.u32 %v14553_v24, %v12862_v30  ;;  %9160 = vmatpush.bf16.msrb.mxu2 %v13713_v17  ;;  %v12706_v24 = vld [vmem:[%s15385_s29 + $0x3c] sm:$0xf0]  ;;  %v14761_v17 = vld [vmem:[%s15385_s29 + $0x7e8] sm:$0xf0] }
 0x8e9   : > { %v6772_v43 = vadd.f32 %v6771_v61, %v6753_v3  ;;  %v14514_v61 = vld [vmem:[%s15385_s29 + $0x34] sm:$0xf]  ;;  %v13689_v41 = vor.u32 %v14761_v17, %v13688_v26  ;;  %v14508_v26 = vld [vmem:[%s15385_s29 + $0x4] sm:$0xf]  ;;  %v12682_v17 = vld [vmem:[%s15385_s29 + $0xc] sm:$0xf0] }
 0x8ea   : > { %v12709_v3 = vor.u32 %v14514_v61, %v12706_v24  ;;  %v13676_v24 = vld [vmem:[%s15385_s29 + $0x7c8] sm:$0xf] }
 0x8eb   : > { %9199 = vmatpush.bf16.msra.mxu0 %v12745_v8  ;;  %v12718_v8 = vld [vmem:[%s15385_s29 + $0x54] sm:$0xf0]  ;;  %9216 = vmatpush.bf16.msra.mxu1 %v12865_v49 }
 0x8ec   : > { %v12721_v5 = vor.u32 %v14517_v46, %v12718_v8  ;;  %9161 = vmatpush.bf16.msrb.mxu2 %v13701_v55  ;;  %v12841_v46 = vor.u32 %v14547_v9, %v12838_v40  ;;  %v13808_v8 = vld [vmem:[%s15385_s29 + $0x8d0] sm:$0xf]  ;;  %v12829_v55 = vor.u32 %v14544_v47, %v12826_v59  ;;  %v13784_v47 = vld [vmem:[%s15385_s29 + $0x8a0] sm:$0xf] }
 0x8ed   : > { %v6790_v32 = vpop.f32.mrf.mxu2  ;;  %v18020_v50 = vpop.f32.mrf.mxu3 }
 0x8ee   : > { %v18028_v0 = vpop.f32.mrf.mxu0  ;;  %v18030_v35 = vpop.f32.mrf.mxu1  ;;  %v6791_v30 = vadd.f32 %v6790_v32, %v6772_v43  ;;  %v14791_v32 = vld [vmem:[%s15385_s29 + $0x8d8] sm:$0xf0] }
 0x8ef   : > { %9200 = vmatpush.bf16.msra.mxu0 %v12733_v22  ;;  %v14794_v22 = vld [vmem:[%s15385_s29 + $0x8f0] sm:$0xf0]  ;;  %9217 = vmatpush.bf16.msra.mxu1 %v12853_v21  ;;  %v13809_v43 = vor.u32 %v14791_v32, %v13808_v8  ;;  %v12685_v32 = vor.u32 %v14508_v26, %v12682_v17  ;;  %v6756_v59 = vadd.f32 %v18028_v0, %v18026_v6  ;;  %v12802_v17 = vld [vmem:[%s15385_s29 + $0xfc] sm:$0xf0] }
 0x8f0   : > { %v13821_v49 = vor.u32 %v14794_v22, %v13820_v14  ;;  %v6989_v21 = vmax.f32 %v6791_v30, 0.0  ;;  %v6977_v14 = vmax.f32 %v6789_v27, 0.0  ;;  %9162 = vmatpush.bf16.msrb.mxu2 %v13689_v41  ;;  %v14758_v30 = vld [vmem:[%s15385_s29 + $0x7d0] sm:$0xf0]  ;;  %v6810_v0 = vadd.f32 %v18020_v50, %v18077_v53  ;;  %v13138_v50 = vld [vmem:[%s15385_s29 + $0x39c] sm:$0xf0] }
 0x8f1   : > { %9058 = vmatmul.bf16.gmra.mxu0 %v17822_v58  ;;  %9077 = vmatmul.bf16.gmra.mxu1 %v17905_v23  ;;  %v13677_v27 = vor.u32 %v14758_v30, %v13676_v24  ;;  %v14785_v24 = vld [vmem:[%s15385_s29 + $0x8a8] sm:$0xf0]  ;;  %v14538_v26 = vld [vmem:[%s15385_s29 + $0xf4] sm:$0xf] }
 0x8f2   : > { %9096 = vmatmul.bf16.gmra.mxu2 %v18035_v15  ;;  %9115 = vmatmul.bf16.gmra.mxu3 %v18037_v10  ;;  %v18088_v8 = vpack.c.bf16 %v6989_v21, %v6977_v14  ;;  %v13664_v21 = vld [vmem:[%s15385_s29 + $0x7b0] sm:$0xf]  ;;  %v14625_v30 = vld [vmem:[%s15385_s29 + $0x3ac] sm:$0xf] }
 0x8f3   : > { %9201 = vmatpush.bf16.msra.mxu0 %v12721_v5  ;;  %9178 = vmatpush.bf16.msrb.mxu3 %v13821_v49  ;;  %v12694_v5 = vld [vmem:[%s15385_s29 + $0x24] sm:$0xf0]  ;;  %v13796_v49 = vld [vmem:[%s15385_s29 + $0x8b8] sm:$0xf] }
 0x8f4   : > { %9218 = vmatpush.bf16.msra.mxu1 %v12841_v46  ;;  %v12697_v60 = vor.u32 %v14511_v2, %v12694_v5  ;;  %v14788_v46 = vld [vmem:[%s15385_s29 + $0x8c0] sm:$0xf0]  ;;  %v14541_v2 = vld [vmem:[%s15385_s29 + $0x10c] sm:$0xf]  ;;  %9163 = vmatpush.bf16.msrb.mxu2 %v13677_v27 }
 0x8f5   : > { %v18052_v54 = vpop.f32.mrf.mxu2  ;;  %v18054_v29 = vpop.f32.mrf.mxu3  ;;  %v13797_v41 = vor.u32 %v14788_v46, %v13796_v49  ;;  %v13150_v49 = vld [vmem:[%s15385_s29 + $0x3b4] sm:$0xf0] }
 0x8f6   : > { %v6757_v48 = vpop.f32.mrf.mxu0  ;;  %v18060_v62 = vpop.f32.mrf.mxu1  ;;  %v13153_v46 = vor.u32 %v14625_v30, %v13150_v49  ;;  %v14535_v30 = vld [vmem:[%s15385_s29 + $0xdc] sm:$0xf]  ;;  %v12790_v49 = vld [vmem:[%s15385_s29 + $0xe4] sm:$0xf0] }
 0x8f7   : > { %9202 = vmatpush.bf16.msra.mxu0 %v12709_v3  ;;  %9179 = vmatpush.bf16.msrb.mxu3 %v13809_v43  ;;  %v6758_v3 = vadd.f32 %v6757_v48, %v18026_v6  ;;  %v12814_v48 = vld [vmem:[%s15385_s29 + $0x114] sm:$0xf0]  ;;  %v6808_v43 = vadd.f32 %v18001_v1, %v18077_v53  ;;  %v13785_v1 = vor.u32 %v14785_v24, %v13784_v47 }
 0x8f8   : > { %9219 = vmatpush.bf16.msra.mxu1 %v12829_v55  ;;  %v12817_v5 = vor.u32 %v14541_v2, %v12814_v48  ;;  %v12805_v6 = vor.u32 %v14538_v26, %v12802_v17  ;;  %v13772_v2 = vld [vmem:[%s15385_s29 + $0x888] sm:$0xf]  ;;  %v13760_v26 = vld [vmem:[%s15385_s29 + $0x870] sm:$0xf] }
 0x8f9   : > { %v6777_v14 = vadd.f32 %v18060_v62, %v6758_v3 }
 0x8fb   : > { %9203 = vmatpush.bf16.msra.mxu0 %v12697_v60  ;;  %9180 = vmatpush.bf16.msrb.mxu3 %v13797_v41  ;;  %v14755_v60 = vld [vmem:[%s15385_s29 + $0x7b8] sm:$0xf0] }
 0x8fc   : > { %v13665_v55 = vor.u32 %v14755_v60, %v13664_v21  ;;  %9220 = vmatpush.bf16.msra.mxu1 %v12817_v5  ;;  %v14782_v21 = vld [vmem:[%s15385_s29 + $0x890] sm:$0xf0] }
 0x8fd   : > { %v6795_v22 = vpop.f32.mrf.mxu2  ;;  %v18079_v61 = vpop.f32.mrf.mxu3  ;;  %v14622_v60 = vld [vmem:[%s15385_s29 + $0x394] sm:$0xf] }
 0x8fe   : > { %v6826_v9 = vpop.f32.mrf.mxu0  ;;  %v6845_v40 = vpop.f32.mrf.mxu1  ;;  %v18106_v41 = vadd.f32 %v6795_v22, %v6777_v14  ;;  %9164 = vmatpush.bf16.msrb.mxu2 %v13665_v55  ;;  %v6775_v22 = vadd.f32 %v18030_v35, %v6756_v59  ;;  %v13773_v55 = vor.u32 %v14782_v21, %v13772_v2  ;;  %v13141_v24 = vor.u32 %v14622_v60, %v13138_v50 }
 0x8ff   : > { %v6827_v27 = vadd.f32 %v6826_v9, %v6808_v43  ;;  %9204 = vmatpush.bf16.msra.mxu0 %v12685_v32  ;;  %9181 = vmatpush.bf16.msrb.mxu3 %v13785_v1  ;;  %v13652_v9 = vld [vmem:[%s15385_s29 + $0x798] sm:$0xf]  ;;  %v14752_v32 = vld [vmem:[%s15385_s29 + $0x7a0] sm:$0xf0]  ;;  %v12793_v1 = vor.u32 %v14535_v30, %v12790_v49 }
 0x900   : > { %v13653_v43 = vor.u32 %v14752_v32, %v13652_v9  ;;  %9221 = vmatpush.bf16.msra.mxu1 %v12805_v6  ;;  %v6794_v35 = vadd.f32 %v18052_v54, %v6775_v22  ;;  %v7013_v59 = vmax.f32 %v18106_v41, 0.0  ;;  %v14779_v6 = vld [vmem:[%s15385_s29 + $0x878] sm:$0xf0]  ;;  %v13126_v9 = vld [vmem:[%s15385_s29 + $0x384] sm:$0xf0] }
 0x901   : > { %9129 = vmatmul.bf16.vlgmr.msrb.gmra.mxu0 %v18088_v8  ;;  %v6846_v47 = vadd.f32 %v6845_v40, %v6827_v27  ;;  %v13640_v40 = vld [vmem:[%s15385_s29 + $0x780] sm:$0xf]  ;;  %v14749_v27 = vld [vmem:[%s15385_s29 + $0x788] sm:$0xf0]  ;;  %v13761_v41 = vor.u32 %v14779_v6, %v13760_v26  ;;  %v14532_v22 = vld [vmem:[%s15385_s29 + $0xc4] sm:$0xf] }
 0x902   : > { %9165 = vmatpush.bf16.msrb.mxu2 %v13653_v43  ;;  %v13641_v17 = vor.u32 %v14749_v27, %v13640_v40  ;;  %v13246_v6 = vld [vmem:[%s15385_s29 + $0x474] sm:$0xf0] }
 0x903   : > { %9273 = vmatpush.bf16.msrb.mxu0 %v13153_v46  ;;  %9182 = vmatpush.bf16.msrb.mxu3 %v13773_v55  ;;  %v6978_v32 = vmax.f32 %v6846_v47, 0.0  ;;  %v13748_v47 = vld [vmem:[%s15385_s29 + $0x858] sm:$0xf]  ;;  %v14577_v55 = vld [vmem:[%s15385_s29 + $0x22c] sm:$0xf] }
 0x904   : > { %9222 = vmatpush.bf16.msra.mxu1 %v12793_v1  ;;  %v14616_v1 = vld [vmem:[%s15385_s29 + $0x364] sm:$0xf] }
 0x905   : > { %v18110_v62 = vpop.f32.mrf.mxu2  ;;  %v18112_v3 = vpop.f32.mrf.mxu3 }
 0x906   : > { %v6828_v48 = vpop.f32.mrf.mxu0  ;;  %v6847_v5 = vpop.f32.mrf.mxu1  ;;  %9166 = vmatpush.bf16.msrb.mxu2 %v13641_v17  ;;  %v14649_v17 = vld [vmem:[%s15385_s29 + $0x46c] sm:$0xf] }
 0x907   : > { %v6829_v14 = vadd.f32 %v6828_v48, %v6810_v0  ;;  %9274 = vmatpush.bf16.msrb.mxu0 %v13141_v24  ;;  %v14619_v0 = vld [vmem:[%s15385_s29 + $0x37c] sm:$0xf]  ;;  %v12778_v48 = vld [vmem:[%s15385_s29 + $0xcc] sm:$0xf0]  ;;  %9183 = vmatpush.bf16.msrb.mxu3 %v13761_v41 }
 0x908   : > { %v13129_v2 = vor.u32 %v14619_v0, %v13126_v9  ;;  %v12781_v43 = vor.u32 %v14532_v22, %v12778_v48  ;;  %v13249_v0 = vor.u32 %v14649_v17, %v13246_v6  ;;  %v6813_v9 = vadd.f32 %v18054_v29, %v18077_v53  ;;  %v14613_v22 = vld [vmem:[%s15385_s29 + $0x34c] sm:$0xf]  ;;  %v13102_v48 = vld [vmem:[%s15385_s29 + $0x354] sm:$0xf0] }
 0x909   : > { %v6848_v46 = vadd.f32 %v6847_v5, %v6829_v14  ;;  %v7001_v5 = vmax.f32 %v6794_v35, 0.0  ;;  %v14776_v14 = vld [vmem:[%s15385_s29 + $0x860] sm:$0xf0]  ;;  %v12958_v35 = vld [vmem:[%s15385_s29 + $0x234] sm:$0xf0] }
 0x90a   : > { %v13749_v49 = vor.u32 %v14776_v14, %v13748_v47  ;;  %v12961_v27 = vor.u32 %v14577_v55, %v12958_v35  ;;  %9223 = vmatpush.bf16.msra.mxu1 %v12781_v43  ;;  %v13105_v43 = vor.u32 %v14613_v22, %v13102_v48  ;;  %v14646_v47 = vld [vmem:[%s15385_s29 + $0x454] sm:$0xf]  ;;  %v13234_v14 = vld [vmem:[%s15385_s29 + $0x45c] sm:$0xf0]  ;;  %v18176_v22 = vperm.slane %v18016_v51, 2 }
 0x90b   : > { %v6990_v54 = vmax.f32 %v6848_v46, 0.0  ;;  %9275 = vmatpush.bf16.msrb.mxu0 %v13129_v2  ;;  %v13114_v46 = vld [vmem:[%s15385_s29 + $0x36c] sm:$0xf0]  ;;  %v18146_v40 = vpack.c.bf16 %v7013_v59, %v7001_v5  ;;  %v14773_v59 = vld [vmem:[%s15385_s29 + $0x848] sm:$0xf0]  ;;  %v13237_v55 = vor.u32 %v14646_v47, %v13234_v14 }
 0x90c   : > { %v13117_v26 = vor.u32 %v14616_v1, %v13114_v46  ;;  %9184 = vmatpush.bf16.msrb.mxu3 %v13749_v49  ;;  %9235 = vmatpush.bf16.msra.mxu2 %v12961_v27  ;;  %v12946_v2 = vld [vmem:[%s15385_s29 + $0x21c] sm:$0xf0]  ;;  %v6815_v49 = vadd.f32 %v18079_v61, %v18077_v53  ;;  %v14571_v46 = vld [vmem:[%s15385_s29 + $0x1fc] sm:$0xf]  ;;  %v14601_v27 = vld [vmem:[%s15385_s29 + $0x2ec] sm:$0xf] }
 0x90d   : > { %v18133_v21 = vpack.c.bf16 %v6990_v54, %v6978_v32  ;;  %v18135_v60 = vpop.f32.mrf.mxu2  ;;  %v18137_v50 = vpop.f32.mrf.mxu3  ;;  %19087 = vst [vmem:[#allocation37_spill] sm:$0xff] %v18146_v40  ;;  %v13736_v32 = vld [vmem:[%s15385_s29 + $0x840] sm:$0xf]  ;;  %v14574_v54 = vld [vmem:[%s15385_s29 + $0x214] sm:$0xf] }
 0x90e   : > { %v6831_v24 = vpop.f32.mrf.mxu0  ;;  %v6850_v30 = vpop.f32.mrf.mxu1  ;;  %v13737_v41 = vor.u32 %v14773_v59, %v13736_v32  ;;  %v12949_v29 = vor.u32 %v14574_v54, %v12946_v2  ;;  %v14610_v53 = vld [vmem:[%s15385_s29 + $0x334] sm:$0xf]  ;;  %v13090_v61 = vld [vmem:[%s15385_s29 + $0x33c] sm:$0xf0]  ;;  %v13222_v2 = vld [vmem:[%s15385_s29 + $0x444] sm:$0xf0] }
 0x90f   : > { %19086 = vst [vmem:[#allocation36_spill] sm:$0xff] %v18133_v21  ;;  %9148 = vmatmul.bf16.vlgmr.msrb.gmra.mxu1 %v18133_v21  ;;  %9276 = vmatpush.bf16.msrb.mxu0 %v13117_v26  ;;  %v6832_v5 = vadd.f32 %v6831_v24, %v6813_v9  ;;  %v12934_v24 = vld [vmem:[%s15385_s29 + $0x204] sm:$0xf0]  ;;  %v13093_v54 = vor.u32 %v14610_v53, %v13090_v61  ;;  %v12922_v47 = vld [vmem:[%s15385_s29 + $0x1ec] sm:$0xf0] }
 0x910   : > { %9292 = vmatpush.bf16.msrb.mxu1 %v13249_v0  ;;  %9185 = vmatpush.bf16.msrb.mxu3 %v13737_v41  ;;  %v12937_v6 = vor.u32 %v14571_v46, %v12934_v24  ;;  %v13054_v0 = vld [vmem:[%s15385_s29 + $0x2f4] sm:$0xf0]  ;;  %v14643_v41 = vld [vmem:[%s15385_s29 + $0x43c] sm:$0xf]  ;;  %v13042_v14 = vld [vmem:[%s15385_s29 + $0x2dc] sm:$0xf0] }
 0x911   : > { %9134 = vmatmul.bf16.gmra.mxu0 %v18146_v40  ;;  %9236 = vmatpush.bf16.msra.mxu2 %v12949_v29  ;;  %v6851_v9 = vadd.f32 %v6850_v30, %v6832_v5  ;;  %v13057_v59 = vor.u32 %v14601_v27, %v13054_v0  ;;  %v13225_v48 = vor.u32 %v14643_v41, %v13222_v2  ;;  %v14598_v30 = vld [vmem:[%s15385_s29 + $0x2d4] sm:$0xf]  ;;  %v13210_v0 = vld [vmem:[%s15385_s29 + $0x42c] sm:$0xf0] }
 0x912   : > { %v13045_v27 = vor.u32 %v14598_v30, %v13042_v14  ;;  %v13066_v14 = vld [vmem:[%s15385_s29 + $0x30c] sm:$0xf0] }
 0x913   : > { %9277 = vmatpush.bf16.msrb.mxu0 %v13105_v43  ;;  %v14568_v43 = vld [vmem:[%s15385_s29 + $0x1e4] sm:$0xf]  ;;  %v7002_v46 = vmax.f32 %v6851_v9, 0.0  ;;  %v12910_v9 = vld [vmem:[%s15385_s29 + $0x1d4] sm:$0xf0] }
 0x914   : > { %9293 = vmatpush.bf16.msrb.mxu1 %v13237_v55  ;;  %9254 = vmatpush.bf16.msra.mxu3 %v13057_v59  ;;  %v12925_v5 = vor.u32 %v14568_v43, %v12922_v47  ;;  %v14607_v55 = vld [vmem:[%s15385_s29 + $0x31c] sm:$0xf]  ;;  %v14565_v59 = vld [vmem:[%s15385_s29 + $0x1cc] sm:$0xf]  ;;  %v14604_v43 = vld [vmem:[%s15385_s29 + $0x304] sm:$0xf]  ;;  %v6865_v47 = vadd.f32 %v18110_v62, %v18176_v22 }
 0x915   : > { %v18163_v35 = vpop.f32.mrf.mxu2  ;;  %v18165_v1 = vpop.f32.mrf.mxu3  ;;  %9237 = vmatpush.bf16.msra.mxu2 %v12937_v6 }
 0x916   : > { %v6833_v26 = vpop.f32.mrf.mxu0  ;;  %v6852_v17 = vpop.f32.mrf.mxu1 }
 0x917   : > { %v6834_v32 = vadd.f32 %v6833_v26, %v6815_v49  ;;  %9278 = vmatpush.bf16.msrb.mxu0 %v13093_v54  ;;  %v13078_v49 = vld [vmem:[%s15385_s29 + $0x324] sm:$0xf0]  ;;  %v14595_v54 = vld [vmem:[%s15385_s29 + $0x2bc] sm:$0xf] }
 0x918   : > { %9294 = vmatpush.bf16.msrb.mxu1 %v13225_v48  ;;  %v13081_v26 = vor.u32 %v14607_v55, %v13078_v49  ;;  %9255 = vmatpush.bf16.msra.mxu3 %v13045_v27  ;;  %v12913_v48 = vor.u32 %v14565_v59, %v12910_v9  ;;  %v14637_v55 = vld [vmem:[%s15385_s29 + $0x40c] sm:$0xf]  ;;  %v13069_v49 = vor.u32 %v14604_v43, %v13066_v14  ;;  %v12898_v27 = vld [vmem:[%s15385_s29 + $0x1bc] sm:$0xf0]  ;;  %v18216_v43 = vperm.slane %v18016_v51, 3 }
 0x919   : > { %v6853_v29 = vadd.f32 %v6852_v17, %v6834_v32  ;;  %v14640_v17 = vld [vmem:[%s15385_s29 + $0x424] sm:$0xf]  ;;  %9238 = vmatpush.bf16.msra.mxu2 %v12925_v5  ;;  %v13198_v5 = vld [vmem:[%s15385_s29 + $0x414] sm:$0xf0]  ;;  %v6884_v59 = vadd.f32 %v18112_v3, %v6865_v47  ;;  %v14559_v3 = vld [vmem:[%s15385_s29 + $0x19c] sm:$0xf] }
 0x91a   : > { %v13213_v53 = vor.u32 %v14640_v17, %v13210_v0  ;;  %v13201_v62 = vor.u32 %v14637_v55, %v13198_v5  ;;  %v14592_v17 = vld [vmem:[%s15385_s29 + $0x2a4] sm:$0xf]  ;;  %v13018_v0 = vld [vmem:[%s15385_s29 + $0x2ac] sm:$0xf0]  ;;  %v12886_v47 = vld [vmem:[%s15385_s29 + $0x1a4] sm:$0xf0] }
 0x91b   : > { %v7014_v24 = vmax.f32 %v6853_v29, 0.0  ;;  %9279 = vmatpush.bf16.msrb.mxu0 %v13081_v26  ;;  %v13030_v29 = vld [vmem:[%s15385_s29 + $0x2c4] sm:$0xf0]  ;;  %v13021_v9 = vor.u32 %v14592_v17, %v13018_v0  ;;  %v13006_v17 = vld [vmem:[%s15385_s29 + $0x294] sm:$0xf0] }
 0x91c   : > { %v13033_v30 = vor.u32 %v14595_v54, %v13030_v29  ;;  %9295 = vmatpush.bf16.msrb.mxu1 %v13213_v53  ;;  %v14721_v53 = vld [vmem:[%s15385_s29 + $0x6ac] sm:$0xf]  ;;  %v14634_v54 = vld [vmem:[%s15385_s29 + $0x3f4] sm:$0xf]  ;;  %v13186_v29 = vld [vmem:[%s15385_s29 + $0x3fc] sm:$0xf0] }
 0x91d   : > { %v18186_v61 = vpop.f32.mrf.mxu2  ;;  %v18188_v6 = vpop.f32.mrf.mxu3  ;;  %v18190_v32 = vpack.c.bf16 %v7014_v24, %v7002_v46  ;;  %v6867_v46 = vadd.f32 %v18135_v60, %v18176_v22  ;;  %v14562_v24 = vld [vmem:[%s15385_s29 + $0x1b4] sm:$0xf]  ;;  %9239 = vmatpush.bf16.msra.mxu2 %v12913_v48  ;;  %v13534_v60 = vld [vmem:[%s15385_s29 + $0x6b4] sm:$0xf0] }
 0x91e   : > { %v6902_v41 = vpop.f32.mrf.mxu0  ;;  %v6921_v2 = vpop.f32.mrf.mxu1  ;;  %9256 = vmatpush.bf16.msra.mxu3 %v13033_v30  ;;  %v12901_v26 = vor.u32 %v14562_v24, %v12898_v27  ;;  %v13537_v48 = vor.u32 %v14721_v53, %v13534_v60  ;;  %v13189_v30 = vor.u32 %v14634_v54, %v13186_v29  ;;  %v14589_v24 = vld [vmem:[%s15385_s29 + $0x28c] sm:$0xf]  ;;  %v14718_v0 = vld [vmem:[%s15385_s29 + $0x694] sm:$0xf]  ;;  %v13522_v53 = vld [vmem:[%s15385_s29 + $0x69c] sm:$0xf0] }
 0x91f   : > { %19088 = vst [vmem:[#allocation38_spill] sm:$0xff] %v18190_v32  ;;  %9153 = vmatmul.bf16.gmra.mxu1 %v18190_v32  ;;  %9280 = vmatpush.bf16.msrb.mxu0 %v13069_v49  ;;  %v6886_v14 = vadd.f32 %v18137_v50, %v6867_v46  ;;  %v6903_v55 = vadd.f32 %v6902_v41, %v6884_v59  ;;  %v14631_v59 = vld [vmem:[%s15385_s29 + $0x3dc] sm:$0xf] }
 0x920   : > { %9296 = vmatpush.bf16.msrb.mxu1 %v13201_v62  ;;  %v12889_v62 = vor.u32 %v14559_v3, %v12886_v47  ;;  %v13009_v41 = vor.u32 %v14589_v24, %v13006_v17  ;;  %v13525_v46 = vor.u32 %v14718_v0, %v13522_v53  ;;  %v6922_v60 = vadd.f32 %v6921_v2, %v18216_v43  ;;  %v12874_v3 = vld [vmem:[%s15385_s29 + $0x18c] sm:$0xf0]  ;;  %v14586_v24 = vld [vmem:[%s15385_s29 + $0x274] sm:$0xf]  ;;  %v14715_v17 = vld [vmem:[%s15385_s29 + $0x67c] sm:$0xf] }
 0x921   : > { %9205 = vmatmul.bf16.vlgmr.msra.gmra.mxu0 %v17455_v25  ;;  %9240 = vmatpush.bf16.msra.mxu2 %v12901_v26  ;;  %v6979_v54 = vmax.f32 %v6903_v55, 0.0  ;;  %v13510_v0 = vld [vmem:[%s15385_s29 + $0x684] sm:$0xf0]  ;;  %v14628_v55 = vld [vmem:[%s15385_s29 + $0x3c4] sm:$0xf] }
 0x922   : > { %9257 = vmatpush.bf16.msra.mxu3 %v13021_v9  ;;  %v13174_v9 = vld [vmem:[%s15385_s29 + $0x3e4] sm:$0xf0] }
 0x923   : > { %9349 = vmatpush.bf16.msra.mxu0 %v13537_v48  ;;  %v13177_v26 = vor.u32 %v14631_v59, %v13174_v9  ;;  %v14556_v48 = vld [vmem:[%s15385_s29 + $0x184] sm:$0xf]  ;;  %v14583_v59 = vld [vmem:[%s15385_s29 + $0x25c] sm:$0xf]  ;;  %v12982_v9 = vld [vmem:[%s15385_s29 + $0x264] sm:$0xf0] }
 0x924   : > { %9297 = vmatpush.bf16.msrb.mxu1 %v13189_v30  ;;  %v12877_v47 = vor.u32 %v14556_v48, %v12874_v3  ;;  %v12985_v48 = vor.u32 %v14583_v59, %v12982_v9  ;;  %v13342_v3 = vld [vmem:[%s15385_s29 + $0x534] sm:$0xf0] }
 0x925   : > { %v6940_v49 = vpop.f32.mrf.mxu2  ;;  %v6959_v5 = vpop.f32.mrf.mxu3  ;;  %9241 = vmatpush.bf16.msra.mxu2 %v12889_v62 }
 0x926   : > { %v6904_v27 = vpop.f32.mrf.mxu0  ;;  %v6923_v51 = vpop.f32.mrf.mxu1  ;;  %9258 = vmatpush.bf16.msra.mxu3 %v13009_v41  ;;  %v13162_v41 = vld [vmem:[%s15385_s29 + $0x3cc] sm:$0xf0] }
 0x927   : > { %v6905_v50 = vadd.f32 %v6904_v27, %v6886_v14  ;;  %v6941_v14 = vadd.f32 %v6940_v49, %v6922_v60  ;;  %9350 = vmatpush.bf16.msra.mxu0 %v13525_v46  ;;  %v12994_v27 = vld [vmem:[%s15385_s29 + $0x27c] sm:$0xf0]  ;;  %v6924_v53 = vadd.f32 %v6923_v51, %v18216_v43  ;;  %v13165_v46 = vor.u32 %v14628_v55, %v13162_v41  ;;  %v14673_v60 = vld [vmem:[%s15385_s29 + $0x52c] sm:$0xf] }
 0x928   : > { %v12997_v30 = vor.u32 %v14586_v24, %v12994_v27  ;;  %9298 = vmatpush.bf16.msrb.mxu1 %v13177_v26  ;;  %v14712_v24 = vld [vmem:[%s15385_s29 + $0x664] sm:$0xf]  ;;  %v13498_v27 = vld [vmem:[%s15385_s29 + $0x66c] sm:$0xf0] }
 0x929   : > { %v6991_v29 = vmax.f32 %v6905_v50, 0.0  ;;  %v13513_v50 = vor.u32 %v14715_v17, %v13510_v0  ;;  %9242 = vmatpush.bf16.msra.mxu2 %v12877_v47  ;;  %v13345_v17 = vor.u32 %v14673_v60, %v13342_v3  ;;  %v13501_v0 = vor.u32 %v14712_v24, %v13498_v27  ;;  %v13486_v60 = vld [vmem:[%s15385_s29 + $0x654] sm:$0xf0] }
 0x92a   : > { %9259 = vmatpush.bf16.msra.mxu3 %v12997_v30  ;;  %v6870_v30 = vadd.f32 %v18163_v35, %v18176_v22  ;;  %v14580_v35 = vld [vmem:[%s15385_s29 + $0x244] sm:$0xf] }
 0x92b   : > { %v18232_v2 = vpack.c.bf16 %v6991_v29, %v6979_v54  ;;  %v6960_v54 = vadd.f32 %v6959_v5, %v6941_v14  ;;  %9351 = vmatpush.bf16.msra.mxu0 %v13513_v50  ;;  %v14745_v5 = vld [vmem:[%s15385_s29 + $0x76c] sm:$0xf]  ;;  %v13630_v14 = vld [vmem:[%s15385_s29 + $0x774] sm:$0xf0]  ;;  %v12970_v50 = vld [vmem:[%s15385_s29 + $0x24c] sm:$0xf0] }
 0x92c   : > { %9299 = vmatpush.bf16.msrb.mxu1 %v13165_v46  ;;  %v13633_v47 = vor.u32 %v14745_v5, %v13630_v14  ;;  %v12973_v59 = vor.u32 %v14580_v35, %v12970_v50  ;;  %v13330_v46 = vld [vmem:[%s15385_s29 + $0x51c] sm:$0xf0]  ;;  %v6889_v9 = vadd.f32 %v18165_v1, %v6870_v30  ;;  %v14667_v30 = vld [vmem:[%s15385_s29 + $0x4fc] sm:$0xf]  ;;  %v13318_v5 = vld [vmem:[%s15385_s29 + $0x504] sm:$0xf0] }
 0x92d   : > { %19089 = vst [vmem:[#allocation39_spill] sm:$0xff] %v18232_v2  ;;  %v6942_v49 = vpop.f32.mrf.mxu2  ;;  %v6961_v62 = vpop.f32.mrf.mxu3  ;;  %9167 = vmatmul.bf16.vlgmr.msrb.gmra.mxu2 %v18232_v2  ;;  %v6980_v41 = vmax.f32 %v6960_v54, 0.0  ;;  %v13618_v54 = vld [vmem:[%s15385_s29 + $0x75c] sm:$0xf0]  ;;  %v14697_v14 = vld [vmem:[%s15385_s29 + $0x5ec] sm:$0xf]  ;;  %v13321_v35 = vor.u32 %v14667_v30, %v13318_v5 }
 0x92e   : > { %v6943_v29 = vadd.f32 %v6942_v49, %v6924_v53  ;;  %v6907_v51 = vpop.f32.mrf.mxu0  ;;  %v6926_v26 = vpop.f32.mrf.mxu1  ;;  %v6872_v53 = vadd.f32 %v18186_v61, %v18176_v22  ;;  %9260 = vmatpush.bf16.msra.mxu3 %v12985_v48  ;;  %9311 = vmatpush.bf16.msrb.mxu2 %v13345_v17  ;;  %v14709_v61 = vld [vmem:[%s15385_s29 + $0x64c] sm:$0xf]  ;;  %v13438_v50 = vld [vmem:[%s15385_s29 + $0x5f4] sm:$0xf0]  ;;  %v13462_v5 = vld [vmem:[%s15385_s29 + $0x624] sm:$0xf0] }
 0x92f   : > { %9224 = vmatmul.bf16.vlgmr.msra.gmra.mxu1 %v17544_v37  ;;  %9352 = vmatpush.bf16.msra.mxu0 %v13501_v0  ;;  %v13489_v3 = vor.u32 %v14709_v61, %v13486_v60  ;;  %v6908_v27 = vadd.f32 %v6907_v51, %v6889_v9  ;;  %v13474_v51 = vld [vmem:[%s15385_s29 + $0x63c] sm:$0xf0]  ;;  %v14664_v60 = vld [vmem:[%s15385_s29 + $0x4e4] sm:$0xf] }
 0x930   : > { %v6962_v55 = vadd.f32 %v6961_v62, %v6943_v29  ;;  %v14670_v62 = vld [vmem:[%s15385_s29 + $0x514] sm:$0xf]  ;;  %9368 = vmatpush.bf16.msra.mxu1 %v13633_v47  ;;  %v6891_v24 = vadd.f32 %v18188_v6, %v6872_v53 }
 0x931   : > { %9210 = vmatmul.bf16.gmra.mxu0 %v17516_v16  ;;  %v13333_v22 = vor.u32 %v14670_v62, %v13330_v46  ;;  %v14742_v29 = vld [vmem:[%s15385_s29 + $0x754] sm:$0xf]  ;;  %v6927_v62 = vadd.f32 %v6926_v26, %v18216_v43 }
 0x932   : > { %v6992_v49 = vmax.f32 %v6962_v55, 0.0  ;;  %9261 = vmatpush.bf16.msra.mxu3 %v12973_v59  ;;  %v13621_v1 = vor.u32 %v14742_v29, %v13618_v54  ;;  %v14706_v6 = vld [vmem:[%s15385_s29 + $0x634] sm:$0xf]  ;;  %v13606_v59 = vld [vmem:[%s15385_s29 + $0x744] sm:$0xf0] }
 0x933   : > { %9312 = vmatpush.bf16.msrb.mxu2 %v13333_v22  ;;  %9353 = vmatpush.bf16.msra.mxu0 %v13489_v3  ;;  %v13477_v46 = vor.u32 %v14706_v6, %v13474_v51  ;;  %v7003_v22 = vmax.f32 %v6908_v27, 0.0  ;;  %v13306_v29 = vld [vmem:[%s15385_s29 + $0x4ec] sm:$0xf0]  ;;  %v14703_v27 = vld [vmem:[%s15385_s29 + $0x61c] sm:$0xf] }
 0x934   : > { %v18262_v48 = vpack.c.bf16 %v6992_v49, %v6980_v41  ;;  %9369 = vmatpush.bf16.msra.mxu1 %v13621_v1  ;;  %v13441_v41 = vor.u32 %v14697_v14, %v13438_v50  ;;  %v14739_v49 = vld [vmem:[%s15385_s29 + $0x73c] sm:$0xf]  ;;  %v13309_v54 = vor.u32 %v14664_v60, %v13306_v29  ;;  %v13426_v1 = vld [vmem:[%s15385_s29 + $0x5dc] sm:$0xf0]  ;;  %v14736_v14 = vld [vmem:[%s15385_s29 + $0x724] sm:$0xf]  ;;  %v13465_v50 = vor.u32 %v14703_v27, %v13462_v5 }
 0x935   : > { %v6945_v17 = vpop.f32.mrf.mxu2  ;;  %v6964_v0 = vpop.f32.mrf.mxu3  ;;  %v13609_v9 = vor.u32 %v14739_v49, %v13606_v59  ;;  %v14661_v51 = vld [vmem:[%s15385_s29 + $0x4cc] sm:$0xf]  ;;  %v14688_v27 = vld [vmem:[%s15385_s29 + $0x5a4] sm:$0xf] }
 0x936   : > { %19090 = vst [vmem:[#allocation40_spill] sm:$0xff] %v18262_v48  ;;  %9186 = vmatmul.bf16.vlgmr.msrb.gmra.mxu3 %v18262_v48  ;;  %v6909_v55 = vpop.f32.mrf.mxu0  ;;  %v6928_v47 = vpop.f32.mrf.mxu1  ;;  %v6946_v3 = vadd.f32 %v6945_v17, %v6927_v62  ;;  %v13594_v17 = vld [vmem:[%s15385_s29 + $0x72c] sm:$0xf0]  ;;  %v14733_v29 = vld [vmem:[%s15385_s29 + $0x70c] sm:$0xf] }
 0x937   : > { %v6910_v53 = vadd.f32 %v6909_v55, %v6891_v24  ;;  %9330 = vmatpush.bf16.msrb.mxu3 %v13441_v41  ;;  %9313 = vmatpush.bf16.msrb.mxu2 %v13321_v35  ;;  %v14694_v24 = vld [vmem:[%s15385_s29 + $0x5d4] sm:$0xf]  ;;  %v6929_v55 = vadd.f32 %v6928_v47, %v18216_v43  ;;  %v13597_v6 = vor.u32 %v14736_v14, %v13594_v17  ;;  %v14691_v41 = vld [vmem:[%s15385_s29 + $0x5bc] sm:$0xf]  ;;  %v12772_v17 = vld [vmem:[%s15385_s29 + $0xb0] sm:$0xf] }
 0x938   : > { %9354 = vmatpush.bf16.msra.mxu0 %v13477_v46  ;;  %9370 = vmatpush.bf16.msra.mxu1 %v13609_v9  ;;  %v13429_v26 = vor.u32 %v14694_v24, %v13426_v1  ;;  %v6965_v49 = vadd.f32 %v6964_v0, %v6946_v3  ;;  %v13414_v46 = vld [vmem:[%s15385_s29 + $0x5c4] sm:$0xf0]  ;;  %v14700_v9 = vld [vmem:[%s15385_s29 + $0x604] sm:$0xf]  ;;  %v13582_v3 = vld [vmem:[%s15385_s29 + $0x714] sm:$0xf0] }
 0x939   : > { %v7015_v61 = vmax.f32 %v6910_v53, 0.0  ;;  %v13294_v53 = vld [vmem:[%s15385_s29 + $0x4d4] sm:$0xf0]  ;;  %v13417_v60 = vor.u32 %v14691_v41, %v13414_v46  ;;  %v14658_v1 = vld [vmem:[%s15385_s29 + $0x4b4] sm:$0xf] }
 0x93a   : > { %v13297_v47 = vor.u32 %v14661_v51, %v13294_v53  ;;  %v7004_v5 = vmax.f32 %v6965_v49, 0.0  ;;  %v14730_v51 = vld [vmem:[%s15385_s29 + $0x6f4] sm:$0xf]  ;;  %v13570_v53 = vld [vmem:[%s15385_s29 + $0x6fc] sm:$0xf0] }
 0x93b   : > { %v18280_v30 = vpack.c.bf16 %v7015_v61, %v7003_v22  ;;  %9331 = vmatpush.bf16.msrb.mxu3 %v13429_v26  ;;  %9314 = vmatpush.bf16.msrb.mxu2 %v13309_v54  ;;  %v13450_v22 = vld [vmem:[%s15385_s29 + $0x60c] sm:$0xf0]  ;;  %v13585_v54 = vor.u32 %v14733_v29, %v13582_v3  ;;  %v13282_v26 = vld [vmem:[%s15385_s29 + $0x4bc] sm:$0xf0]  ;;  %v13270_v46 = vld [vmem:[%s15385_s29 + $0x4a4] sm:$0xf0] }
 0x93c   : > { %9355 = vmatpush.bf16.msra.mxu0 %v13465_v50  ;;  %v13453_v0 = vor.u32 %v14700_v9, %v13450_v22  ;;  %9371 = vmatpush.bf16.msra.mxu1 %v13597_v6  ;;  %v13402_v50 = vld [vmem:[%s15385_s29 + $0x5ac] sm:$0xf0]  ;;  %v14531_v6 = vld [vmem:[%s15385_s29 + $0xb8] sm:$0xf0]  ;;  %v14685_v9 = vld [vmem:[%s15385_s29 + $0x58c] sm:$0xf] }
 0x93d   : > { %19091 = vst [vmem:[#allocation41_spill] sm:$0xff] %v18280_v30  ;;  %v6947_v35 = vpop.f32.mrf.mxu2  ;;  %9172 = vmatmul.bf16.gmra.mxu2 %v18280_v30  ;;  %v6966_v61 = vpop.f32.mrf.mxu3  ;;  %v12773_v49 = vor.u32 %v14531_v6, %v12772_v17  ;;  %v14528_v29 = vld [vmem:[%s15385_s29 + $0xa0] sm:$0xf0]  ;;  %v13378_v17 = vld [vmem:[%s15385_s29 + $0x57c] sm:$0xf0] }
 0x93e   : > { %v6948_v59 = vadd.f32 %v6947_v35, %v6929_v55  ;;  %v18291_v62 = vpop.f32.mrf.mxu0  ;;  %v18293_v43 = vpop.f32.mrf.mxu1  ;;  %v13285_v55 = vor.u32 %v14658_v1, %v13282_v26  ;;  %v13405_v35 = vor.u32 %v14688_v27, %v13402_v50  ;;  %v13558_v1 = vld [vmem:[%s15385_s29 + $0x6e4] sm:$0xf0]  ;;  %v14525_v6 = vld [vmem:[%s15385_s29 + $0x88] sm:$0xf0] }
 0x93f   : > { %9229 = vmatmul.bf16.gmra.mxu1 %v17596_v39  ;;  %9332 = vmatpush.bf16.msrb.mxu3 %v13417_v60  ;;  %v13390_v60 = vld [vmem:[%s15385_s29 + $0x594] sm:$0xf0] }
 0x940   : > { %v6967_v24 = vadd.f32 %v6966_v61, %v6948_v59  ;;  %9315 = vmatpush.bf16.msrb.mxu2 %v13297_v47  ;;  %9356 = vmatpush.bf16.msra.mxu0 %v13453_v0  ;;  %v13573_v59 = vor.u32 %v14730_v51, %v13570_v53  ;;  %v14655_v47 = vld [vmem:[%s15385_s29 + $0x49c] sm:$0xf]  ;;  %v12760_v0 = vld [vmem:[%s15385_s29 + $0x98] sm:$0xf]  ;;  %v13393_v3 = vor.u32 %v14685_v9, %v13390_v60  ;;  %v13366_v9 = vld [vmem:[%s15385_s29 + $0x564] sm:$0xf0] }
 0x941   : > { %9281 = vmatmul.bf16.vlgmr.msrb.gmra.mxu0 %v17766_v13  ;;  %9372 = vmatpush.bf16.msra.mxu1 %v13585_v54  ;;  %v13273_v61 = vor.u32 %v14655_v47, %v13270_v46  ;;  %v14727_v54 = vld [vmem:[%s15385_s29 + $0x6dc] sm:$0xf] }
 0x942   : > { %v7016_v14 = vmax.f32 %v6967_v24, 0.0  ;;  %v12761_v24 = vor.u32 %v14528_v29, %v12760_v0  ;;  %v13561_v27 = vor.u32 %v14727_v54, %v13558_v1  ;;  %v14679_v46 = vld [vmem:[%s15385_s29 + $0x55c] sm:$0xf]  ;;  %v13726_v29 = vld [vmem:[%s15385_s29 + $0x834] sm:$0xf0] }
 0x943   : > { %9333 = vmatpush.bf16.msrb.mxu3 %v13405_v35  ;;  %v12748_v35 = vld [vmem:[%s15385_s29 + $0x80] sm:$0xf]  ;;  %v13369_v0 = vor.u32 %v14679_v46, %v13366_v9  ;;  %v12856_v46 = vld [vmem:[%s15385_s29 + $0x158] sm:$0xf]  ;;  %v14552_v9 = vld [vmem:[%s15385_s29 + $0x160] sm:$0xf0] }
 0x944   : > { %v18310_v41 = vpack.c.bf16 %v7016_v14, %v7004_v5  ;;  %9316 = vmatpush.bf16.msrb.mxu2 %v13285_v55  ;;  %9425 = vmatpush.bf16.msrb.mxu0 %v12773_v49  ;;  %v14652_v5 = vld [vmem:[%s15385_s29 + $0x484] sm:$0xf]  ;;  %v13258_v14 = vld [vmem:[%s15385_s29 + $0x48c] sm:$0xf0]  ;;  %v14682_v55 = vld [vmem:[%s15385_s29 + $0x574] sm:$0xf]  ;;  %v12749_v53 = vor.u32 %v14525_v6, %v12748_v35 }
 0x945   : > { %9373 = vmatpush.bf16.msra.mxu1 %v13573_v59  ;;  %v13261_v50 = vor.u32 %v14652_v5, %v13258_v14  ;;  %v13381_v51 = vor.u32 %v14682_v55, %v13378_v17  ;;  %v14724_v49 = vld [vmem:[%s15385_s29 + $0x6c4] sm:$0xf]  ;;  %v13546_v59 = vld [vmem:[%s15385_s29 + $0x6cc] sm:$0xf0]  ;;  %v14555_v5 = vld [vmem:[%s15385_s29 + $0x178] sm:$0xf0] }
 0x946   : > { %9191 = vmatmul.bf16.gmra.mxu3 %v18310_v41  ;;  %v18316_v22 = vpop.f32.mrf.mxu0  ;;  %v18323_v26 = vpop.f32.mrf.mxu1  ;;  %v13549_v47 = vor.u32 %v14724_v49, %v13546_v59  ;;  %v14676_v55 = vld [vmem:[%s15385_s29 + $0x544] sm:$0xf]  ;;  %v14766_v17 = vld [vmem:[%s15385_s29 + $0x814] sm:$0xf]  ;;  %v14519_v49 = vld [vmem:[%s15385_s29 + $0x58] sm:$0xf0] }
 0x947   : > { %9334 = vmatpush.bf16.msrb.mxu3 %v13393_v3  ;;  %v12736_v3 = vld [vmem:[%s15385_s29 + $0x68] sm:$0xf] }
 0x948   : > { %9317 = vmatpush.bf16.msrb.mxu2 %v13273_v61  ;;  %9426 = vmatpush.bf16.msrb.mxu0 %v12761_v24  ;;  %v14769_v61 = vld [vmem:[%s15385_s29 + $0x82c] sm:$0xf]  ;;  %v14522_v24 = vld [vmem:[%s15385_s29 + $0x70] sm:$0xf0] }
 0x949   : > { %9374 = vmatpush.bf16.msra.mxu1 %v13561_v27  ;;  %v13729_v54 = vor.u32 %v14769_v61, %v13726_v29  ;;  %v12737_v1 = vor.u32 %v14522_v24, %v12736_v3  ;;  %v12868_v27 = vld [vmem:[%s15385_s29 + $0x170] sm:$0xf]  ;;  %v12857_v61 = vor.u32 %v14552_v9, %v12856_v46  ;;  %v13702_v29 = vld [vmem:[%s15385_s29 + $0x804] sm:$0xf0]  ;;  %v14793_v3 = vld [vmem:[%s15385_s29 + $0x8ec] sm:$0xf] }
 0x94a   : > { %v12869_v14 = vor.u32 %v14555_v5, %v12868_v27  ;;  %v12712_v27 = vld [vmem:[%s15385_s29 + $0x38] sm:$0xf]  ;;  %v14516_v5 = vld [vmem:[%s15385_s29 + $0x40] sm:$0xf0]  ;;  %v13810_v46 = vld [vmem:[%s15385_s29 + $0x8dc] sm:$0xf0] }
 0x94b   : > { %9335 = vmatpush.bf16.msrb.mxu3 %v13381_v51  ;;  %v13714_v51 = vld [vmem:[%s15385_s29 + $0x81c] sm:$0xf0] }
 0x94c   : > { %9318 = vmatpush.bf16.msrb.mxu2 %v13261_v50  ;;  %9427 = vmatpush.bf16.msrb.mxu0 %v12749_v53  ;;  %v13354_v50 = vld [vmem:[%s15385_s29 + $0x54c] sm:$0xf0]  ;;  %v13717_v59 = vor.u32 %v14766_v17, %v13714_v51  ;;  %v14549_v17 = vld [vmem:[%s15385_s29 + $0x148] sm:$0xf0]  ;;  %v14760_v51 = vld [vmem:[%s15385_s29 + $0x7e4] sm:$0xf] }
 0x94d   : > { %9243 = vmatmul.bf16.vlgmr.msra.gmra.mxu2 %v17641_v45  ;;  %9375 = vmatpush.bf16.msra.mxu1 %v13549_v47  ;;  %v13357_v6 = vor.u32 %v14676_v55, %v13354_v50  ;;  %v12724_v53 = vld [vmem:[%s15385_s29 + $0x50] sm:$0xf]  ;;  %v12713_v55 = vor.u32 %v14516_v5, %v12712_v27  ;;  %v12844_v50 = vld [vmem:[%s15385_s29 + $0x140] sm:$0xf]  ;;  %v13678_v5 = vld [vmem:[%s15385_s29 + $0x7d4] sm:$0xf0] }
 0x94e   : > { %v18337_v60 = vpop.f32.mrf.mxu0  ;;  %v18349_v35 = vpop.f32.mrf.mxu1  ;;  %v12725_v47 = vor.u32 %v14519_v49, %v12724_v53  ;;  %v13690_v53 = vld [vmem:[%s15385_s29 + $0x7ec] sm:$0xf0]  ;;  %v14790_v49 = vld [vmem:[%s15385_s29 + $0x8d4] sm:$0xf]  ;;  %v12700_v9 = vld [vmem:[%s15385_s29 + $0x20] sm:$0xf] }
 0x94f   : > { %9300 = vmatmul.bf16.vlgmr.msrb.gmra.mxu1 %v17848_v11  ;;  %9336 = vmatpush.bf16.msrb.mxu3 %v13369_v0  ;;  %v14763_v0 = vld [vmem:[%s15385_s29 + $0x7fc] sm:$0xf] }
 0x950   : > { %9387 = vmatpush.bf16.msra.mxu2 %v13729_v54  ;;  %9428 = vmatpush.bf16.msrb.mxu0 %v12737_v1  ;;  %v13705_v54 = vor.u32 %v14763_v0, %v13702_v29  ;;  %v13822_v1 = vld [vmem:[%s15385_s29 + $0x8f4] sm:$0xf0]  ;;  %v12832_v29 = vld [vmem:[%s15385_s29 + $0x128] sm:$0xf] }
 0x951   : > { %9286 = vmatmul.bf16.gmra.mxu0 %v17822_v58  ;;  %9444 = vmatpush.bf16.msrb.mxu1 %v12869_v14  ;;  %v13825_v14 = vor.u32 %v14793_v3, %v13822_v1  ;;  %v14546_v3 = vld [vmem:[%s15385_s29 + $0x130] sm:$0xf0] }
 0x952   : > { %v12833_v27 = vor.u32 %v14546_v3, %v12832_v29  ;;  %v14784_v29 = vld [vmem:[%s15385_s29 + $0x8a4] sm:$0xf]  ;;  %v18393_v3 = vpop.f32.mrf.mxu2 }
 0x953   : > { %9337 = vmatpush.bf16.msrb.mxu3 %v13357_v6  ;;  %v12845_v6 = vor.u32 %v14549_v17, %v12844_v50  ;;  %v13798_v17 = vld [vmem:[%s15385_s29 + $0x8c4] sm:$0xf0] }
 0x954   : > { %9388 = vmatpush.bf16.msra.mxu2 %v13717_v59  ;;  %9429 = vmatpush.bf16.msrb.mxu0 %v12725_v47  ;;  %v13693_v59 = vor.u32 %v14760_v51, %v13690_v53  ;;  %v14513_v47 = vld [vmem:[%s15385_s29 + $0x28] sm:$0xf0]  ;;  %v14510_v51 = vld [vmem:[%s15385_s29 + $0x10] sm:$0xf0] }
 0x955   : > { %9445 = vmatpush.bf16.msrb.mxu1 %v12857_v61  ;;  %v13813_v61 = vor.u32 %v14790_v49, %v13810_v46  ;;  %v12701_v0 = vor.u32 %v14513_v47, %v12700_v9  ;;  %v12820_v46 = vld [vmem:[%s15385_s29 + $0x110] sm:$0xf]  ;;  %v14543_v9 = vld [vmem:[%s15385_s29 + $0x118] sm:$0xf0] }
 0x956   : > { %9262 = vmatmul.bf16.vlgmr.msra.gmra.mxu3 %v17671_v18  ;;  %v18360_v24 = vpop.f32.mrf.mxu0  ;;  %v18375_v1 = vpop.f32.mrf.mxu1  ;;  %v12821_v47 = vor.u32 %v14543_v9, %v12820_v46  ;;  %v13654_v46 = vld [vmem:[%s15385_s29 + $0x7a4] sm:$0xf0]  ;;  %v14781_v9 = vld [vmem:[%s15385_s29 + $0x88c] sm:$0xf] }
 0x957   : > { %9406 = vmatpush.bf16.msra.mxu3 %v13825_v14  ;;  %v14787_v14 = vld [vmem:[%s15385_s29 + $0x8bc] sm:$0xf] }
 0x958   : > { %9389 = vmatpush.bf16.msra.mxu2 %v13705_v54  ;;  %9430 = vmatpush.bf16.msrb.mxu0 %v12713_v55  ;;  %v14757_v54 = vld [vmem:[%s15385_s29 + $0x7cc] sm:$0xf]  ;;  %v13801_v53 = vor.u32 %v14787_v14, %v13798_v17  ;;  %v14627_v14 = vld [vmem:[%s15385_s29 + $0x3b8] sm:$0xf0] }
 0x959   : > { %9446 = vmatpush.bf16.msrb.mxu1 %v12845_v6  ;;  %v13681_v50 = vor.u32 %v14757_v54, %v13678_v5  ;;  %v12688_v6 = vld [vmem:[%s15385_s29 + $0x8] sm:$0xf]  ;;  %v13786_v54 = vld [vmem:[%s15385_s29 + $0x8ac] sm:$0xf0] }
 0x95a   : > { %v12689_v49 = vor.u32 %v14510_v51, %v12688_v6  ;;  %v13156_v5 = vld [vmem:[%s15385_s29 + $0x3b0] sm:$0xf]  ;;  %v12808_v6 = vld [vmem:[%s15385_s29 + $0xf8] sm:$0xf]  ;;  %v14540_v51 = vld [vmem:[%s15385_s29 + $0x100] sm:$0xf0] }
 0x95b   : > { %9407 = vmatpush.bf16.msra.mxu3 %v13813_v61  ;;  %v13666_v61 = vld [vmem:[%s15385_s29 + $0x7bc] sm:$0xf0]  ;;  %v13157_v17 = vor.u32 %v14627_v14, %v13156_v5 }
 0x95c   : > { %9390 = vmatpush.bf16.msra.mxu2 %v13693_v59  ;;  %9431 = vmatpush.bf16.msrb.mxu0 %v12701_v0  ;;  %v14754_v59 = vld [vmem:[%s15385_s29 + $0x7b4] sm:$0xf] }
 0x95d   : > { %9248 = vmatmul.bf16.gmra.mxu2 %v17700_v57  ;;  %9447 = vmatpush.bf16.msrb.mxu1 %v12833_v27  ;;  %v13669_v0 = vor.u32 %v14754_v59, %v13666_v61  ;;  %v13789_v27 = vor.u32 %v14784_v29, %v13786_v54  ;;  %v13774_v61 = vld [vmem:[%s15385_s29 + $0x894] sm:$0xf0]  ;;  %v14624_v54 = vld [vmem:[%s15385_s29 + $0x3a0] sm:$0xf0] }
 0x95e   : > { %v18381_v55 = vpop.f32.mrf.mxu0  ;;  %v18403_v59 = vpop.f32.mrf.mxu1  ;;  %v13144_v29 = vld [vmem:[%s15385_s29 + $0x398] sm:$0xf]  ;;  %v13777_v5 = vor.u32 %v14781_v9, %v13774_v61 }
 0x95f   : > { %9305 = vmatmul.bf16.gmra.mxu1 %v17905_v23  ;;  %9408 = vmatpush.bf16.msra.mxu3 %v13801_v53  ;;  %v12809_v53 = vor.u32 %v14540_v51, %v12808_v6  ;;  %v13145_v14 = vor.u32 %v14624_v54, %v13144_v29  ;;  %v14748_v6 = vld [vmem:[%s15385_s29 + $0x784] sm:$0xf]  ;;  %v18419_v29 = vpop.f32.mrf.mxu3  ;;  %v14534_v54 = vld [vmem:[%s15385_s29 + $0xd0] sm:$0xf0] }
 0x960   : > { %9391 = vmatpush.bf16.msra.mxu2 %v13681_v50  ;;  %9432 = vmatpush.bf16.msrb.mxu0 %v12689_v49  ;;  %v14751_v50 = vld [vmem:[%s15385_s29 + $0x79c] sm:$0xf]  ;;  %v13645_v9 = vor.u32 %v14748_v6, %v13642_v38  ;;  %v12964_v38 = vld [vmem:[%s15385_s29 + $0x230] sm:$0xf]  ;;  %v13120_v6 = vld [vmem:[%s15385_s29 + $0x368] sm:$0xf] }
 0x961   : > { %9357 = vmatmul.bf16.vlgmr.msra.gmra.mxu0 %v18088_v8  ;;  %9448 = vmatpush.bf16.msrb.mxu1 %v12821_v47  ;;  %v13657_v47 = vor.u32 %v14751_v50, %v13654_v46  ;;  %v13132_v50 = vld [vmem:[%s15385_s29 + $0x380] sm:$0xf]  ;;  %v14621_v46 = vld [vmem:[%s15385_s29 + $0x388] sm:$0xf0] }
 0x962   : > { %v13133_v61 = vor.u32 %v14621_v46, %v13132_v50  ;;  %v13252_v46 = vld [vmem:[%s15385_s29 + $0x470] sm:$0xf] }
 0x963   : > { %9409 = vmatpush.bf16.msra.mxu3 %v13789_v27  ;;  %v12796_v27 = vld [vmem:[%s15385_s29 + $0xe0] sm:$0xf] }
 0x964   : > { %9501 = vmatpush.bf16.msra.mxu0 %v13157_v17  ;;  %9392 = vmatpush.bf16.msra.mxu2 %v13669_v0  ;;  %v14537_v17 = vld [vmem:[%s15385_s29 + $0xe8] sm:$0xf0]  ;;  %v13765_v0 = vor.u32 %v14778_v52, %v13762_v36  ;;  %v14775_v36 = vld [vmem:[%s15385_s29 + $0x85c] sm:$0xf]  ;;  %v13750_v52 = vld [vmem:[%s15385_s29 + $0x864] sm:$0xf0] }
 0x965   : > { %9449 = vmatpush.bf16.msrb.mxu1 %v12809_v53  ;;  %v12797_v51 = vor.u32 %v14537_v17, %v12796_v27  ;;  %v12784_v53 = vld [vmem:[%s15385_s29 + $0xc8] sm:$0xf]  ;;  %v18423_v27 = vpop.f32.mrf.mxu2  ;;  %v14579_v17 = vld [vmem:[%s15385_s29 + $0x238] sm:$0xf0] }
 0x966   : > { %9267 = vmatmul.bf16.gmra.mxu3 %v17726_v44  ;;  %v18406_v49 = vpop.f32.mrf.mxu0  ;;  %v12965_v50 = vor.u32 %v14579_v17, %v12964_v38  ;;  %v14576_v17 = vld [vmem:[%s15385_s29 + $0x220] sm:$0xf0]  ;;  %v13408_v44 = vld [vmem:[%s15385_s29 + $0x5a8] sm:$0xf] }
 0x967   : > { %9410 = vmatpush.bf16.msra.mxu3 %v13777_v5  ;;  %v12785_v5 = vor.u32 %v14534_v54, %v12784_v53  ;;  %v14651_v53 = vld [vmem:[%s15385_s29 + $0x478] sm:$0xf0]  ;;  %v18437_v54 = vpop.f32.mrf.mxu1  ;;  %v18448_v33 = vpop.f32.mrf.mxu3 }
 0x968   : > { %9502 = vmatpush.bf16.msra.mxu0 %v13145_v14  ;;  %9393 = vmatpush.bf16.msra.mxu2 %v13657_v47  ;;  %v13753_v14 = vor.u32 %v14775_v36, %v13750_v52  ;;  %v13738_v36 = vld [vmem:[%s15385_s29 + $0x84c] sm:$0xf0]  ;;  %v12952_v52 = vld [vmem:[%s15385_s29 + $0x218] sm:$0xf] }
 0x969   : > { %9450 = vmatpush.bf16.msrb.mxu1 %v12797_v51  ;;  %v14618_v51 = vld [vmem:[%s15385_s29 + $0x370] sm:$0xf0] }
 0x96b   : > { %9411 = vmatpush.bf16.msra.mxu3 %v13765_v0  ;;  %v13121_v0 = vor.u32 %v14618_v51, %v13120_v6  ;;  %v13108_v6 = vld [vmem:[%s15385_s29 + $0x350] sm:$0xf]  ;;  %v14615_v51 = vld [vmem:[%s15385_s29 + $0x358] sm:$0xf0] }
 0x96c   : > { %9394 = vmatpush.bf16.msra.mxu2 %v13645_v9  ;;  %9503 = vmatpush.bf16.msra.mxu0 %v13133_v61  ;;  %v13253_v9 = vor.u32 %v14651_v53, %v13252_v46  ;;  %v14772_v61 = vld [vmem:[%s15385_s29 + $0x844] sm:$0xf]  ;;  %v13109_v46 = vor.u32 %v14615_v51, %v13108_v6  ;;  %v13240_v53 = vld [vmem:[%s15385_s29 + $0x458] sm:$0xf] }
 0x96d   : > { %9319 = vmatmul.bf16.vlgmr.msrb.gmra.mxu2 %v17980_v34  ;;  %9451 = vmatpush.bf16.msrb.mxu1 %v12785_v5  ;;  %v13741_v38 = vor.u32 %v14772_v61, %v13738_v36  ;;  %v12953_v5 = vor.u32 %v14576_v17, %v12952_v52  ;;  %v13060_v61 = vld [vmem:[%s15385_s29 + $0x2f0] sm:$0xf]  ;;  %v18453_v36 = vpop.f32.mrf.mxu2  ;;  %v14603_v17 = vld [vmem:[%s15385_s29 + $0x2f8] sm:$0xf0]  ;;  %v14612_v6 = vld [vmem:[%s15385_s29 + $0x340] sm:$0xf0] }
 0x96e   : > { %v18429_v47 = vpop.f32.mrf.mxu0  ;;  %v13061_v51 = vor.u32 %v14603_v17, %v13060_v61  ;;  %v14642_v61 = vld [vmem:[%s15385_s29 + $0x430] sm:$0xf0] }
 0x96f   : > { %9376 = vmatmul.bf16.vlgmr.msra.gmra.mxu1 %v18133_v21  ;;  %9412 = vmatpush.bf16.msra.mxu3 %v13753_v14  ;;  %v14648_v14 = vld [vmem:[%s15385_s29 + $0x460] sm:$0xf0] }
 0x970   : > { %9463 = vmatpush.bf16.msrb.mxu2 %v12965_v50  ;;  %9504 = vmatpush.bf16.msra.mxu0 %v13121_v0  ;;  %v13241_v42 = vor.u32 %v14648_v14, %v13240_v53  ;;  %v12940_v50 = vld [vmem:[%s15385_s29 + $0x200] sm:$0xf]  ;;  %v14573_v0 = vld [vmem:[%s15385_s29 + $0x208] sm:$0xf0] }
 0x971   : > { %9362 = vmatmul.bf16.gmra.mxu0 %v18146_v40  ;;  %9520 = vmatpush.bf16.msra.mxu1 %v13253_v9  ;;  %v12941_v52 = vor.u32 %v14573_v0, %v12940_v50  ;;  %v13228_v14 = vld [vmem:[%s15385_s29 + $0x440] sm:$0xf]  ;;  %v14609_v0 = vld [vmem:[%s15385_s29 + $0x328] sm:$0xf0]  ;;  %v18469_v40 = vpop.f32.mrf.mxu1 }
 0x972   : > { %v13229_v56 = vor.u32 %v14645_v31, %v13228_v14  ;;  %v13084_v50 = vld [vmem:[%s15385_s29 + $0x320] sm:$0xf]  ;;  %v13216_v31 = vld [vmem:[%s15385_s29 + $0x428] sm:$0xf]  ;;  %v13204_v14 = vld [vmem:[%s15385_s29 + $0x410] sm:$0xf] }
 0x973   : > { %9413 = vmatpush.bf16.msra.mxu3 %v13741_v38  ;;  %v13096_v38 = vld [vmem:[%s15385_s29 + $0x338] sm:$0xf]  ;;  %v13217_v17 = vor.u32 %v14642_v61, %v13216_v31  ;;  %v14564_v61 = vld [vmem:[%s15385_s29 + $0x1c0] sm:$0xf0] }
 0x974   : > { %9464 = vmatpush.bf16.msrb.mxu2 %v12953_v5  ;;  %9505 = vmatpush.bf16.msra.mxu0 %v13109_v46  ;;  %v13097_v53 = vor.u32 %v14612_v6, %v13096_v38  ;;  %v13085_v46 = vor.u32 %v14609_v0, %v13084_v50  ;;  %v18481_v6 = vpop.f32.mrf.mxu3  ;;  %v12904_v31 = vld [vmem:[%s15385_s29 + $0x1b8] sm:$0xf] }
 0x975   : > { %9521 = vmatpush.bf16.msra.mxu1 %v13241_v42  ;;  %v12929_v42 = vor.u32 %v14570_v12, %v12928_v4  ;;  %v13036_v12 = vld [vmem:[%s15385_s29 + $0x2c0] sm:$0xf]  ;;  %v14597_v4 = vld [vmem:[%s15385_s29 + $0x2c8] sm:$0xf0]  ;;  %v18487_v50 = vpop.f32.mrf.mxu2 }
 0x976   : > { %9338 = vmatmul.bf16.vlgmr.msrb.gmra.mxu3 %v17982_v28  ;;  %v18456_v9 = vpop.f32.mrf.mxu0  ;;  %v13048_v28 = vld [vmem:[%s15385_s29 + $0x2d8] sm:$0xf] }
 0x977   : > { %9482 = vmatpush.bf16.msrb.mxu3 %v13061_v51  ;;  %v13049_v5 = vor.u32 %v14600_v19, %v13048_v28  ;;  %v12916_v19 = vld [vmem:[%s15385_s29 + $0x1d0] sm:$0xf]  ;;  %v14567_v28 = vld [vmem:[%s15385_s29 + $0x1d8] sm:$0xf0]  ;;  %v13037_v51 = vor.u32 %v14597_v4, %v13036_v12 }
 0x978   : > { %9465 = vmatpush.bf16.msrb.mxu2 %v12941_v52  ;;  %9506 = vmatpush.bf16.msra.mxu0 %v13097_v53  ;;  %v12917_v52 = vor.u32 %v14567_v28, %v12916_v19  ;;  %v14606_v53 = vld [vmem:[%s15385_s29 + $0x310] sm:$0xf0]  ;;  %v12905_v19 = vor.u32 %v14564_v61, %v12904_v31  ;;  %v13540_v12 = vld [vmem:[%s15385_s29 + $0x6b0] sm:$0xf]  ;;  %v14723_v4 = vld [vmem:[%s15385_s29 + $0x6b8] sm:$0xf0] }
 0x979   : > { %9522 = vmatpush.bf16.msra.mxu1 %v13229_v56  ;;  %v13072_v56 = vld [vmem:[%s15385_s29 + $0x308] sm:$0xf]  ;;  %v14594_v28 = vld [vmem:[%s15385_s29 + $0x2b0] sm:$0xf0] }
 0x97a   : > { %v13073_v0 = vor.u32 %v14606_v53, %v13072_v56  ;;  %v13541_v56 = vor.u32 %v14723_v4, %v13540_v12  ;;  %v13192_v53 = vld [vmem:[%s15385_s29 + $0x3f8] sm:$0xf] }
 0x97b   : > { %9483 = vmatpush.bf16.msrb.mxu3 %v13049_v5  ;;  %v14639_v5 = vld [vmem:[%s15385_s29 + $0x418] sm:$0xf0] }
 0x97c   : > { %9466 = vmatpush.bf16.msrb.mxu2 %v12929_v42  ;;  %9507 = vmatpush.bf16.msra.mxu0 %v13085_v46  ;;  %v13205_v42 = vor.u32 %v14639_v5, %v13204_v14  ;;  %v13024_v46 = vld [vmem:[%s15385_s29 + $0x2a8] sm:$0xf]  ;;  %v14561_v5 = vld [vmem:[%s15385_s29 + $0x1a8] sm:$0xf0]  ;;  %v18515_v21 = vpop.f32.mrf.mxu3 }
 0x97d   : > { %9324 = vmatmul.bf16.gmra.mxu2 %v18035_v15  ;;  %9523 = vmatpush.bf16.msra.mxu1 %v13217_v17  ;;  %v13025_v17 = vor.u32 %v14594_v28, %v13024_v46  ;;  %v14591_v46 = vld [vmem:[%s15385_s29 + $0x298] sm:$0xf0]  ;;  %v14720_v28 = vld [vmem:[%s15385_s29 + $0x6a0] sm:$0xf0] }
 0x97e   : > { %v18476_v38 = vpop.f32.mrf.mxu0  ;;  %v14588_v15 = vld [vmem:[%s15385_s29 + $0x280] sm:$0xf0] }
 0x97f   : > { %9381 = vmatmul.bf16.gmra.mxu1 %v18190_v32  ;;  %9484 = vmatpush.bf16.msrb.mxu3 %v13037_v51  ;;  %v18498_v51 = vpop.f32.mrf.mxu1  ;;  %v13000_v32 = vld [vmem:[%s15385_s29 + $0x278] sm:$0xf] }
 0x980   : > { %9467 = vmatpush.bf16.msrb.mxu2 %v12917_v52  ;;  %9508 = vmatpush.bf16.msra.mxu0 %v13073_v0  ;;  %v12892_v52 = vld [vmem:[%s15385_s29 + $0x1a0] sm:$0xf]  ;;  %v13012_v0 = vld [vmem:[%s15385_s29 + $0x290] sm:$0xf] }
 0x981   : > { %9433 = vmatmul.bf16.vlgmr.msrb.gmra.mxu0 %v17455_v25  ;;  %v14636_v25 = vld [vmem:[%s15385_s29 + $0x400] sm:$0xf0]  ;;  %9524 = vmatpush.bf16.msra.mxu1 %v13205_v42  ;;  %v12893_v61 = vor.u32 %v14561_v5, %v12892_v52  ;;  %v13528_v42 = vld [vmem:[%s15385_s29 + $0x698] sm:$0xf]  ;;  %v13013_v12 = vor.u32 %v14591_v46, %v13012_v0  ;;  %v13516_v52 = vld [vmem:[%s15385_s29 + $0x680] sm:$0xf]  ;;  %v18519_v0 = vpop.f32.mrf.mxu2 }
 0x982   : > { %v13193_v14 = vor.u32 %v14636_v25, %v13192_v53  ;;  %v13529_v4 = vor.u32 %v14720_v28, %v13528_v42  ;;  %v12880_v53 = vld [vmem:[%s15385_s29 + $0x188] sm:$0xf]  ;;  %v14717_v5 = vld [vmem:[%s15385_s29 + $0x688] sm:$0xf0]  ;;  %v14630_v28 = vld [vmem:[%s15385_s29 + $0x3d0] sm:$0xf0] }
 0x983   : > { %9485 = vmatpush.bf16.msrb.mxu3 %v13025_v17  ;;  %v13180_v17 = vld [vmem:[%s15385_s29 + $0x3e0] sm:$0xf]  ;;  %v13517_v46 = vor.u32 %v14717_v5, %v13516_v52  ;;  %v13168_v42 = vld [vmem:[%s15385_s29 + $0x3c8] sm:$0xf]  ;;  %v13636_v5 = vld [vmem:[%s15385_s29 + $0x770] sm:$0xf] }
 0x984   : > { %9577 = vmatpush.bf16.msrb.mxu0 %v13541_v56  ;;  %9468 = vmatpush.bf16.msrb.mxu2 %v12905_v19  ;;  %v14633_v56 = vld [vmem:[%s15385_s29 + $0x3e8] sm:$0xf0]  ;;  %v13001_v19 = vor.u32 %v14588_v15, %v13000_v32  ;;  %v12988_v15 = vld [vmem:[%s15385_s29 + $0x260] sm:$0xf] }
 0x985   : > { %9525 = vmatpush.bf16.msra.mxu1 %v13193_v14  ;;  %v13181_v25 = vor.u32 %v14633_v56, %v13180_v17  ;;  %v14585_v32 = vld [vmem:[%s15385_s29 + $0x268] sm:$0xf0]  ;;  %v13504_v56 = vld [vmem:[%s15385_s29 + $0x668] sm:$0xf] }
 0x986   : > { %9343 = vmatmul.bf16.gmra.mxu3 %v18037_v10  ;;  %v18504_v31 = vpop.f32.mrf.mxu0  ;;  %v14558_v10 = vld [vmem:[%s15385_s29 + $0x190] sm:$0xf0] }
 0x987   : > { %9486 = vmatpush.bf16.msrb.mxu3 %v13013_v12  ;;  %v12881_v14 = vor.u32 %v14558_v10, %v12880_v53  ;;  %v13169_v12 = vor.u32 %v14630_v28, %v13168_v42  ;;  %v12989_v10 = vor.u32 %v14585_v32, %v12988_v15  ;;  %v14714_v53 = vld [vmem:[%s15385_s29 + $0x670] sm:$0xf0]  ;;  %v14747_v42 = vld [vmem:[%s15385_s29 + $0x778] sm:$0xf0]  ;;  %v13336_v15 = vld [vmem:[%s15385_s29 + $0x518] sm:$0xf] }
 0x988   : > { %9578 = vmatpush.bf16.msrb.mxu0 %v13529_v4  ;;  %9469 = vmatpush.bf16.msrb.mxu2 %v12893_v61  ;;  %v13348_v4 = vld [vmem:[%s15385_s29 + $0x530] sm:$0xf]  ;;  %v14675_v61 = vld [vmem:[%s15385_s29 + $0x538] sm:$0xf0]  ;;  %v14582_v28 = vld [vmem:[%s15385_s29 + $0x250] sm:$0xf0] }
 0x989   : > { %9526 = vmatpush.bf16.msra.mxu1 %v13181_v25  ;;  %v13349_v25 = vor.u32 %v14675_v61, %v13348_v4  ;;  %v14672_v32 = vld [vmem:[%s15385_s29 + $0x520] sm:$0xf0]  ;;  %v13492_v4 = vld [vmem:[%s15385_s29 + $0x650] sm:$0xf]  ;;  %v14711_v61 = vld [vmem:[%s15385_s29 + $0x658] sm:$0xf0] }
 0x98b   : > { %9487 = vmatpush.bf16.msrb.mxu3 %v13001_v19  ;;  %v13505_v19 = vor.u32 %v14714_v53, %v13504_v56  ;;  %v13624_v56 = vld [vmem:[%s15385_s29 + $0x758] sm:$0xf]  ;;  %v14744_v53 = vld [vmem:[%s15385_s29 + $0x760] sm:$0xf0] }
 0x98c   : > { %v18523_v17 = vpop.f32.mrf.mxu1  ;;  %9470 = vmatpush.bf16.msrb.mxu2 %v12881_v14  ;;  %9579 = vmatpush.bf16.msrb.mxu0 %v13517_v46  ;;  %v13637_v14 = vor.u32 %v14747_v42, %v13636_v5  ;;  %v12976_v46 = vld [vmem:[%s15385_s29 + $0x248] sm:$0xf]  ;;  %v13625_v42 = vor.u32 %v14744_v53, %v13624_v56  ;;  %v13612_v53 = vld [vmem:[%s15385_s29 + $0x740] sm:$0xf] }
 0x98d   : > { %9395 = vmatmul.bf16.vlgmr.msra.gmra.mxu2 %v18232_v2  ;;  %9527 = vmatpush.bf16.msra.mxu1 %v13169_v12  ;;  %v18544_v12 = vpop.f32.mrf.mxu3  ;;  %v14741_v2 = vld [vmem:[%s15385_s29 + $0x748] sm:$0xf0] }
 0x98e   : > { %v18532_v52 = vpop.f32.mrf.mxu0 }
 0x98f   : > { %9452 = vmatmul.bf16.vlgmr.msrb.gmra.mxu1 %v17544_v37  ;;  %9488 = vmatpush.bf16.msrb.mxu3 %v12989_v10  ;;  %v12977_v37 = vor.u32 %v14582_v28, %v12976_v46  ;;  %v13493_v10 = vor.u32 %v14711_v61, %v13492_v4  ;;  %v14669_v46 = vld [vmem:[%s15385_s29 + $0x508] sm:$0xf0]  ;;  %v13444_v28 = vld [vmem:[%s15385_s29 + $0x5f0] sm:$0xf]  ;;  %v13480_v4 = vld [vmem:[%s15385_s29 + $0x638] sm:$0xf] }
 0x990   : > { %9539 = vmatpush.bf16.msra.mxu2 %v13349_v25  ;;  %9580 = vmatpush.bf16.msrb.mxu0 %v13505_v19  ;;  %v18553_v25 = vld [vmem:[%s735_s3] sm:$0x7]  ;;  %v18555_v19 = vpop.f32.mrf.mxu2  ;;  %v14708_v61 = vld [vmem:[%s15385_s29 + $0x640] sm:$0xf0]  ;;  %s19117_s3 = sld [smem:[#allocation9_spill]] }
 0x991   : > { %9438 = vmatmul.bf16.gmra.mxu0 %v17516_v16  ;;  %9596 = vmatpush.bf16.msrb.mxu1 %v13637_v14  ;;  %v13337_v16 = vor.u32 %v14672_v32, %v13336_v15  ;;  %19092 = vst [vmem:[#allocation42_spill] sm:$0xff] %v18553_v25  ;;  %v13324_v14 = vld [vmem:[%s15385_s29 + $0x500] sm:$0xf]  ;;  %v14699_v32 = vld [vmem:[%s15385_s29 + $0x5f8] sm:$0xf0]  ;;  %v18569_v34 = vperm.slane %v18553_v25, 0 }
 0x992   : > { %v13325_v15 = vor.u32 %v14669_v46, %v13324_v14  ;;  %v13445_v56 = vor.u32 %v14699_v32, %v13444_v28  ;;  %v13312_v46 = vld [vmem:[%s15385_s29 + $0x4e8] sm:$0xf]  ;;  %v13468_v28 = vld [vmem:[%s15385_s29 + $0x620] sm:$0xf]  ;;  %v14705_v32 = vld [vmem:[%s15385_s29 + $0x628] sm:$0xf0] }
 0x993   : > { %9489 = vmatpush.bf16.msrb.mxu3 %v12977_v37  ;;  %v13481_v37 = vor.u32 %v14708_v61, %v13480_v4  ;;  %v13600_v61 = vld [vmem:[%s15385_s29 + $0x728] sm:$0xf]  ;;  %v14735_v25 = vld [vmem:[%s15385_s29 + $0x718] sm:$0xf0] }
 0x994   : > { %v18557_v5 = vpop.f32.mrf.mxu1  ;;  %9540 = vmatpush.bf16.msra.mxu2 %v13337_v16  ;;  %9581 = vmatpush.bf16.msrb.mxu0 %v13493_v10  ;;  %v13613_v16 = vor.u32 %v14741_v2, %v13612_v53  ;;  %v13469_v2 = vor.u32 %v14705_v32, %v13468_v28  ;;  %v8979_v53 = vadd.f32 %v18291_v62, %v18569_v34  ;;  %v14693_v62 = vld [vmem:[%s15385_s29 + $0x5c8] sm:$0xf0]  ;;  %v13456_v32 = vld [vmem:[%s15385_s29 + $0x608] sm:$0xf] }
 0x995   : > { %9597 = vmatpush.bf16.msrb.mxu1 %v13625_v42  ;;  %v14696_v42 = vld [vmem:[%s15385_s29 + $0x5e0] sm:$0xf0] }
 0x996   : > { %9414 = vmatmul.bf16.vlgmr.msra.gmra.mxu3 %v18262_v48  ;;  %v18571_v14 = vpop.f32.mrf.mxu0  ;;  %v14666_v48 = vld [vmem:[%s15385_s29 + $0x4f0] sm:$0xf0]  ;;  %v13433_v4 = vor.u32 %v14696_v42, %v13432_v7  ;;  %v13300_v7 = vld [vmem:[%s15385_s29 + $0x4d0] sm:$0xf]  ;;  %p13830_p1 = scmp.ne.s32.totalorder %s19117_s3, 5 }
 0x997   : > { %19093 = vst [vmem:[#allocation43_spill] sm:$0xff] %v18571_v14  ;;  %9558 = vmatpush.bf16.msra.mxu3 %v13445_v56  ;;  %v13313_v10 = vor.u32 %v14666_v48, %v13312_v46  ;;  %v14738_v56 = vld [vmem:[%s15385_s29 + $0x730] sm:$0xf0]  ;;  %v18585_v46 = vpop.f32.mrf.mxu3  ;;  %v8998_v14 = vadd.f32 %v18293_v43, %v8979_v53  ;;  %v14732_v53 = vld [vmem:[%s15385_s29 + $0x700] sm:$0xf0]  ;;  %s19119_s22 = sld [smem:[#allocation48_spill]] (!%p13830_p1) }
 0x998   : > { %9541 = vmatpush.bf16.msra.mxu2 %v13325_v15  ;;  %9582 = vmatpush.bf16.msrb.mxu0 %v13481_v37  ;;  %v13601_v48 = vor.u32 %v14738_v56, %v13600_v61  ;;  %v14663_v37 = vld [vmem:[%s15385_s29 + $0x4d8] sm:$0xf0]  ;;  %v18591_v42 = vpop.f32.mrf.mxu2  ;;  %v14702_v61 = vld [vmem:[%s15385_s29 + $0x610] sm:$0xf0]  ;;  %s19121_s25 = sld [smem:[#allocation46_spill]] (!%p13830_p1) }
 0x999   : > { %9598 = vmatpush.bf16.msrb.mxu1 %v13613_v16  ;;  %v13420_v16 = vld [vmem:[%s15385_s29 + $0x5c0] sm:$0xf]  ;;  %v13301_v28 = vor.u32 %v14663_v37, %v13300_v7  ;;  %v13288_v7 = vld [vmem:[%s15385_s29 + $0x4b8] sm:$0xf]  ;;  %v14660_v37 = vld [vmem:[%s15385_s29 + $0x4c0] sm:$0xf0] }
 0x99a   : > { %v13421_v56 = vor.u32 %v14693_v62, %v13420_v16  ;;  %v14690_v16 = vld [vmem:[%s15385_s29 + $0x5b0] sm:$0xf0]  ;;  %s19122_s13 = sld [smem:[#allocation47_spill]] (!%p13830_p1) }
 0x99b   : > { %9559 = vmatpush.bf16.msra.mxu3 %v13433_v4  ;;  %v13588_v4 = vld [vmem:[%s15385_s29 + $0x710] sm:$0xf]  ;;  %v13409_v43 = vor.u32 %v14690_v16, %v13408_v44  ;;  %v14654_v16 = vld [vmem:[%s15385_s29 + $0x490] sm:$0xf0]  ;;  %s19123_s17 = sld [smem:[#allocation49_spill]] (!%p13830_p1) }
 0x99c   : > { %v18583_v15 = vpop.f32.mrf.mxu1  ;;  %9542 = vmatpush.bf16.msra.mxu2 %v13313_v10  ;;  %9583 = vmatpush.bf16.msrb.mxu0 %v13469_v2  ;;  %v13589_v10 = vor.u32 %v14735_v25, %v13588_v4  ;;  %v13289_v2 = vor.u32 %v14660_v37, %v13288_v7  ;;  %v13576_v25 = vld [vmem:[%s15385_s29 + $0x6f8] sm:$0xf]  ;;  %v13564_v4 = vld [vmem:[%s15385_s29 + $0x6e0] sm:$0xf] }
 0x99d   : > { %9400 = vmatmul.bf16.gmra.mxu2 %v18280_v30  ;;  %v13457_v30 = vor.u32 %v14702_v61, %v13456_v32  ;;  %9599 = vmatpush.bf16.msrb.mxu1 %v13601_v48  ;;  %v13396_v32 = vld [vmem:[%s15385_s29 + $0x590] sm:$0xf]  ;;  %v14687_v61 = vld [vmem:[%s15385_s29 + $0x598] sm:$0xf0]  ;;  %s19120_s15 = smov (!%p13830_p1), %s19119_s22 }
 0x99e   : > { %v18606_v62 = vpop.f32.mrf.mxu0 }
 0x99f   : > { %9457 = vmatmul.bf16.gmra.mxu1 %v17596_v39  ;;  %9560 = vmatpush.bf16.msra.mxu3 %v13421_v56  ;;  %v9017_v39 = vadd.f32 %v18393_v3, %v8998_v14  ;;  %v13577_v3 = vor.u32 %v14732_v53, %v13576_v25  ;;  %v13276_v14 = vld [vmem:[%s15385_s29 + $0x4a0] sm:$0xf]  ;;  %v13397_v56 = vor.u32 %v14687_v61, %v13396_v32 }
 0x9a0   : > { %9543 = vmatpush.bf16.msra.mxu2 %v13301_v28  ;;  %9584 = vmatpush.bf16.msrb.mxu0 %v13457_v30  ;;  %v14657_v28 = vld [vmem:[%s15385_s29 + $0x4a8] sm:$0xf0] }
 0x9a1   : > { %9509 = vmatmul.bf16.vlgmr.msra.gmra.mxu0 %v17766_v13  ;;  %v8981_v13 = vadd.f32 %v18316_v22, %v18569_v34  ;;  %9600 = vmatpush.bf16.msrb.mxu1 %v13589_v10  ;;  %v9036_v30 = vadd.f32 %v18419_v29, %v9017_v39  ;;  %v13277_v44 = vor.u32 %v14657_v28, %v13276_v14  ;;  %v18620_v22 = vpop.f32.mrf.mxu3  ;;  %v14729_v10 = vld [vmem:[%s15385_s29 + $0x6e8] sm:$0xf0]  ;;  %v18626_v29 = vpop.f32.mrf.mxu2  ;;  %v14684_v14 = vld [vmem:[%s15385_s29 + $0x580] sm:$0xf0] }
 0x9a2   : > { %v13565_v39 = vor.u32 %v14729_v10, %v13564_v4  ;;  %v14771_v10 = vld [vmem:[%s15385_s29 + $0x838] sm:$0xf0] }
 0x9a3   : > { %9561 = vmatpush.bf16.msra.mxu3 %v13409_v43  ;;  %v9000_v7 = vadd.f32 %v18323_v26, %v8981_v13  ;;  %v9055_v37 = vadd.f32 %v18381_v55, %v9036_v30  ;;  %v13384_v43 = vld [vmem:[%s15385_s29 + $0x578] sm:$0xf]  ;;  %v8984_v26 = vadd.f32 %v18337_v60, %v18569_v34  ;;  %v13552_v13 = vld [vmem:[%s15385_s29 + $0x6c8] sm:$0xf] }
 0x9a4   : > { %v18612_v48 = vpop.f32.mrf.mxu1  ;;  %9544 = vmatpush.bf16.msra.mxu2 %v13289_v2  ;;  %v13264_v2 = vld [vmem:[%s15385_s29 + $0x488] sm:$0xf]  ;;  %v13385_v55 = vor.u32 %v14684_v14, %v13384_v43 }
 0x9a5   : > { %9601 = vmatpush.bf16.msrb.mxu1 %v13577_v3  ;;  %v9019_v25 = vadd.f32 %v18423_v27, %v9000_v7  ;;  %v13265_v53 = vor.u32 %v14654_v16, %v13264_v2  ;;  %v14726_v3 = vld [vmem:[%s15385_s29 + $0x6d0] sm:$0xf0]  ;;  %v9074_v28 = vadd.f32 %v18403_v59, %v9055_v37  ;;  %v13372_v27 = vld [vmem:[%s15385_s29 + $0x560] sm:$0xf]  ;;  %v9003_v7 = vadd.f32 %v18349_v35, %v8984_v26  ;;  %v13720_v16 = vld [vmem:[%s15385_s29 + $0x818] sm:$0xf] }
 0x9a6   : > { %9419 = vmatmul.bf16.gmra.mxu3 %v18310_v41  ;;  %v13553_v30 = vor.u32 %v14726_v3, %v13552_v13  ;;  %v18640_v61 = vpop.f32.mrf.mxu0  ;;  %v14678_v35 = vld [vmem:[%s15385_s29 + $0x550] sm:$0xf0]  ;;  %v14765_v13 = vld [vmem:[%s15385_s29 + $0x808] sm:$0xf0] }
 0x9a7   : > { %9562 = vmatpush.bf16.msra.mxu3 %v13397_v56  ;;  %v13732_v56 = vld [vmem:[%s15385_s29 + $0x830] sm:$0xf]  ;;  %v9038_v60 = vadd.f32 %v18448_v33, %v9019_v25  ;;  %v9093_v4 = vadd.f32 %v18519_v0, %v9074_v28  ;;  %v9022_v2 = vadd.f32 %v18453_v36, %v9003_v7  ;;  %v13360_v0 = vld [vmem:[%s15385_s29 + $0x548] sm:$0xf]  ;;  %v8986_v36 = vadd.f32 %v18360_v24, %v18569_v34  ;;  %v14795_v24 = vld [vmem:[%s15385_s29 + $0x8f8] sm:$0xf0] }
 0x9a8   : > { %9545 = vmatpush.bf16.msra.mxu2 %v13277_v44  ;;  %v14681_v44 = vld [vmem:[%s15385_s29 + $0x568] sm:$0xf0]  ;;  %v13361_v43 = vor.u32 %v14678_v35, %v13360_v0  ;;  %v13804_v0 = vld [vmem:[%s15385_s29 + $0x8c0] sm:$0xf] }
 0x9a9   : > { %9602 = vmatpush.bf16.msrb.mxu1 %v13565_v39  ;;  %v13373_v59 = vor.u32 %v14681_v44, %v13372_v27  ;;  %v9057_v37 = vadd.f32 %v18406_v49, %v9038_v60  ;;  %v18653_v33 = vpop.f32.mrf.mxu3  ;;  %v14768_v49 = vld [vmem:[%s15385_s29 + $0x820] sm:$0xf0]  ;;  %v9041_v26 = vadd.f32 %v18481_v6, %v9022_v2  ;;  %v13816_v60 = vld [vmem:[%s15385_s29 + $0x8d8] sm:$0xf]  ;;  %v14759_v2 = vld [vmem:[%s15385_s29 + $0x7d8] sm:$0xf0] }
 0x9aa   : > { %v13721_v25 = vor.u32 %v14768_v49, %v13720_v16 }
 0x9ab   : > { %9563 = vmatpush.bf16.msra.mxu3 %v13385_v55  ;;  %v13708_v55 = vld [vmem:[%s15385_s29 + $0x800] sm:$0xf] }
 0x9ac   : > { %v18638_v32 = vpop.f32.mrf.mxu1  ;;  %9546 = vmatpush.bf16.msra.mxu2 %v13265_v53  ;;  %v9076_v53 = vadd.f32 %v18437_v54, %v9057_v37  ;;  %v13709_v34 = vor.u32 %v14765_v13, %v13708_v55  ;;  %v9005_v54 = vadd.f32 %v18375_v1, %v8986_v36  ;;  %v13792_v36 = vld [vmem:[%s15385_s29 + $0x8a8] sm:$0xf] }
 0x9ad   : > { %9471 = vmatmul.bf16.vlgmr.msrb.gmra.mxu2 %v17641_v45  ;;  %v13733_v45 = vor.u32 %v14771_v10, %v13732_v56  ;;  %9603 = vmatpush.bf16.msrb.mxu1 %v13553_v30  ;;  %v9060_v30 = vadd.f32 %v18429_v47, %v9041_v26  ;;  %v14792_v10 = vld [vmem:[%s15385_s29 + $0x8e0] sm:$0xf0] }
 0x9ae   : > { %v9095_v3 = vadd.f32 %v18555_v19, %v9076_v53  ;;  %v9024_v19 = vadd.f32 %v18487_v50, %v9005_v54  ;;  %v13817_v7 = vor.u32 %v14792_v10, %v13816_v60 }
 0x9af   : > { %9528 = vmatmul.bf16.vlgmr.msra.gmra.mxu1 %v17848_v11  ;;  %9564 = vmatpush.bf16.msra.mxu3 %v13373_v59  ;;  %v9112_v11 = vadd.f32 %v18544_v12, %v9093_v4  ;;  %v13828_v12 = vld [vmem:[%s15385_s29 + $0x8f0] sm:$0xf]  ;;  %v9079_v47 = vadd.f32 %v18469_v40, %v9060_v30 }
 0x9b0   : > { %v9168_v39 = vpop.f32.mrf.mxu2  ;;  %9615 = vmatpush.bf16.msrb.mxu2 %v13733_v45  ;;  %v13829_v6 = vor.u32 %v14795_v24, %v13828_v12  ;;  %v9114_v1 = vadd.f32 %v18585_v46, %v9095_v3  ;;  %v13684_v46 = vld [vmem:[%s15385_s29 + $0x7d0] sm:$0xf]  ;;  %v13660_v12 = vld [vmem:[%s15385_s29 + $0x7a0] sm:$0xf]  ;;  %v14753_v3 = vld [vmem:[%s15385_s29 + $0x7a8] sm:$0xf0] }
 0x9b1   : > { %9514 = vmatmul.bf16.gmra.mxu0 %v17822_v58  ;;  %v9131_v58 = vadd.f32 %v18476_v38, %v9112_v11  ;;  %v18676_v38 = vpop.f32.mrf.mxu0  ;;  %v9098_v35 = vadd.f32 %v18591_v42, %v9079_v47  ;;  %v14756_v42 = vld [vmem:[%s15385_s29 + $0x7c0] sm:$0xf0]  ;;  %v19094_v24 = vld [vmem:[#allocation31_spill] sm:$0xff]  ;;  %v13756_v47 = vld [vmem:[%s15385_s29 + $0x860] sm:$0xf] }
 0x9b2   : > { %v9133_v50 = vadd.f32 %v18504_v31, %v9114_v1  ;;  %v14789_v31 = vld [vmem:[%s15385_s29 + $0x8c8] sm:$0xf0]  ;;  %v19095_v1 = vld [vmem:[#allocation43_spill] sm:$0xff] }
 0x9b3   : > { %9565 = vmatpush.bf16.msra.mxu3 %v13361_v43  ;;  %v9150_v28 = vadd.f32 %v18523_v17, %v9131_v58  ;;  %v13696_v17 = vld [vmem:[%s15385_s29 + $0x7e8] sm:$0xf] }
 0x9b4   : > { %v18665_v14 = vpop.f32.mrf.mxu1  ;;  %9616 = vmatpush.bf16.msrb.mxu2 %v13721_v25  ;;  %v9152_v40 = vadd.f32 %v18557_v5, %v9133_v50  ;;  %v13672_v5 = vld [vmem:[%s15385_s29 + $0x7b8] sm:$0xf]  ;;  %v14777_v50 = vld [vmem:[%s15385_s29 + $0x868] sm:$0xf0] }
 0x9b5   : > { %v9169_v27 = vadd.f32 %v9168_v39, %v9150_v28  ;;  %v9043_v39 = vadd.f32 %v18515_v21, %v9024_v19  ;;  %v13805_v21 = vor.u32 %v14789_v31, %v13804_v0  ;;  %v13673_v53 = vor.u32 %v14756_v42, %v13672_v5  ;;  %v13768_v19 = vld [vmem:[%s15385_s29 + $0x878] sm:$0xf]  ;;  %v14774_v31 = vld [vmem:[%s15385_s29 + $0x850] sm:$0xf0] }
 0x9b6   : > { %9490 = vmatmul.bf16.vlgmr.msrb.gmra.mxu3 %v17671_v18  ;;  %v14762_v18 = vld [vmem:[%s15385_s29 + $0x7f0] sm:$0xf0] }
 0x9b7   : > { %9634 = vmatpush.bf16.msrb.mxu3 %v13829_v6  ;;  %v13697_v59 = vor.u32 %v14762_v18, %v13696_v17  ;;  %v14780_v17 = vld [vmem:[%s15385_s29 + $0x880] sm:$0xf0] }
 0x9b8   : > { %v9170_v44 = vpop.f32.mrf.mxu2  ;;  %9617 = vmatpush.bf16.msrb.mxu2 %v13709_v34  ;;  %v13769_v60 = vor.u32 %v14780_v17, %v13768_v19 }
 0x9b9   : > { %v9187_v56 = vpop.f32.mrf.mxu3  ;;  %v9171_v16 = vadd.f32 %v9170_v44, %v9152_v40  ;;  %v18700_v43 = vpop.f32.mrf.mxu0  ;;  %v14750_v44 = vld [vmem:[%s15385_s29 + $0x790] sm:$0xf0]  ;;  %v19099_v40 = vld [vmem:[#allocation37_spill] sm:$0xff] }
 0x9ba   : > { %v9188_v4 = vadd.f32 %v9187_v56, %v9169_v27  ;;  %v13648_v27 = vld [vmem:[%s15385_s29 + $0x788] sm:$0xf] }
 0x9bb   : > { %9635 = vmatpush.bf16.msrb.mxu3 %v13817_v7  ;;  %v13649_v56 = vor.u32 %v14750_v44, %v13648_v27  ;;  %v19097_v7 = vld [vmem:[#allocation32_spill] sm:$0xff] }
 0x9bc   : > { %v9653_v45 = vadd.f32 %v9188_v4, %v16741_v63  ;;  %v18688_v37 = vpop.f32.mrf.mxu1  ;;  %9618 = vmatpush.bf16.msrb.mxu2 %v13697_v59  ;;  %v13685_v63 = vor.u32 %v14759_v2, %v13684_v46  ;;  %v19096_v59 = vld [vmem:[#allocation25_spill] sm:$0xff]  ;;  %v19098_v46 = vld [vmem:[#allocation36_spill] sm:$0xff] }
 0x9bd   : > { %9476 = vmatmul.bf16.gmra.mxu2 %v17700_v57  ;;  %v9062_v57 = vadd.f32 %v18456_v9, %v9043_v39  ;;  %v14786_v9 = vld [vmem:[%s15385_s29 + $0x8b0] sm:$0xf0]  ;;  %v13757_v39 = vor.u32 %v14777_v50, %v13756_v47 }
 0x9be   : > { %9665 = vst [vmem:[#allocation2 + $0x30] sm:$0xff] %v9653_v45  ;;  %v13793_v58 = vor.u32 %v14786_v9, %v13792_v36 }
 0x9bf   : > { %9533 = vmatmul.bf16.gmra.mxu1 %v17905_v23  ;;  %9636 = vmatpush.bf16.msrb.mxu3 %v13805_v21  ;;  %v9117_v23 = vadd.f32 %v18620_v22, %v9098_v35  ;;  %v9081_v26 = vadd.f32 %v18498_v51, %v9062_v57  ;;  %v13780_v22 = vld [vmem:[%s15385_s29 + $0x890] sm:$0xf]  ;;  %v13661_v51 = vor.u32 %v14753_v3, %v13660_v12 }
 0x9c0   : > { %v9173_v11 = vpop.f32.mrf.mxu2  ;;  %9619 = vmatpush.bf16.msrb.mxu2 %v13685_v63  ;;  %v13744_v63 = vld [vmem:[%s15385_s29 + $0x848] sm:$0xf] }
 0x9c1   : > { %v9189_v49 = vpop.f32.mrf.mxu3  ;;  %9585 = vmatmul.bf16.vlgmr.msrb.gmra.mxu0 %v18088_v8  ;;  %v9136_v55 = vadd.f32 %v18532_v52, %v9117_v23  ;;  %v9100_v28 = vadd.f32 %v18626_v29, %v9081_v26  ;;  %v9282_v18 = vpop.f32.mrf.mxu0  ;;  %v13745_v57 = vor.u32 %v14774_v31, %v13744_v63  ;;  %v19102_v23 = vld [vmem:[#allocation34_spill] sm:$0xff] }
 0x9c2   : > { %v9190_v25 = vadd.f32 %v9189_v49, %v9171_v16  ;;  %v19100_v16 = vld [vmem:[#allocation28_spill] sm:$0xff] }
 0x9c3   : > { %9637 = vmatpush.bf16.msrb.mxu3 %v13793_v58  ;;  %v9155_v34 = vadd.f32 %v18583_v15, %v9136_v55  ;;  %v9119_v29 = vadd.f32 %v18653_v33, %v9100_v28  ;;  %v19104_v55 = vld [vmem:[#allocation35_spill] sm:$0xff] }
 0x9c4   : > { %v9656_v8 = vadd.f32 %v9190_v25, %v16751_v20  ;;  %v18711_v13 = vpop.f32.mrf.mxu1  ;;  %9620 = vmatpush.bf16.msrb.mxu2 %v13673_v53  ;;  %v14783_v20 = vld [vmem:[%s15385_s29 + $0x898] sm:$0xf0]  ;;  %v19103_v53 = vld [vmem:[#allocation38_spill] sm:$0xff] }
 0x9c5   : > { %v13781_v52 = vor.u32 %v14783_v20, %v13780_v22  ;;  %v9174_v54 = vadd.f32 %v9173_v11, %v9155_v34  ;;  %v9138_v4 = vadd.f32 %v19095_v1, %v9119_v29  ;;  %v19105_v28 = vld [vmem:[#allocation39_spill] sm:$0xff]  ;;  %v19108_v29 = vld [vmem:[#allocation41_spill] sm:$0xff] }
 0x9c6   : > { %9668 = vst [vmem:[#allocation2 + $0x18] sm:$0xff] %v9656_v8  ;;  %9495 = vmatmul.bf16.gmra.mxu3 %v19094_v24 }
 0x9c7   : > { %9638 = vmatpush.bf16.msrb.mxu3 %v13781_v52  ;;  %v9157_v45 = vadd.f32 %v18612_v48, %v9138_v4  ;;  %v19101_v48 = vld [vmem:[#allocation33_spill] sm:$0xff]  ;;  %v19106_v52 = vld [vmem:[#allocation40_spill] sm:$0xff] }
 0x9c8   : > { %v9175_v6 = vpop.f32.mrf.mxu2  ;;  %9621 = vmatpush.bf16.msrb.mxu2 %v13661_v51 }
 0x9c9   : > { %v9192_v30 = vpop.f32.mrf.mxu3  ;;  %v9176_v2 = vadd.f32 %v9175_v6, %v9157_v45  ;;  %v9284_v49 = vpop.f32.mrf.mxu0 }
 0x9ca   : > { %v9193_v15 = vadd.f32 %v9192_v30, %v9174_v54  ;;  %v19107_v54 = vld [vmem:[#allocation42_spill] sm:$0xff] }
 0x9cb   : > { %9639 = vmatpush.bf16.msrb.mxu3 %v13769_v60  ;;  %v7428_v6 = vperm.slane %v19107_v54, 1 }
 0x9cc   : > { %v9659_v10 = vadd.f32 %v9193_v15, %v19096_v59  ;;  %v9301_v33 = vpop.f32.mrf.mxu1  ;;  %9622 = vmatpush.bf16.msrb.mxu2 %v13649_v56 }
 0x9cd   : > { %9547 = vmatmul.bf16.vlgmr.msra.gmra.mxu2 %v19097_v7  ;;  %v9207_v44 = vadd.f32 %v18606_v62, %v7428_v6  ;;  %v9209_v59 = vadd.f32 %v18640_v61, %v7428_v6 }
 0x9ce   : > { %9671 = vst [vmem:[#allocation2 + $0x8] sm:$0xff] %v9659_v10 }
 0x9cf   : > { %9604 = vmatmul.bf16.vlgmr.msrb.gmra.mxu1 %v19098_v46  ;;  %9640 = vmatpush.bf16.msrb.mxu3 %v13757_v39  ;;  %v9226_v15 = vadd.f32 %v18638_v32, %v9207_v44  ;;  %v9228_v10 = vadd.f32 %v18665_v14, %v9209_v59  ;;  %v9212_v32 = vadd.f32 %v18676_v38, %v7428_v6 }
 0x9d0   : > { %v9244_v0 = vpop.f32.mrf.mxu2 }
 0x9d1   : > { %v9194_v35 = vpop.f32.mrf.mxu3  ;;  %9590 = vmatmul.bf16.gmra.mxu0 %v19099_v40  ;;  %v9287_v25 = vpop.f32.mrf.mxu0  ;;  %v9245_v56 = vadd.f32 %v9244_v0, %v9226_v15 }
 0x9d2   : > { %v9195_v21 = vadd.f32 %v9194_v35, %v9176_v2  ;;  %v9231_v35 = vadd.f32 %v18688_v37, %v9212_v32  ;;  %v19112_v32 = vld [vmem:[#allocation29_spill] sm:$0xff] }
 0x9d3   : > { %9641 = vmatpush.bf16.msrb.mxu3 %v13745_v57 }
 0x9d4   : > { %v9662_v11 = vadd.f32 %v9195_v21, %v19100_v16  ;;  %v9303_v5 = vpop.f32.mrf.mxu1  ;;  %v9214_v16 = vadd.f32 %v18700_v43, %v7428_v6 }
 0x9d6   : > { %9674 = vst [vmem:[#allocation2 + $0x48] sm:$0xff] %v9662_v11  ;;  %9566 = vmatmul.bf16.vlgmr.msra.gmra.mxu3 %v19101_v48 }
 0x9d8   : > { %v9246_v42 = vpop.f32.mrf.mxu2 }
 0x9d9   : > { %v9263_v36 = vpop.f32.mrf.mxu3  ;;  %v9289_v12 = vpop.f32.mrf.mxu0  ;;  %v9247_v50 = vadd.f32 %v9246_v42, %v9228_v10  ;;  %v19111_v10 = vld [vmem:[#allocation26_spill] sm:$0xff] }
 0x9da   : > { %v9264_v4 = vadd.f32 %v9263_v36, %v9245_v56 }
 0x9dc   : > { %v9306_v26 = vpop.f32.mrf.mxu1  ;;  %v9283_v7 = vadd.f32 %v9282_v18, %v9264_v4 }
 0x9dd   : > { %9552 = vmatmul.bf16.gmra.mxu2 %v19102_v23 }
 0x9de   : > { %v9302_v46 = vadd.f32 %v9301_v33, %v9283_v7  ;;  %v9233_v33 = vadd.f32 %v18711_v13, %v9214_v16 }
 0x9df   : > { %9609 = vmatmul.bf16.gmra.mxu1 %v19103_v53 }
 0x9e0   : > { %v9249_v9 = vpop.f32.mrf.mxu2 }
 0x9e1   : > { %v9265_v58 = vpop.f32.mrf.mxu3  ;;  %v9358_v51 = vpop.f32.mrf.mxu0  ;;  %v9250_v61 = vadd.f32 %v9249_v9, %v9231_v35 }
 0x9e2   : > { %v9266_v39 = vadd.f32 %v9265_v58, %v9247_v50 }
 0x9e4   : > { %v18740_v22 = vpop.f32.mrf.mxu1  ;;  %v9285_v40 = vadd.f32 %v9284_v49, %v9266_v39 }
 0x9e6   : > { %9571 = vmatmul.bf16.gmra.mxu3 %v19104_v55 }
 0x9e8   : > { %v9251_v8 = vpop.f32.mrf.mxu2 }
 0x9e9   : > { %v9268_v3 = vpop.f32.mrf.mxu3  ;;  %v9360_v19 = vpop.f32.mrf.mxu0  ;;  %v9252_v23 = vadd.f32 %v9251_v8, %v9233_v33 }
 0x9ea   : > { %v9269_v21 = vadd.f32 %v9268_v3, %v9250_v61 }
 0x9ec   : > { %v9377_v20 = vpop.f32.mrf.mxu1  ;;  %v9288_v42 = vadd.f32 %v9287_v25, %v9269_v21 }
 0x9ed   : > { %9623 = vmatmul.bf16.vlgmr.msrb.gmra.mxu2 %v19105_v28 }
 0x9ee   : > { %v9307_v58 = vadd.f32 %v9306_v26, %v9288_v42  ;;  %v19110_v26 = vld [vmem:[#allocation23_spill] sm:$0xff]  ;;  %v7429_v42 = vperm.slane %v19107_v54, 2 }
 0x9f0   : > { %v9320_v34 = vpop.f32.mrf.mxu2 }
 0x9f1   : > { %v9270_v24 = vpop.f32.mrf.mxu3  ;;  %v9363_v47 = vpop.f32.mrf.mxu0  ;;  %v9321_v0 = vadd.f32 %v9320_v34, %v9302_v46  ;;  %v19109_v34 = vld [vmem:[#allocation21_spill] sm:$0xff] }
 0x9f2   : > { %v9271_v9 = vadd.f32 %v9270_v24, %v9252_v23 }
 0x9f4   : > { %v9379_v17 = vpop.f32.mrf.mxu1  ;;  %v9290_v43 = vadd.f32 %v9289_v12, %v9271_v9 }
 0x9f6   : > { %9642 = vmatmul.bf16.vlgmr.msrb.gmra.mxu3 %v19106_v52  ;;  %v9309_v8 = vadd.f32 %v18740_v22, %v9290_v43 }
 0x9f8   : > { %v9322_v30 = vpop.f32.mrf.mxu2 }
 0x9f9   : > { %v9339_v27 = vpop.f32.mrf.mxu3  ;;  %v9365_v14 = vpop.f32.mrf.mxu0 }
 0x9fa   : > { %v9340_v63 = vadd.f32 %v9339_v27, %v9321_v0 }
 0x9fc   : > { %v9382_v2 = vpop.f32.mrf.mxu1  ;;  %v9359_v57 = vadd.f32 %v9358_v51, %v9340_v63 }
 0x9fd   : > { %9628 = vmatmul.bf16.gmra.mxu2 %v19108_v29 }
 0x9fe   : > { %v9378_v36 = vadd.f32 %v9377_v20, %v9359_v57 }
 0xa00   : > { %v9325_v60 = vpop.f32.mrf.mxu2 }
 0xa01   : > { %v9341_v1 = vpop.f32.mrf.mxu3  ;;  %v9434_v3 = vpop.f32.mrf.mxu0 }
 0xa04   : > { %v9384_v48 = vpop.f32.mrf.mxu1 }
 0xa06   : > { %9647 = vmatmul.bf16.gmra.mxu3 %v18310_v41  ;;  %v9304_v41 = vadd.f32 %v9303_v5, %v9285_v40  ;;  %v9326_v5 = vadd.f32 %v9325_v60, %v9307_v58 }
 0xa08   : > { %v9327_v62 = vpop.f32.mrf.mxu2  ;;  %v9323_v11 = vadd.f32 %v9322_v30, %v9304_v41 }
 0xa09   : > { %v9344_v45 = vpop.f32.mrf.mxu3  ;;  %v9328_v24 = vadd.f32 %v9327_v62, %v9309_v8  ;;  %v9436_v29 = vpop.f32.mrf.mxu0 }
 0xa0a   : > { %v9342_v38 = vadd.f32 %v9341_v1, %v9323_v11  ;;  %v9345_v52 = vadd.f32 %v9344_v45, %v9326_v5  ;;  %v9437_v5 = vadd.f32 %v9436_v29, %v7429_v42 }
 0xa0c   : > { %v9361_v55 = vadd.f32 %v9360_v19, %v9342_v38  ;;  %v9453_v6 = vpop.f32.mrf.mxu1  ;;  %v9364_v27 = vadd.f32 %v9363_v47, %v9345_v52 }
 0xa0e   : > { %v9380_v30 = vadd.f32 %v9379_v17, %v9361_v55  ;;  %v9383_v56 = vadd.f32 %v9382_v2, %v9364_v27 }
 0xa10   : > { %v9396_v31 = vpop.f32.mrf.mxu2 }
 0xa11   : > { %v9346_v18 = vpop.f32.mrf.mxu3  ;;  %v9397_v37 = vadd.f32 %v9396_v31, %v9378_v36  ;;  %v9439_v22 = vpop.f32.mrf.mxu0 }
 0xa12   : > { %v9347_v15 = vadd.f32 %v9346_v18, %v9328_v24  ;;  %v9440_v8 = vadd.f32 %v9439_v22, %v7429_v42 }
 0xa14   : > { %v9455_v60 = vpop.f32.mrf.mxu1  ;;  %v9366_v17 = vadd.f32 %v9365_v14, %v9347_v15 }
 0xa16   : > { %v9385_v50 = vadd.f32 %v9384_v48, %v9366_v17 }
 0xa18   : > { %v9398_v49 = vpop.f32.mrf.mxu2 }
 0xa19   : > { %v9415_v53 = vpop.f32.mrf.mxu3  ;;  %v9399_v13 = vadd.f32 %v9398_v49, %v9380_v30  ;;  %v9441_v35 = vpop.f32.mrf.mxu0 }
 0xa1a   : > { %v9416_v28 = vadd.f32 %v9415_v53, %v9397_v37  ;;  %v9435_v37 = vadd.f32 %v9434_v3, %v7429_v42 }
 0xa1c   : > { %v9654_v51 = vadd.f32 %v9416_v28, %v19109_v34  ;;  %v9458_v39 = vpop.f32.mrf.mxu1  ;;  %v9454_v49 = vadd.f32 %v9453_v6, %v9435_v37 }
 0xa1e   : > { %9666 = vst [vmem:[#allocation2] sm:$0xff] %v9654_v51  ;;  %v9456_v51 = vadd.f32 %v9455_v60, %v9437_v5  ;;  %v9442_v60 = vadd.f32 %v9441_v35, %v7429_v42 }
 0xa20   : > { %v9401_v25 = vpop.f32.mrf.mxu2 }
 0xa21   : > { %v9417_v20 = vpop.f32.mrf.mxu3  ;;  %v9402_v12 = vadd.f32 %v9401_v25, %v9383_v56  ;;  %v9510_v14 = vpop.f32.mrf.mxu0 }
 0xa22   : > { %v9418_v44 = vadd.f32 %v9417_v20, %v9399_v13 }
 0xa24   : > { %v9657_v19 = vadd.f32 %v9418_v44, %v19110_v26  ;;  %v9460_v63 = vpop.f32.mrf.mxu1  ;;  %v9459_v44 = vadd.f32 %v9458_v39, %v9440_v8 }
 0xa25   : > { %v9461_v17 = vadd.f32 %v9460_v63, %v9442_v60 }
 0xa26   : > { %9669 = vst [vmem:[#allocation2 + $0x50] sm:$0xff] %v9657_v19 }
 0xa28   : > { %v9403_v1 = vpop.f32.mrf.mxu2 }
 0xa29   : > { %v9420_v4 = vpop.f32.mrf.mxu3  ;;  %v9404_v47 = vadd.f32 %v9403_v1, %v9385_v50  ;;  %v9512_v57 = vpop.f32.mrf.mxu0 }
 0xa2a   : > { %v9421_v59 = vadd.f32 %v9420_v4, %v9402_v12 }
 0xa2c   : > { %v9660_v7 = vadd.f32 %v9421_v59, %v19111_v10  ;;  %v9529_v18 = vpop.f32.mrf.mxu1 }
 0xa2e   : > { %9672 = vst [vmem:[#allocation2 + $0x38] sm:$0xff] %v9660_v7 }
 0xa30   : > { %v9472_v45 = vpop.f32.mrf.mxu2 }
 0xa31   : > { %v9422_v62 = vpop.f32.mrf.mxu3  ;;  %v9515_v33 = vpop.f32.mrf.mxu0  ;;  %v9473_v53 = vadd.f32 %v9472_v45, %v9454_v49 }
 0xa32   : > { %v9423_v46 = vadd.f32 %v9422_v62, %v9404_v47 }
 0xa34   : > { %v9663_v0 = vadd.f32 %v9423_v46, %v19112_v32  ;;  %v9531_v16 = vpop.f32.mrf.mxu1 }
 0xa36   : > { %9675 = vst [vmem:[#allocation2 + $0x10] sm:$0xff] %v9663_v0 }
 0xa38   : > { %v9474_v2 = vpop.f32.mrf.mxu2 }
 0xa39   : > { %v9491_v40 = vpop.f32.mrf.mxu3  ;;  %v9517_v58 = vpop.f32.mrf.mxu0  ;;  %v9475_v52 = vadd.f32 %v9474_v2, %v9456_v51 }
 0xa3a   : > { %v9492_v28 = vadd.f32 %v9491_v40, %v9473_v53  ;;  %v19113_v40 = vld [vmem:[#allocation22_spill] sm:$0xff] }
 0xa3c   : > { %v9534_v23 = vpop.f32.mrf.mxu1  ;;  %v9511_v43 = vadd.f32 %v9510_v14, %v9492_v28 }
 0xa3e   : > { %v9530_v20 = vadd.f32 %v9529_v18, %v9511_v43 }
 0xa40   : > { %v9477_v61 = vpop.f32.mrf.mxu2 }
 0xa41   : > { %v9493_v31 = vpop.f32.mrf.mxu3  ;;  %v9586_v54 = vpop.f32.mrf.mxu0  ;;  %v9478_v26 = vadd.f32 %v9477_v61, %v9459_v44 }
 0xa42   : > { %v9494_v25 = vadd.f32 %v9493_v31, %v9475_v52 }
 0xa44   : > { %v9536_v34 = vpop.f32.mrf.mxu1  ;;  %v9513_v3 = vadd.f32 %v9512_v57, %v9494_v25 }
 0xa46   : > { %v9532_v29 = vadd.f32 %v9531_v16, %v9513_v3 }
 0xa48   : > { %v9479_v21 = vpop.f32.mrf.mxu2 }
 0xa49   : > { %v9496_v41 = vpop.f32.mrf.mxu3  ;;  %v9588_v4 = vpop.f32.mrf.mxu0  ;;  %v9480_v50 = vadd.f32 %v9479_v21, %v9461_v17 }
 0xa4a   : > { %v9497_v56 = vadd.f32 %v9496_v41, %v9478_v26 }
 0xa4c   : > { %v9605_v6 = vpop.f32.mrf.mxu1  ;;  %v9516_v59 = vadd.f32 %v9515_v33, %v9497_v56 }
 0xa4e   : > { %v9535_v46 = vadd.f32 %v9534_v23, %v9516_v59 }
 0xa50   : > { %v9548_v11 = vpop.f32.mrf.mxu2 }
 0xa51   : > { %v9498_v48 = vpop.f32.mrf.mxu3  ;;  %v9549_v27 = vadd.f32 %v9548_v11, %v9530_v20  ;;  %v9591_v63 = vpop.f32.mrf.mxu0 }
 0xa52   : > { %v9499_v39 = vadd.f32 %v9498_v48, %v9480_v50  ;;  %v19114_v48 = vld [vmem:[#allocation24_spill] sm:$0xff] }
 0xa54   : > { %v9607_v22 = vpop.f32.mrf.mxu1  ;;  %v9518_v31 = vadd.f32 %v9517_v58, %v9499_v39 }
 0xa56   : > { %v9537_v57 = vadd.f32 %v9536_v34, %v9518_v31 }
 0xa58   : > { %v9550_v38 = vpop.f32.mrf.mxu2 }
 0xa59   : > { %v9567_v36 = vpop.f32.mrf.mxu3  ;;  %v9551_v1 = vadd.f32 %v9550_v38, %v9532_v29  ;;  %v9593_v49 = vpop.f32.mrf.mxu0 }
 0xa5a   : > { %v9568_v24 = vadd.f32 %v9567_v36, %v9549_v27 }
 0xa5c   : > { %v9587_v12 = vadd.f32 %v9586_v54, %v9568_v24  ;;  %v9610_v11 = vpop.f32.mrf.mxu1 }
 0xa5e   : > { %v9606_v7 = vadd.f32 %v9605_v6, %v9587_v12 }
 0xa60   : > { %v9553_v9 = vpop.f32.mrf.mxu2 }
 0xa61   : > { %v9569_v55 = vpop.f32.mrf.mxu3  ;;  %v9554_v2 = vadd.f32 %v9553_v9, %v9535_v46 }
 0xa62   : > { %v9570_v10 = vadd.f32 %v9569_v55, %v9551_v1  ;;  %v19115_v55 = vld [vmem:[#allocation27_spill] sm:$0xff] }
 0xa64   : > { %v9589_v32 = vadd.f32 %v9588_v4, %v9570_v10  ;;  %v9612_v5 = vpop.f32.mrf.mxu1 }
 0xa66   : > { %v9608_v14 = vadd.f32 %v9607_v22, %v9589_v32 }
 0xa68   : > { %v9555_v30 = vpop.f32.mrf.mxu2 }
 0xa69   : > { %v9572_v13 = vpop.f32.mrf.mxu3  ;;  %v9556_v42 = vadd.f32 %v9555_v30, %v9537_v57  ;;  %v19116_v30 = vld [vmem:[#allocation30_spill] sm:$0xff] }
 0xa6a   : > { %v9573_v35 = vadd.f32 %v9572_v13, %v9554_v2 }
 0xa6c   : > { %v9592_v21 = vadd.f32 %v9591_v63, %v9573_v35 }
 0xa6e   : > { %v9611_v23 = vadd.f32 %v9610_v11, %v9592_v21 }
 0xa70   : > { %v9624_v19 = vpop.f32.mrf.mxu2 }
 0xa71   : > { %v9574_v15 = vpop.f32.mrf.mxu3  ;;  %v9625_v47 = vadd.f32 %v9624_v19, %v9606_v7 }
 0xa72   : > { %v9575_v36 = vadd.f32 %v9574_v15, %v9556_v42 }
 0xa74   : > { %v9594_v9 = vadd.f32 %v9593_v49, %v9575_v36 }
 0xa76   : > { %v9613_v34 = vadd.f32 %v9612_v5, %v9594_v9 }
 0xa78   : > { %v9626_v45 = vpop.f32.mrf.mxu2 }
 0xa79   : > { %v9643_v62 = vpop.f32.mrf.mxu3  ;;  %v9627_v18 = vadd.f32 %v9626_v45, %v9608_v14 }
 0xa7a   : > { %v9644_v0 = vadd.f32 %v9643_v62, %v9625_v47 }
 0xa7c   : > { %v9655_v61 = vadd.f32 %v9644_v0, %v19113_v40 }
 0xa7e   : > { %9667 = vst [vmem:[#allocation2 + $0x58] sm:$0xff] %v9655_v61 }
 0xa80   : > { %v9629_v33 = vpop.f32.mrf.mxu2 }
 0xa81   : > { %v9645_v41 = vpop.f32.mrf.mxu3  ;;  %v9630_v37 = vadd.f32 %v9629_v33, %v9611_v23 }
 0xa82   : > { %v9646_v16 = vadd.f32 %v9645_v41, %v9627_v18 }
 0xa84   : > { %v9658_v38 = vadd.f32 %v9646_v16, %v19114_v48 }
 0xa86   : > { %9670 = vst [vmem:[#allocation2 + $0x20] sm:$0xff] %v9658_v38 }
 0xa88   : > { %v9631_v51 = vpop.f32.mrf.mxu2 }
 0xa89   : > { %v9648_v53 = vpop.f32.mrf.mxu3  ;;  %v9632_v43 = vadd.f32 %v9631_v51, %v9613_v34 }
 0xa8a   : > { %v9649_v58 = vadd.f32 %v9648_v53, %v9630_v37 }
 0xa8c   : > { %v9661_v28 = vadd.f32 %v9649_v58, %v19115_v55 }
 0xa8e   : > { %9673 = vst [vmem:[#allocation2 + $0x28] sm:$0xff] %v9661_v28 }
 0xa91   : > { %v9650_v52 = vpop.f32.mrf.mxu3 }
 0xa92   : > { %v9651_v13 = vadd.f32 %v9650_v52, %v9632_v43  ;;  %9680 = sbr.rel (%p13830_p1) target bundleno = 3157 (0xc55), region = 92 }
 0xa94   : > { %v9664_v25 = vadd.f32 %v9651_v13, %v19116_v30 }
 0xa96   : > { %9676 = vst [vmem:[#allocation2 + $0x40] sm:$0xff] %v9664_v25 }
 0xa97   : > { %v9687_v20 = vld [vmem:[#allocation2 + $0x8] sm:$0xff]  ;;  %v9688_v54 = vld [vmem:[#allocation2 + $0x38] sm:$0xff]  ;;  %v9681_v44 = vld [vmem:[#allocation2 + $0x30] sm:$0xff] }
 0xa98   : > { %v9689_v8 = vld [vmem:[#allocation2 + $0x28] sm:$0xff]  ;;  %v9703_v27 = vadd.f32 %v9688_v54, %v9687_v20  ;;  %v9682_v3 = vld [vmem:[#allocation2] sm:$0xff]  ;;  %v9683_v6 = vld [vmem:[#allocation2 + $0x58] sm:$0xff] }
 0xa99   : > { %v9695_v24 = vadd.f32 %v9682_v3, %v9681_v44  ;;  %v9690_v26 = vld [vmem:[#allocation2 + $0x48] sm:$0xff]  ;;  %v9691_v19 = vld [vmem:[#allocation2 + $0x10] sm:$0xff]  ;;  %v9684_v56 = vld [vmem:[#allocation2 + $0x18] sm:$0xff] }
 0xa9a   : > { %v9704_v15 = vadd.f32 %v9703_v27, %v9689_v8  ;;  %v9685_v29 = vld [vmem:[#allocation2 + $0x50] sm:$0xff]  ;;  %v9707_v60 = vadd.f32 %v9691_v19, %v9690_v26  ;;  %v9686_v17 = vld [vmem:[#allocation2 + $0x20] sm:$0xff]  ;;  %v14803_v13 = vld [vmem:[%s19119_s22 + $0x38] sm:$0xff] }
 0xa9b   : > { %v9696_v12 = vadd.f32 %v9695_v24, %v9683_v6  ;;  %v9699_v4 = vadd.f32 %v9685_v29, %v9684_v56  ;;  %v19118_v50 = vld [vmem:[#allocation20_spill] sm:$0xff]  ;;  %v14811_v30 = vld [vmem:[%s19120_s15 + $0x78] sm:$0xff]  ;;  %10055 = vmatpush.bf16.msra.mxu0 %v14803_v13  ;;  %14821 = vmatpush.bf16.msra.mxu3 %v14803_v13  ;;  %v14801_v27 = vld [vmem:[%s19120_s15 + $0x28] sm:$0xff] }
 0xa9c   : > { %9705 = vadd.xlane.f32.xlu1 %v9704_v15  ;;  %v14819_v25 = vld [vmem:[%s19120_s15 + $0xb8] sm:$0xff]  ;;  %10074 = vmatpush.bf16.msra.mxu1 %v14811_v30  ;;  %v14808_v24 = vld [vmem:[%s19120_s15 + $0x60] sm:$0xff] }
 0xa9d   : > { %9697 = vadd.xlane.f32.xlu0 %v9696_v12  ;;  %v9692_v1 = vld [vmem:[#allocation2 + $0x40] sm:$0xff]  ;;  %v9700_v10 = vadd.f32 %v9699_v4, %v9686_v17  ;;  %10093 = vmatpush.bf16.msra.mxu2 %v14819_v25  ;;  %v14807_v15 = vld [vmem:[%s19120_s15 + $0x58] sm:$0xff]  ;;  %v14806_v12 = vld [vmem:[%s19120_s15 + $0x50] sm:$0xff] }
 0xa9e   : > { %v9708_v59 = vadd.f32 %v9707_v60, %v9692_v1  ;;  %v14814_v60 = vld [vmem:[%s19120_s15 + $0x90] sm:$0xff]  ;;  %v14805_v4 = vld [vmem:[%s19120_s15 + $0x48] sm:$0xff]  ;;  %v9693_v30 = vld [vmem:[%s19121_s25] sm:$0x7] }
 0xaa4   : > { %9709 = vadd.xlane.f32.xlu1 %v9708_v59 }
 0xaa5   : > { %9701 = vadd.xlane.f32.xlu0 %v9700_v10 }
 0xb0f   : > { %v9706_v7 = vpop.xlane.xlu1 %9705 }
 0xb10   : > { %v9713_v22 = vmul.f32 %v9706_v7, %v19118_v50  ;;  %v9698_v47 = vpop.xlane.xlu0 %9697 }
 0xb11   : > { %v9711_v45 = vmul.f32 %v9698_v47, %v19118_v50 }
 0xb12   : > { %v18768_v62 = vsub.f32 %v9687_v20, %v9713_v22  ;;  %v18770_v39 = vsub.f32 %v9688_v54, %v9713_v22  ;;  %v18772_v46 = vsub.f32 %v9689_v8, %v9713_v22  ;;  %v14802_v20 = vld [vmem:[%s19120_s15 + $0x30] sm:$0xff]  ;;  %v14796_v22 = vld [vmem:[%s19120_s15] sm:$0xff] }
 0xb13   : > { %v18774_v32 = vsub.f32 %v9681_v44, %v9711_v45  ;;  %v18776_v0 = vsub.f32 %v9682_v3, %v9711_v45  ;;  %v18778_v2 = vsub.f32 %v9683_v6, %v9711_v45  ;;  %v14810_v54 = vld [vmem:[%s19120_s15 + $0x70] sm:$0xff]  ;;  %10056 = vmatpush.bf16.msra.mxu0 %v14802_v20  ;;  %14822 = vmatpush.bf16.msra.mxu3 %v14802_v20  ;;  %v14809_v44 = vld [vmem:[%s19120_s15 + $0x68] sm:$0xff]  ;;  %v14800_v6 = vld [vmem:[%s19120_s15 + $0x20] sm:$0xff] }
 0xb14   : > { %v9733_v40 = vmul.f32 %v18768_v62, %v18768_v62  ;;  %v9734_v61 = vmul.f32 %v18770_v39, %v18770_v39  ;;  %v9735_v31 = vmul.f32 %v18772_v46, %v18772_v46  ;;  %v14818_v8 = vld [vmem:[%s19120_s15 + $0xb0] sm:$0xff]  ;;  %10075 = vmatpush.bf16.msra.mxu1 %v14810_v54  ;;  %v14817_v3 = vld [vmem:[%s19120_s15 + $0xa8] sm:$0xff]  ;;  %v14804_v45 = vld [vmem:[%s19120_s15 + $0x40] sm:$0xff] }
 0xb15   : > { %v9727_v35 = vmul.f32 %v18774_v32, %v18774_v32  ;;  %v9728_v14 = vmul.f32 %v18776_v0, %v18776_v0  ;;  %v9729_v41 = vmul.f32 %v18778_v2, %v18778_v2  ;;  %10094 = vmatpush.bf16.msra.mxu2 %v14818_v8 }
 0xb16   : > { %v9747_v63 = vadd.f32 %v9734_v61, %v9733_v40  ;;  %v14812_v40 = vld [vmem:[%s19120_s15 + $0x80] sm:$0xff] }
 0xb17   : > { %v9710_v18 = vpop.xlane.xlu1 %9709  ;;  %v9739_v57 = vadd.f32 %v9728_v14, %v9727_v35  ;;  %10057 = vmatpush.bf16.msra.mxu0 %v14801_v27  ;;  %14823 = vmatpush.bf16.msra.mxu3 %v14801_v27 }
 0xb18   : > { %v9714_v21 = vmul.f32 %v9710_v18, %v19118_v50  ;;  %v9702_v16 = vpop.xlane.xlu0 %9701  ;;  %v9748_v11 = vadd.f32 %v9747_v63, %v9735_v31  ;;  %10076 = vmatpush.bf16.msra.mxu1 %v14809_v44  ;;  %v9816_v44 = vperm.slane %v9693_v30, 0 }
 0xb19   : > { %v9712_v33 = vmul.f32 %v9702_v16, %v19118_v50  ;;  %v9740_v42 = vadd.f32 %v9739_v57, %v9729_v41  ;;  %10095 = vmatpush.bf16.msra.mxu2 %v14817_v3  ;;  %v9817_v3 = vperm.slane %v9693_v30, 1 }
 0xb1a   : > { %v18794_v48 = vsub.f32 %v9690_v26, %v9714_v21  ;;  %v18796_v38 = vsub.f32 %v9691_v19, %v9714_v21  ;;  %v18798_v36 = vsub.f32 %v9692_v1, %v9714_v21  ;;  %9749 = vadd.xlane.f32.xlu0 %v9748_v11  ;;  %v14816_v26 = vld [vmem:[%s19120_s15 + $0xa0] sm:$0xff]  ;;  %v14799_v19 = vld [vmem:[%s19120_s15 + $0x18] sm:$0xff]  ;;  %v14797_v1 = vld [vmem:[%s19120_s15 + $0x8] sm:$0xff] }
 0xb1b   : > { %v18800_v23 = vsub.f32 %v9684_v56, %v9712_v33  ;;  %v18802_v37 = vsub.f32 %v9685_v29, %v9712_v33  ;;  %v18804_v49 = vsub.f32 %v9686_v17, %v9712_v33  ;;  %9741 = vadd.xlane.f32.xlu2 %v9740_v42  ;;  %10058 = vmatpush.bf16.msra.mxu0 %v14800_v6  ;;  %v14815_v56 = vld [vmem:[%s19120_s15 + $0x98] sm:$0xff]  ;;  %v14798_v29 = vld [vmem:[%s19120_s15 + $0x10] sm:$0xff]  ;;  %v14813_v17 = vld [vmem:[%s19120_s15 + $0x88] sm:$0xff] }
 0xb1c   : > { %v9736_v53 = vmul.f32 %v18794_v48, %v18794_v48  ;;  %v9737_v9 = vmul.f32 %v18796_v38, %v18796_v38  ;;  %v9738_v58 = vmul.f32 %v18798_v36, %v18798_v36  ;;  %14824 = vmatpush.bf16.msra.mxu3 %v14800_v6  ;;  %10077 = vmatpush.bf16.msra.mxu1 %v14808_v24  ;;  %v9694_v24 = vld [vmem:[%s19122_s13] sm:$0x7] }
 0xb1d   : > { %v9730_v55 = vmul.f32 %v18800_v23, %v18800_v23  ;;  %v9731_v28 = vmul.f32 %v18802_v37, %v18802_v37  ;;  %v9732_v51 = vmul.f32 %v18804_v49, %v18804_v49  ;;  %10096 = vmatpush.bf16.msra.mxu2 %v14816_v26 }
 0xb1e   : > { %v9751_v5 = vadd.f32 %v9737_v9, %v9736_v53 }
 0xb1f   : > { %v9743_v34 = vadd.f32 %v9731_v28, %v9730_v55  ;;  %10059 = vmatpush.bf16.msra.mxu0 %v14799_v19 }
 0xb20   : > { %v9752_v43 = vadd.f32 %v9751_v5, %v9738_v58  ;;  %14825 = vmatpush.bf16.msra.mxu3 %v14799_v19  ;;  %10078 = vmatpush.bf16.msra.mxu1 %v14807_v15 }
 0xb21   : > { %v9744_v52 = vadd.f32 %v9743_v34, %v9732_v51  ;;  %10097 = vmatpush.bf16.msra.mxu2 %v14815_v56 }
 0xb22   : > { %9753 = vadd.xlane.f32.xlu1 %v9752_v43 }
 0xb23   : > { %9745 = vadd.xlane.f32.xlu2 %v9744_v52  ;;  %10060 = vmatpush.bf16.msra.mxu0 %v14798_v29 }
 0xb24   : > { %14826 = vmatpush.bf16.msra.mxu3 %v14798_v29  ;;  %10079 = vmatpush.bf16.msra.mxu1 %v14806_v12 }
 0xb25   : > { %10098 = vmatpush.bf16.msra.mxu2 %v14814_v60  ;;  %v9818_v60 = vperm.slane %v9693_v30, 2 }
 0xb27   : > { %10061 = vmatpush.bf16.msra.mxu0 %v14797_v1 }
 0xb28   : > { %14827 = vmatpush.bf16.msra.mxu3 %v14797_v1  ;;  %10080 = vmatpush.bf16.msra.mxu1 %v14805_v4  ;;  %v9835_v4 = vperm.slane %v9694_v24, 0 }
 0xb29   : > { %10099 = vmatpush.bf16.msra.mxu2 %v14813_v17 }
 0xb2b   : > { %10062 = vmatpush.bf16.msra.mxu0 %v14796_v22 }
 0xb2c   : > { %14828 = vmatpush.bf16.msra.mxu3 %v14796_v22  ;;  %10081 = vmatpush.bf16.msra.mxu1 %v14804_v45 }
 0xb2d   : > { %10100 = vmatpush.bf16.msra.mxu2 %v14812_v40 }
 0xb8d   : > { %v9750_v59 = vpop.xlane.xlu0 %9749 }
 0xb8e   : > { %v9742_v10 = vpop.xlane.xlu2 %9741  ;;  %v9757_v7 = vmul.f32 %v9750_v59, %v19118_v50 }
 0xb8f   : > { %v9755_v47 = vmul.f32 %v9742_v10, %v19118_v50  ;;  %v9836_v10 = vperm.slane %v9694_v24, 1 }
 0xb90   : > { %v9761_v61 = vadd.f32 1e-05, %v9757_v7  ;;  %v9837_v7 = vperm.slane %v9694_v24, 2 }
 0xb91   : > { %v9759_v31 = vadd.f32 1e-05, %v9755_v47 }
 0xb92   : > { %15068 = vrsqrt.f32 %v9761_v61  ;;  %vm9789_vm15 = vweird.f32 %v9761_v61 }
 0xb93   : > { %15070 = vrsqrt.f32 %v9759_v31  ;;  %vm9769_vm2 = vweird.f32 %v9759_v31 }
 0xb95   : > { %v9754_v35 = vpop.xlane.xlu1 %9753 }
 0xb96   : > { %v9758_v14 = vmul.f32 %v9754_v35, %v19118_v50  ;;  %v9746_v63 = vpop.xlane.xlu2 %9745 }
 0xb97   : > { %v9756_v18 = vmul.f32 %v9746_v63, %v19118_v50 }
 0xb98   : > { %v15069_v41 = vpop.eup %15068  ;;  %v9762_v57 = vadd.f32 1e-05, %v9758_v14 }
 0xb99   : > { %v15071_v21 = vpop.eup %15070  ;;  %v9784_v16 = vmul.f32 %v15069_v41, %v9761_v61  ;;  %v9760_v11 = vadd.f32 1e-05, %v9756_v18  ;;  %vm9790_vm0 = vweird.f32 %v15069_v41 }
 0xb9a   : > { %v9764_v33 = vmul.f32 %v15071_v21, %v9759_v31  ;;  %15072 = vrsqrt.f32 %v9762_v57  ;;  %vm9770_vm1 = vweird.f32 %v15071_v21  ;;  %vm9791_vm3 = vmor %vm9789_vm15, %vm9790_vm0  ;;  %vm9799_vm5 = vweird.f32 %v9762_v57 }
 0xb9b   : > { %v9785_v42 = vmul.f32 %v15069_v41, %v9784_v16  ;;  %15074 = vrsqrt.f32 %v9760_v11  ;;  %vm9771_vm4 = vmor %vm9769_vm2, %vm9770_vm1  ;;  %vm9779_vm9 = vweird.f32 %v9760_v11 }
 0xb9c   : > { %v9765_v53 = vmul.f32 %v15071_v21, %v9764_v33 }
 0xb9d   : > { %v9786_v9 = vmul.f32 0.5, %v9785_v42 }
 0xb9e   : > { %v9766_v58 = vmul.f32 0.5, %v9765_v53 }
 0xb9f   : > { %v9787_v55 = vsub.f32 1.5, %v9786_v9 }
 0xba0   : > { %v15073_v28 = vpop.eup %15072  ;;  %v9767_v5 = vsub.f32 1.5, %v9766_v58 }
 0xba1   : > { %v15075_v51 = vpop.eup %15074  ;;  %v9788_v50 = vmul.f32 %v15069_v41, %v9787_v55  ;;  %v9794_v34 = vmul.f32 %v15073_v28, %v9762_v57  ;;  %vm9800_vm6 = vweird.f32 %v15073_v28 }
 0xba2   : > { %v9768_v43 = vmul.f32 %v15071_v21, %v9767_v5  ;;  %v9774_v52 = vmul.f32 %v15075_v51, %v9760_v11  ;;  %vm9780_vm7 = vweird.f32 %v15075_v51  ;;  %vm9801_vm8 = vmor %vm9799_vm5, %vm9800_vm6 }
 0xba3   : > { %v9795_v13 = vmul.f32 %v15073_v28, %v9794_v34  ;;  %v9792_v25 = vsel %vm9791_vm3, %v15069_v41, %v9788_v50  ;;  %vm9781_vm10 = vmor %vm9779_vm9, %vm9780_vm7 }
 0xba4   : > { %v9775_v20 = vmul.f32 %v15075_v51, %v9774_v52  ;;  %v9772_v54 = vsel %vm9771_vm4, %v15071_v21, %v9768_v43  ;;  %v9809_v26 = vmul.f32 %v9792_v25, %v18768_v62  ;;  %v9810_v9 = vmul.f32 %v9792_v25, %v18770_v39 }
 0xba5   : > { %v9796_v8 = vmul.f32 0.5, %v9795_v13  ;;  %v9803_v15 = vmul.f32 %v9772_v54, %v18774_v32  ;;  %v9804_v56 = vmul.f32 %v9772_v54, %v18776_v0  ;;  %v9805_v12 = vmul.f32 %v9772_v54, %v18778_v2 }
 0xba6   : > { %v9776_v27 = vmul.f32 0.5, %v9775_v20  ;;  %v9828_v59 = vmul.f32 %v9816_v44, %v9809_v26  ;;  %v9811_v58 = vmul.f32 %v9792_v25, %v18772_v46  ;;  %v9829_v5 = vmul.f32 %v9817_v3, %v9810_v9 }
 0xba7   : > { %v9797_v6 = vsub.f32 1.5, %v9796_v8  ;;  %v9822_v22 = vmul.f32 %v9816_v44, %v9803_v15  ;;  %v9823_v32 = vmul.f32 %v9817_v3, %v9804_v56  ;;  %v9824_v40 = vmul.f32 %v9818_v60, %v9805_v12 }
 0xba8   : > { %v9777_v19 = vsub.f32 1.5, %v9776_v27  ;;  %v9847_v18 = vadd.f32 %v9835_v4, %v9828_v59  ;;  %v9848_v43 = vadd.f32 %v9836_v10, %v9829_v5 }
 0xba9   : > { %v9798_v29 = vmul.f32 %v15073_v28, %v9797_v6  ;;  %v9841_v63 = vadd.f32 %v9835_v4, %v9822_v22  ;;  %v9842_v57 = vadd.f32 %v9836_v10, %v9823_v32  ;;  %v9843_v11 = vadd.f32 %v9837_v7, %v9824_v40 }
 0xbaa   : > { %v9778_v1 = vmul.f32 %v15075_v51, %v9777_v19 }
 0xbab   : > { %v9802_v17 = vsel %vm9801_vm8, %v15073_v28, %v9798_v29 }
 0xbac   : > { %v9782_v62 = vsel %vm9781_vm10, %v15075_v51, %v9778_v1  ;;  %v9812_v47 = vmul.f32 %v9802_v17, %v18794_v48  ;;  %v9830_v51 = vmul.f32 %v9818_v60, %v9811_v58 }
 0xbad   : > { %v9806_v0 = vmul.f32 %v9782_v62, %v18800_v23  ;;  %v9807_v45 = vmul.f32 %v9782_v62, %v18802_v37  ;;  %v9808_v2 = vmul.f32 %v9782_v62, %v18804_v49  ;;  %v9813_v37 = vmul.f32 %v9802_v17, %v18796_v38  ;;  %v15067_v38 = vld [vmem:[%s19123_s17] ss:$0 sm:$0xff] }
 0xbae   : > { %v9831_v61 = vmul.f32 %v9816_v44, %v9812_v47  ;;  %v9814_v49 = vmul.f32 %v9802_v17, %v18798_v36  ;;  %v9849_v52 = vadd.f32 %v9837_v7, %v9830_v51 }
 0xbaf   : > { %v9825_v31 = vmul.f32 %v9816_v44, %v9806_v0  ;;  %v9826_v35 = vmul.f32 %v9817_v3, %v9807_v45  ;;  %v9827_v14 = vmul.f32 %v9818_v60, %v9808_v2  ;;  %v9832_v55 = vmul.f32 %v9817_v3, %v9813_v37 }
 0xbb0   : > { %v9850_v41 = vadd.f32 %v9835_v4, %v9831_v61  ;;  %v9833_v28 = vmul.f32 %v9818_v60, %v9814_v49 }
 0xbb1   : > { %v9844_v21 = vadd.f32 %v9835_v4, %v9825_v31  ;;  %v9845_v16 = vadd.f32 %v9836_v10, %v9826_v35  ;;  %v9846_v48 = vadd.f32 %v9837_v7, %v9827_v14  ;;  %v9851_v50 = vadd.f32 %v9836_v10, %v9832_v55 }
 0xbb2   : > { %v9856_v33 = vpack.c.bf16 %v9850_v41, %v9847_v18  ;;  %v9852_v34 = vadd.f32 %v9837_v7, %v9833_v28 }
 0xbb3   : > { %v9853_v42 = vpack.c.bf16 %v9844_v21, %v9841_v63  ;;  %v9854_v23 = vpack.c.bf16 %v9845_v16, %v9842_v57  ;;  %v9855_v53 = vpack.c.bf16 %v9846_v48, %v9843_v11  ;;  %v9857_v13 = vpack.c.bf16 %v9851_v50, %v9848_v43 }
 0xbb4   : > { %10068 = vmatmul.bf16.vlgmr.msra.gmra.mxu3 %v9856_v33  ;;  %v9858_v30 = vpack.c.bf16 %v9852_v34, %v9849_v52 }
 0xbb5   : > { %10063 = vmatmul.bf16.vlgmr.msra.gmra.mxu0 %v9853_v42  ;;  %10082 = vmatmul.bf16.vlgmr.msra.gmra.mxu1 %v9854_v23 }
 0xbb6   : > { %10101 = vmatmul.bf16.vlgmr.msra.gmra.mxu2 %v9855_v53 }
 0xbc5   : > { %10087 = vmatmul.bf16.gmra.mxu1 %v9857_v13 }
 0xbc6   : > { %10106 = vmatmul.bf16.gmra.mxu2 %v9858_v30 }
 0xc32   : > { %v10064_v39 = vpop.f32.mrf.mxu0  ;;  %v10083_v46 = vpop.f32.mrf.mxu1 }
 0xc33   : > { %v10065_v36 = vadd.f32 %v15067_v38, %v10064_v39 }
 0xc35   : > { %v10084_v25 = vadd.f32 %v10083_v46, %v10065_v36 }
 0xc37   : > { %v10069_v6 = vpop.f32.mrf.mxu3 }
 0xc38   : > { %v10070_v15 = vadd.f32 %v15067_v38, %v10069_v6 }
 0xc39   : > { %v10102_v20 = vpop.f32.mrf.mxu2 }
 0xc3a   : > { %v10103_v54 = vadd.f32 %v10102_v20, %v10084_v25  ;;  %v10066_v8 = vpop.f32.mrf.mxu0  ;;  %v10085_v27 = vpop.f32.mrf.mxu1 }
 0xc3b   : > { %v10067_v44 = vadd.f32 %v15067_v38, %v10066_v8 }
 0xc3c   : > { %10112 = vst [vmem:[%s15392_s26] sm:$0xff] %v10103_v54 }
 0xc3d   : > { %v10086_v3 = vadd.f32 %v10085_v27, %v10067_v44 }
 0xc3f   : > { %v10071_v60 = vpop.f32.mrf.mxu3 }
 0xc40   : > { %v10072_v4 = vadd.f32 %v15067_v38, %v10071_v60 }
 0xc41   : > { %v10104_v24 = vpop.f32.mrf.mxu2 }
 0xc42   : > { %v10105_v26 = vadd.f32 %v10104_v24, %v10086_v3  ;;  %v10088_v19 = vpop.f32.mrf.mxu1 }
 0xc43   : > { %v10089_v56 = vadd.f32 %v10088_v19, %v10070_v15 }
 0xc44   : > { %10113 = vst [vmem:[%s15392_s26 + $0x8] sm:$0xff] %v10105_v26 }
 0xc49   : > { %v10107_v29 = vpop.f32.mrf.mxu2 }
 0xc4a   : > { %v10108_v12 = vadd.f32 %v10107_v29, %v10089_v56  ;;  %v10090_v1 = vpop.f32.mrf.mxu1 }
 0xc4b   : > { %v10091_v17 = vadd.f32 %v10090_v1, %v10072_v4 }
 0xc4c   : > { %10114 = vst [vmem:[%s15392_s26 + $0x10] sm:$0xff] %v10108_v12 }
 0xc51   : > { %v10109_v59 = vpop.f32.mrf.mxu2 }
 0xc52   : > { %v10110_v10 = vadd.f32 %v10109_v59, %v10091_v17 }
 0xc54   : > { %10115 = vst [vmem:[%s15392_s26 + $0x18] sm:$0xff] %v10110_v10 }
 0xc55 PF: > { %s19124_s29 = sld [smem:[#allocation10_spill]]  ;;  %s10129_s14 = sshll.u32 %s15392_s26, 4  ;;  %s10130_s14 = int_to_ptr.vmem [resolvable:$true] %s10129_s14 }
 0xc56   : > { %s19125_s22 = sld [smem:[#allocation7_spill]] }
 0xc57   : > { %s19127_s20 = sld [smem:[#allocation50_spill]] }
 0xc5b   : > { %s14820_s27 = sshll.u32 %s19124_s29, 5 }
 0xc5c   : > { %s19128_s16 = sand.u32 1, %s19125_s22  }
 0xc5d   : > { %s10128_s18 = scalar_lea.hbm %s19127_s20, %s14820_s27  ;;  %s10117_s30 = scalar_lea.sflag [#allocation4], %s19128_s16 }
 0xc5e   : > { %s10131_s28 = sshll.u32 %s10128_s18, 4  ;;  %s15096_s0 = scalar_lea.hbm %s19127_s20, 64  ;;  %s10132_s28 = int_to_ptr.hbm [resolvable:$true] %s10131_s28 }
 0xc5f   : > { %s15090_s25 = sshra.s32 %s10132_s28, 4  ;;  %s15091_s25 = int_to_ptr.hbm [resolvable:$true] %s15090_s25 }
 0xc60   : > { %s15092_s19 = scalar_lea.hbm %s15091_s25, 32  ;;  %p15097_p6 = scmp.lt.s32.totalorder %s15091_s25, %s19127_s20 }
 0xc61   : > { %p15093_p2 = scmp.ne.s32.totalorder %s15091_s25, %s15092_s19  ;;  %p15098_p7 = scmp.lt.s32.totalorder %s15096_s0, %s15092_s19 }
 0xc63   : > { %p15094_p4 = pnand %p15093_p2, %p15310_p3  ;;  %p15099_p8 = por %p15098_p7, %p15097_p6 }
 0xc65   : > { %p15095_p5 = pneg %p15094_p4 }
 0xc67   : > { %p15100_p10 = pnand %p15099_p8, %p15095_p5 }
 0xc69   : > { %15103 = shalt.err (!%p15100_p10)
}
 0xc6a   : > { %s15174_s26 = smov 128   ;;  %s15175_s29 = smov 8  }
 0xc6b   : > { %14835 = dma.vmem_to_hbm [thread:$0]  (%p15310_p3), %s10130_s14, 512, %s10132_s28, %s10117_s30, %s15174_s26, %s15174_s26, %s15175_s29  }
 0xc6c PF: > { %s19129_s22 = sld [smem:[#allocation13_spill]] }
 0xc6d   : > { %s19130_s27 = sld [smem:[#allocation6_spill]] }
 0xc72   : > { %p14841_p11 = scmp.ge.s32.totalorder %s19129_s22, 2 }
 0xc73   : > { %s10146_s12 = sand.u32 1, %s19130_s27  }
 0xc74   : > { %p14838_p12 = pnand %p14841_p11, %p15320_p9  ;;  %s10147_s18 = scalar_lea.sflag [#allocation4], %s10146_s12 }
 0xc76   : > { %p14839_p13 = pneg %p14838_p12 }
 0xc78   : > { %15137 = dma.done.wait (%p14839_p13), %s10147_s18, 512  }
 0xc79   : > { %15139 = vsyncadd (%p14839_p13), %s10147_s18, 4294966784  ;;  %s29_s28 = sadd.s32 1, %s19129_s22   ;;  %s19132_s21 = sld [smem:[#allocation7_spill]] }
 0xc7a   : > { %p26_p0 = scmp.ge.s32.totalorder %s29_s28, 14   ;;  %s19133_s22 = sld [smem:[#allocation8_spill]] }
 0xc7b   : > { %s19134_s23 = sld [smem:[#allocation18_spill]] }
 0xc7c   : > { %s19135_s24 = sld [smem:[#allocation11_spill]]  ;;  %28 = sbr.rel (!%p26_p0) target bundleno = 13 (0xd), region = 161 }
 0xc7d   : > { %s19136_s25 = sld [smem:[#allocation12_spill]] }
 0xc7e   : > { %s19137_s26 = sld [smem:[#allocation14_spill]] }
 0xc7f   : > { %s19138_s27 = sld [smem:[#allocation16_spill]] }
 0xc81   :  { %10153 = vsyncpa [#allocation4], 1 }
 0xc82   :  { %10155 = vsyncpa [#allocation4 + $0x1], 1 }

</bundles_post_ra>
